<compile_context>
chip_gen: v7x
topology: tpu7x:2x2x1
jax: 0.10.0
libtpu: 0.0.40
codegen_flags: <defaults>
</compile_context>

<pallas_src>
import jax
import jax.numpy as jnp
from jax.experimental import pallas as pl
from jax.experimental.pallas import tpu as pltpu

_VMEM_LIMIT = 48 * 1024 * 1024      # < v7x 64 MiB physical, << v5e/v6e 128 MiB
_VMEM_BUDGET = 12 * 1024 * 1024     # target working-set per grid step (double-buffered)

_GELU_C = 0.7978845608028654        # sqrt(2/pi)


def _gelu_tanh(x):
    # tanh-approximate GELU (same formula used in kernel and reference).
    return 0.5 * x * (1.0 + jnp.tanh(_GELU_C * (x + 0.044715 * (x * x * x))))


# --------------------------------------------------------------------------
# Fully fused kernel: dw5x5 -> GELU -> dw7x7(dil 3) -> GELU -> 1x1 conv -> u*attn.
# One grid step handles one whole batch element (C, H, W); the intermediate
# activations live entirely in VMEM scratch.
# --------------------------------------------------------------------------
def _lka_fused_kernel(x_ref, w0_ref, b0_ref, w1_ref, b1_ref, w2_ref, b2_ref,
                      o_ref, xp0_ref, xp1_ref, attn_ref):
    c, h, w = o_ref.shape
    x = x_ref[...].astype(jnp.float32)

    # ---- depthwise 5x5, padding 2 ----
    xp0_ref[...] = jnp.zeros_like(xp0_ref)
    xp0_ref[:, 2:2 + h, 2:2 + w] = x
    w0 = w0_ref[...].astype(jnp.float32)             # (c, 5, 5)
    acc = jnp.zeros((c, h, w), jnp.float32)
    for ky in range(5):
        for kx in range(5):
            acc = acc + xp0_ref[:, ky:ky + h, kx:kx + w] * w0[:, ky:ky + 1, kx:kx + 1]
    acc = acc + b0_ref[...].astype(jnp.float32)       # (c,1,1) broadcast
    a = _gelu_tanh(acc)

    # ---- depthwise 7x7, dilation 3, padding 9 ----
    xp1_ref[...] = jnp.zeros_like(xp1_ref)
    xp1_ref[:, 9:9 + h, 9:9 + w] = a
    w1 = w1_ref[...].astype(jnp.float32)              # (c, 7, 7)
    acc2 = jnp.zeros((c, h, w), jnp.float32)
    for ky in range(7):
        for kx in range(7):
            acc2 = acc2 + (xp1_ref[:, 3 * ky:3 * ky + h, 3 * kx:3 * kx + w]
                           * w1[:, ky:ky + 1, kx:kx + 1])
    acc2 = acc2 + b1_ref[...].astype(jnp.float32)
    attn_ref[...] = _gelu_tanh(acc2)                  # keep in VMEM, never touches HBM

    # ---- pointwise 1x1 conv + bias, then gate with u = x ----
    # y[o] = sum_i w2[o, i] * attn[i]  -- C unrolled broadcast-MACs on the VPU.
    w2 = w2_ref[...].astype(jnp.float32)              # (c, c, 1)
    y = jnp.zeros((c, h, w), jnp.float32)
    for i in range(c):
        y = y + w2[:, i:i + 1, :] * attn_ref[i:i + 1, :, :]
    y = y + b2_ref[...].astype(jnp.float32)           # (c,1,1) broadcast
    o_ref[...] = (x * y).astype(o_ref.dtype)


# --------------------------------------------------------------------------
# Fallback stage 1: depthwise 5x5 (pad 2) -> GELU -> depthwise 7x7 (dil 3, pad 9) -> GELU
# One grid step handles one (batch, channel-group) block of shape (cg, H, W).
# --------------------------------------------------------------------------
def _lka_dw_kernel(x_ref, w0_ref, b0_ref, w1_ref, b1_ref, o_ref, xp0_ref, xp1_ref):
    cg, h, w = o_ref.shape
    x = x_ref[...].astype(jnp.float32)

    # ---- depthwise 5x5, padding 2 ----
    xp0_ref[...] = jnp.zeros_like(xp0_ref)
    xp0_ref[:, 2:2 + h, 2:2 + w] = x
    w0 = w0_ref[...].astype(jnp.float32)              # (cg, 5, 5)
    acc = jnp.zeros((cg, h, w), jnp.float32)
    for ky in range(5):
        for kx in range(5):
            acc = acc + xp0_ref[:, ky:ky + h, kx:kx + w] * w0[:, ky:ky + 1, kx:kx + 1]
    acc = acc + b0_ref[...].astype(jnp.float32)
    a = _gelu_tanh(acc)

    # ---- depthwise 7x7, dilation 3, padding 9 ----
    xp1_ref[...] = jnp.zeros_like(xp1_ref)
    xp1_ref[:, 9:9 + h, 9:9 + w] = a
    w1 = w1_ref[...].astype(jnp.float32)              # (cg, 7, 7)
    acc2 = jnp.zeros((cg, h, w), jnp.float32)
    for ky in range(7):
        for kx in range(7):
            acc2 = acc2 + (xp1_ref[:, 3 * ky:3 * ky + h, 3 * kx:3 * kx + w]
                           * w1[:, ky:ky + 1, kx:kx + 1])
    acc2 = acc2 + b1_ref[...].astype(jnp.float32)
    o_ref[...] = _gelu_tanh(acc2).astype(o_ref.dtype)


# --------------------------------------------------------------------------
# Fallback stage 2: pointwise 1x1 conv (channel mixing) + bias, then gate with u = x.
# Operates on lane-dense (C, T) blocks of the flattened (B, C, H*W) arrays.
# --------------------------------------------------------------------------
def _lka_pw_kernel(attn_ref, u_ref, w2_ref, b2_ref, o_ref):
    c, t = attn_ref.shape
    attn = attn_ref[...].astype(jnp.float32)
    w2 = w2_ref[...].astype(jnp.float32)              # (c, c)

    if c <= 32:
        # Tiny contraction: exact f32 on the VPU (avoids a wasteful tiny MXU matmul).
        y = jnp.zeros((c, t), jnp.float32)
        for i in range(c):
            y = y + w2[:, i:i + 1] * attn[i:i + 1, :]
    else:
        y = jax.lax.dot_general(
            w2, attn, (((1,), (0,)), ((), ())),
            precision=jax.lax.Precision.HIGHEST,
            preferred_element_type=jnp.float32)

    y = y + b2_ref[...].astype(jnp.float32)           # (c,1) broadcast
    o_ref[...] = (u_ref[...].astype(jnp.float32) * y).astype(o_ref.dtype)


# --------------------------------------------------------------------------
# Tile-size / path-selection helpers (VMEM-budgeted)
# --------------------------------------------------------------------------
def _fused_vmem_bytes(c, h, w):
    blk = c * h * w * 4                                     # one (C,H,W) f32 block
    scratch = c * ((h + 4) * (w + 4) + (h + 18) * (w + 18) + h * w) * 4
    wts = 2 * c * (25 + 49 + c + 3) * 4                     # double-buffered weights
    return 2 * 2 * blk + scratch + wts                      # dbl-buffered in+out + scratch


def _pick_channel_group(c, h, w):
    # per-channel f32 bytes: double-buffered in+out blocks + the two padded scratches
    per_ch = 4 * (4 * h * w + (h + 4) * (w + 4) + (h + 18) * (w + 18))
    for cand in range(c, 0, -1):
        if c % cand == 0 and cand * per_ch <= _VMEM_BUDGET:
            return cand
    return 1


def _pick_hw_tile(c, hw):
    # lane-dense: largest multiple of 128 that divides hw and fits the budget
    max_t = _VMEM_BUDGET // (6 * 4 * max(c, 1))       # attn, u, out; double-buffered; f32
    if hw > 128:
        t = (min(max_t, hw) // 128) * 128
        while t >= 128:
            if hw % t == 0:
                return t
            t -= 128
    return hw


# --------------------------------------------------------------------------
# Module wrapper
# --------------------------------------------------------------------------
class LKAPallas:
    """Mirrors LKA(dim).forward for NCHW input."""

    def __init__(self, dim, w0, b0, w1, b1, w2, b2):
        self.dim = dim
        self.w0 = w0                         # (C, 5, 5)   depthwise
        self.b0 = b0.reshape(dim, 1, 1)      # (C, 1, 1)
        self.w1 = w1                         # (C, 7, 7)   depthwise, dilation 3
        self.b1 = b1.reshape(dim, 1, 1)      # (C, 1, 1)
        self.w2 = w2                         # (C, C)      pointwise
        self.b2 = b2                         # (C,)

    # -------------------- fully fused (preferred) path --------------------
    def _fused(self, x):
        b, c, h, w = x.shape
        return pl.pallas_call(
            _lka_fused_kernel,
            out_shape=jax.ShapeDtypeStruct((b, c, h, w), x.dtype),
            grid_spec=pltpu.PrefetchScalarGridSpec(
                num_scalar_prefetch=0,
                grid=(b,),
                in_specs=[
                    pl.BlockSpec((None, c, h, w), lambda i: (i, 0, 0, 0)),
                    pl.BlockSpec((c, 5, 5), lambda i: (0, 0, 0)),
                    pl.BlockSpec((c, 1, 1), lambda i: (0, 0, 0)),
                    pl.BlockSpec((c, 7, 7), lambda i: (0, 0, 0)),
                    pl.BlockSpec((c, 1, 1), lambda i: (0, 0, 0)),
                    pl.BlockSpec((c, c, 1), lambda i: (0, 0, 0)),
                    pl.BlockSpec((c, 1, 1), lambda i: (0, 0, 0)),
                ],
                out_specs=pl.BlockSpec((None, c, h, w), lambda i: (i, 0, 0, 0)),
                scratch_shapes=[
                    pltpu.VMEM((c, h + 4, w + 4), jnp.float32),     # 5x5 pad 2
                    pltpu.VMEM((c, h + 18, w + 18), jnp.float32),   # 7x7 dil 3 pad 9
                    pltpu.VMEM((c, h, w), jnp.float32),             # attn (never hits HBM)
                ],
            ),
            compiler_params=pltpu.CompilerParams(
                dimension_semantics=("parallel",),
                vmem_limit_bytes=_VMEM_LIMIT,
            ),
        )(x, self.w0, self.b0, self.w1, self.b1,
          self.w2.reshape(c, c, 1), self.b2.reshape(c, 1, 1))

    # ---------------- two-stage fallback (large working sets) -------------
    def _two_stage(self, x):
        b, c, h, w = x.shape

        # stage 1: fused depthwise chain (NCHW blocks)
        cg = _pick_channel_group(c, h, w)
        attn = pl.pallas_call(
            _lka_dw_kernel,
            out_shape=jax.ShapeDtypeStruct((b, c, h, w), x.dtype),
            grid_spec=pltpu.PrefetchScalarGridSpec(
                num_scalar_prefetch=0,
                grid=(b, c // cg),
                in_specs=[
                    pl.BlockSpec((None, cg, h, w), lambda i, j: (i, j, 0, 0)),
                    pl.BlockSpec((cg, 5, 5), lambda i, j: (j, 0, 0)),
                    pl.BlockSpec((cg, 1, 1), lambda i, j: (j, 0, 0)),
                    pl.BlockSpec((cg, 7, 7), lambda i, j: (j, 0, 0)),
                    pl.BlockSpec((cg, 1, 1), lambda i, j: (j, 0, 0)),
                ],
                out_specs=pl.BlockSpec((None, cg, h, w), lambda i, j: (i, j, 0, 0)),
                scratch_shapes=[
                    pltpu.VMEM((cg, h + 4, w + 4), jnp.float32),
                    pltpu.VMEM((cg, h + 18, w + 18), jnp.float32),
                ],
            ),
            compiler_params=pltpu.CompilerParams(
                dimension_semantics=("parallel", "parallel"),
                vmem_limit_bytes=_VMEM_LIMIT,
            ),
        )(x, self.w0, self.b0, self.w1, self.b1)

        # stage 2: 1x1 conv + gating on lane-dense (C, HW) blocks
        hw = h * w
        th = _pick_hw_tile(c, hw)
        attn2 = attn.reshape(b, c, hw)       # free reshape (contiguous), no transpose
        u2 = x.reshape(b, c, hw)
        out2 = pl.pallas_call(
            _lka_pw_kernel,
            out_shape=jax.ShapeDtypeStruct((b, c, hw), x.dtype),
            grid_spec=pltpu.PrefetchScalarGridSpec(
                num_scalar_prefetch=0,
                grid=(b, hw // th),
                in_specs=[
                    pl.BlockSpec((None, c, th), lambda i, j: (i, 0, j)),
                    pl.BlockSpec((None, c, th), lambda i, j: (i, 0, j)),
                    pl.BlockSpec((c, c), lambda i, j: (0, 0)),
                    pl.BlockSpec((c, 1), lambda i, j: (0, 0)),
                ],
                out_specs=pl.BlockSpec((None, c, th), lambda i, j: (i, 0, j)),
            ),
            compiler_params=pltpu.CompilerParams(
                dimension_semantics=("parallel", "parallel"),
                vmem_limit_bytes=_VMEM_LIMIT,
            ),
        )(attn2, u2, self.w2, self.b2.reshape(c, 1))
        return out2.reshape(b, c, h, w)

    def __call__(self, x):
        b, c, h, w = x.shape
        assert c == self.dim
        if c <= 64 and _fused_vmem_bytes(c, h, w) <= _VMEM_BUDGET:
            return self._fused(x)
        return self._two_stage(x)


# --------------------------------------------------------------------------
# Pure-JAX reference of the PyTorch forward (tanh-approx GELU, like the kernel)
# --------------------------------------------------------------------------
def _reference(x, w0, b0, w1, b1, w2, b2):
    c = x.shape[1]
    hp = jax.lax.Precision.HIGHEST

    dn5 = jax.lax.conv_dimension_numbers(x.shape, (c, 1, 5, 5), ("NCHW", "OIHW", "NCHW"))
    a = jax.lax.conv_general_dilated(
        x, w0.reshape(c, 1, 5, 5), window_strides=(1, 1), padding=((2, 2), (2, 2)),
        dimension_numbers=dn5, feature_group_count=c, precision=hp)
    a = _gelu_tanh(a + b0.reshape(1, c, 1, 1))

    dn7 = jax.lax.conv_dimension_numbers(a.shape, (c, 1, 7, 7), ("NCHW", "OIHW", "NCHW"))
    a = jax.lax.conv_general_dilated(
        a, w1.reshape(c, 1, 7, 7), window_strides=(1, 1), padding=((9, 9), (9, 9)),
        rhs_dilation=(3, 3), dimension_numbers=dn7, feature_group_count=c, precision=hp)
    a = _gelu_tanh(a + b1.reshape(1, c, 1, 1))

    a = jnp.einsum("oi,bihw->bohw", w2, a, precision=hp) + b2.reshape(1, c, 1, 1)
    return x * a


if __name__ == "__main__":
    key = jax.random.PRNGKey(0)
    B, C, H, W = 2, 4, 16, 16
    ks = jax.random.split(key, 7)

    x = jax.random.normal(ks[0], (B, C, H, W), dtype=jnp.float32)
    w0 = jax.random.normal(ks[1], (C, 5, 5), dtype=jnp.float32) * 0.2
    b0 = jax.random.normal(ks[2], (C,), dtype=jnp.float32) * 0.1
    w1 = jax.random.normal(ks[3], (C, 7, 7), dtype=jnp.float32) * 0.1
    b1 = jax.random.normal(ks[4], (C,), dtype=jnp.float32) * 0.1
    w2 = jax.random.normal(ks[5], (C, C), dtype=jnp.float32) * 0.3
    b2 = jax.random.normal(ks[6], (C,), dtype=jnp.float32) * 0.1

    lka = LKAPallas(C, w0, b0, w1, b1, w2, b2)
    fwd = jax.jit(lambda t: lka(t))

    out = jax.block_until_ready(fwd(x))
    ref = _reference(x, w0, b0, w1, b1, w2, b2)

    if out.shape == ref.shape and bool(jnp.allclose(out, ref, atol=2e-3, rtol=2e-3)):
        print("KERNEL_OK")
    else:
        print("KERNEL_MISMATCH", float(jnp.max(jnp.abs(out - ref))))
</pallas_src>

<mosaic_0001>
module attributes {stable_mosaic.version = 11 : i64} {
  func.func @_lka_fused_kernel(%arg0: i32, %arg1: memref<1x4x16x16xf32, #tpu.memory_space<vmem>>, %arg2: memref<4x5x5xf32, #tpu.memory_space<vmem>>, %arg3: memref<4x1x1xf32, #tpu.memory_space<vmem>>, %arg4: memref<4x7x7xf32, #tpu.memory_space<vmem>>, %arg5: memref<4x1x1xf32, #tpu.memory_space<vmem>>, %arg6: memref<4x4x1xf32, #tpu.memory_space<vmem>>, %arg7: memref<4x1x1xf32, #tpu.memory_space<vmem>>, %arg8: memref<1x4x16x16xf32, #tpu.memory_space<vmem>>, %arg9: memref<4x20x20xf32, #tpu.memory_space<vmem>>, %arg10: memref<4x34x34xf32, #tpu.memory_space<vmem>>, %arg11: memref<4x16x16xf32, #tpu.memory_space<vmem>>) attributes {dimension_semantics = [#tpu.dimension_semantics<parallel>], iteration_bounds = array<i64: 2>, scalar_prefetch = 0 : i64, scratch_operands = 3 : i64, tpu.core_type = #tpu.core_type<tc>, window_params = [{transform_indices = @transform_0, window_bounds = array<i64: 1, 4, 16, 16>}, {pipeline_mode = #tpu.pipeline_mode<synchronous>, transform_indices = @transform_1, window_bounds = array<i64: 4, 5, 5>}, {pipeline_mode = #tpu.pipeline_mode<synchronous>, transform_indices = @transform_2, window_bounds = array<i64: 4, 1, 1>}, {pipeline_mode = #tpu.pipeline_mode<synchronous>, transform_indices = @transform_3, window_bounds = array<i64: 4, 7, 7>}, {pipeline_mode = #tpu.pipeline_mode<synchronous>, transform_indices = @transform_4, window_bounds = array<i64: 4, 1, 1>}, {pipeline_mode = #tpu.pipeline_mode<synchronous>, transform_indices = @transform_5, window_bounds = array<i64: 4, 4, 1>}, {pipeline_mode = #tpu.pipeline_mode<synchronous>, transform_indices = @transform_6, window_bounds = array<i64: 4, 1, 1>}, {transform_indices = @transform_7, window_bounds = array<i64: 1, 4, 16, 16>}]} {
    %c0 = arith.constant 0 : index
    %c0_0 = arith.constant 0 : index
    %c0_1 = arith.constant 0 : index
    %c0_2 = arith.constant 0 : index
    %0 = vector.load %arg1[%c0, %c0_0, %c0_1, %c0_2] : memref<1x4x16x16xf32, #tpu.memory_space<vmem>>, vector<1x4x16x16xf32>
    %1 = vector.shape_cast %0 : vector<1x4x16x16xf32> to vector<4x16x16xf32>
    %cst = arith.constant 0.000000e+00 : f32
    %2 = vector.broadcast %cst : f32 to vector<4x20x20xf32>
    %c0_3 = arith.constant 0 : index
    %c0_4 = arith.constant 0 : index
    %c0_5 = arith.constant 0 : index
    %3 = vector.load %arg9[%c0_3, %c0_4, %c0_5] : memref<4x20x20xf32, #tpu.memory_space<vmem>>, vector<4x20x20xf32>
    tpu.vector_store %arg9[%c0_3, %c0_4, %c0_5], %2 {strides = array<i32>} : memref<4x20x20xf32, #tpu.memory_space<vmem>>, vector<4x20x20xf32>,
    %c0_6 = arith.constant 0 : index
    %c2 = arith.constant 2 : index
    %c2_7 = arith.constant 2 : index
    %4 = vector.load %arg9[%c0_6, %c2, %c2_7] : memref<4x20x20xf32, #tpu.memory_space<vmem>>, vector<4x16x16xf32>
    tpu.vector_store %arg9[%c0_6, %c2, %c2_7], %1 {strides = array<i32>} : memref<4x20x20xf32, #tpu.memory_space<vmem>>, vector<4x16x16xf32>,
    %c0_8 = arith.constant 0 : index
    %c0_9 = arith.constant 0 : index
    %c0_10 = arith.constant 0 : index
    %5 = vector.load %arg2[%c0_8, %c0_9, %c0_10] : memref<4x5x5xf32, #tpu.memory_space<vmem>>, vector<4x5x5xf32>
    %cst_11 = arith.constant 0.000000e+00 : f32
    %6 = vector.broadcast %cst_11 : f32 to vector<4x16x16xf32>
    %c0_12 = arith.constant 0 : index
    %c0_13 = arith.constant 0 : index
    %c0_14 = arith.constant 0 : index
    %7 = vector.load %arg9[%c0_12, %c0_13, %c0_14] : memref<4x20x20xf32, #tpu.memory_space<vmem>>, vector<4x16x16xf32>
    %8 = vector.extract_strided_slice %5 {offsets = [0, 0, 0], sizes = [4, 1, 1], strides = [1, 1, 1]} : vector<4x5x5xf32> to vector<4x1x1xf32>
    %9 = vector.broadcast %8 : vector<4x1x1xf32> to vector<4x16x16xf32>
    %10 = arith.mulf %7, %9 : vector<4x16x16xf32>
    %11 = arith.addf %6, %10 : vector<4x16x16xf32>
    %c0_15 = arith.constant 0 : index
    %c0_16 = arith.constant 0 : index
    %c1 = arith.constant 1 : index
    %12 = vector.load %arg9[%c0_15, %c0_16, %c1] : memref<4x20x20xf32, #tpu.memory_space<vmem>>, vector<4x16x16xf32>
    %13 = vector.extract_strided_slice %5 {offsets = [0, 0, 1], sizes = [4, 1, 1], strides = [1, 1, 1]} : vector<4x5x5xf32> to vector<4x1x1xf32>
    %14 = vector.broadcast %13 : vector<4x1x1xf32> to vector<4x16x16xf32>
    %15 = arith.mulf %12, %14 : vector<4x16x16xf32>
    %16 = arith.addf %11, %15 : vector<4x16x16xf32>
    %c0_17 = arith.constant 0 : index
    %c0_18 = arith.constant 0 : index
    %c2_19 = arith.constant 2 : index
    %17 = vector.load %arg9[%c0_17, %c0_18, %c2_19] : memref<4x20x20xf32, #tpu.memory_space<vmem>>, vector<4x16x16xf32>
    %18 = vector.extract_strided_slice %5 {offsets = [0, 0, 2], sizes = [4, 1, 1], strides = [1, 1, 1]} : vector<4x5x5xf32> to vector<4x1x1xf32>
    %19 = vector.broadcast %18 : vector<4x1x1xf32> to vector<4x16x16xf32>
    %20 = arith.mulf %17, %19 : vector<4x16x16xf32>
    %21 = arith.addf %16, %20 : vector<4x16x16xf32>
    %c0_20 = arith.constant 0 : index
    %c0_21 = arith.constant 0 : index
    %c3 = arith.constant 3 : index
    %22 = vector.load %arg9[%c0_20, %c0_21, %c3] : memref<4x20x20xf32, #tpu.memory_space<vmem>>, vector<4x16x16xf32>
    %23 = vector.extract_strided_slice %5 {offsets = [0, 0, 3], sizes = [4, 1, 1], strides = [1, 1, 1]} : vector<4x5x5xf32> to vector<4x1x1xf32>
    %24 = vector.broadcast %23 : vector<4x1x1xf32> to vector<4x16x16xf32>
    %25 = arith.mulf %22, %24 : vector<4x16x16xf32>
    %26 = arith.addf %21, %25 : vector<4x16x16xf32>
    %c0_22 = arith.constant 0 : index
    %c0_23 = arith.constant 0 : index
    %c4 = arith.constant 4 : index
    %27 = vector.load %arg9[%c0_22, %c0_23, %c4] : memref<4x20x20xf32, #tpu.memory_space<vmem>>, vector<4x16x16xf32>
    %28 = vector.extract_strided_slice %5 {offsets = [0, 0, 4], sizes = [4, 1, 1], strides = [1, 1, 1]} : vector<4x5x5xf32> to vector<4x1x1xf32>
    %29 = vector.broadcast %28 : vector<4x1x1xf32> to vector<4x16x16xf32>
    %30 = arith.mulf %27, %29 : vector<4x16x16xf32>
    %31 = arith.addf %26, %30 : vector<4x16x16xf32>
    %c0_24 = arith.constant 0 : index
    %c1_25 = arith.constant 1 : index
    %c0_26 = arith.constant 0 : index
    %32 = vector.load %arg9[%c0_24, %c1_25, %c0_26] : memref<4x20x20xf32, #tpu.memory_space<vmem>>, vector<4x16x16xf32>
    %33 = vector.extract_strided_slice %5 {offsets = [0, 1, 0], sizes = [4, 1, 1], strides = [1, 1, 1]} : vector<4x5x5xf32> to vector<4x1x1xf32>
    %34 = vector.broadcast %33 : vector<4x1x1xf32> to vector<4x16x16xf32>
    %35 = arith.mulf %32, %34 : vector<4x16x16xf32>
    %36 = arith.addf %31, %35 : vector<4x16x16xf32>
    %c0_27 = arith.constant 0 : index
    %c1_28 = arith.constant 1 : index
    %c1_29 = arith.constant 1 : index
    %37 = vector.load %arg9[%c0_27, %c1_28, %c1_29] : memref<4x20x20xf32, #tpu.memory_space<vmem>>, vector<4x16x16xf32>
    %38 = vector.extract_strided_slice %5 {offsets = [0, 1, 1], sizes = [4, 1, 1], strides = [1, 1, 1]} : vector<4x5x5xf32> to vector<4x1x1xf32>
    %39 = vector.broadcast %38 : vector<4x1x1xf32> to vector<4x16x16xf32>
    %40 = arith.mulf %37, %39 : vector<4x16x16xf32>
    %41 = arith.addf %36, %40 : vector<4x16x16xf32>
    %c0_30 = arith.constant 0 : index
    %c1_31 = arith.constant 1 : index
    %c2_32 = arith.constant 2 : index
    %42 = vector.load %arg9[%c0_30, %c1_31, %c2_32] : memref<4x20x20xf32, #tpu.memory_space<vmem>>, vector<4x16x16xf32>
    %43 = vector.extract_strided_slice %5 {offsets = [0, 1, 2], sizes = [4, 1, 1], strides = [1, 1, 1]} : vector<4x5x5xf32> to vector<4x1x1xf32>
    %44 = vector.broadcast %43 : vector<4x1x1xf32> to vector<4x16x16xf32>
    %45 = arith.mulf %42, %44 : vector<4x16x16xf32>
    %46 = arith.addf %41, %45 : vector<4x16x16xf32>
    %c0_33 = arith.constant 0 : index
    %c1_34 = arith.constant 1 : index
    %c3_35 = arith.constant 3 : index
    %47 = vector.load %arg9[%c0_33, %c1_34, %c3_35] : memref<4x20x20xf32, #tpu.memory_space<vmem>>, vector<4x16x16xf32>
    %48 = vector.extract_strided_slice %5 {offsets = [0, 1, 3], sizes = [4, 1, 1], strides = [1, 1, 1]} : vector<4x5x5xf32> to vector<4x1x1xf32>
    %49 = vector.broadcast %48 : vector<4x1x1xf32> to vector<4x16x16xf32>
    %50 = arith.mulf %47, %49 : vector<4x16x16xf32>
    %51 = arith.addf %46, %50 : vector<4x16x16xf32>
    %c0_36 = arith.constant 0 : index
    %c1_37 = arith.constant 1 : index
    %c4_38 = arith.constant 4 : index
    %52 = vector.load %arg9[%c0_36, %c1_37, %c4_38] : memref<4x20x20xf32, #tpu.memory_space<vmem>>, vector<4x16x16xf32>
    %53 = vector.extract_strided_slice %5 {offsets = [0, 1, 4], sizes = [4, 1, 1], strides = [1, 1, 1]} : vector<4x5x5xf32> to vector<4x1x1xf32>
    %54 = vector.broadcast %53 : vector<4x1x1xf32> to vector<4x16x16xf32>
    %55 = arith.mulf %52, %54 : vector<4x16x16xf32>
    %56 = arith.addf %51, %55 : vector<4x16x16xf32>
    %c0_39 = arith.constant 0 : index
    %c2_40 = arith.constant 2 : index
    %c0_41 = arith.constant 0 : index
    %57 = vector.load %arg9[%c0_39, %c2_40, %c0_41] : memref<4x20x20xf32, #tpu.memory_space<vmem>>, vector<4x16x16xf32>
    %58 = vector.extract_strided_slice %5 {offsets = [0, 2, 0], sizes = [4, 1, 1], strides = [1, 1, 1]} : vector<4x5x5xf32> to vector<4x1x1xf32>
    %59 = vector.broadcast %58 : vector<4x1x1xf32> to vector<4x16x16xf32>
    %60 = arith.mulf %57, %59 : vector<4x16x16xf32>
    %61 = arith.addf %56, %60 : vector<4x16x16xf32>
    %c0_42 = arith.constant 0 : index
    %c2_43 = arith.constant 2 : index
    %c1_44 = arith.constant 1 : index
    %62 = vector.load %arg9[%c0_42, %c2_43, %c1_44] : memref<4x20x20xf32, #tpu.memory_space<vmem>>, vector<4x16x16xf32>
    %63 = vector.extract_strided_slice %5 {offsets = [0, 2, 1], sizes = [4, 1, 1], strides = [1, 1, 1]} : vector<4x5x5xf32> to vector<4x1x1xf32>
    %64 = vector.broadcast %63 : vector<4x1x1xf32> to vector<4x16x16xf32>
    %65 = arith.mulf %62, %64 : vector<4x16x16xf32>
    %66 = arith.addf %61, %65 : vector<4x16x16xf32>
    %c0_45 = arith.constant 0 : index
    %c2_46 = arith.constant 2 : index
    %c2_47 = arith.constant 2 : index
    %67 = vector.load %arg9[%c0_45, %c2_46, %c2_47] : memref<4x20x20xf32, #tpu.memory_space<vmem>>, vector<4x16x16xf32>
    %68 = vector.extract_strided_slice %5 {offsets = [0, 2, 2], sizes = [4, 1, 1], strides = [1, 1, 1]} : vector<4x5x5xf32> to vector<4x1x1xf32>
    %69 = vector.broadcast %68 : vector<4x1x1xf32> to vector<4x16x16xf32>
    %70 = arith.mulf %67, %69 : vector<4x16x16xf32>
    %71 = arith.addf %66, %70 : vector<4x16x16xf32>
    %c0_48 = arith.constant 0 : index
    %c2_49 = arith.constant 2 : index
    %c3_50 = arith.constant 3 : index
    %72 = vector.load %arg9[%c0_48, %c2_49, %c3_50] : memref<4x20x20xf32, #tpu.memory_space<vmem>>, vector<4x16x16xf32>
    %73 = vector.extract_strided_slice %5 {offsets = [0, 2, 3], sizes = [4, 1, 1], strides = [1, 1, 1]} : vector<4x5x5xf32> to vector<4x1x1xf32>
    %74 = vector.broadcast %73 : vector<4x1x1xf32> to vector<4x16x16xf32>
    %75 = arith.mulf %72, %74 : vector<4x16x16xf32>
    %76 = arith.addf %71, %75 : vector<4x16x16xf32>
    %c0_51 = arith.constant 0 : index
    %c2_52 = arith.constant 2 : index
    %c4_53 = arith.constant 4 : index
    %77 = vector.load %arg9[%c0_51, %c2_52, %c4_53] : memref<4x20x20xf32, #tpu.memory_space<vmem>>, vector<4x16x16xf32>
    %78 = vector.extract_strided_slice %5 {offsets = [0, 2, 4], sizes = [4, 1, 1], strides = [1, 1, 1]} : vector<4x5x5xf32> to vector<4x1x1xf32>
    %79 = vector.broadcast %78 : vector<4x1x1xf32> to vector<4x16x16xf32>
    %80 = arith.mulf %77, %79 : vector<4x16x16xf32>
    %81 = arith.addf %76, %80 : vector<4x16x16xf32>
    %c0_54 = arith.constant 0 : index
    %c3_55 = arith.constant 3 : index
    %c0_56 = arith.constant 0 : index
    %82 = vector.load %arg9[%c0_54, %c3_55, %c0_56] : memref<4x20x20xf32, #tpu.memory_space<vmem>>, vector<4x16x16xf32>
    %83 = vector.extract_strided_slice %5 {offsets = [0, 3, 0], sizes = [4, 1, 1], strides = [1, 1, 1]} : vector<4x5x5xf32> to vector<4x1x1xf32>
    %84 = vector.broadcast %83 : vector<4x1x1xf32> to vector<4x16x16xf32>
    %85 = arith.mulf %82, %84 : vector<4x16x16xf32>
    %86 = arith.addf %81, %85 : vector<4x16x16xf32>
    %c0_57 = arith.constant 0 : index
    %c3_58 = arith.constant 3 : index
    %c1_59 = arith.constant 1 : index
    %87 = vector.load %arg9[%c0_57, %c3_58, %c1_59] : memref<4x20x20xf32, #tpu.memory_space<vmem>>, vector<4x16x16xf32>
    %88 = vector.extract_strided_slice %5 {offsets = [0, 3, 1], sizes = [4, 1, 1], strides = [1, 1, 1]} : vector<4x5x5xf32> to vector<4x1x1xf32>
    %89 = vector.broadcast %88 : vector<4x1x1xf32> to vector<4x16x16xf32>
    %90 = arith.mulf %87, %89 : vector<4x16x16xf32>
    %91 = arith.addf %86, %90 : vector<4x16x16xf32>
    %c0_60 = arith.constant 0 : index
    %c3_61 = arith.constant 3 : index
    %c2_62 = arith.constant 2 : index
    %92 = vector.load %arg9[%c0_60, %c3_61, %c2_62] : memref<4x20x20xf32, #tpu.memory_space<vmem>>, vector<4x16x16xf32>
    %93 = vector.extract_strided_slice %5 {offsets = [0, 3, 2], sizes = [4, 1, 1], strides = [1, 1, 1]} : vector<4x5x5xf32> to vector<4x1x1xf32>
    %94 = vector.broadcast %93 : vector<4x1x1xf32> to vector<4x16x16xf32>
    %95 = arith.mulf %92, %94 : vector<4x16x16xf32>
    %96 = arith.addf %91, %95 : vector<4x16x16xf32>
    %c0_63 = arith.constant 0 : index
    %c3_64 = arith.constant 3 : index
    %c3_65 = arith.constant 3 : index
    %97 = vector.load %arg9[%c0_63, %c3_64, %c3_65] : memref<4x20x20xf32, #tpu.memory_space<vmem>>, vector<4x16x16xf32>
    %98 = vector.extract_strided_slice %5 {offsets = [0, 3, 3], sizes = [4, 1, 1], strides = [1, 1, 1]} : vector<4x5x5xf32> to vector<4x1x1xf32>
    %99 = vector.broadcast %98 : vector<4x1x1xf32> to vector<4x16x16xf32>
    %100 = arith.mulf %97, %99 : vector<4x16x16xf32>
    %101 = arith.addf %96, %100 : vector<4x16x16xf32>
    %c0_66 = arith.constant 0 : index
    %c3_67 = arith.constant 3 : index
    %c4_68 = arith.constant 4 : index
    %102 = vector.load %arg9[%c0_66, %c3_67, %c4_68] : memref<4x20x20xf32, #tpu.memory_space<vmem>>, vector<4x16x16xf32>
    %103 = vector.extract_strided_slice %5 {offsets = [0, 3, 4], sizes = [4, 1, 1], strides = [1, 1, 1]} : vector<4x5x5xf32> to vector<4x1x1xf32>
    %104 = vector.broadcast %103 : vector<4x1x1xf32> to vector<4x16x16xf32>
    %105 = arith.mulf %102, %104 : vector<4x16x16xf32>
    %106 = arith.addf %101, %105 : vector<4x16x16xf32>
    %c0_69 = arith.constant 0 : index
    %c4_70 = arith.constant 4 : index
    %c0_71 = arith.constant 0 : index
    %107 = vector.load %arg9[%c0_69, %c4_70, %c0_71] : memref<4x20x20xf32, #tpu.memory_space<vmem>>, vector<4x16x16xf32>
    %108 = vector.extract_strided_slice %5 {offsets = [0, 4, 0], sizes = [4, 1, 1], strides = [1, 1, 1]} : vector<4x5x5xf32> to vector<4x1x1xf32>
    %109 = vector.broadcast %108 : vector<4x1x1xf32> to vector<4x16x16xf32>
    %110 = arith.mulf %107, %109 : vector<4x16x16xf32>
    %111 = arith.addf %106, %110 : vector<4x16x16xf32>
    %c0_72 = arith.constant 0 : index
    %c4_73 = arith.constant 4 : index
    %c1_74 = arith.constant 1 : index
    %112 = vector.load %arg9[%c0_72, %c4_73, %c1_74] : memref<4x20x20xf32, #tpu.memory_space<vmem>>, vector<4x16x16xf32>
    %113 = vector.extract_strided_slice %5 {offsets = [0, 4, 1], sizes = [4, 1, 1], strides = [1, 1, 1]} : vector<4x5x5xf32> to vector<4x1x1xf32>
    %114 = vector.broadcast %113 : vector<4x1x1xf32> to vector<4x16x16xf32>
    %115 = arith.mulf %112, %114 : vector<4x16x16xf32>
    %116 = arith.addf %111, %115 : vector<4x16x16xf32>
    %c0_75 = arith.constant 0 : index
    %c4_76 = arith.constant 4 : index
    %c2_77 = arith.constant 2 : index
    %117 = vector.load %arg9[%c0_75, %c4_76, %c2_77] : memref<4x20x20xf32, #tpu.memory_space<vmem>>, vector<4x16x16xf32>
    %118 = vector.extract_strided_slice %5 {offsets = [0, 4, 2], sizes = [4, 1, 1], strides = [1, 1, 1]} : vector<4x5x5xf32> to vector<4x1x1xf32>
    %119 = vector.broadcast %118 : vector<4x1x1xf32> to vector<4x16x16xf32>
    %120 = arith.mulf %117, %119 : vector<4x16x16xf32>
    %121 = arith.addf %116, %120 : vector<4x16x16xf32>
    %c0_78 = arith.constant 0 : index
    %c4_79 = arith.constant 4 : index
    %c3_80 = arith.constant 3 : index
    %122 = vector.load %arg9[%c0_78, %c4_79, %c3_80] : memref<4x20x20xf32, #tpu.memory_space<vmem>>, vector<4x16x16xf32>
    %123 = vector.extract_strided_slice %5 {offsets = [0, 4, 3], sizes = [4, 1, 1], strides = [1, 1, 1]} : vector<4x5x5xf32> to vector<4x1x1xf32>
    %124 = vector.broadcast %123 : vector<4x1x1xf32> to vector<4x16x16xf32>
    %125 = arith.mulf %122, %124 : vector<4x16x16xf32>
    %126 = arith.addf %121, %125 : vector<4x16x16xf32>
    %c0_81 = arith.constant 0 : index
    %c4_82 = arith.constant 4 : index
    %c4_83 = arith.constant 4 : index
    %127 = vector.load %arg9[%c0_81, %c4_82, %c4_83] : memref<4x20x20xf32, #tpu.memory_space<vmem>>, vector<4x16x16xf32>
    %128 = vector.extract_strided_slice %5 {offsets = [0, 4, 4], sizes = [4, 1, 1], strides = [1, 1, 1]} : vector<4x5x5xf32> to vector<4x1x1xf32>
    %129 = vector.broadcast %128 : vector<4x1x1xf32> to vector<4x16x16xf32>
    %130 = arith.mulf %127, %129 : vector<4x16x16xf32>
    %131 = arith.addf %126, %130 : vector<4x16x16xf32>
    %c0_84 = arith.constant 0 : index
    %c0_85 = arith.constant 0 : index
    %c0_86 = arith.constant 0 : index
    %132 = vector.load %arg3[%c0_84, %c0_85, %c0_86] : memref<4x1x1xf32, #tpu.memory_space<vmem>>, vector<4x1x1xf32>
    %133 = vector.broadcast %132 : vector<4x1x1xf32> to vector<4x16x16xf32>
    %134 = arith.addf %131, %133 : vector<4x16x16xf32>
    %cst_87 = arith.constant 5.000000e-01 : f32
    %135 = vector.broadcast %cst_87 : f32 to vector<4x16x16xf32>
    %136 = arith.mulf %135, %134 : vector<4x16x16xf32>
    %137 = arith.mulf %134, %134 : vector<4x16x16xf32>
    %138 = arith.mulf %137, %134 : vector<4x16x16xf32>
    %cst_88 = arith.constant 4.471500e-02 : f32
    %139 = vector.broadcast %cst_88 : f32 to vector<4x16x16xf32>
    %140 = arith.mulf %139, %138 : vector<4x16x16xf32>
    %141 = arith.addf %134, %140 : vector<4x16x16xf32>
    %cst_89 = arith.constant 0.797884583 : f32
    %142 = vector.broadcast %cst_89 : f32 to vector<4x16x16xf32>
    %143 = arith.mulf %142, %141 : vector<4x16x16xf32>
    %144 = math.tanh %143 : vector<4x16x16xf32>
    %cst_90 = arith.constant 1.000000e+00 : f32
    %145 = vector.broadcast %cst_90 : f32 to vector<4x16x16xf32>
    %146 = arith.addf %145, %144 : vector<4x16x16xf32>
    %147 = arith.mulf %136, %146 : vector<4x16x16xf32>
    %cst_91 = arith.constant 0.000000e+00 : f32
    %148 = vector.broadcast %cst_91 : f32 to vector<4x34x34xf32>
    %c0_92 = arith.constant 0 : index
    %c0_93 = arith.constant 0 : index
    %c0_94 = arith.constant 0 : index
    %149 = vector.load %arg10[%c0_92, %c0_93, %c0_94] : memref<4x34x34xf32, #tpu.memory_space<vmem>>, vector<4x34x34xf32>
    tpu.vector_store %arg10[%c0_92, %c0_93, %c0_94], %148 {strides = array<i32>} : memref<4x34x34xf32, #tpu.memory_space<vmem>>, vector<4x34x34xf32>,
    %c0_95 = arith.constant 0 : index
    %c9 = arith.constant 9 : index
    %c9_96 = arith.constant 9 : index
    %150 = vector.load %arg10[%c0_95, %c9, %c9_96] : memref<4x34x34xf32, #tpu.memory_space<vmem>>, vector<4x16x16xf32>
    tpu.vector_store %arg10[%c0_95, %c9, %c9_96], %147 {strides = array<i32>} : memref<4x34x34xf32, #tpu.memory_space<vmem>>, vector<4x16x16xf32>,
    %c0_97 = arith.constant 0 : index
    %c0_98 = arith.constant 0 : index
    %c0_99 = arith.constant 0 : index
    %151 = vector.load %arg4[%c0_97, %c0_98, %c0_99] : memref<4x7x7xf32, #tpu.memory_space<vmem>>, vector<4x7x7xf32>
    %cst_100 = arith.constant 0.000000e+00 : f32
    %152 = vector.broadcast %cst_100 : f32 to vector<4x16x16xf32>
    %c0_101 = arith.constant 0 : index
    %c0_102 = arith.constant 0 : index
    %c0_103 = arith.constant 0 : index
    %153 = vector.load %arg10[%c0_101, %c0_102, %c0_103] : memref<4x34x34xf32, #tpu.memory_space<vmem>>, vector<4x16x16xf32>
    %154 = vector.extract_strided_slice %151 {offsets = [0, 0, 0], sizes = [4, 1, 1], strides = [1, 1, 1]} : vector<4x7x7xf32> to vector<4x1x1xf32>
    %155 = vector.broadcast %154 : vector<4x1x1xf32> to vector<4x16x16xf32>
    %156 = arith.mulf %153, %155 : vector<4x16x16xf32>
    %157 = arith.addf %152, %156 : vector<4x16x16xf32>
    %c0_104 = arith.constant 0 : index
    %c0_105 = arith.constant 0 : index
    %c3_106 = arith.constant 3 : index
    %158 = vector.load %arg10[%c0_104, %c0_105, %c3_106] : memref<4x34x34xf32, #tpu.memory_space<vmem>>, vector<4x16x16xf32>
    %159 = vector.extract_strided_slice %151 {offsets = [0, 0, 1], sizes = [4, 1, 1], strides = [1, 1, 1]} : vector<4x7x7xf32> to vector<4x1x1xf32>
    %160 = vector.broadcast %159 : vector<4x1x1xf32> to vector<4x16x16xf32>
    %161 = arith.mulf %158, %160 : vector<4x16x16xf32>
    %162 = arith.addf %157, %161 : vector<4x16x16xf32>
    %c0_107 = arith.constant 0 : index
    %c0_108 = arith.constant 0 : index
    %c6 = arith.constant 6 : index
    %163 = vector.load %arg10[%c0_107, %c0_108, %c6] : memref<4x34x34xf32, #tpu.memory_space<vmem>>, vector<4x16x16xf32>
    %164 = vector.extract_strided_slice %151 {offsets = [0, 0, 2], sizes = [4, 1, 1], strides = [1, 1, 1]} : vector<4x7x7xf32> to vector<4x1x1xf32>
    %165 = vector.broadcast %164 : vector<4x1x1xf32> to vector<4x16x16xf32>
    %166 = arith.mulf %163, %165 : vector<4x16x16xf32>
    %167 = arith.addf %162, %166 : vector<4x16x16xf32>
    %c0_109 = arith.constant 0 : index
    %c0_110 = arith.constant 0 : index
    %c9_111 = arith.constant 9 : index
    %168 = vector.load %arg10[%c0_109, %c0_110, %c9_111] : memref<4x34x34xf32, #tpu.memory_space<vmem>>, vector<4x16x16xf32>
    %169 = vector.extract_strided_slice %151 {offsets = [0, 0, 3], sizes = [4, 1, 1], strides = [1, 1, 1]} : vector<4x7x7xf32> to vector<4x1x1xf32>
    %170 = vector.broadcast %169 : vector<4x1x1xf32> to vector<4x16x16xf32>
    %171 = arith.mulf %168, %170 : vector<4x16x16xf32>
    %172 = arith.addf %167, %171 : vector<4x16x16xf32>
    %c0_112 = arith.constant 0 : index
    %c0_113 = arith.constant 0 : index
    %c12 = arith.constant 12 : index
    %173 = vector.load %arg10[%c0_112, %c0_113, %c12] : memref<4x34x34xf32, #tpu.memory_space<vmem>>, vector<4x16x16xf32>
    %174 = vector.extract_strided_slice %151 {offsets = [0, 0, 4], sizes = [4, 1, 1], strides = [1, 1, 1]} : vector<4x7x7xf32> to vector<4x1x1xf32>
    %175 = vector.broadcast %174 : vector<4x1x1xf32> to vector<4x16x16xf32>
    %176 = arith.mulf %173, %175 : vector<4x16x16xf32>
    %177 = arith.addf %172, %176 : vector<4x16x16xf32>
    %c0_114 = arith.constant 0 : index
    %c0_115 = arith.constant 0 : index
    %c15 = arith.constant 15 : index
    %178 = vector.load %arg10[%c0_114, %c0_115, %c15] : memref<4x34x34xf32, #tpu.memory_space<vmem>>, vector<4x16x16xf32>
    %179 = vector.extract_strided_slice %151 {offsets = [0, 0, 5], sizes = [4, 1, 1], strides = [1, 1, 1]} : vector<4x7x7xf32> to vector<4x1x1xf32>
    %180 = vector.broadcast %179 : vector<4x1x1xf32> to vector<4x16x16xf32>
    %181 = arith.mulf %178, %180 : vector<4x16x16xf32>
    %182 = arith.addf %177, %181 : vector<4x16x16xf32>
    %c0_116 = arith.constant 0 : index
    %c0_117 = arith.constant 0 : index
    %c18 = arith.constant 18 : index
    %183 = vector.load %arg10[%c0_116, %c0_117, %c18] : memref<4x34x34xf32, #tpu.memory_space<vmem>>, vector<4x16x16xf32>
    %184 = vector.extract_strided_slice %151 {offsets = [0, 0, 6], sizes = [4, 1, 1], strides = [1, 1, 1]} : vector<4x7x7xf32> to vector<4x1x1xf32>
    %185 = vector.broadcast %184 : vector<4x1x1xf32> to vector<4x16x16xf32>
    %186 = arith.mulf %183, %185 : vector<4x16x16xf32>
    %187 = arith.addf %182, %186 : vector<4x16x16xf32>
    %c0_118 = arith.constant 0 : index
    %c3_119 = arith.constant 3 : index
    %c0_120 = arith.constant 0 : index
    %188 = vector.load %arg10[%c0_118, %c3_119, %c0_120] : memref<4x34x34xf32, #tpu.memory_space<vmem>>, vector<4x16x16xf32>
    %189 = vector.extract_strided_slice %151 {offsets = [0, 1, 0], sizes = [4, 1, 1], strides = [1, 1, 1]} : vector<4x7x7xf32> to vector<4x1x1xf32>
    %190 = vector.broadcast %189 : vector<4x1x1xf32> to vector<4x16x16xf32>
    %191 = arith.mulf %188, %190 : vector<4x16x16xf32>
    %192 = arith.addf %187, %191 : vector<4x16x16xf32>
    %c0_121 = arith.constant 0 : index
    %c3_122 = arith.constant 3 : index
    %c3_123 = arith.constant 3 : index
    %193 = vector.load %arg10[%c0_121, %c3_122, %c3_123] : memref<4x34x34xf32, #tpu.memory_space<vmem>>, vector<4x16x16xf32>
    %194 = vector.extract_strided_slice %151 {offsets = [0, 1, 1], sizes = [4, 1, 1], strides = [1, 1, 1]} : vector<4x7x7xf32> to vector<4x1x1xf32>
    %195 = vector.broadcast %194 : vector<4x1x1xf32> to vector<4x16x16xf32>
    %196 = arith.mulf %193, %195 : vector<4x16x16xf32>
    %197 = arith.addf %192, %196 : vector<4x16x16xf32>
    %c0_124 = arith.constant 0 : index
    %c3_125 = arith.constant 3 : index
    %c6_126 = arith.constant 6 : index
    %198 = vector.load %arg10[%c0_124, %c3_125, %c6_126] : memref<4x34x34xf32, #tpu.memory_space<vmem>>, vector<4x16x16xf32>
    %199 = vector.extract_strided_slice %151 {offsets = [0, 1, 2], sizes = [4, 1, 1], strides = [1, 1, 1]} : vector<4x7x7xf32> to vector<4x1x1xf32>
    %200 = vector.broadcast %199 : vector<4x1x1xf32> to vector<4x16x16xf32>
    %201 = arith.mulf %198, %200 : vector<4x16x16xf32>
    %202 = arith.addf %197, %201 : vector<4x16x16xf32>
    %c0_127 = arith.constant 0 : index
    %c3_128 = arith.constant 3 : index
    %c9_129 = arith.constant 9 : index
    %203 = vector.load %arg10[%c0_127, %c3_128, %c9_129] : memref<4x34x34xf32, #tpu.memory_space<vmem>>, vector<4x16x16xf32>
    %204 = vector.extract_strided_slice %151 {offsets = [0, 1, 3], sizes = [4, 1, 1], strides = [1, 1, 1]} : vector<4x7x7xf32> to vector<4x1x1xf32>
    %205 = vector.broadcast %204 : vector<4x1x1xf32> to vector<4x16x16xf32>
    %206 = arith.mulf %203, %205 : vector<4x16x16xf32>
    %207 = arith.addf %202, %206 : vector<4x16x16xf32>
    %c0_130 = arith.constant 0 : index
    %c3_131 = arith.constant 3 : index
    %c12_132 = arith.constant 12 : index
    %208 = vector.load %arg10[%c0_130, %c3_131, %c12_132] : memref<4x34x34xf32, #tpu.memory_space<vmem>>, vector<4x16x16xf32>
    %209 = vector.extract_strided_slice %151 {offsets = [0, 1, 4], sizes = [4, 1, 1], strides = [1, 1, 1]} : vector<4x7x7xf32> to vector<4x1x1xf32>
    %210 = vector.broadcast %209 : vector<4x1x1xf32> to vector<4x16x16xf32>
    %211 = arith.mulf %208, %210 : vector<4x16x16xf32>
    %212 = arith.addf %207, %211 : vector<4x16x16xf32>
    %c0_133 = arith.constant 0 : index
    %c3_134 = arith.constant 3 : index
    %c15_135 = arith.constant 15 : index
    %213 = vector.load %arg10[%c0_133, %c3_134, %c15_135] : memref<4x34x34xf32, #tpu.memory_space<vmem>>, vector<4x16x16xf32>
    %214 = vector.extract_strided_slice %151 {offsets = [0, 1, 5], sizes = [4, 1, 1], strides = [1, 1, 1]} : vector<4x7x7xf32> to vector<4x1x1xf32>
    %215 = vector.broadcast %214 : vector<4x1x1xf32> to vector<4x16x16xf32>
    %216 = arith.mulf %213, %215 : vector<4x16x16xf32>
    %217 = arith.addf %212, %216 : vector<4x16x16xf32>
    %c0_136 = arith.constant 0 : index
    %c3_137 = arith.constant 3 : index
    %c18_138 = arith.constant 18 : index
    %218 = vector.load %arg10[%c0_136, %c3_137, %c18_138] : memref<4x34x34xf32, #tpu.memory_space<vmem>>, vector<4x16x16xf32>
    %219 = vector.extract_strided_slice %151 {offsets = [0, 1, 6], sizes = [4, 1, 1], strides = [1, 1, 1]} : vector<4x7x7xf32> to vector<4x1x1xf32>
    %220 = vector.broadcast %219 : vector<4x1x1xf32> to vector<4x16x16xf32>
    %221 = arith.mulf %218, %220 : vector<4x16x16xf32>
    %222 = arith.addf %217, %221 : vector<4x16x16xf32>
    %c0_139 = arith.constant 0 : index
    %c6_140 = arith.constant 6 : index
    %c0_141 = arith.constant 0 : index
    %223 = vector.load %arg10[%c0_139, %c6_140, %c0_141] : memref<4x34x34xf32, #tpu.memory_space<vmem>>, vector<4x16x16xf32>
    %224 = vector.extract_strided_slice %151 {offsets = [0, 2, 0], sizes = [4, 1, 1], strides = [1, 1, 1]} : vector<4x7x7xf32> to vector<4x1x1xf32>
    %225 = vector.broadcast %224 : vector<4x1x1xf32> to vector<4x16x16xf32>
    %226 = arith.mulf %223, %225 : vector<4x16x16xf32>
    %227 = arith.addf %222, %226 : vector<4x16x16xf32>
    %c0_142 = arith.constant 0 : index
    %c6_143 = arith.constant 6 : index
    %c3_144 = arith.constant 3 : index
    %228 = vector.load %arg10[%c0_142, %c6_143, %c3_144] : memref<4x34x34xf32, #tpu.memory_space<vmem>>, vector<4x16x16xf32>
    %229 = vector.extract_strided_slice %151 {offsets = [0, 2, 1], sizes = [4, 1, 1], strides = [1, 1, 1]} : vector<4x7x7xf32> to vector<4x1x1xf32>
    %230 = vector.broadcast %229 : vector<4x1x1xf32> to vector<4x16x16xf32>
    %231 = arith.mulf %228, %230 : vector<4x16x16xf32>
    %232 = arith.addf %227, %231 : vector<4x16x16xf32>
    %c0_145 = arith.constant 0 : index
    %c6_146 = arith.constant 6 : index
    %c6_147 = arith.constant 6 : index
    %233 = vector.load %arg10[%c0_145, %c6_146, %c6_147] : memref<4x34x34xf32, #tpu.memory_space<vmem>>, vector<4x16x16xf32>
    %234 = vector.extract_strided_slice %151 {offsets = [0, 2, 2], sizes = [4, 1, 1], strides = [1, 1, 1]} : vector<4x7x7xf32> to vector<4x1x1xf32>
    %235 = vector.broadcast %234 : vector<4x1x1xf32> to vector<4x16x16xf32>
    %236 = arith.mulf %233, %235 : vector<4x16x16xf32>
    %237 = arith.addf %232, %236 : vector<4x16x16xf32>
    %c0_148 = arith.constant 0 : index
    %c6_149 = arith.constant 6 : index
    %c9_150 = arith.constant 9 : index
    %238 = vector.load %arg10[%c0_148, %c6_149, %c9_150] : memref<4x34x34xf32, #tpu.memory_space<vmem>>, vector<4x16x16xf32>
    %239 = vector.extract_strided_slice %151 {offsets = [0, 2, 3], sizes = [4, 1, 1], strides = [1, 1, 1]} : vector<4x7x7xf32> to vector<4x1x1xf32>
    %240 = vector.broadcast %239 : vector<4x1x1xf32> to vector<4x16x16xf32>
    %241 = arith.mulf %238, %240 : vector<4x16x16xf32>
    %242 = arith.addf %237, %241 : vector<4x16x16xf32>
    %c0_151 = arith.constant 0 : index
    %c6_152 = arith.constant 6 : index
    %c12_153 = arith.constant 12 : index
    %243 = vector.load %arg10[%c0_151, %c6_152, %c12_153] : memref<4x34x34xf32, #tpu.memory_space<vmem>>, vector<4x16x16xf32>
    %244 = vector.extract_strided_slice %151 {offsets = [0, 2, 4], sizes = [4, 1, 1], strides = [1, 1, 1]} : vector<4x7x7xf32> to vector<4x1x1xf32>
    %245 = vector.broadcast %244 : vector<4x1x1xf32> to vector<4x16x16xf32>
    %246 = arith.mulf %243, %245 : vector<4x16x16xf32>
    %247 = arith.addf %242, %246 : vector<4x16x16xf32>
    %c0_154 = arith.constant 0 : index
    %c6_155 = arith.constant 6 : index
    %c15_156 = arith.constant 15 : index
    %248 = vector.load %arg10[%c0_154, %c6_155, %c15_156] : memref<4x34x34xf32, #tpu.memory_space<vmem>>, vector<4x16x16xf32>
    %249 = vector.extract_strided_slice %151 {offsets = [0, 2, 5], sizes = [4, 1, 1], strides = [1, 1, 1]} : vector<4x7x7xf32> to vector<4x1x1xf32>
    %250 = vector.broadcast %249 : vector<4x1x1xf32> to vector<4x16x16xf32>
    %251 = arith.mulf %248, %250 : vector<4x16x16xf32>
    %252 = arith.addf %247, %251 : vector<4x16x16xf32>
    %c0_157 = arith.constant 0 : index
    %c6_158 = arith.constant 6 : index
    %c18_159 = arith.constant 18 : index
    %253 = vector.load %arg10[%c0_157, %c6_158, %c18_159] : memref<4x34x34xf32, #tpu.memory_space<vmem>>, vector<4x16x16xf32>
    %254 = vector.extract_strided_slice %151 {offsets = [0, 2, 6], sizes = [4, 1, 1], strides = [1, 1, 1]} : vector<4x7x7xf32> to vector<4x1x1xf32>
    %255 = vector.broadcast %254 : vector<4x1x1xf32> to vector<4x16x16xf32>
    %256 = arith.mulf %253, %255 : vector<4x16x16xf32>
    %257 = arith.addf %252, %256 : vector<4x16x16xf32>
    %c0_160 = arith.constant 0 : index
    %c9_161 = arith.constant 9 : index
    %c0_162 = arith.constant 0 : index
    %258 = vector.load %arg10[%c0_160, %c9_161, %c0_162] : memref<4x34x34xf32, #tpu.memory_space<vmem>>, vector<4x16x16xf32>
    %259 = vector.extract_strided_slice %151 {offsets = [0, 3, 0], sizes = [4, 1, 1], strides = [1, 1, 1]} : vector<4x7x7xf32> to vector<4x1x1xf32>
    %260 = vector.broadcast %259 : vector<4x1x1xf32> to vector<4x16x16xf32>
    %261 = arith.mulf %258, %260 : vector<4x16x16xf32>
    %262 = arith.addf %257, %261 : vector<4x16x16xf32>
    %c0_163 = arith.constant 0 : index
    %c9_164 = arith.constant 9 : index
    %c3_165 = arith.constant 3 : index
    %263 = vector.load %arg10[%c0_163, %c9_164, %c3_165] : memref<4x34x34xf32, #tpu.memory_space<vmem>>, vector<4x16x16xf32>
    %264 = vector.extract_strided_slice %151 {offsets = [0, 3, 1], sizes = [4, 1, 1], strides = [1, 1, 1]} : vector<4x7x7xf32> to vector<4x1x1xf32>
    %265 = vector.broadcast %264 : vector<4x1x1xf32> to vector<4x16x16xf32>
    %266 = arith.mulf %263, %265 : vector<4x16x16xf32>
    %267 = arith.addf %262, %266 : vector<4x16x16xf32>
    %c0_166 = arith.constant 0 : index
    %c9_167 = arith.constant 9 : index
    %c6_168 = arith.constant 6 : index
    %268 = vector.load %arg10[%c0_166, %c9_167, %c6_168] : memref<4x34x34xf32, #tpu.memory_space<vmem>>, vector<4x16x16xf32>
    %269 = vector.extract_strided_slice %151 {offsets = [0, 3, 2], sizes = [4, 1, 1], strides = [1, 1, 1]} : vector<4x7x7xf32> to vector<4x1x1xf32>
    %270 = vector.broadcast %269 : vector<4x1x1xf32> to vector<4x16x16xf32>
    %271 = arith.mulf %268, %270 : vector<4x16x16xf32>
    %272 = arith.addf %267, %271 : vector<4x16x16xf32>
    %c0_169 = arith.constant 0 : index
    %c9_170 = arith.constant 9 : index
    %c9_171 = arith.constant 9 : index
    %273 = vector.load %arg10[%c0_169, %c9_170, %c9_171] : memref<4x34x34xf32, #tpu.memory_space<vmem>>, vector<4x16x16xf32>
    %274 = vector.extract_strided_slice %151 {offsets = [0, 3, 3], sizes = [4, 1, 1], strides = [1, 1, 1]} : vector<4x7x7xf32> to vector<4x1x1xf32>
    %275 = vector.broadcast %274 : vector<4x1x1xf32> to vector<4x16x16xf32>
    %276 = arith.mulf %273, %275 : vector<4x16x16xf32>
    %277 = arith.addf %272, %276 : vector<4x16x16xf32>
    %c0_172 = arith.constant 0 : index
    %c9_173 = arith.constant 9 : index
    %c12_174 = arith.constant 12 : index
    %278 = vector.load %arg10[%c0_172, %c9_173, %c12_174] : memref<4x34x34xf32, #tpu.memory_space<vmem>>, vector<4x16x16xf32>
    %279 = vector.extract_strided_slice %151 {offsets = [0, 3, 4], sizes = [4, 1, 1], strides = [1, 1, 1]} : vector<4x7x7xf32> to vector<4x1x1xf32>
    %280 = vector.broadcast %279 : vector<4x1x1xf32> to vector<4x16x16xf32>
    %281 = arith.mulf %278, %280 : vector<4x16x16xf32>
    %282 = arith.addf %277, %281 : vector<4x16x16xf32>
    %c0_175 = arith.constant 0 : index
    %c9_176 = arith.constant 9 : index
    %c15_177 = arith.constant 15 : index
    %283 = vector.load %arg10[%c0_175, %c9_176, %c15_177] : memref<4x34x34xf32, #tpu.memory_space<vmem>>, vector<4x16x16xf32>
    %284 = vector.extract_strided_slice %151 {offsets = [0, 3, 5], sizes = [4, 1, 1], strides = [1, 1, 1]} : vector<4x7x7xf32> to vector<4x1x1xf32>
    %285 = vector.broadcast %284 : vector<4x1x1xf32> to vector<4x16x16xf32>
    %286 = arith.mulf %283, %285 : vector<4x16x16xf32>
    %287 = arith.addf %282, %286 : vector<4x16x16xf32>
    %c0_178 = arith.constant 0 : index
    %c9_179 = arith.constant 9 : index
    %c18_180 = arith.constant 18 : index
    %288 = vector.load %arg10[%c0_178, %c9_179, %c18_180] : memref<4x34x34xf32, #tpu.memory_space<vmem>>, vector<4x16x16xf32>
    %289 = vector.extract_strided_slice %151 {offsets = [0, 3, 6], sizes = [4, 1, 1], strides = [1, 1, 1]} : vector<4x7x7xf32> to vector<4x1x1xf32>
    %290 = vector.broadcast %289 : vector<4x1x1xf32> to vector<4x16x16xf32>
    %291 = arith.mulf %288, %290 : vector<4x16x16xf32>
    %292 = arith.addf %287, %291 : vector<4x16x16xf32>
    %c0_181 = arith.constant 0 : index
    %c12_182 = arith.constant 12 : index
    %c0_183 = arith.constant 0 : index
    %293 = vector.load %arg10[%c0_181, %c12_182, %c0_183] : memref<4x34x34xf32, #tpu.memory_space<vmem>>, vector<4x16x16xf32>
    %294 = vector.extract_strided_slice %151 {offsets = [0, 4, 0], sizes = [4, 1, 1], strides = [1, 1, 1]} : vector<4x7x7xf32> to vector<4x1x1xf32>
    %295 = vector.broadcast %294 : vector<4x1x1xf32> to vector<4x16x16xf32>
    %296 = arith.mulf %293, %295 : vector<4x16x16xf32>
    %297 = arith.addf %292, %296 : vector<4x16x16xf32>
    %c0_184 = arith.constant 0 : index
    %c12_185 = arith.constant 12 : index
    %c3_186 = arith.constant 3 : index
    %298 = vector.load %arg10[%c0_184, %c12_185, %c3_186] : memref<4x34x34xf32, #tpu.memory_space<vmem>>, vector<4x16x16xf32>
    %299 = vector.extract_strided_slice %151 {offsets = [0, 4, 1], sizes = [4, 1, 1], strides = [1, 1, 1]} : vector<4x7x7xf32> to vector<4x1x1xf32>
    %300 = vector.broadcast %299 : vector<4x1x1xf32> to vector<4x16x16xf32>
    %301 = arith.mulf %298, %300 : vector<4x16x16xf32>
    %302 = arith.addf %297, %301 : vector<4x16x16xf32>
    %c0_187 = arith.constant 0 : index
    %c12_188 = arith.constant 12 : index
    %c6_189 = arith.constant 6 : index
    %303 = vector.load %arg10[%c0_187, %c12_188, %c6_189] : memref<4x34x34xf32, #tpu.memory_space<vmem>>, vector<4x16x16xf32>
    %304 = vector.extract_strided_slice %151 {offsets = [0, 4, 2], sizes = [4, 1, 1], strides = [1, 1, 1]} : vector<4x7x7xf32> to vector<4x1x1xf32>
    %305 = vector.broadcast %304 : vector<4x1x1xf32> to vector<4x16x16xf32>
    %306 = arith.mulf %303, %305 : vector<4x16x16xf32>
    %307 = arith.addf %302, %306 : vector<4x16x16xf32>
    %c0_190 = arith.constant 0 : index
    %c12_191 = arith.constant 12 : index
    %c9_192 = arith.constant 9 : index
    %308 = vector.load %arg10[%c0_190, %c12_191, %c9_192] : memref<4x34x34xf32, #tpu.memory_space<vmem>>, vector<4x16x16xf32>
    %309 = vector.extract_strided_slice %151 {offsets = [0, 4, 3], sizes = [4, 1, 1], strides = [1, 1, 1]} : vector<4x7x7xf32> to vector<4x1x1xf32>
    %310 = vector.broadcast %309 : vector<4x1x1xf32> to vector<4x16x16xf32>
    %311 = arith.mulf %308, %310 : vector<4x16x16xf32>
    %312 = arith.addf %307, %311 : vector<4x16x16xf32>
    %c0_193 = arith.constant 0 : index
    %c12_194 = arith.constant 12 : index
    %c12_195 = arith.constant 12 : index
    %313 = vector.load %arg10[%c0_193, %c12_194, %c12_195] : memref<4x34x34xf32, #tpu.memory_space<vmem>>, vector<4x16x16xf32>
    %314 = vector.extract_strided_slice %151 {offsets = [0, 4, 4], sizes = [4, 1, 1], strides = [1, 1, 1]} : vector<4x7x7xf32> to vector<4x1x1xf32>
    %315 = vector.broadcast %314 : vector<4x1x1xf32> to vector<4x16x16xf32>
    %316 = arith.mulf %313, %315 : vector<4x16x16xf32>
    %317 = arith.addf %312, %316 : vector<4x16x16xf32>
    %c0_196 = arith.constant 0 : index
    %c12_197 = arith.constant 12 : index
    %c15_198 = arith.constant 15 : index
    %318 = vector.load %arg10[%c0_196, %c12_197, %c15_198] : memref<4x34x34xf32, #tpu.memory_space<vmem>>, vector<4x16x16xf32>
    %319 = vector.extract_strided_slice %151 {offsets = [0, 4, 5], sizes = [4, 1, 1], strides = [1, 1, 1]} : vector<4x7x7xf32> to vector<4x1x1xf32>
    %320 = vector.broadcast %319 : vector<4x1x1xf32> to vector<4x16x16xf32>
    %321 = arith.mulf %318, %320 : vector<4x16x16xf32>
    %322 = arith.addf %317, %321 : vector<4x16x16xf32>
    %c0_199 = arith.constant 0 : index
    %c12_200 = arith.constant 12 : index
    %c18_201 = arith.constant 18 : index
    %323 = vector.load %arg10[%c0_199, %c12_200, %c18_201] : memref<4x34x34xf32, #tpu.memory_space<vmem>>, vector<4x16x16xf32>
    %324 = vector.extract_strided_slice %151 {offsets = [0, 4, 6], sizes = [4, 1, 1], strides = [1, 1, 1]} : vector<4x7x7xf32> to vector<4x1x1xf32>
    %325 = vector.broadcast %324 : vector<4x1x1xf32> to vector<4x16x16xf32>
    %326 = arith.mulf %323, %325 : vector<4x16x16xf32>
    %327 = arith.addf %322, %326 : vector<4x16x16xf32>
    %c0_202 = arith.constant 0 : index
    %c15_203 = arith.constant 15 : index
    %c0_204 = arith.constant 0 : index
    %328 = vector.load %arg10[%c0_202, %c15_203, %c0_204] : memref<4x34x34xf32, #tpu.memory_space<vmem>>, vector<4x16x16xf32>
    %329 = vector.extract_strided_slice %151 {offsets = [0, 5, 0], sizes = [4, 1, 1], strides = [1, 1, 1]} : vector<4x7x7xf32> to vector<4x1x1xf32>
    %330 = vector.broadcast %329 : vector<4x1x1xf32> to vector<4x16x16xf32>
    %331 = arith.mulf %328, %330 : vector<4x16x16xf32>
    %332 = arith.addf %327, %331 : vector<4x16x16xf32>
    %c0_205 = arith.constant 0 : index
    %c15_206 = arith.constant 15 : index
    %c3_207 = arith.constant 3 : index
    %333 = vector.load %arg10[%c0_205, %c15_206, %c3_207] : memref<4x34x34xf32, #tpu.memory_space<vmem>>, vector<4x16x16xf32>
    %334 = vector.extract_strided_slice %151 {offsets = [0, 5, 1], sizes = [4, 1, 1], strides = [1, 1, 1]} : vector<4x7x7xf32> to vector<4x1x1xf32>
    %335 = vector.broadcast %334 : vector<4x1x1xf32> to vector<4x16x16xf32>
    %336 = arith.mulf %333, %335 : vector<4x16x16xf32>
    %337 = arith.addf %332, %336 : vector<4x16x16xf32>
    %c0_208 = arith.constant 0 : index
    %c15_209 = arith.constant 15 : index
    %c6_210 = arith.constant 6 : index
    %338 = vector.load %arg10[%c0_208, %c15_209, %c6_210] : memref<4x34x34xf32, #tpu.memory_space<vmem>>, vector<4x16x16xf32>
    %339 = vector.extract_strided_slice %151 {offsets = [0, 5, 2], sizes = [4, 1, 1], strides = [1, 1, 1]} : vector<4x7x7xf32> to vector<4x1x1xf32>
    %340 = vector.broadcast %339 : vector<4x1x1xf32> to vector<4x16x16xf32>
    %341 = arith.mulf %338, %340 : vector<4x16x16xf32>
    %342 = arith.addf %337, %341 : vector<4x16x16xf32>
    %c0_211 = arith.constant 0 : index
    %c15_212 = arith.constant 15 : index
    %c9_213 = arith.constant 9 : index
    %343 = vector.load %arg10[%c0_211, %c15_212, %c9_213] : memref<4x34x34xf32, #tpu.memory_space<vmem>>, vector<4x16x16xf32>
    %344 = vector.extract_strided_slice %151 {offsets = [0, 5, 3], sizes = [4, 1, 1], strides = [1, 1, 1]} : vector<4x7x7xf32> to vector<4x1x1xf32>
    %345 = vector.broadcast %344 : vector<4x1x1xf32> to vector<4x16x16xf32>
    %346 = arith.mulf %343, %345 : vector<4x16x16xf32>
    %347 = arith.addf %342, %346 : vector<4x16x16xf32>
    %c0_214 = arith.constant 0 : index
    %c15_215 = arith.constant 15 : index
    %c12_216 = arith.constant 12 : index
    %348 = vector.load %arg10[%c0_214, %c15_215, %c12_216] : memref<4x34x34xf32, #tpu.memory_space<vmem>>, vector<4x16x16xf32>
    %349 = vector.extract_strided_slice %151 {offsets = [0, 5, 4], sizes = [4, 1, 1], strides = [1, 1, 1]} : vector<4x7x7xf32> to vector<4x1x1xf32>
    %350 = vector.broadcast %349 : vector<4x1x1xf32> to vector<4x16x16xf32>
    %351 = arith.mulf %348, %350 : vector<4x16x16xf32>
    %352 = arith.addf %347, %351 : vector<4x16x16xf32>
    %c0_217 = arith.constant 0 : index
    %c15_218 = arith.constant 15 : index
    %c15_219 = arith.constant 15 : index
    %353 = vector.load %arg10[%c0_217, %c15_218, %c15_219] : memref<4x34x34xf32, #tpu.memory_space<vmem>>, vector<4x16x16xf32>
    %354 = vector.extract_strided_slice %151 {offsets = [0, 5, 5], sizes = [4, 1, 1], strides = [1, 1, 1]} : vector<4x7x7xf32> to vector<4x1x1xf32>
    %355 = vector.broadcast %354 : vector<4x1x1xf32> to vector<4x16x16xf32>
    %356 = arith.mulf %353, %355 : vector<4x16x16xf32>
    %357 = arith.addf %352, %356 : vector<4x16x16xf32>
    %c0_220 = arith.constant 0 : index
    %c15_221 = arith.constant 15 : index
    %c18_222 = arith.constant 18 : index
    %358 = vector.load %arg10[%c0_220, %c15_221, %c18_222] : memref<4x34x34xf32, #tpu.memory_space<vmem>>, vector<4x16x16xf32>
    %359 = vector.extract_strided_slice %151 {offsets = [0, 5, 6], sizes = [4, 1, 1], strides = [1, 1, 1]} : vector<4x7x7xf32> to vector<4x1x1xf32>
    %360 = vector.broadcast %359 : vector<4x1x1xf32> to vector<4x16x16xf32>
    %361 = arith.mulf %358, %360 : vector<4x16x16xf32>
    %362 = arith.addf %357, %361 : vector<4x16x16xf32>
    %c0_223 = arith.constant 0 : index
    %c18_224 = arith.constant 18 : index
    %c0_225 = arith.constant 0 : index
    %363 = vector.load %arg10[%c0_223, %c18_224, %c0_225] : memref<4x34x34xf32, #tpu.memory_space<vmem>>, vector<4x16x16xf32>
    %364 = vector.extract_strided_slice %151 {offsets = [0, 6, 0], sizes = [4, 1, 1], strides = [1, 1, 1]} : vector<4x7x7xf32> to vector<4x1x1xf32>
    %365 = vector.broadcast %364 : vector<4x1x1xf32> to vector<4x16x16xf32>
    %366 = arith.mulf %363, %365 : vector<4x16x16xf32>
    %367 = arith.addf %362, %366 : vector<4x16x16xf32>
    %c0_226 = arith.constant 0 : index
    %c18_227 = arith.constant 18 : index
    %c3_228 = arith.constant 3 : index
    %368 = vector.load %arg10[%c0_226, %c18_227, %c3_228] : memref<4x34x34xf32, #tpu.memory_space<vmem>>, vector<4x16x16xf32>
    %369 = vector.extract_strided_slice %151 {offsets = [0, 6, 1], sizes = [4, 1, 1], strides = [1, 1, 1]} : vector<4x7x7xf32> to vector<4x1x1xf32>
    %370 = vector.broadcast %369 : vector<4x1x1xf32> to vector<4x16x16xf32>
    %371 = arith.mulf %368, %370 : vector<4x16x16xf32>
    %372 = arith.addf %367, %371 : vector<4x16x16xf32>
    %c0_229 = arith.constant 0 : index
    %c18_230 = arith.constant 18 : index
    %c6_231 = arith.constant 6 : index
    %373 = vector.load %arg10[%c0_229, %c18_230, %c6_231] : memref<4x34x34xf32, #tpu.memory_space<vmem>>, vector<4x16x16xf32>
    %374 = vector.extract_strided_slice %151 {offsets = [0, 6, 2], sizes = [4, 1, 1], strides = [1, 1, 1]} : vector<4x7x7xf32> to vector<4x1x1xf32>
    %375 = vector.broadcast %374 : vector<4x1x1xf32> to vector<4x16x16xf32>
    %376 = arith.mulf %373, %375 : vector<4x16x16xf32>
    %377 = arith.addf %372, %376 : vector<4x16x16xf32>
    %c0_232 = arith.constant 0 : index
    %c18_233 = arith.constant 18 : index
    %c9_234 = arith.constant 9 : index
    %378 = vector.load %arg10[%c0_232, %c18_233, %c9_234] : memref<4x34x34xf32, #tpu.memory_space<vmem>>, vector<4x16x16xf32>
    %379 = vector.extract_strided_slice %151 {offsets = [0, 6, 3], sizes = [4, 1, 1], strides = [1, 1, 1]} : vector<4x7x7xf32> to vector<4x1x1xf32>
    %380 = vector.broadcast %379 : vector<4x1x1xf32> to vector<4x16x16xf32>
    %381 = arith.mulf %378, %380 : vector<4x16x16xf32>
    %382 = arith.addf %377, %381 : vector<4x16x16xf32>
    %c0_235 = arith.constant 0 : index
    %c18_236 = arith.constant 18 : index
    %c12_237 = arith.constant 12 : index
    %383 = vector.load %arg10[%c0_235, %c18_236, %c12_237] : memref<4x34x34xf32, #tpu.memory_space<vmem>>, vector<4x16x16xf32>
    %384 = vector.extract_strided_slice %151 {offsets = [0, 6, 4], sizes = [4, 1, 1], strides = [1, 1, 1]} : vector<4x7x7xf32> to vector<4x1x1xf32>
    %385 = vector.broadcast %384 : vector<4x1x1xf32> to vector<4x16x16xf32>
    %386 = arith.mulf %383, %385 : vector<4x16x16xf32>
    %387 = arith.addf %382, %386 : vector<4x16x16xf32>
    %c0_238 = arith.constant 0 : index
    %c18_239 = arith.constant 18 : index
    %c15_240 = arith.constant 15 : index
    %388 = vector.load %arg10[%c0_238, %c18_239, %c15_240] : memref<4x34x34xf32, #tpu.memory_space<vmem>>, vector<4x16x16xf32>
    %389 = vector.extract_strided_slice %151 {offsets = [0, 6, 5], sizes = [4, 1, 1], strides = [1, 1, 1]} : vector<4x7x7xf32> to vector<4x1x1xf32>
    %390 = vector.broadcast %389 : vector<4x1x1xf32> to vector<4x16x16xf32>
    %391 = arith.mulf %388, %390 : vector<4x16x16xf32>
    %392 = arith.addf %387, %391 : vector<4x16x16xf32>
    %c0_241 = arith.constant 0 : index
    %c18_242 = arith.constant 18 : index
    %c18_243 = arith.constant 18 : index
    %393 = vector.load %arg10[%c0_241, %c18_242, %c18_243] : memref<4x34x34xf32, #tpu.memory_space<vmem>>, vector<4x16x16xf32>
    %394 = vector.extract_strided_slice %151 {offsets = [0, 6, 6], sizes = [4, 1, 1], strides = [1, 1, 1]} : vector<4x7x7xf32> to vector<4x1x1xf32>
    %395 = vector.broadcast %394 : vector<4x1x1xf32> to vector<4x16x16xf32>
    %396 = arith.mulf %393, %395 : vector<4x16x16xf32>
    %397 = arith.addf %392, %396 : vector<4x16x16xf32>
    %c0_244 = arith.constant 0 : index
    %c0_245 = arith.constant 0 : index
    %c0_246 = arith.constant 0 : index
    %398 = vector.load %arg5[%c0_244, %c0_245, %c0_246] : memref<4x1x1xf32, #tpu.memory_space<vmem>>, vector<4x1x1xf32>
    %399 = vector.broadcast %398 : vector<4x1x1xf32> to vector<4x16x16xf32>
    %400 = arith.addf %397, %399 : vector<4x16x16xf32>
    %cst_247 = arith.constant 5.000000e-01 : f32
    %401 = vector.broadcast %cst_247 : f32 to vector<4x16x16xf32>
    %402 = arith.mulf %401, %400 : vector<4x16x16xf32>
    %403 = arith.mulf %400, %400 : vector<4x16x16xf32>
    %404 = arith.mulf %403, %400 : vector<4x16x16xf32>
    %cst_248 = arith.constant 4.471500e-02 : f32
    %405 = vector.broadcast %cst_248 : f32 to vector<4x16x16xf32>
    %406 = arith.mulf %405, %404 : vector<4x16x16xf32>
    %407 = arith.addf %400, %406 : vector<4x16x16xf32>
    %cst_249 = arith.constant 0.797884583 : f32
    %408 = vector.broadcast %cst_249 : f32 to vector<4x16x16xf32>
    %409 = arith.mulf %408, %407 : vector<4x16x16xf32>
    %410 = math.tanh %409 : vector<4x16x16xf32>
    %cst_250 = arith.constant 1.000000e+00 : f32
    %411 = vector.broadcast %cst_250 : f32 to vector<4x16x16xf32>
    %412 = arith.addf %411, %410 : vector<4x16x16xf32>
    %413 = arith.mulf %402, %412 : vector<4x16x16xf32>
    %c0_251 = arith.constant 0 : index
    %c0_252 = arith.constant 0 : index
    %c0_253 = arith.constant 0 : index
    %414 = vector.load %arg11[%c0_251, %c0_252, %c0_253] : memref<4x16x16xf32, #tpu.memory_space<vmem>>, vector<4x16x16xf32>
    tpu.vector_store %arg11[%c0_251, %c0_252, %c0_253], %413 {strides = array<i32>} : memref<4x16x16xf32, #tpu.memory_space<vmem>>, vector<4x16x16xf32>,
    %c0_254 = arith.constant 0 : index
    %c0_255 = arith.constant 0 : index
    %c0_256 = arith.constant 0 : index
    %415 = vector.load %arg6[%c0_254, %c0_255, %c0_256] : memref<4x4x1xf32, #tpu.memory_space<vmem>>, vector<4x4x1xf32>
    %cst_257 = arith.constant 0.000000e+00 : f32
    %416 = vector.broadcast %cst_257 : f32 to vector<4x16x16xf32>
    %417 = vector.extract_strided_slice %415 {offsets = [0, 0, 0], sizes = [4, 1, 1], strides = [1, 1, 1]} : vector<4x4x1xf32> to vector<4x1x1xf32>
    %c0_258 = arith.constant 0 : index
    %c0_259 = arith.constant 0 : index
    %c0_260 = arith.constant 0 : index
    %418 = vector.load %arg11[%c0_258, %c0_259, %c0_260] : memref<4x16x16xf32, #tpu.memory_space<vmem>>, vector<1x16x16xf32>
    %419 = vector.broadcast %417 : vector<4x1x1xf32> to vector<4x16x16xf32>
    %420 = vector.broadcast %418 : vector<1x16x16xf32> to vector<4x16x16xf32>
    %421 = arith.mulf %419, %420 : vector<4x16x16xf32>
    %422 = arith.addf %416, %421 : vector<4x16x16xf32>
    %423 = vector.extract_strided_slice %415 {offsets = [0, 1, 0], sizes = [4, 1, 1], strides = [1, 1, 1]} : vector<4x4x1xf32> to vector<4x1x1xf32>
    %c1_261 = arith.constant 1 : index
    %c0_262 = arith.constant 0 : index
    %c0_263 = arith.constant 0 : index
    %424 = vector.load %arg11[%c1_261, %c0_262, %c0_263] : memref<4x16x16xf32, #tpu.memory_space<vmem>>, vector<1x16x16xf32>
    %425 = vector.broadcast %423 : vector<4x1x1xf32> to vector<4x16x16xf32>
    %426 = vector.broadcast %424 : vector<1x16x16xf32> to vector<4x16x16xf32>
    %427 = arith.mulf %425, %426 : vector<4x16x16xf32>
    %428 = arith.addf %422, %427 : vector<4x16x16xf32>
    %429 = vector.extract_strided_slice %415 {offsets = [0, 2, 0], sizes = [4, 1, 1], strides = [1, 1, 1]} : vector<4x4x1xf32> to vector<4x1x1xf32>
    %c2_264 = arith.constant 2 : index
    %c0_265 = arith.constant 0 : index
    %c0_266 = arith.constant 0 : index
    %430 = vector.load %arg11[%c2_264, %c0_265, %c0_266] : memref<4x16x16xf32, #tpu.memory_space<vmem>>, vector<1x16x16xf32>
    %431 = vector.broadcast %429 : vector<4x1x1xf32> to vector<4x16x16xf32>
    %432 = vector.broadcast %430 : vector<1x16x16xf32> to vector<4x16x16xf32>
    %433 = arith.mulf %431, %432 : vector<4x16x16xf32>
    %434 = arith.addf %428, %433 : vector<4x16x16xf32>
    %435 = vector.extract_strided_slice %415 {offsets = [0, 3, 0], sizes = [4, 1, 1], strides = [1, 1, 1]} : vector<4x4x1xf32> to vector<4x1x1xf32>
    %c3_267 = arith.constant 3 : index
    %c0_268 = arith.constant 0 : index
    %c0_269 = arith.constant 0 : index
    %436 = vector.load %arg11[%c3_267, %c0_268, %c0_269] : memref<4x16x16xf32, #tpu.memory_space<vmem>>, vector<1x16x16xf32>
    %437 = vector.broadcast %435 : vector<4x1x1xf32> to vector<4x16x16xf32>
    %438 = vector.broadcast %436 : vector<1x16x16xf32> to vector<4x16x16xf32>
    %439 = arith.mulf %437, %438 : vector<4x16x16xf32>
    %440 = arith.addf %434, %439 : vector<4x16x16xf32>
    %c0_270 = arith.constant 0 : index
    %c0_271 = arith.constant 0 : index
    %c0_272 = arith.constant 0 : index
    %441 = vector.load %arg7[%c0_270, %c0_271, %c0_272] : memref<4x1x1xf32, #tpu.memory_space<vmem>>, vector<4x1x1xf32>
    %442 = vector.broadcast %441 : vector<4x1x1xf32> to vector<4x16x16xf32>
    %443 = arith.addf %440, %442 : vector<4x16x16xf32>
    %444 = arith.mulf %1, %443 : vector<4x16x16xf32>
    %c0_273 = arith.constant 0 : index
    %c0_274 = arith.constant 0 : index
    %c0_275 = arith.constant 0 : index
    %c0_276 = arith.constant 0 : index
    %445 = vector.load %arg8[%c0_273, %c0_274, %c0_275, %c0_276] : memref<1x4x16x16xf32, #tpu.memory_space<vmem>>, vector<1x4x16x16xf32>
    %446 = vector.shape_cast %445 : vector<1x4x16x16xf32> to vector<4x16x16xf32>
    %447 = vector.shape_cast %444 : vector<4x16x16xf32> to vector<1x4x16x16xf32>
    tpu.vector_store %arg8[%c0_273, %c0_274, %c0_275, %c0_276], %447 {strides = array<i32>} : memref<1x4x16x16xf32, #tpu.memory_space<vmem>>, vector<1x4x16x16xf32>,
    return
  }
  func.func @transform_0(%arg0: i32) -> (i32, i32, i32, i32) {
    %c0_i32 = arith.constant 0 : i32
    %c0_i32_0 = arith.constant 0 : i32
    %c0_i32_1 = arith.constant 0 : i32
    %c0_i32_2 = arith.constant 0 : i32
    return %arg0, %c0_i32, %c0_i32_0, %c0_i32_1 : i32, i32, i32, i32
  }
  func.func @transform_1(%arg0: i32) -> (i32, i32, i32) {
    %c0_i32 = arith.constant 0 : i32
    %c0_i32_0 = arith.constant 0 : i32
    %c0_i32_1 = arith.constant 0 : i32
    %c0_i32_2 = arith.constant 0 : i32
    return %c0_i32, %c0_i32_0, %c0_i32_1 : i32, i32, i32
  }
  func.func @transform_2(%arg0: i32) -> (i32, i32, i32) {
    %c0_i32 = arith.constant 0 : i32
    %c0_i32_0 = arith.constant 0 : i32
    %c0_i32_1 = arith.constant 0 : i32
    %c0_i32_2 = arith.constant 0 : i32
    return %c0_i32, %c0_i32_0, %c0_i32_1 : i32, i32, i32
  }
  func.func @transform_3(%arg0: i32) -> (i32, i32, i32) {
    %c0_i32 = arith.constant 0 : i32
    %c0_i32_0 = arith.constant 0 : i32
    %c0_i32_1 = arith.constant 0 : i32
    %c0_i32_2 = arith.constant 0 : i32
    return %c0_i32, %c0_i32_0, %c0_i32_1 : i32, i32, i32
  }
  func.func @transform_4(%arg0: i32) -> (i32, i32, i32) {
    %c0_i32 = arith.constant 0 : i32
    %c0_i32_0 = arith.constant 0 : i32
    %c0_i32_1 = arith.constant 0 : i32
    %c0_i32_2 = arith.constant 0 : i32
    return %c0_i32, %c0_i32_0, %c0_i32_1 : i32, i32, i32
  }
  func.func @transform_5(%arg0: i32) -> (i32, i32, i32) {
    %c0_i32 = arith.constant 0 : i32
    %c0_i32_0 = arith.constant 0 : i32
    %c0_i32_1 = arith.constant 0 : i32
    %c0_i32_2 = arith.constant 0 : i32
    return %c0_i32, %c0_i32_0, %c0_i32_1 : i32, i32, i32
  }
  func.func @transform_6(%arg0: i32) -> (i32, i32, i32) {
    %c0_i32 = arith.constant 0 : i32
    %c0_i32_0 = arith.constant 0 : i32
    %c0_i32_1 = arith.constant 0 : i32
    %c0_i32_2 = arith.constant 0 : i32
    return %c0_i32, %c0_i32_0, %c0_i32_1 : i32, i32, i32
  }
  func.func @transform_7(%arg0: i32) -> (i32, i32, i32, i32) {
    %c0_i32 = arith.constant 0 : i32
    %c0_i32_0 = arith.constant 0 : i32
    %c0_i32_1 = arith.constant 0 : i32
    %c0_i32_2 = arith.constant 0 : i32
    return %arg0, %c0_i32, %c0_i32_0, %c0_i32_1 : i32, i32, i32, i32
  }
}

</mosaic_0001>

<bundles_post_ra>
// kernel: _lambda_.1
= control target key start
LH: loop header
LB: loop body
LE: loop exit
PB: predicated region body
PF: predicated region fallthrough
CT: control target
= control target key end

     0   :  { %s10963_s0 = inlined_call_operand.hbm [shape: f32[2,4,16,16], index: 0, kind: input, shape index: {}]   ;;  %s10964_s1 = inlined_call_operand.hbm [shape: f32[4,5,5], index: 1, kind: input, shape index: {}]   ;;  %s10965_s2 = inlined_call_operand.hbm [shape: f32[4,1,1], index: 2, kind: input, shape index: {}]   ;;  %s10966_s3 = inlined_call_operand.hbm [shape: f32[4,7,7], index: 3, kind: input, shape index: {}]   ;;  %s10967_s4 = inlined_call_operand.hbm [shape: f32[4,1,1], index: 4, kind: input, shape index: {}]   ;;  %s10968_s5 = inlined_call_operand.vmem [shape: f32[4,4,1], index: 5, kind: input, shape index: {}]   ;;  %s10969_s6 = inlined_call_operand.vmem [shape: f32[4,1,1], index: 6, kind: input, shape index: {}]   ;;  %s10970_s7 = inlined_call_operand.hbm [shape: f32[2,4,16,16], index: 7, kind: output, shape index: {}]  }
   0x1   :  { %11034 = sst [smem:[#allocation176_spill]] %s10963_s0 }
   0x2   :  { %11035 = sst [smem:[#allocation177_spill]] %s10964_s1 }
   0x3   :  { %11036 = sst [smem:[#allocation178_spill]] %s10965_s2 }
   0x4   :  { %11037 = sst [smem:[#allocation179_spill]] %s10966_s3 }
   0x5   :  { %11038 = sst [smem:[#allocation180_spill]] %s10967_s4 }
   0x6   :  { %11039 = sst [smem:[#allocation181_spill]] %s10970_s7 }
   0x7   :  { %12 = vsyncpa [#allocation6], 0 }
   0x8   :  { %14 = vsyncpa [#allocation6 + $0x1], 0 }
   0x9   :  { %15 = vsyncpa [#allocation9], 0 }
   0xa   :  { %16 = vsyncpa [#allocation12], 0 }
   0xb   :  { %17 = vsyncpa [#allocation7], 0 }
   0xc   :  { %19 = vsyncpa [#allocation7 + $0x1], 0  ;;  %s6937_s24 = smov 0   ;;  %s6939_s25 = smov 0  }
   0xd   :  { %s6941_s26 = smov 0   ;;  %s6943_s27 = smov 0  }
   0xe LB: > { %11040 = sst [smem:[#allocation19_spill]] %s6857_s24  ;;  %s6958_s28 = sadd.s32 4294967295, %s6869_s27   ;;  %s6869_s27 = sphi %s6943_s27, %s11657_s27   ;;  %s6865_s26 = sphi %s6941_s26, %s11660_s26   ;;  %s6861_s25 = sphi %s6939_s25, %s11659_s25   ;;  %s6857_s24 = sphi %s6937_s24, %s11658_s24  }
   0xf   : > { %11041 = sst [smem:[#allocation20_spill]] %s6861_s25  ;;  %s5766_s29 = sadd.s32 4294967294, %s6869_s27  }
  0x10   : > { %11042 = sst [smem:[#allocation21_spill]] %s6865_s26  ;;  %p45_p0 = scmp.ne.s32.totalorder %s6861_s25, %s6857_s24 }
  0x11   : > { %11043 = sst [smem:[#allocation22_spill]] %s6869_s27  ;;  %p10971_p1 = scmp.eq.s32.totalorder %s6958_s28, 0 }
  0x12   : > { %p201_p3 = scmp.eq.s32.totalorder %s5766_s29, 1  ;;  %p5767_p5 = scmp.ge.s32.totalorder %s6869_s27, 1 }
  0x13   : > { %p6967_p4 = por %p10971_p1, %p45_p0  ;;  %p208_p7 = scmp.lt.s32.totalorder %s6869_s27, 3 }
  0x14   : > { %p6972_p6 = por %p201_p3, %p45_p0  ;;  %s6871_s10 = smov [#allocation8]  }
  0x15   : > { %s11044_s30 = scalar_select %p6967_p4, 1, 0 }
  0x16   : > { %s11045_s8 = scalar_select %p6972_p6, 1, 0 }
  0x17   : > { %p6977_p8 = pnand %p5767_p5, %p208_p7  ;;  %s220_s11 = sshll.u32 %s6871_s10, 4  ;;  %s6981_s11 = int_to_ptr.vmem [resolvable:$true] %s220_s11 }
  0x18   : > { %11046 = sst [smem:[#allocation23_spill]] %s11045_s8  ;;  %s6872_s13 = smov [#allocation11]  }
  0x19   : > { %s11047_s9 = scalar_select %p6977_p8, 1, 0 }
  0x1a   : > { %p6446_p9 = pneg %p6977_p8  ;;  %s246_s14 = sshll.u32 %s6872_s13, 4  ;;  %s6992_s14 = int_to_ptr.vmem [resolvable:$true] %s246_s14 }
  0x1b   : > { %s6873_s15 = smov [#allocation10]   ;;  %s11049_s1 = sld [smem:[#allocation177_spill]] }
  0x1c   : > { %p6988_p11 = pnand %p6446_p9, %p10971_p1  ;;  %s6994_s16 = sshll.u32 %s6873_s15, 4  ;;  %s234_s16 = int_to_ptr.vmem [resolvable:$true] %s6994_s16 }
  0x1e   : > { %p7004_p13 = pneg %p6988_p11 }
  0x21   : > { %s6653_s19 = scalar_lea.hbm %s11049_s1, 512 }
  0x22   : > { %p6654_p12 = scmp.ne.s32.totalorder %s11049_s1, %s6653_s19  ;;  %p6660_p5 = scmp.lt.u32.totalorder %s6653_s19, %s11049_s1 }
  0x24   : > { %p6656_p0 = pnand %p7004_p13, %p6654_p12 }
  0x26   : > { %p6657_p3 = pneg %p6656_p0 }
  0x28   : > { %p6662_p7 = pnand %p6660_p5, %p6657_p3 }
  0x2a   : > { %6665 = shalt.err (!%p6662_p7)
}
  0x2b   : > { %s6666_s10 = scalar_lea.vmem %s6981_s11, 512  ;;  %p6674_p2 = scmp.lt.s32.totalorder %s6981_s11, %s6981_s11 }
  0x2c   : > { %p6667_p9 = scmp.ne.s32.totalorder %s6981_s11, %s6666_s10  ;;  %p6675_p6 = scmp.lt.s32.totalorder %s6666_s10, %s6666_s10 }
  0x2e   : > { %p6669_p10 = pnand %p6667_p9, %p7004_p13  ;;  %p6676_p12 = por %p6675_p6, %p6674_p2 }
  0x30   : > { %p6670_p1 = pneg %p6669_p10 }
  0x32   : > { %p6677_p0 = pnand %p6676_p12, %p6670_p1 }
  0x34   : > { %6680 = shalt.err (!%p6677_p0)
}
  0x35   : > { %s10975_s13 = smov 128   ;;  %s10976_s15 = smov 8  }
  0x36   : > { %6449 = dma.hbm_to_vmem [thread:$0]  (!%p6988_p11), %s11049_s1, 512, %s6981_s11, [#allocation9], %s10975_s13, %s10975_s13, %s10976_s15  }
  0x37   : > { %s11051_s3 = sld [smem:[#allocation179_spill]] }
  0x3d   : > { %s6681_s21 = scalar_lea.hbm %s11051_s3, 512 }
  0x3e   : > { %p6682_p1 = scmp.ne.s32.totalorder %s11051_s3, %s6681_s21  ;;  %p6688_p10 = scmp.lt.u32.totalorder %s6681_s21, %s11051_s3 }
  0x40   : > { %p6684_p2 = pnand %p6682_p1, %p7004_p13 }
  0x42   : > { %p6685_p6 = pneg %p6684_p2 }
  0x44   : > { %p6690_p3 = pnand %p6688_p10, %p6685_p6 }
  0x46   : > { %6693 = shalt.err (!%p6690_p3)
}
  0x47   : > { %s6694_s11 = scalar_lea.vmem %s6992_s14, 512  ;;  %p6702_p12 = scmp.lt.s32.totalorder %s6992_s14, %s6992_s14 }
  0x48   : > { %p6695_p5 = scmp.ne.s32.totalorder %s6992_s14, %s6694_s11  ;;  %p6703_p0 = scmp.lt.s32.totalorder %s6694_s11, %s6694_s11 }
  0x4a   : > { %p6697_p7 = pnand %p6695_p5, %p7004_p13  ;;  %p6704_p1 = por %p6703_p0, %p6702_p12 }
  0x4c   : > { %p6698_p9 = pneg %p6697_p7 }
  0x4e   : > { %p6705_p2 = pnand %p6704_p1, %p6698_p9 }
  0x50   : > { %6708 = shalt.err (!%p6705_p2)
}
  0x51   : > { %6455 = dma.hbm_to_vmem [thread:$0]  (!%p6988_p11), %s11051_s3, 512, %s6992_s14, [#allocation12], %s10975_s13, %s10975_s13, %s10976_s15  }
  0x52   : > { %s11052_s2 = sld [smem:[#allocation178_spill]] }
  0x58   : > { %s6709_s20 = scalar_lea.hbm %s11052_s2, 64 }
  0x59   : > { %p6710_p6 = scmp.ne.s32.totalorder %s11052_s2, %s6709_s20  ;;  %p6716_p5 = scmp.lt.u32.totalorder %s6709_s20, %s11052_s2 }
  0x5b   : > { %p6712_p10 = pnand %p6710_p6, %p7004_p13 }
  0x5d   : > { %p6713_p3 = pneg %p6712_p10 }
  0x5f   : > { %p6718_p7 = pnand %p6716_p5, %p6713_p3 }
  0x61   : > { %6721 = shalt.err (!%p6718_p7)
}
  0x62   : > { %s6722_s11 = scalar_lea.vmem %s234_s16, 64  ;;  %p6730_p1 = scmp.lt.s32.totalorder %s234_s16, %s234_s16 }
  0x63   : > { %p6723_p9 = scmp.ne.s32.totalorder %s234_s16, %s6722_s11  ;;  %p6731_p2 = scmp.lt.s32.totalorder %s6722_s11, %s6722_s11 }
  0x65   : > { %p6725_p12 = pnand %p6723_p9, %p7004_p13  ;;  %p6732_p4 = por %p6731_p2, %p6730_p1 }
  0x67   : > { %p6726_p0 = pneg %p6725_p12 }
  0x69   : > { %p6733_p8 = pnand %p6732_p4, %p6726_p0 }
  0x6b   : > { %6736 = shalt.err (!%p6733_p8)
}
  0x6c   : > { %s6876_s14 = smov 16   ;;  %s6877_s8 = smov 1  }
  0x6d   : > { %6452 = dma.hbm_to_vmem [thread:$0]  (!%p6988_p11), %s11052_s2, 64, %s234_s16, [#allocation9], %s6876_s14, %s6876_s14, %s6877_s8  }
  0x6e   : > { %s6878_s19 = smov [#allocation13]   ;;  %s11053_s4 = sld [smem:[#allocation180_spill]] }
  0x6f   : > { %s259_s20 = sshll.u32 %s6878_s19, 4  ;;  %s260_s20 = int_to_ptr.vmem [resolvable:$true] %s259_s20 }
  0x74   : > { %s6737_s29 = scalar_lea.hbm %s11053_s4, 64 }
  0x75   : > { %p6738_p4 = scmp.ne.s32.totalorder %s11053_s4, %s6737_s29  ;;  %p6744_p10 = scmp.lt.u32.totalorder %s6737_s29, %s11053_s4 }
  0x77   : > { %p6740_p8 = pnand %p6738_p4, %p7004_p13 }
  0x79   : > { %p6741_p6 = pneg %p6740_p8 }
  0x7b   : > { %p6746_p3 = pnand %p6744_p10, %p6741_p6 }
  0x7d   : > { %6749 = shalt.err (!%p6746_p3)
}
  0x7e   : > { %s6750_s16 = scalar_lea.vmem %s260_s20, 64  ;;  %p6758_p12 = scmp.lt.s32.totalorder %s260_s20, %s260_s20 }
  0x7f   : > { %p6751_p5 = scmp.ne.s32.totalorder %s260_s20, %s6750_s16  ;;  %p6759_p0 = scmp.lt.s32.totalorder %s6750_s16, %s6750_s16 }
  0x81   : > { %p6753_p7 = pnand %p6751_p5, %p7004_p13  ;;  %p6760_p1 = por %p6759_p0, %p6758_p12 }
  0x83   : > { %p6754_p9 = pneg %p6753_p7 }
  0x85   : > { %p6761_p2 = pnand %p6760_p1, %p6754_p9 }
  0x87   : > { %6764 = shalt.err (!%p6761_p2)
}
  0x88   : > { %6458 = dma.hbm_to_vmem [thread:$0]  (!%p6988_p11), %s11053_s4, 64, %s260_s20, [#allocation12], %s6876_s14, %s6876_s14, %s6877_s8  }
  0x89   : > { %s7092_s22 = sadd.s32 1, %s6869_s27   ;;  %s32_s13 = sadd.s32 1, %s6865_s26 }
  0x8a   : > { %11054 = sst [smem:[#allocation24_spill]] %s7092_s22  ;;  %s29_s12 = ssub.s32 %s6869_s27, %s7092_s22 }
  0x8b   : > { %p39_p13 = scmp.ne.s32.totalorder %s6865_s26, %s6861_s25  ;;  %p30_p4 = scmp.eq.s32.totalorder %s29_s12, 0 }
  0x8c   : > { %p40_p8 = scmp.eq.s32.totalorder %s6869_s27, 0  ;;  %p11055_p6 = scmp.eq.s32.totalorder %s6958_s28, 1 }
  0x8d   : > { %p6471_p3 = scmp.lt.s32.totalorder %s6869_s27, 2  ;;  %s279_s21 = sand.u32 1, %s6865_s26  }
  0x8e   : > { %p7102_p10 = por %p11055_p6, %p39_p13  ;;  %p41_p5 = por %p40_p8, %p39_p13 }
  0x8f   : > { %s7108_s19 = scalar_select %p30_p4, %s6865_s26, %s32_s13  }
  0x90   : > { %s11056_s15 = scalar_select %p7102_p10, 1, 0 }
  0x91   : > { %11058 = sst [smem:[#allocation26_spill]] %s7108_s19  ;;  %s5773_s23 = sshll.u32 %s279_s21, 6 }
  0x92   : > { %11057 = sst [smem:[#allocation25_spill]] %s11056_s15  ;;  %s5800_s14 = sshll.u32 %s6869_s27, 10 }
  0x93   : > { %s11059_s0 = sld [smem:[#allocation176_spill]]  ;;  %s283_s10 = scalar_lea.vmem [#allocation5], %s5773_s23 }
  0x94   : > { %s290_s11 = sshll.u32 %s283_s10, 4  ;;  %p7119_p11 = pnand %p6471_p3, %p41_p5  ;;  %s7117_s11 = int_to_ptr.vmem [resolvable:$true] %s290_s11 }
  0x95   : > { %s7123_s17 = scalar_lea.sflag [#allocation6], %s279_s21 }
  0x96   : > { %p6767_p9 = pneg %p7119_p11 }
  0x99   : > { %s7115_s29 = scalar_lea.hbm %s11059_s0, %s5800_s14  ;;  %s6770_s23 = scalar_lea.hbm %s11059_s0, 2048 }
  0x9a   : > { %s6765_s18 = scalar_lea.hbm %s7115_s29, 1024  ;;  %p6771_p1 = scmp.lt.u32.totalorder %s7115_s29, %s11059_s0 }
  0x9b   : > { %p6766_p7 = scmp.ne.s32.totalorder %s7115_s29, %s6765_s18  ;;  %p6772_p2 = scmp.lt.u32.totalorder %s6770_s23, %s6765_s18 }
  0x9c   : > { %p6774_p4 = scmp.lt.u32.totalorder %s6765_s18, %s7115_s29 }
  0x9d   : > { %p6768_p12 = pnand %p6767_p9, %p6766_p7  ;;  %p6773_p13 = por %p6772_p2, %p6771_p1 }
  0x9f   : > { %p6769_p0 = pneg %p6768_p12  ;;  %p6775_p8 = por %p6774_p4, %p6773_p13 }
  0xa1   : > { %p6776_p6 = pnand %p6775_p8, %p6769_p0 }
  0xa3   : > { %6779 = shalt.err (!%p6776_p6)
}
  0xa4   : > { %s6780_s21 = scalar_lea.vmem %s7117_s11, 1024  ;;  %s6879_s20 = smov [#allocation5]  }
  0xa5   : > { %p6781_p3 = scmp.ne.s32.totalorder %s7117_s11, %s6780_s21  ;;  %s6785_s10 = sshll.u32 %s6879_s20, 4  ;;  %s6786_s10 = int_to_ptr.vmem [resolvable:$false] %s6785_s10 }
  0xa6   : > { %s6787_s13 = scalar_lea.vmem %s6786_s10, 2048  ;;  %p6788_p12 = scmp.lt.s32.totalorder %s7117_s11, %s6786_s10 }
  0xa7   : > { %p6783_p5 = pnand %p6781_p3, %p6767_p9  ;;  %p6789_p1 = scmp.lt.s32.totalorder %s6787_s13, %s6780_s21 }
  0xa9   : > { %p6784_p7 = pneg %p6783_p5  ;;  %p6790_p2 = por %p6789_p1, %p6788_p12 }
  0xab   : > { %p6791_p13 = pnand %p6790_p2, %p6784_p7 }
  0xad   : > { %6794 = shalt.err (!%p6791_p13)
}
  0xae   : > { %s11061_s18 = smov 8   ;;  %s11062_s12 = smov 128  }
  0xaf   : > { %6462 = dma.hbm_to_vmem [thread:$0]  (!%p7119_p11), %s7115_s29, 1024, %s7117_s11, %s7123_s17, %s11062_s12, %s11062_s12, %s11061_s18  }
  0xb0   : > { %p11063_p9 = scmp.ne.s32.totalorder %s11047_s9, 0 }
  0xb2   : > { %302 = sbr.rel (%p11063_p9) target bundleno = 9793 (0x2641), region = 48 }
  0xb9   : > { %s7157_s23 = sand.u32 1, %s6861_s25   ;;  %p11066_p0 = scmp.ne.s32.totalorder %s11044_s30, 0 }
  0xba   : > { %11064 = sst [smem:[#allocation27_spill]] %s7157_s23  ;;  %s10977_s14 = sshll.u32 %s7157_s23, 6 }
  0xbb   : > { %s305_s8 = scalar_lea.sflag [#allocation6], %s7157_s23  ;;  %s7163_s16 = scalar_lea.vmem [#allocation5], %s10977_s14 }
  0xbc   : > { %11065 = sst [smem:[#allocation28_spill]] %s7163_s16 }
  0xbd   : > { %6840 = dma.done.wait (%p11066_p0), %s305_s8, 1024  }
  0xbe   : > { %6842 = vsyncadd (%p11066_p0), %s305_s8, 4294966272  ;;  %p11067_p11 = scmp.eq.s32.totalorder %s6958_s28, 0 }
  0xc0   : > { %6844 = dma.done.wait (%p11067_p11), [#allocation9], 576   ;;  %p11068_p4 = pmov %p11067_p11 }
  0xc2   : > { %6846 = vsyncadd (%p11068_p4), [#allocation9], 4294966720  ;;  %p11069_p8 = pmov %p11068_p4 }
  0xc3   : > { %p11070_p6 = pmov %p11068_p4 }
  0xc4   : > { %6848 = dma.done.wait (%p11069_p8), [#allocation12], 576  }
  0xc5   : > { %6850 = vsyncadd (%p11070_p6), [#allocation12], 4294966720  ;;  %vm363_vm0 = vcmask 162816   ;;  %v10986_v0 = vmov 0.0   ;;  %vm366_vm1 = vcmask 158720   ;;  %v357_v1 = vld [vmem:[%s7163_s16 + $0x10] sm:$0xff] }
  0xc6   : > { %368 = vst.msk [vmem:[#allocation2 + $0x18] sm:$0xff] %vm363_vm0, %v10986_v0  ;;  %369 = vst.msk [vmem:[#allocation2 + $0x20] sm:$0xff] %vm363_vm0, %v10986_v0  ;;  %v355_v2 = vld [vmem:[%s7163_s16] sm:$0xff]  ;;  %s6881_s30 = smov 2   ;;  %v358_v3 = vld [vmem:[%s7163_s16 + $0x18] sm:$0xff]  ;;  %s10984_s9 = smov 127  }
  0xc7   : > { %364 = vst.msk [vmem:[#allocation2] sm:$0xff] %vm363_vm0, %v10986_v0  ;;  %365 = vst.msk [vmem:[#allocation2 + $0x8] sm:$0xff] %vm363_vm0, %v10986_v0  ;;  %389 = vrot.lane.b32.xlu1 %v357_v1, %s6881_s30  ;;  %385 = vrot.lane.b32.xlu0 %v355_v2, %s6881_s30  ;;  %v356_v4 = vld [vmem:[%s7163_s16 + $0x8] sm:$0xff]  ;;  %v7193_v5 = vld [vmem:[#allocation8] sm:$0x1f]  ;;  %s10980_s29 = smov 126  }
  0xc8   : > { %371 = vst.msk [vmem:[#allocation2 + $0x30] sm:$0xff] %vm363_vm0, %v10986_v0  ;;  %372 = vst.msk [vmem:[#allocation2 + $0x38] sm:$0xff] %vm363_vm0, %v10986_v0  ;;  %v7195_v6 = vld [vmem:[#allocation8 + $0x8] sm:$0x1f]  ;;  %v7198_v7 = vld [vmem:[#allocation8 + $0x10] sm:$0x1f] }
  0xc9   : > { %374 = vst.msk [vmem:[#allocation2 + $0x48] sm:$0xff] %vm363_vm0, %v10986_v0  ;;  %375 = vst.msk [vmem:[#allocation2 + $0x50] sm:$0xff] %vm363_vm0, %v10986_v0  ;;  %v360_v8 = vld [vmem:[%s7163_s16 + $0x28] sm:$0xff]  ;;  %v359_v9 = vld [vmem:[%s7163_s16 + $0x20] sm:$0xff]  ;;  %s10978_s11 = smov 125   ;;  %s10982_s17 = smov 124  }
  0xca   : > { %370 = vst.msk [vmem:[#allocation2 + $0x28] sm:$0xf] %vm366_vm1, %v10986_v0  ;;  %367 = vst.msk [vmem:[#allocation2 + $0x10] sm:$0xf] %vm366_vm1, %v10986_v0  ;;  %v7203_v10 = vld [vmem:[#allocation8 + $0x18] sm:$0x1f] }
  0xcb   : > { %373 = vst.msk [vmem:[#allocation2 + $0x40] sm:$0xf] %vm366_vm1, %v10986_v0  ;;  %376 = vst.msk [vmem:[#allocation2 + $0x58] sm:$0xf] %vm366_vm1, %v10986_v0  ;;  %391 = vrot.lane.b32.xlu1 %v358_v3, %s6881_s30  ;;  %387 = vrot.lane.b32.xlu0 %v356_v4, %s6881_s30  ;;  %v362_v11 = vld [vmem:[%s7163_s16 + $0x38] sm:$0xff]  ;;  %v361_v12 = vld [vmem:[%s7163_s16 + $0x30] sm:$0xff] }
  0xcc   : > { %5802 = vpush %v7193_v5  ;;  %v7242_v13 = vrot.slane %v7195_v6, 1  ;;  %v7245_v14 = vrot.slane %v7193_v5, 1  ;;  %v7252_v15 = vrot.slane %v7203_v10, 1  ;;  %v7255_v16 = vrot.slane %v7198_v7, 1 }
  0xcd   : > { %5804 = vpush %v7195_v6  ;;  %vm409_vm2 = vcmask 146448   ;;  %vm2102_vm3 = vcmask 277504   ;;  %vm2156_vm4 = vcmask 203848   ;;  %vm2107_vm5 = vcmask 271360  }
  0xce   : > { %5806 = vpush %v7198_v7  ;;  %vm5425_vm6 = vcmask 130048  }
  0xcf   : > { %5808 = vpush %v7203_v10  ;;  %395 = vrot.lane.b32.xlu1 %v360_v8, %s6881_s30  ;;  %393 = vrot.lane.b32.xlu0 %v359_v9, %s6881_s30 }
  0xd3   : > { %399 = vrot.lane.b32.xlu1 %v362_v11, %s6881_s30  ;;  %397 = vrot.lane.b32.xlu0 %v361_v12, %s6881_s30 }
  0xd7   : > { %464 = vrot.lane.b32.xlu1 %v7195_v6, %s10984_s9  ;;  %462 = vrot.lane.b32.xlu0 %v7193_v5, %s10984_s9 }
  0xdb   : > { %468 = vrot.lane.b32.xlu1 %v7203_v10, %s10984_s9  ;;  %466 = vrot.lane.b32.xlu0 %v7198_v7, %s10984_s9 }
  0xdf   : > { %532 = vrot.lane.b32.xlu1 %v7195_v6, %s10980_s29  ;;  %530 = vrot.lane.b32.xlu0 %v7193_v5, %s10980_s29 }
  0xe3   : > { %536 = vrot.lane.b32.xlu1 %v7203_v10, %s10980_s29  ;;  %534 = vrot.lane.b32.xlu0 %v7198_v7, %s10980_s29 }
  0xe7   : > { %600 = vrot.lane.b32.xlu1 %v7195_v6, %s10978_s11  ;;  %598 = vrot.lane.b32.xlu0 %v7193_v5, %s10978_s11 }
  0xeb   : > { %604 = vrot.lane.b32.xlu1 %v7203_v10, %s10978_s11  ;;  %602 = vrot.lane.b32.xlu0 %v7198_v7, %s10978_s11 }
  0xef   : > { %668 = vrot.lane.b32.xlu1 %v7195_v6, %s10982_s17  ;;  %666 = vrot.lane.b32.xlu0 %v7193_v5, %s10982_s17 }
  0xf3   : > { %672 = vrot.lane.b32.xlu1 %v7203_v10, %s10982_s17  ;;  %670 = vrot.lane.b32.xlu0 %v7198_v7, %s10982_s17 }
  0xf7   : > { %776 = vrot.lane.b32.xlu1 %v7242_v13, %s10984_s9  ;;  %774 = vrot.lane.b32.xlu0 %v7245_v14, %s10984_s9 }
  0xfb   : > { %780 = vrot.lane.b32.xlu1 %v7252_v15, %s10984_s9  ;;  %778 = vrot.lane.b32.xlu0 %v7255_v16, %s10984_s9 }
  0xfd   : > { %s7289_s21 = spop %5802 }
  0xfe   : > { %s7291_s20 = spop %5804 }
  0xff   : > { %844 = vrot.lane.b32.xlu1 %v7242_v13, %s10980_s29  ;;  %842 = vrot.lane.b32.xlu0 %v7245_v14, %s10980_s29  ;;  %s7293_s10 = spop %5806 }
 0x100   : > { %s7295_s13 = spop %5808 }
 0x103   : > { %848 = vrot.lane.b32.xlu1 %v7252_v15, %s10980_s29  ;;  %846 = vrot.lane.b32.xlu0 %v7255_v16, %s10980_s29 }
 0x107   : > { %912 = vrot.lane.b32.xlu1 %v7242_v13, %s10978_s11  ;;  %910 = vrot.lane.b32.xlu0 %v7245_v14, %s10978_s11 }
 0x10b   : > { %916 = vrot.lane.b32.xlu1 %v7252_v15, %s10978_s11  ;;  %914 = vrot.lane.b32.xlu0 %v7255_v16, %s10978_s11 }
 0x139   : > { %v390_v17 = vpop.permute.xlu1 %389  ;;  %v386_v18 = vpop.permute.xlu0 %385 }
 0x13a   : > { %412 = vst.msk [vmem:[#allocation2 + $0x1a] sm:$0xff] %vm409_vm2, %v390_v17  ;;  %410 = vst.msk [vmem:[#allocation2 + $0x2] sm:$0xff] %vm409_vm2, %v386_v18 }
 0x13d   : > { %v392_v19 = vpop.permute.xlu1 %391  ;;  %v388_v20 = vpop.permute.xlu0 %387 }
 0x13e   : > { %413 = vst.msk [vmem:[#allocation2 + $0x22] sm:$0xff] %vm409_vm2, %v392_v19  ;;  %411 = vst.msk [vmem:[#allocation2 + $0xa] sm:$0xff] %vm409_vm2, %v388_v20 }
 0x141   : > { %v396_v21 = vpop.permute.xlu1 %395  ;;  %v394_v22 = vpop.permute.xlu0 %393  ;;  %v7297_v51 = vld [vmem:[#allocation2] sm:$0xff]  ;;  %v7305_v59 = vld [vmem:[#allocation2 + $0x18] sm:$0xff] }
 0x142   : > { %415 = vst.msk [vmem:[#allocation2 + $0x3a] sm:$0xff] %vm409_vm2, %v396_v21  ;;  %414 = vst.msk [vmem:[#allocation2 + $0x32] sm:$0xff] %vm409_vm2, %v394_v22 }
 0x145   : > { %v400_v23 = vpop.permute.xlu1 %399  ;;  %v398_v24 = vpop.permute.xlu0 %397  ;;  %v7299_v52 = vld [vmem:[#allocation2 + $0x8] sm:$0xff]  ;;  %v7307_v60 = vld [vmem:[#allocation2 + $0x20] sm:$0xff] }
 0x146   : > { %417 = vst.msk [vmem:[#allocation2 + $0x52] sm:$0xff] %vm409_vm2, %v400_v23  ;;  %416 = vst.msk [vmem:[#allocation2 + $0x4a] sm:$0xff] %vm409_vm2, %v398_v24 }
 0x149   : > { %v465_v25 = vpop.permute.xlu1 %464  ;;  %v463_v26 = vpop.permute.xlu0 %462  ;;  %v7313_v1 = vld [vmem:[#allocation2 + $0x30] sm:$0xff]  ;;  %v7315_v2 = vld [vmem:[#allocation2 + $0x38] sm:$0xff] }
 0x14a   : > { %5810 = vpush %v463_v26 }
 0x14b   : > { %5812 = vpush %v465_v25 }
 0x14d   : > { %v469_v27 = vpop.permute.xlu1 %468  ;;  %v467_v28 = vpop.permute.xlu0 %466  ;;  %v7321_v9 = vld [vmem:[#allocation2 + $0x48] sm:$0xff]  ;;  %v7323_v11 = vld [vmem:[#allocation2 + $0x50] sm:$0xff] }
 0x14e   : > { %5814 = vpush %v467_v28 }
 0x14f   : > { %5816 = vpush %v469_v27 }
 0x151   : > { %v533_v29 = vpop.permute.xlu1 %532  ;;  %v531_v30 = vpop.permute.xlu0 %530 }
 0x152   : > { %5818 = vpush %v531_v30 }
 0x153   : > { %5820 = vpush %v533_v29 }
 0x155   : > { %v537_v31 = vpop.permute.xlu1 %536  ;;  %v535_v32 = vpop.permute.xlu0 %534 }
 0x156   : > { %5822 = vpush %v535_v32 }
 0x157   : > { %5824 = vpush %v537_v31 }
 0x159   : > { %v601_v33 = vpop.permute.xlu1 %600  ;;  %v599_v34 = vpop.permute.xlu0 %598 }
 0x15a   : > { %5826 = vpush %v599_v34 }
 0x15b   : > { %5828 = vpush %v601_v33 }
 0x15d   : > { %v605_v35 = vpop.permute.xlu1 %604  ;;  %v603_v36 = vpop.permute.xlu0 %602 }
 0x15e   : > { %5830 = vpush %v603_v36 }
 0x15f   : > { %5832 = vpush %v605_v35 }
 0x161   : > { %v669_v37 = vpop.permute.xlu1 %668  ;;  %v667_v38 = vpop.permute.xlu0 %666 }
 0x162   : > { %5834 = vpush %v667_v38 }
 0x163   : > { %5836 = vpush %v669_v37 }
 0x165   : > { %v673_v39 = vpop.permute.xlu1 %672  ;;  %v671_v40 = vpop.permute.xlu0 %670 }
 0x166   : > { %5838 = vpush %v671_v40 }
 0x167   : > { %5840 = vpush %v673_v39 }
 0x168   : > { %5842 = vpush %v7245_v14 }
 0x169   : > { %5844 = vpush %v7242_v13  ;;  %v777_v41 = vpop.permute.xlu1 %776  ;;  %v775_v42 = vpop.permute.xlu0 %774 }
 0x16a   : > { %5846 = vpush %v7255_v16 }
 0x16b   : > { %5848 = vpush %v7252_v15 }
 0x16c   : > { %5850 = vpush %v775_v42 }
 0x16d   : > { %5852 = vpush %v777_v41  ;;  %v781_v43 = vpop.permute.xlu1 %780  ;;  %v779_v44 = vpop.permute.xlu0 %778 }
 0x16e   : > { %5854 = vpush %v779_v44 }
 0x16f   : > { %5856 = vpush %v781_v43 }
 0x171   : > { %v845_v45 = vpop.permute.xlu1 %844  ;;  %v843_v46 = vpop.permute.xlu0 %842 }
 0x172   : > { %5858 = vpush %v843_v46 }
 0x173   : > { %5860 = vpush %v845_v45 }
 0x175   : > { %v849_v47 = vpop.permute.xlu1 %848  ;;  %v847_v48 = vpop.permute.xlu0 %846 }
 0x176   : > { %5862 = vpush %v847_v48 }
 0x177   : > { %5864 = vpush %v849_v47 }
 0x179   : > { %v913_v49 = vpop.permute.xlu1 %912  ;;  %v911_v50 = vpop.permute.xlu0 %910 }
 0x17a   : > { %5866 = vpush %v911_v50 }
 0x17b   : > { %5868 = vpush %v913_v49  ;;  %s5811_s18 = spop %5810 }
 0x17c   : > { %v471_v53 = vstv %s5811_s18  ;;  %s5813_s12 = spop %5812 }
 0x17d   : > { %v482_v54 = vmul.f32 %v471_v53, %v7297_v51  ;;  %v483_v55 = vmul.f32 %v471_v53, %v7299_v52  ;;  %v917_v56 = vpop.permute.xlu1 %916  ;;  %v915_v57 = vpop.permute.xlu0 %914  ;;  %v474_v58 = vstv %s5813_s12 }
 0x17e   : > { %5870 = vpush %v915_v57  ;;  %v484_v61 = vmul.f32 %v474_v58, %v7305_v59  ;;  %v485_v62 = vmul.f32 %v474_v58, %v7307_v60 }
 0x17f   : > { %5872 = vpush %v917_v56  ;;  %500 = vrot.lane.b32.xlu1 %v483_v55, %s10984_s9  ;;  %498 = vrot.lane.b32.xlu0 %v482_v54, %s10984_s9  ;;  %s5815_s8 = spop %5814  ;;  %v7385_v55 = vld [vmem:[#allocation2 + $0x1] sm:$0xff]  ;;  %v7387_v56 = vld [vmem:[#allocation2 + $0x9] sm:$0xff] }
 0x180   : > { %v477_v63 = vstv %s5815_s8  ;;  %s5817_s30 = spop %5816 }
 0x181   : > { %v486_v3 = vmul.f32 %v477_v63, %v7313_v1  ;;  %v487_v4 = vmul.f32 %v477_v63, %v7315_v2  ;;  %v480_v8 = vstv %s5817_s30 }
 0x182   : > { %v488_v12 = vmul.f32 %v480_v8, %v7321_v9  ;;  %v489_v17 = vmul.f32 %v480_v8, %v7323_v11 }
 0x183   : > { %504 = vrot.lane.b32.xlu1 %v485_v62, %s10984_s9  ;;  %502 = vrot.lane.b32.xlu0 %v484_v61, %s10984_s9  ;;  %s5819_s18 = spop %5818  ;;  %v7395_v61 = vld [vmem:[#allocation2 + $0x21] sm:$0xff] }
 0x184   : > { %v539_v18 = vstv %s5819_s18  ;;  %s5821_s12 = spop %5820 }
 0x185   : > { %v550_v19 = vmul.f32 %v539_v18, %v7297_v51  ;;  %v551_v20 = vmul.f32 %v539_v18, %v7299_v52  ;;  %v542_v21 = vstv %s5821_s12 }
 0x186   : > { %v552_v22 = vmul.f32 %v542_v21, %v7305_v59  ;;  %v553_v23 = vmul.f32 %v542_v21, %v7307_v60 }
 0x187   : > { %508 = vrot.lane.b32.xlu1 %v487_v4, %s10984_s9  ;;  %506 = vrot.lane.b32.xlu0 %v486_v3, %s10984_s9  ;;  %s5823_s8 = spop %5822  ;;  %v7403_v3 = vld [vmem:[#allocation2 + $0x39] sm:$0xff] }
 0x188   : > { %v545_v24 = vstv %s5823_s8  ;;  %s5825_s30 = spop %5824 }
 0x189   : > { %v554_v25 = vmul.f32 %v545_v24, %v7313_v1  ;;  %v555_v26 = vmul.f32 %v545_v24, %v7315_v2  ;;  %v548_v27 = vstv %s5825_s30 }
 0x18a   : > { %v556_v28 = vmul.f32 %v548_v27, %v7321_v9  ;;  %v557_v29 = vmul.f32 %v548_v27, %v7323_v11 }
 0x18b   : > { %512 = vrot.lane.b32.xlu1 %v489_v17, %s10984_s9  ;;  %510 = vrot.lane.b32.xlu0 %v488_v12, %s10984_s9  ;;  %s5827_s18 = spop %5826  ;;  %v7411_v12 = vld [vmem:[#allocation2 + $0x51] sm:$0xff] }
 0x18c   : > { %v607_v30 = vstv %s5827_s18  ;;  %s5829_s12 = spop %5828 }
 0x18d   : > { %v618_v31 = vmul.f32 %v607_v30, %v7297_v51  ;;  %v619_v32 = vmul.f32 %v607_v30, %v7299_v52  ;;  %v610_v33 = vstv %s5829_s12 }
 0x18e   : > { %v620_v34 = vmul.f32 %v610_v33, %v7305_v59  ;;  %v621_v35 = vmul.f32 %v610_v33, %v7307_v60 }
 0x18f   : > { %568 = vrot.lane.b32.xlu1 %v551_v20, %s10980_s29  ;;  %566 = vrot.lane.b32.xlu0 %v550_v19, %s10980_s29  ;;  %s5831_s8 = spop %5830 }
 0x190   : > { %v613_v36 = vstv %s5831_s8  ;;  %s5833_s30 = spop %5832 }
 0x191   : > { %v622_v37 = vmul.f32 %v613_v36, %v7313_v1  ;;  %v623_v38 = vmul.f32 %v613_v36, %v7315_v2  ;;  %v616_v39 = vstv %s5833_s30 }
 0x192   : > { %v624_v40 = vmul.f32 %v616_v39, %v7321_v9  ;;  %v625_v41 = vmul.f32 %v616_v39, %v7323_v11 }
 0x193   : > { %572 = vrot.lane.b32.xlu1 %v553_v23, %s10980_s29  ;;  %570 = vrot.lane.b32.xlu0 %v552_v22, %s10980_s29  ;;  %s5835_s18 = spop %5834 }
 0x194   : > { %v675_v42 = vstv %s5835_s18  ;;  %s5837_s12 = spop %5836 }
 0x195   : > { %v686_v43 = vmul.f32 %v675_v42, %v7297_v51  ;;  %v687_v44 = vmul.f32 %v675_v42, %v7299_v52  ;;  %v678_v45 = vstv %s5837_s12 }
 0x196   : > { %v688_v46 = vmul.f32 %v678_v45, %v7305_v59  ;;  %v689_v47 = vmul.f32 %v678_v45, %v7307_v60  ;;  %v7393_v60 = vld [vmem:[#allocation2 + $0x19] sm:$0xff] }
 0x197   : > { %576 = vrot.lane.b32.xlu1 %v555_v26, %s10980_s29  ;;  %574 = vrot.lane.b32.xlu0 %v554_v25, %s10980_s29  ;;  %s5839_s8 = spop %5838 }
 0x198   : > { %s5841_s30 = spop %5840  ;;  %v681_v48 = vstv %s5839_s8 }
 0x199   : > { %s7365_s14 = spop %5842  ;;  %v690_v49 = vmul.f32 %v681_v48, %v7313_v1  ;;  %v691_v50 = vmul.f32 %v681_v48, %v7315_v2  ;;  %v684_v51 = vstv %s5841_s30  ;;  %v7401_v2 = vld [vmem:[#allocation2 + $0x31] sm:$0xff] }
 0x19a   : > { %s7369_s18 = spop %5844  ;;  %v692_v52 = vmul.f32 %v684_v51, %v7321_v9  ;;  %v693_v53 = vmul.f32 %v684_v51, %v7323_v11  ;;  %v7409_v11 = vld [vmem:[#allocation2 + $0x49] sm:$0xff] }
 0x19b   : > { %580 = vrot.lane.b32.xlu1 %v557_v29, %s10980_s29  ;;  %578 = vrot.lane.b32.xlu0 %v556_v28, %s10980_s29 }
 0x19f   : > { %636 = vrot.lane.b32.xlu1 %v619_v32, %s10978_s11  ;;  %634 = vrot.lane.b32.xlu0 %v618_v31, %s10978_s11 }
 0x1a3   : > { %640 = vrot.lane.b32.xlu1 %v621_v35, %s10978_s11  ;;  %638 = vrot.lane.b32.xlu0 %v620_v34, %s10978_s11 }
 0x1a7   : > { %644 = vrot.lane.b32.xlu1 %v623_v38, %s10978_s11  ;;  %642 = vrot.lane.b32.xlu0 %v622_v37, %s10978_s11 }
 0x1ab   : > { %648 = vrot.lane.b32.xlu1 %v625_v41, %s10978_s11  ;;  %646 = vrot.lane.b32.xlu0 %v624_v40, %s10978_s11  ;;  %s7373_s11 = spop %5846 }
 0x1ac   : > { %s7377_s12 = spop %5848 }
 0x1ad   : > { %s5851_s29 = spop %5850 }
 0x1ae   : > { %v783_v54 = vstv %s5851_s29  ;;  %s5853_s8 = spop %5852 }
 0x1af   : > { %704 = vrot.lane.b32.xlu1 %v687_v44, %s10982_s17  ;;  %702 = vrot.lane.b32.xlu0 %v686_v43, %s10982_s17  ;;  %v794_v57 = vmul.f32 %v783_v54, %v7385_v55  ;;  %v795_v58 = vmul.f32 %v783_v54, %v7387_v56  ;;  %v786_v59 = vstv %s5853_s8  ;;  %s5855_s30 = spop %5854 }
 0x1b0   : > { %v796_v62 = vmul.f32 %v786_v59, %v7393_v60  ;;  %v797_v63 = vmul.f32 %v786_v59, %v7395_v61  ;;  %v789_v1 = vstv %s5855_s30  ;;  %s5857_s29 = spop %5856 }
 0x1b1   : > { %v798_v4 = vmul.f32 %v789_v1, %v7401_v2  ;;  %v799_v8 = vmul.f32 %v789_v1, %v7403_v3  ;;  %v792_v9 = vstv %s5857_s29  ;;  %s5859_s8 = spop %5858 }
 0x1b2   : > { %v800_v17 = vmul.f32 %v792_v9, %v7409_v11  ;;  %v801_v18 = vmul.f32 %v792_v9, %v7411_v12  ;;  %v851_v19 = vstv %s5859_s8  ;;  %s5861_s30 = spop %5860 }
 0x1b3   : > { %708 = vrot.lane.b32.xlu1 %v689_v47, %s10982_s17  ;;  %706 = vrot.lane.b32.xlu0 %v688_v46, %s10982_s17  ;;  %v862_v20 = vmul.f32 %v851_v19, %v7385_v55  ;;  %v863_v21 = vmul.f32 %v851_v19, %v7387_v56  ;;  %v854_v22 = vstv %s5861_s30  ;;  %s5863_s29 = spop %5862 }
 0x1b4   : > { %v864_v23 = vmul.f32 %v854_v22, %v7393_v60  ;;  %v865_v24 = vmul.f32 %v854_v22, %v7395_v61  ;;  %v857_v25 = vstv %s5863_s29  ;;  %s5865_s8 = spop %5864 }
 0x1b5   : > { %v866_v26 = vmul.f32 %v857_v25, %v7401_v2  ;;  %v867_v27 = vmul.f32 %v857_v25, %v7403_v3  ;;  %v860_v28 = vstv %s5865_s8  ;;  %s5867_s30 = spop %5866 }
 0x1b6   : > { %v868_v29 = vmul.f32 %v860_v28, %v7409_v11  ;;  %v869_v30 = vmul.f32 %v860_v28, %v7411_v12  ;;  %v919_v31 = vstv %s5867_s30  ;;  %s5869_s29 = spop %5868 }
 0x1b7   : > { %712 = vrot.lane.b32.xlu1 %v691_v50, %s10982_s17  ;;  %710 = vrot.lane.b32.xlu0 %v690_v49, %s10982_s17  ;;  %v930_v32 = vmul.f32 %v919_v31, %v7385_v55  ;;  %v931_v33 = vmul.f32 %v919_v31, %v7387_v56  ;;  %v922_v34 = vstv %s5869_s29  ;;  %s5871_s8 = spop %5870  ;;  %s11073_s29 = smov 124  }
 0x1b8   : > { %v932_v35 = vmul.f32 %v922_v34, %v7393_v60  ;;  %v933_v36 = vmul.f32 %v922_v34, %v7395_v61  ;;  %v925_v37 = vstv %s5871_s8  ;;  %s5873_s30 = spop %5872 }
 0x1b9   : > { %v934_v38 = vmul.f32 %v925_v37, %v7401_v2  ;;  %v935_v39 = vmul.f32 %v925_v37, %v7403_v3  ;;  %v928_v40 = vstv %s5873_s30 }
 0x1ba   : > { %v936_v41 = vmul.f32 %v928_v40, %v7409_v11  ;;  %v937_v42 = vmul.f32 %v928_v40, %v7411_v12 }
 0x1bb   : > { %716 = vrot.lane.b32.xlu1 %v693_v53, %s10982_s17  ;;  %714 = vrot.lane.b32.xlu0 %v692_v52, %s10982_s17  ;;  %s11071_s17 = smov 126  }
 0x1bf   : > { %812 = vrot.lane.b32.xlu1 %v795_v58, %s10984_s9  ;;  %810 = vrot.lane.b32.xlu0 %v794_v57, %s10984_s9 }
 0x1c3   : > { %816 = vrot.lane.b32.xlu1 %v797_v63, %s10984_s9  ;;  %814 = vrot.lane.b32.xlu0 %v796_v62, %s10984_s9 }
 0x1c7   : > { %820 = vrot.lane.b32.xlu1 %v799_v8, %s10984_s9  ;;  %818 = vrot.lane.b32.xlu0 %v798_v4, %s10984_s9 }
 0x1cb   : > { %824 = vrot.lane.b32.xlu1 %v801_v18, %s10984_s9  ;;  %822 = vrot.lane.b32.xlu0 %v800_v17, %s10984_s9  ;;  %s11072_s9 = smov 125  }
 0x1cf   : > { %880 = vrot.lane.b32.xlu1 %v863_v21, %s11071_s17  ;;  %878 = vrot.lane.b32.xlu0 %v862_v20, %s11071_s17 }
 0x1d3   : > { %884 = vrot.lane.b32.xlu1 %v865_v24, %s11071_s17  ;;  %882 = vrot.lane.b32.xlu0 %v864_v23, %s11071_s17 }
 0x1d7   : > { %888 = vrot.lane.b32.xlu1 %v867_v27, %s11071_s17  ;;  %886 = vrot.lane.b32.xlu0 %v866_v26, %s11071_s17 }
 0x1db   : > { %892 = vrot.lane.b32.xlu1 %v869_v30, %s11071_s17  ;;  %890 = vrot.lane.b32.xlu0 %v868_v29, %s11071_s17 }
 0x1df   : > { %948 = vrot.lane.b32.xlu1 %v931_v33, %s11072_s9  ;;  %946 = vrot.lane.b32.xlu0 %v930_v32, %s11072_s9 }
 0x1e3   : > { %952 = vrot.lane.b32.xlu1 %v933_v36, %s11072_s9  ;;  %950 = vrot.lane.b32.xlu0 %v932_v35, %s11072_s9 }
 0x1e7   : > { %956 = vrot.lane.b32.xlu1 %v935_v39, %s11072_s9  ;;  %954 = vrot.lane.b32.xlu0 %v934_v38, %s11072_s9 }
 0x1eb   : > { %960 = vrot.lane.b32.xlu1 %v937_v42, %s11072_s9  ;;  %958 = vrot.lane.b32.xlu0 %v936_v41, %s11072_s9 }
 0x1ef   : > { %980 = vrot.lane.b32.xlu1 %v7242_v13, %s11073_s29  ;;  %978 = vrot.lane.b32.xlu0 %v7245_v14, %s11073_s29 }
 0x1f1   : > { %v7453_v43 = vpop.permute.xlu1 %500  ;;  %v7455_v44 = vpop.permute.xlu0 %498 }
 0x1f3   : > { %984 = vrot.lane.b32.xlu1 %v7252_v15, %s11073_s29  ;;  %982 = vrot.lane.b32.xlu0 %v7255_v16, %s11073_s29 }
 0x1f5   : > { %v7461_v45 = vpop.permute.xlu1 %504  ;;  %v7463_v46 = vpop.permute.xlu0 %502 }
 0x1f9   : > { %v7465_v47 = vpop.permute.xlu1 %508  ;;  %v7467_v13 = vpop.permute.xlu0 %506 }
 0x1fd   : > { %v7469_v48 = vpop.permute.xlu1 %512  ;;  %v7471_v14 = vpop.permute.xlu0 %510 }
 0x201   : > { %v7473_v49 = vpop.permute.xlu1 %568  ;;  %v7475_v50 = vpop.permute.xlu0 %566 }
 0x205   : > { %v7477_v15 = vpop.permute.xlu1 %572  ;;  %v7479_v51 = vpop.permute.xlu0 %570 }
 0x209   : > { %v7481_v16 = vpop.permute.xlu1 %576  ;;  %v7483_v52 = vpop.permute.xlu0 %574 }
 0x20d   : > { %v7485_v53 = vpop.permute.xlu1 %580  ;;  %v7487_v54 = vpop.permute.xlu0 %578 }
 0x211   : > { %v7489_v57 = vpop.permute.xlu1 %636  ;;  %v7491_v58 = vpop.permute.xlu0 %634 }
 0x215   : > { %v7493_v59 = vpop.permute.xlu1 %640  ;;  %v7495_v62 = vpop.permute.xlu0 %638 }
 0x219   : > { %v7497_v63 = vpop.permute.xlu1 %644  ;;  %v7499_v1 = vpop.permute.xlu0 %642 }
 0x21d   : > { %v7501_v4 = vpop.permute.xlu1 %648  ;;  %v7503_v8 = vpop.permute.xlu0 %646 }
 0x221   : > { %v7505_v9 = vpop.permute.xlu1 %704  ;;  %v7507_v17 = vpop.permute.xlu0 %702 }
 0x225   : > { %v7509_v18 = vpop.permute.xlu1 %708  ;;  %v7511_v19 = vpop.permute.xlu0 %706 }
 0x229   : > { %v7513_v20 = vpop.permute.xlu1 %712  ;;  %v7515_v21 = vpop.permute.xlu0 %710 }
 0x22d   : > { %v7517_v22 = vpop.permute.xlu1 %716  ;;  %v7519_v23 = vpop.permute.xlu0 %714 }
 0x231   : > { %v7521_v24 = vpop.permute.xlu1 %812  ;;  %v7523_v25 = vpop.permute.xlu0 %810 }
 0x235   : > { %v7525_v26 = vpop.permute.xlu1 %816  ;;  %v7527_v27 = vpop.permute.xlu0 %814 }
 0x239   : > { %v7529_v28 = vpop.permute.xlu1 %820  ;;  %v7531_v29 = vpop.permute.xlu0 %818 }
 0x23a   : > { %11074 = vst [vmem:[#allocation29_spill] sm:$0xff] %v7531_v29 }
 0x23d   : > { %v7533_v30 = vpop.permute.xlu1 %824  ;;  %v7535_v31 = vpop.permute.xlu0 %822 }
 0x23e   : > { %11075 = vst [vmem:[#allocation30_spill] sm:$0xff] %v7533_v30  ;;  %11076 = vst [vmem:[#allocation31_spill] sm:$0xff] %v7535_v31 }
 0x241   : > { %v7537_v32 = vpop.permute.xlu1 %880  ;;  %v7539_v33 = vpop.permute.xlu0 %878 }
 0x242   : > { %11077 = vst [vmem:[#allocation32_spill] sm:$0xff] %v7537_v32  ;;  %11078 = vst [vmem:[#allocation33_spill] sm:$0xff] %v7539_v33 }
 0x245   : > { %v7541_v34 = vpop.permute.xlu1 %884  ;;  %v7543_v35 = vpop.permute.xlu0 %882 }
 0x246   : > { %11079 = vst [vmem:[#allocation34_spill] sm:$0xff] %v7541_v34  ;;  %11080 = vst [vmem:[#allocation35_spill] sm:$0xff] %v7543_v35 }
 0x249   : > { %v7545_v36 = vpop.permute.xlu1 %888  ;;  %v7547_v37 = vpop.permute.xlu0 %886 }
 0x24a   : > { %11081 = vst [vmem:[#allocation36_spill] sm:$0xff] %v7545_v36  ;;  %11082 = vst [vmem:[#allocation37_spill] sm:$0xff] %v7547_v37 }
 0x24d   : > { %v7549_v38 = vpop.permute.xlu1 %892  ;;  %v7551_v39 = vpop.permute.xlu0 %890 }
 0x24e   : > { %11083 = vst [vmem:[#allocation38_spill] sm:$0xff] %v7549_v38  ;;  %11084 = vst [vmem:[#allocation39_spill] sm:$0xff] %v7551_v39 }
 0x251   : > { %v7553_v40 = vpop.permute.xlu1 %948  ;;  %v7555_v41 = vpop.permute.xlu0 %946 }
 0x252   : > { %11085 = vst [vmem:[#allocation40_spill] sm:$0xff] %v7553_v40  ;;  %11086 = vst [vmem:[#allocation41_spill] sm:$0xff] %v7555_v41  ;;  %v7570_v40 = vrot.slane %v7193_v5, 2 }
 0x255   : > { %v7557_v42 = vpop.permute.xlu1 %952  ;;  %v7559_v0 = vpop.permute.xlu0 %950 }
 0x256   : > { %11087 = vst [vmem:[#allocation42_spill] sm:$0xff] %v7557_v42  ;;  %11088 = vst [vmem:[#allocation43_spill] sm:$0xff] %v7559_v0  ;;  %v7573_v42 = vrot.slane %v7195_v6, 2 }
 0x259   : > { %v7561_v33 = vpop.permute.xlu1 %956  ;;  %v7563_v34 = vpop.permute.xlu0 %954 }
 0x25a   : > { %11089 = vst [vmem:[#allocation44_spill] sm:$0xff] %v7561_v33  ;;  %11090 = vst [vmem:[#allocation45_spill] sm:$0xff] %v7563_v34  ;;  %v7576_v33 = vrot.slane %v7198_v7, 2 }
 0x25d   : > { %v7565_v35 = vpop.permute.xlu1 %960  ;;  %v7567_v36 = vpop.permute.xlu0 %958 }
 0x25e   : > { %11091 = vst [vmem:[#allocation46_spill] sm:$0xff] %v7565_v35  ;;  %11092 = vst [vmem:[#allocation47_spill] sm:$0xff] %v7567_v36  ;;  %v7579_v35 = vrot.slane %v7203_v10, 2 }
 0x261   : > { %v981_v37 = vpop.permute.xlu1 %980  ;;  %v979_v38 = vpop.permute.xlu0 %978 }
 0x262   : > { %5874 = vpush %v979_v38 }
 0x263   : > { %5876 = vpush %v981_v37 }
 0x265   : > { %v985_v41 = vpop.permute.xlu1 %984  ;;  %v983_v39 = vpop.permute.xlu0 %982 }
 0x266   : > { %5878 = vpush %v983_v39 }
 0x267   : > { %5880 = vpush %v985_v41 }
 0x268   : > { %5882 = vpush %v7570_v40 }
 0x269   : > { %5884 = vpush %v7573_v42 }
 0x26a   : > { %5886 = vpush %v7576_v33 }
 0x26b   : > { %5888 = vpush %v7579_v35 }
 0x293   : > { %s5875_s8 = spop %5874 }
 0x294   : > { %v987_v5 = vstv %s5875_s8  ;;  %s5877_s30 = spop %5876 }
 0x295   : > { %v998_v6 = vmul.f32 %v987_v5, %v7385_v55  ;;  %v999_v7 = vmul.f32 %v987_v5, %v7387_v56  ;;  %v990_v37 = vstv %s5877_s30 }
 0x296   : > { %v1000_v10 = vmul.f32 %v990_v37, %v7393_v60  ;;  %v1001_v38 = vmul.f32 %v990_v37, %v7395_v61 }
 0x297   : > { %1016 = vrot.lane.b32.xlu1 %v999_v7, %s11073_s29  ;;  %1014 = vrot.lane.b32.xlu0 %v998_v6, %s11073_s29  ;;  %s5879_s0 = spop %5878 }
 0x298   : > { %v993_v39 = vstv %s5879_s0  ;;  %s5881_s1 = spop %5880  ;;  %s11093_s0 = smov 127  }
 0x299   : > { %v1002_v55 = vmul.f32 %v993_v39, %v7401_v2  ;;  %v1003_v56 = vmul.f32 %v993_v39, %v7403_v3  ;;  %v996_v41 = vstv %s5881_s1  ;;  %s7625_s1 = spop %5882 }
 0x29a   : > { %v1004_v5 = vmul.f32 %v996_v41, %v7409_v11  ;;  %v1005_v60 = vmul.f32 %v996_v41, %v7411_v12  ;;  %s7627_s8 = spop %5884  ;;  %v7635_v41 = vld [vmem:[#allocation2 + $0xa] sm:$0xff] }
 0x29b   : > { %1020 = vrot.lane.b32.xlu1 %v1001_v38, %s11073_s29  ;;  %1018 = vrot.lane.b32.xlu0 %v1000_v10, %s11073_s29  ;;  %s7629_s30 = spop %5886 }
 0x29c   : > { %s7631_s2 = spop %5888 }
 0x29f   : > { %1024 = vrot.lane.b32.xlu1 %v1003_v56, %s11073_s29  ;;  %1022 = vrot.lane.b32.xlu0 %v1002_v55, %s11073_s29  ;;  %v7633_v56 = vld [vmem:[#allocation2 + $0x2] sm:$0xff] }
 0x2a3   : > { %1028 = vrot.lane.b32.xlu1 %v1005_v60, %s11073_s29  ;;  %1026 = vrot.lane.b32.xlu0 %v1004_v5, %s11073_s29 }
 0x2a7   : > { %1088 = vrot.lane.b32.xlu1 %v7573_v42, %s11093_s0  ;;  %1086 = vrot.lane.b32.xlu0 %v7570_v40, %s11093_s0 }
 0x2ab   : > { %1092 = vrot.lane.b32.xlu1 %v7579_v35, %s11093_s0  ;;  %1090 = vrot.lane.b32.xlu0 %v7576_v33, %s11093_s0 }
 0x309   : > { %v7609_v61 = vpop.permute.xlu1 %1016  ;;  %v7611_v2 = vpop.permute.xlu0 %1014 }
 0x30a   : > { %11094 = vst [vmem:[#allocation48_spill] sm:$0xff] %v7609_v61  ;;  %11095 = vst [vmem:[#allocation49_spill] sm:$0xff] %v7611_v2 }
 0x30d   : > { %v7613_v3 = vpop.permute.xlu1 %1020  ;;  %v7615_v11 = vpop.permute.xlu0 %1018 }
 0x30e   : > { %11096 = vst [vmem:[#allocation50_spill] sm:$0xff] %v7613_v3  ;;  %11097 = vst [vmem:[#allocation51_spill] sm:$0xff] %v7615_v11  ;;  %v7659_v3 = vld [vmem:[#allocation2 + $0x52] sm:$0xff] }
 0x311   : > { %v7617_v12 = vpop.permute.xlu1 %1024  ;;  %v7619_v6 = vpop.permute.xlu0 %1022 }
 0x312   : > { %11098 = vst [vmem:[#allocation52_spill] sm:$0xff] %v7617_v12  ;;  %11099 = vst [vmem:[#allocation53_spill] sm:$0xff] %v7619_v6 }
 0x315   : > { %v7621_v7 = vpop.permute.xlu1 %1028  ;;  %v7623_v37 = vpop.permute.xlu0 %1026 }
 0x316   : > { %11100 = vst [vmem:[#allocation54_spill] sm:$0xff] %v7621_v7  ;;  %11101 = vst [vmem:[#allocation55_spill] sm:$0xff] %v7623_v37 }
 0x319   : > { %v1089_v10 = vpop.permute.xlu1 %1088  ;;  %v1087_v38 = vpop.permute.xlu0 %1086 }
 0x31a   : > { %5890 = vpush %v1087_v38 }
 0x31b   : > { %5892 = vpush %v1089_v10 }
 0x31d   : > { %v1093_v39 = vpop.permute.xlu1 %1092  ;;  %v1091_v55 = vpop.permute.xlu0 %1090 }
 0x31e   : > { %5894 = vpush %v1091_v55  ;;  %v7643_v55 = vld [vmem:[#allocation2 + $0x22] sm:$0xff] }
 0x31f   : > { %5896 = vpush %v1093_v39  ;;  %v7641_v39 = vld [vmem:[#allocation2 + $0x1a] sm:$0xff] }
 0x34b   : > { %s5891_s3 = spop %5890 }
 0x34c   : > { %v1095_v5 = vstv %s5891_s3  ;;  %s5893_s4 = spop %5892 }
 0x34d   : > { %v1106_v60 = vmul.f32 %v1095_v5, %v7633_v56  ;;  %v1107_v10 = vmul.f32 %v1095_v5, %v7635_v41  ;;  %v1098_v38 = vstv %s5893_s4  ;;  %v7649_v5 = vld [vmem:[#allocation2 + $0x32] sm:$0xff] }
 0x34e   : > { %v1108_v37 = vmul.f32 %v1098_v38, %v7641_v39  ;;  %v1109_v7 = vmul.f32 %v1098_v38, %v7643_v55  ;;  %v7657_v38 = vld [vmem:[#allocation2 + $0x4a] sm:$0xff] }
 0x34f   : > { %1124 = vrot.lane.b32.xlu1 %v1107_v10, %s11093_s0  ;;  %1122 = vrot.lane.b32.xlu0 %v1106_v60, %s11093_s0  ;;  %s5895_s19 = spop %5894  ;;  %v7651_v10 = vld [vmem:[#allocation2 + $0x3a] sm:$0xff] }
 0x350   : > { %v1101_v6 = vstv %s5895_s19  ;;  %s5897_s3 = spop %5896 }
 0x351   : > { %v1110_v60 = vmul.f32 %v1101_v6, %v7649_v5  ;;  %v1111_v12 = vmul.f32 %v1101_v6, %v7651_v10  ;;  %v1104_v11 = vstv %s5897_s3 }
 0x353   : > { %1128 = vrot.lane.b32.xlu1 %v1109_v7, %s11093_s0  ;;  %1126 = vrot.lane.b32.xlu0 %v1108_v37, %s11093_s0  ;;  %v1112_v7 = vmul.f32 %v1104_v11, %v7657_v38  ;;  %v1113_v37 = vmul.f32 %v1104_v11, %v7659_v3 }
 0x357   : > { %1132 = vrot.lane.b32.xlu1 %v1111_v12, %s11093_s0  ;;  %1130 = vrot.lane.b32.xlu0 %v1110_v60, %s11093_s0 }
 0x35b   : > { %1136 = vrot.lane.b32.xlu1 %v1113_v37, %s11093_s0  ;;  %1134 = vrot.lane.b32.xlu0 %v1112_v7, %s11093_s0 }
 0x35f   : > { %1156 = vrot.lane.b32.xlu1 %v7573_v42, %s11071_s17  ;;  %1154 = vrot.lane.b32.xlu0 %v7570_v40, %s11071_s17 }
 0x363   : > { %1160 = vrot.lane.b32.xlu1 %v7579_v35, %s11071_s17  ;;  %1158 = vrot.lane.b32.xlu0 %v7576_v33, %s11071_s17 }
 0x3c1   : > { %v7673_v12 = vpop.permute.xlu1 %1124  ;;  %v7675_v6 = vpop.permute.xlu0 %1122 }
 0x3c2   : > { %11102 = vst [vmem:[#allocation56_spill] sm:$0xff] %v7673_v12  ;;  %11103 = vst [vmem:[#allocation57_spill] sm:$0xff] %v7675_v6 }
 0x3c5   : > { %v7677_v11 = vpop.permute.xlu1 %1128  ;;  %v7679_v60 = vpop.permute.xlu0 %1126 }
 0x3c6   : > { %11104 = vst [vmem:[#allocation58_spill] sm:$0xff] %v7677_v11  ;;  %11105 = vst [vmem:[#allocation59_spill] sm:$0xff] %v7679_v60 }
 0x3c9   : > { %v7681_v7 = vpop.permute.xlu1 %1132  ;;  %v7683_v37 = vpop.permute.xlu0 %1130 }
 0x3ca   : > { %11106 = vst [vmem:[#allocation60_spill] sm:$0xff] %v7681_v7  ;;  %11107 = vst [vmem:[#allocation61_spill] sm:$0xff] %v7683_v37 }
 0x3cd   : > { %v7685_v2 = vpop.permute.xlu1 %1136  ;;  %v7687_v61 = vpop.permute.xlu0 %1134 }
 0x3ce   : > { %11108 = vst [vmem:[#allocation62_spill] sm:$0xff] %v7685_v2  ;;  %11109 = vst [vmem:[#allocation63_spill] sm:$0xff] %v7687_v61 }
 0x3d1   : > { %v1157_v36 = vpop.permute.xlu1 %1156  ;;  %v1155_v34 = vpop.permute.xlu0 %1154 }
 0x3d2   : > { %5898 = vpush %v1155_v34 }
 0x3d3   : > { %5900 = vpush %v1157_v36 }
 0x3d5   : > { %v1161_v0 = vpop.permute.xlu1 %1160  ;;  %v1159_v12 = vpop.permute.xlu0 %1158 }
 0x3d6   : > { %5902 = vpush %v1159_v12 }
 0x3d7   : > { %5904 = vpush %v1161_v0 }
 0x403   : > { %s5899_s4 = spop %5898 }
 0x404   : > { %v1163_v11 = vstv %s5899_s4  ;;  %s5901_s19 = spop %5900 }
 0x405   : > { %v1174_v60 = vmul.f32 %v1163_v11, %v7633_v56  ;;  %v1175_v7 = vmul.f32 %v1163_v11, %v7635_v41  ;;  %v1166_v37 = vstv %s5901_s19 }
 0x406   : > { %v1176_v34 = vmul.f32 %v1166_v37, %v7641_v39  ;;  %v1177_v36 = vmul.f32 %v1166_v37, %v7643_v55 }
 0x407   : > { %1192 = vrot.lane.b32.xlu1 %v1175_v7, %s11071_s17  ;;  %1190 = vrot.lane.b32.xlu0 %v1174_v60, %s11071_s17  ;;  %s5903_s3 = spop %5902 }
 0x408   : > { %v1169_v61 = vstv %s5903_s3  ;;  %s5905_s26 = spop %5904 }
 0x409   : > { %v1178_v0 = vmul.f32 %v1169_v61, %v7649_v5  ;;  %v1179_v12 = vmul.f32 %v1169_v61, %v7651_v10  ;;  %v1172_v11 = vstv %s5905_s26 }
 0x40a   : > { %v1180_v60 = vmul.f32 %v1172_v11, %v7657_v38  ;;  %v1181_v7 = vmul.f32 %v1172_v11, %v7659_v3 }
 0x40b   : > { %1196 = vrot.lane.b32.xlu1 %v1177_v36, %s11071_s17  ;;  %1194 = vrot.lane.b32.xlu0 %v1176_v34, %s11071_s17 }
 0x40f   : > { %1200 = vrot.lane.b32.xlu1 %v1179_v12, %s11071_s17  ;;  %1198 = vrot.lane.b32.xlu0 %v1178_v0, %s11071_s17 }
 0x413   : > { %1204 = vrot.lane.b32.xlu1 %v1181_v7, %s11071_s17  ;;  %1202 = vrot.lane.b32.xlu0 %v1180_v60, %s11071_s17 }
 0x417   : > { %1224 = vrot.lane.b32.xlu1 %v7573_v42, %s11072_s9  ;;  %1222 = vrot.lane.b32.xlu0 %v7570_v40, %s11072_s9 }
 0x41b   : > { %1228 = vrot.lane.b32.xlu1 %v7579_v35, %s11072_s9  ;;  %1226 = vrot.lane.b32.xlu0 %v7576_v33, %s11072_s9 }
 0x479   : > { %v7713_v61 = vpop.permute.xlu1 %1192  ;;  %v7715_v37 = vpop.permute.xlu0 %1190 }
 0x47a   : > { %11110 = vst [vmem:[#allocation64_spill] sm:$0xff] %v7713_v61  ;;  %11111 = vst [vmem:[#allocation65_spill] sm:$0xff] %v7715_v37 }
 0x47d   : > { %v7717_v34 = vpop.permute.xlu1 %1196  ;;  %v7719_v36 = vpop.permute.xlu0 %1194 }
 0x47e   : > { %11112 = vst [vmem:[#allocation66_spill] sm:$0xff] %v7717_v34  ;;  %11113 = vst [vmem:[#allocation67_spill] sm:$0xff] %v7719_v36 }
 0x481   : > { %v7721_v0 = vpop.permute.xlu1 %1200  ;;  %v7723_v12 = vpop.permute.xlu0 %1198 }
 0x482   : > { %11114 = vst [vmem:[#allocation68_spill] sm:$0xff] %v7721_v0  ;;  %11115 = vst [vmem:[#allocation69_spill] sm:$0xff] %v7723_v12 }
 0x485   : > { %v7725_v11 = vpop.permute.xlu1 %1204  ;;  %v7727_v60 = vpop.permute.xlu0 %1202 }
 0x486   : > { %11116 = vst [vmem:[#allocation70_spill] sm:$0xff] %v7725_v11  ;;  %11117 = vst [vmem:[#allocation71_spill] sm:$0xff] %v7727_v60 }
 0x489   : > { %v1225_v7 = vpop.permute.xlu1 %1224  ;;  %v1223_v2 = vpop.permute.xlu0 %1222 }
 0x48a   : > { %5906 = vpush %v1223_v2 }
 0x48b   : > { %5908 = vpush %v1225_v7 }
 0x48d   : > { %v1229_v6 = vpop.permute.xlu1 %1228  ;;  %v1227_v61 = vpop.permute.xlu0 %1226 }
 0x48e   : > { %5910 = vpush %v1227_v61 }
 0x48f   : > { %5912 = vpush %v1229_v6 }
 0x4bb   : > { %s5907_s26 = spop %5906 }
 0x4bc   : > { %v1231_v34 = vstv %s5907_s26  ;;  %s5909_s4 = spop %5908 }
 0x4bd   : > { %v1242_v36 = vmul.f32 %v1231_v34, %v7633_v56  ;;  %v1243_v0 = vmul.f32 %v1231_v34, %v7635_v41  ;;  %v1234_v12 = vstv %s5909_s4 }
 0x4be   : > { %v1244_v2 = vmul.f32 %v1234_v12, %v7641_v39  ;;  %v1245_v7 = vmul.f32 %v1234_v12, %v7643_v55 }
 0x4bf   : > { %1260 = vrot.lane.b32.xlu1 %v1243_v0, %s11072_s9  ;;  %1258 = vrot.lane.b32.xlu0 %v1242_v36, %s11072_s9  ;;  %s5911_s19 = spop %5910 }
 0x4c0   : > { %v1237_v60 = vstv %s5911_s19  ;;  %s5913_s3 = spop %5912 }
 0x4c1   : > { %v1246_v6 = vmul.f32 %v1237_v60, %v7649_v5  ;;  %v1247_v61 = vmul.f32 %v1237_v60, %v7651_v10  ;;  %v1240_v34 = vstv %s5913_s3 }
 0x4c2   : > { %v1248_v36 = vmul.f32 %v1240_v34, %v7657_v38  ;;  %v1249_v0 = vmul.f32 %v1240_v34, %v7659_v3 }
 0x4c3   : > { %1264 = vrot.lane.b32.xlu1 %v1245_v7, %s11072_s9  ;;  %1262 = vrot.lane.b32.xlu0 %v1244_v2, %s11072_s9 }
 0x4c7   : > { %1268 = vrot.lane.b32.xlu1 %v1247_v61, %s11072_s9  ;;  %1266 = vrot.lane.b32.xlu0 %v1246_v6, %s11072_s9 }
 0x4cb   : > { %1272 = vrot.lane.b32.xlu1 %v1249_v0, %s11072_s9  ;;  %1270 = vrot.lane.b32.xlu0 %v1248_v36, %s11072_s9 }
 0x4cf   : > { %1292 = vrot.lane.b32.xlu1 %v7573_v42, %s11073_s29  ;;  %1290 = vrot.lane.b32.xlu0 %v7570_v40, %s11073_s29 }
 0x4d3   : > { %1296 = vrot.lane.b32.xlu1 %v7579_v35, %s11073_s29  ;;  %1294 = vrot.lane.b32.xlu0 %v7576_v33, %s11073_s29  ;;  %v7769_v33 = vld [vmem:[#allocation8] sm:$0x1f] }
 0x4d4   : > { %v7772_v36 = vrot.slane %v7769_v33, 3 }
 0x531   : > { %v7753_v12 = vpop.permute.xlu1 %1260  ;;  %v7755_v60 = vpop.permute.xlu0 %1258 }
 0x532   : > { %11118 = vst [vmem:[#allocation72_spill] sm:$0xff] %v7753_v12  ;;  %11119 = vst [vmem:[#allocation73_spill] sm:$0xff] %v7755_v60 }
 0x535   : > { %v7757_v2 = vpop.permute.xlu1 %1264  ;;  %v7759_v7 = vpop.permute.xlu0 %1262 }
 0x536   : > { %11120 = vst [vmem:[#allocation74_spill] sm:$0xff] %v7757_v2  ;;  %11121 = vst [vmem:[#allocation75_spill] sm:$0xff] %v7759_v7  ;;  %v7774_v7 = vld [vmem:[#allocation8 + $0x8] sm:$0x1f] }
 0x539   : > { %v7761_v6 = vpop.permute.xlu1 %1268  ;;  %v7763_v42 = vpop.permute.xlu0 %1266 }
 0x53a   : > { %11122 = vst [vmem:[#allocation76_spill] sm:$0xff] %v7761_v6  ;;  %11123 = vst [vmem:[#allocation77_spill] sm:$0xff] %v7763_v42  ;;  %v7777_v6 = vrot.slane %v7774_v7, 3 }
 0x53d   : > { %v7765_v61 = vpop.permute.xlu1 %1272  ;;  %v7767_v40 = vpop.permute.xlu0 %1270 }
 0x53e   : > { %11124 = vst [vmem:[#allocation78_spill] sm:$0xff] %v7765_v61  ;;  %11125 = vst [vmem:[#allocation79_spill] sm:$0xff] %v7767_v40  ;;  %v7779_v61 = vld [vmem:[#allocation8 + $0x10] sm:$0x1f] }
 0x53f   : > { %v7782_v40 = vrot.slane %v7779_v61, 3 }
 0x541   : > { %v1293_v35 = vpop.permute.xlu1 %1292  ;;  %v1291_v34 = vpop.permute.xlu0 %1290 }
 0x542   : > { %5914 = vpush %v1291_v34 }
 0x543   : > { %5916 = vpush %v1293_v35  ;;  %v7784_v35 = vld [vmem:[#allocation8 + $0x18] sm:$0x1f] }
 0x544   : > { %v7787_v34 = vrot.slane %v7784_v35, 3 }
 0x545   : > { %v1297_v0 = vpop.permute.xlu1 %1296  ;;  %v1295_v2 = vpop.permute.xlu0 %1294 }
 0x546   : > { %5918 = vpush %v1295_v2 }
 0x547   : > { %5920 = vpush %v1297_v0 }
 0x548   : > { %5922 = vpush %v7772_v36 }
 0x549   : > { %5924 = vpush %v7777_v6 }
 0x54a   : > { %5926 = vpush %v7782_v40 }
 0x54b   : > { %5928 = vpush %v7787_v34 }
 0x573   : > { %s5915_s26 = spop %5914 }
 0x574   : > { %v1299_v2 = vstv %s5915_s26  ;;  %s5917_s4 = spop %5916 }
 0x575   : > { %v1310_v42 = vmul.f32 %v1299_v2, %v7633_v56  ;;  %v1311_v0 = vmul.f32 %v1299_v2, %v7635_v41  ;;  %v1302_v60 = vstv %s5917_s4 }
 0x576   : > { %v1312_v12 = vmul.f32 %v1302_v60, %v7641_v39  ;;  %v1313_v11 = vmul.f32 %v1302_v60, %v7643_v55 }
 0x577   : > { %1328 = vrot.lane.b32.xlu1 %v1311_v0, %s11073_s29  ;;  %1326 = vrot.lane.b32.xlu0 %v1310_v42, %s11073_s29  ;;  %s5919_s19 = spop %5918 }
 0x578   : > { %v1305_v37 = vstv %s5919_s19  ;;  %s5921_s3 = spop %5920 }
 0x579   : > { %v1314_v56 = vmul.f32 %v1305_v37, %v7649_v5  ;;  %v1315_v41 = vmul.f32 %v1305_v37, %v7651_v10  ;;  %v1308_v2 = vstv %s5921_s3  ;;  %s7833_s26 = spop %5922 }
 0x57a   : > { %v1316_v42 = vmul.f32 %v1308_v2, %v7657_v38  ;;  %v1317_v39 = vmul.f32 %v1308_v2, %v7659_v3  ;;  %s7835_s4 = spop %5924  ;;  %v7841_v2 = vld [vmem:[#allocation2 + $0x3] sm:$0xff] }
 0x57b   : > { %1332 = vrot.lane.b32.xlu1 %v1313_v11, %s11073_s29  ;;  %1330 = vrot.lane.b32.xlu0 %v1312_v12, %s11073_s29  ;;  %s7837_s19 = spop %5926 }
 0x57c   : > { %s7839_s3 = spop %5928 }
 0x57f   : > { %1336 = vrot.lane.b32.xlu1 %v1315_v41, %s11073_s29  ;;  %1334 = vrot.lane.b32.xlu0 %v1314_v56, %s11073_s29 }
 0x583   : > { %1340 = vrot.lane.b32.xlu1 %v1317_v39, %s11073_s29  ;;  %1338 = vrot.lane.b32.xlu0 %v1316_v42, %s11073_s29  ;;  %v7843_v42 = vld [vmem:[#allocation2 + $0xb] sm:$0xff] }
 0x587   : > { %1400 = vrot.lane.b32.xlu1 %v7777_v6, %s11093_s0  ;;  %1398 = vrot.lane.b32.xlu0 %v7772_v36, %s11093_s0 }
 0x58b   : > { %1404 = vrot.lane.b32.xlu1 %v7787_v34, %s11093_s0  ;;  %1402 = vrot.lane.b32.xlu0 %v7782_v40, %s11093_s0 }
 0x5e9   : > { %v7817_v55 = vpop.permute.xlu1 %1328  ;;  %v7819_v5 = vpop.permute.xlu0 %1326 }
 0x5ea   : > { %11126 = vst [vmem:[#allocation80_spill] sm:$0xff] %v7817_v55  ;;  %11127 = vst [vmem:[#allocation81_spill] sm:$0xff] %v7819_v5  ;;  %v7867_v5 = vld [vmem:[#allocation2 + $0x53] sm:$0xff] }
 0x5ed   : > { %v7821_v3 = vpop.permute.xlu1 %1332  ;;  %v7823_v10 = vpop.permute.xlu0 %1330 }
 0x5ee   : > { %11128 = vst [vmem:[#allocation82_spill] sm:$0xff] %v7821_v3  ;;  %11129 = vst [vmem:[#allocation83_spill] sm:$0xff] %v7823_v10 }
 0x5f1   : > { %v7825_v38 = vpop.permute.xlu1 %1336  ;;  %v7827_v37 = vpop.permute.xlu0 %1334 }
 0x5f2   : > { %11130 = vst [vmem:[#allocation84_spill] sm:$0xff] %v7825_v38  ;;  %11131 = vst [vmem:[#allocation85_spill] sm:$0xff] %v7827_v37 }
 0x5f5   : > { %v7829_v11 = vpop.permute.xlu1 %1340  ;;  %v7831_v12 = vpop.permute.xlu0 %1338 }
 0x5f6   : > { %11132 = vst [vmem:[#allocation86_spill] sm:$0xff] %v7829_v11  ;;  %11133 = vst [vmem:[#allocation87_spill] sm:$0xff] %v7831_v12  ;;  %v7851_v12 = vld [vmem:[#allocation2 + $0x23] sm:$0xff] }
 0x5f9   : > { %v1401_v60 = vpop.permute.xlu1 %1400  ;;  %v1399_v0 = vpop.permute.xlu0 %1398 }
 0x5fa   : > { %5930 = vpush %v1399_v0 }
 0x5fb   : > { %5932 = vpush %v1401_v60 }
 0x5fd   : > { %v1405_v56 = vpop.permute.xlu1 %1404  ;;  %v1403_v41 = vpop.permute.xlu0 %1402 }
 0x5fe   : > { %5934 = vpush %v1403_v41  ;;  %v7849_v41 = vld [vmem:[#allocation2 + $0x1b] sm:$0xff] }
 0x5ff   : > { %5936 = vpush %v1405_v56 }
 0x62b   : > { %s5931_s25 = spop %5930 }
 0x62c   : > { %v1407_v39 = vstv %s5931_s25  ;;  %s5933_s22 = spop %5932 }
 0x62d   : > { %v1418_v60 = vmul.f32 %v1407_v39, %v7841_v2  ;;  %v1419_v0 = vmul.f32 %v1407_v39, %v7843_v42  ;;  %v1410_v56 = vstv %s5933_s22  ;;  %v7857_v39 = vld [vmem:[#allocation2 + $0x33] sm:$0xff] }
 0x62e   : > { %v1420_v11 = vmul.f32 %v1410_v56, %v7849_v41  ;;  %v1421_v37 = vmul.f32 %v1410_v56, %v7851_v12  ;;  %v7865_v56 = vld [vmem:[#allocation2 + $0x4b] sm:$0xff] }
 0x62f   : > { %1436 = vrot.lane.b32.xlu1 %v1419_v0, %s11093_s0  ;;  %1434 = vrot.lane.b32.xlu0 %v1418_v60, %s11093_s0  ;;  %s5935_s27 = spop %5934  ;;  %v7859_v0 = vld [vmem:[#allocation2 + $0x3b] sm:$0xff] }
 0x630   : > { %v1413_v38 = vstv %s5935_s27  ;;  %s5937_s25 = spop %5936 }
 0x631   : > { %v1422_v60 = vmul.f32 %v1413_v38, %v7857_v39  ;;  %v1423_v10 = vmul.f32 %v1413_v38, %v7859_v0  ;;  %v1416_v3 = vstv %s5937_s25 }
 0x633   : > { %1440 = vrot.lane.b32.xlu1 %v1421_v37, %s11093_s0  ;;  %1438 = vrot.lane.b32.xlu0 %v1420_v11, %s11093_s0  ;;  %v1424_v37 = vmul.f32 %v1416_v3, %v7865_v56  ;;  %v1425_v11 = vmul.f32 %v1416_v3, %v7867_v5 }
 0x637   : > { %1444 = vrot.lane.b32.xlu1 %v1423_v10, %s11093_s0  ;;  %1442 = vrot.lane.b32.xlu0 %v1422_v60, %s11093_s0 }
 0x63b   : > { %1448 = vrot.lane.b32.xlu1 %v1425_v11, %s11093_s0  ;;  %1446 = vrot.lane.b32.xlu0 %v1424_v37, %s11093_s0 }
 0x63f   : > { %1468 = vrot.lane.b32.xlu1 %v7777_v6, %s11071_s17  ;;  %1466 = vrot.lane.b32.xlu0 %v7772_v36, %s11071_s17 }
 0x643   : > { %1472 = vrot.lane.b32.xlu1 %v7787_v34, %s11071_s17  ;;  %1470 = vrot.lane.b32.xlu0 %v7782_v40, %s11071_s17 }
 0x6a1   : > { %v7881_v10 = vpop.permute.xlu1 %1436  ;;  %v7883_v38 = vpop.permute.xlu0 %1434 }
 0x6a2   : > { %11134 = vst [vmem:[#allocation88_spill] sm:$0xff] %v7881_v10  ;;  %11135 = vst [vmem:[#allocation89_spill] sm:$0xff] %v7883_v38 }
 0x6a5   : > { %v7885_v3 = vpop.permute.xlu1 %1440  ;;  %v7887_v60 = vpop.permute.xlu0 %1438 }
 0x6a6   : > { %11136 = vst [vmem:[#allocation90_spill] sm:$0xff] %v7885_v3  ;;  %11137 = vst [vmem:[#allocation91_spill] sm:$0xff] %v7887_v60 }
 0x6a9   : > { %v7889_v37 = vpop.permute.xlu1 %1444  ;;  %v7891_v11 = vpop.permute.xlu0 %1442 }
 0x6aa   : > { %11138 = vst [vmem:[#allocation92_spill] sm:$0xff] %v7889_v37  ;;  %11139 = vst [vmem:[#allocation93_spill] sm:$0xff] %v7891_v11 }
 0x6ad   : > { %v7893_v55 = vpop.permute.xlu1 %1448  ;;  %v7895_v32 = vpop.permute.xlu0 %1446 }
 0x6ae   : > { %11140 = vst [vmem:[#allocation94_spill] sm:$0xff] %v7893_v55  ;;  %11141 = vst [vmem:[#allocation95_spill] sm:$0xff] %v7895_v32 }
 0x6b1   : > { %v1469_v31 = vpop.permute.xlu1 %1468  ;;  %v1467_v30 = vpop.permute.xlu0 %1466 }
 0x6b2   : > { %5938 = vpush %v1467_v30 }
 0x6b3   : > { %5940 = vpush %v1469_v31 }
 0x6b5   : > { %v1473_v29 = vpop.permute.xlu1 %1472  ;;  %v1471_v10 = vpop.permute.xlu0 %1470 }
 0x6b6   : > { %5942 = vpush %v1471_v10 }
 0x6b7   : > { %5944 = vpush %v1473_v29 }
 0x6e3   : > { %s5939_s27 = spop %5938 }
 0x6e4   : > { %v1475_v3 = vstv %s5939_s27  ;;  %s5941_s22 = spop %5940 }
 0x6e5   : > { %v1486_v60 = vmul.f32 %v1475_v3, %v7841_v2  ;;  %v1487_v37 = vmul.f32 %v1475_v3, %v7843_v42  ;;  %v1478_v11 = vstv %s5941_s22 }
 0x6e6   : > { %v1488_v30 = vmul.f32 %v1478_v11, %v7849_v41  ;;  %v1489_v31 = vmul.f32 %v1478_v11, %v7851_v12 }
 0x6e7   : > { %1504 = vrot.lane.b32.xlu1 %v1487_v37, %s11071_s17  ;;  %1502 = vrot.lane.b32.xlu0 %v1486_v60, %s11071_s17  ;;  %s5943_s25 = spop %5942 }
 0x6e8   : > { %v1481_v32 = vstv %s5943_s25  ;;  %s5945_s24 = spop %5944 }
 0x6e9   : > { %v1490_v29 = vmul.f32 %v1481_v32, %v7857_v39  ;;  %v1491_v10 = vmul.f32 %v1481_v32, %v7859_v0  ;;  %v1484_v3 = vstv %s5945_s24 }
 0x6ea   : > { %v1492_v60 = vmul.f32 %v1484_v3, %v7865_v56  ;;  %v1493_v37 = vmul.f32 %v1484_v3, %v7867_v5 }
 0x6eb   : > { %1508 = vrot.lane.b32.xlu1 %v1489_v31, %s11071_s17  ;;  %1506 = vrot.lane.b32.xlu0 %v1488_v30, %s11071_s17 }
 0x6ef   : > { %1512 = vrot.lane.b32.xlu1 %v1491_v10, %s11071_s17  ;;  %1510 = vrot.lane.b32.xlu0 %v1490_v29, %s11071_s17 }
 0x6f3   : > { %1516 = vrot.lane.b32.xlu1 %v1493_v37, %s11071_s17  ;;  %1514 = vrot.lane.b32.xlu0 %v1492_v60, %s11071_s17 }
 0x6f7   : > { %1536 = vrot.lane.b32.xlu1 %v7777_v6, %s11072_s9  ;;  %1534 = vrot.lane.b32.xlu0 %v7772_v36, %s11072_s9 }
 0x6fb   : > { %1540 = vrot.lane.b32.xlu1 %v7787_v34, %s11072_s9  ;;  %1538 = vrot.lane.b32.xlu0 %v7782_v40, %s11072_s9 }
 0x759   : > { %v7921_v32 = vpop.permute.xlu1 %1504  ;;  %v7923_v11 = vpop.permute.xlu0 %1502 }
 0x75a   : > { %11142 = vst [vmem:[#allocation96_spill] sm:$0xff] %v7921_v32 }
 0x75d   : > { %v7925_v30 = vpop.permute.xlu1 %1508  ;;  %v7927_v31 = vpop.permute.xlu0 %1506 }
 0x75e   : > { %11143 = vst [vmem:[#allocation97_spill] sm:$0xff] %v7925_v30  ;;  %11144 = vst [vmem:[#allocation98_spill] sm:$0xff] %v7927_v31 }
 0x761   : > { %v7929_v29 = vpop.permute.xlu1 %1512  ;;  %v7931_v10 = vpop.permute.xlu0 %1510 }
 0x762   : > { %11145 = vst [vmem:[#allocation99_spill] sm:$0xff] %v7929_v29  ;;  %11146 = vst [vmem:[#allocation100_spill] sm:$0xff] %v7931_v10 }
 0x765   : > { %v7933_v3 = vpop.permute.xlu1 %1516  ;;  %v7935_v60 = vpop.permute.xlu0 %1514 }
 0x766   : > { %11147 = vst [vmem:[#allocation101_spill] sm:$0xff] %v7933_v3  ;;  %11148 = vst [vmem:[#allocation102_spill] sm:$0xff] %v7935_v60  ;;  %v7981_v3 = vrot.slane %v7774_v7, 4 }
 0x769   : > { %v1537_v37 = vpop.permute.xlu1 %1536  ;;  %v1535_v55 = vpop.permute.xlu0 %1534 }
 0x76a   : > { %5946 = vpush %v1535_v55 }
 0x76b   : > { %5948 = vpush %v1537_v37 }
 0x76d   : > { %v1541_v38 = vpop.permute.xlu1 %1540  ;;  %v1539_v32 = vpop.permute.xlu0 %1538 }
 0x76e   : > { %5950 = vpush %v1539_v32 }
 0x76f   : > { %5952 = vpush %v1541_v38 }
 0x79b   : > { %s5947_s24 = spop %5946 }
 0x79c   : > { %v1543_v30 = vstv %s5947_s24  ;;  %s5949_s27 = spop %5948 }
 0x79d   : > { %v1554_v31 = vmul.f32 %v1543_v30, %v7841_v2  ;;  %v1555_v29 = vmul.f32 %v1543_v30, %v7843_v42  ;;  %v1546_v10 = vstv %s5949_s27 }
 0x79e   : > { %v1556_v55 = vmul.f32 %v1546_v10, %v7849_v41  ;;  %v1557_v37 = vmul.f32 %v1546_v10, %v7851_v12 }
 0x79f   : > { %1572 = vrot.lane.b32.xlu1 %v1555_v29, %s11072_s9  ;;  %1570 = vrot.lane.b32.xlu0 %v1554_v31, %s11072_s9  ;;  %s5951_s22 = spop %5950 }
 0x7a0   : > { %v1549_v60 = vstv %s5951_s22  ;;  %s5953_s25 = spop %5952 }
 0x7a1   : > { %v1558_v38 = vmul.f32 %v1549_v60, %v7857_v39  ;;  %v1559_v32 = vmul.f32 %v1549_v60, %v7859_v0  ;;  %v1552_v30 = vstv %s5953_s25 }
 0x7a2   : > { %v1560_v31 = vmul.f32 %v1552_v30, %v7865_v56  ;;  %v1561_v29 = vmul.f32 %v1552_v30, %v7867_v5 }
 0x7a3   : > { %1576 = vrot.lane.b32.xlu1 %v1557_v37, %s11072_s9  ;;  %1574 = vrot.lane.b32.xlu0 %v1556_v55, %s11072_s9 }
 0x7a7   : > { %1580 = vrot.lane.b32.xlu1 %v1559_v32, %s11072_s9  ;;  %1578 = vrot.lane.b32.xlu0 %v1558_v38, %s11072_s9 }
 0x7ab   : > { %1584 = vrot.lane.b32.xlu1 %v1561_v29, %s11072_s9  ;;  %1582 = vrot.lane.b32.xlu0 %v1560_v31, %s11072_s9 }
 0x7af   : > { %1604 = vrot.lane.b32.xlu1 %v7777_v6, %s11073_s29  ;;  %1602 = vrot.lane.b32.xlu0 %v7772_v36, %s11073_s29 }
 0x7b3   : > { %1608 = vrot.lane.b32.xlu1 %v7787_v34, %s11073_s29  ;;  %1606 = vrot.lane.b32.xlu0 %v7782_v40, %s11073_s29  ;;  %v7978_v40 = vrot.slane %v7769_v33, 4 }
 0x811   : > { %v7961_v10 = vpop.permute.xlu1 %1572  ;;  %v7963_v60 = vpop.permute.xlu0 %1570 }
 0x815   : > { %v7965_v55 = vpop.permute.xlu1 %1576  ;;  %v7967_v37 = vpop.permute.xlu0 %1574 }
 0x816   : > { %11149 = vst [vmem:[#allocation103_spill] sm:$0xff] %v7965_v55  ;;  %11150 = vst [vmem:[#allocation104_spill] sm:$0xff] %v7967_v37 }
 0x819   : > { %v7969_v38 = vpop.permute.xlu1 %1580  ;;  %v7971_v6 = vpop.permute.xlu0 %1578 }
 0x81a   : > { %11151 = vst [vmem:[#allocation105_spill] sm:$0xff] %v7969_v38  ;;  %11152 = vst [vmem:[#allocation106_spill] sm:$0xff] %v7971_v6  ;;  %v7984_v38 = vrot.slane %v7779_v61, 4  ;;  %v8067_v6 = vld [vmem:[#allocation2 + $0x54] sm:$0xff] }
 0x81b   : > { %11170 = vst [vmem:[#allocation124_spill] sm:$0xff] %v8067_v6 }
 0x81d   : > { %v7973_v32 = vpop.permute.xlu1 %1584  ;;  %v7975_v36 = vpop.permute.xlu0 %1582 }
 0x81e   : > { %11153 = vst [vmem:[#allocation107_spill] sm:$0xff] %v7973_v32  ;;  %11154 = vst [vmem:[#allocation108_spill] sm:$0xff] %v7975_v36  ;;  %v7987_v32 = vrot.slane %v7784_v35, 4 }
 0x821   : > { %v1605_v34 = vpop.permute.xlu1 %1604  ;;  %v1603_v30 = vpop.permute.xlu0 %1602 }
 0x822   : > { %5954 = vpush %v1603_v30 }
 0x823   : > { %5956 = vpush %v1605_v34 }
 0x825   : > { %v1609_v31 = vpop.permute.xlu1 %1608  ;;  %v1607_v29 = vpop.permute.xlu0 %1606 }
 0x826   : > { %5958 = vpush %v1607_v29 }
 0x827   : > { %5960 = vpush %v1609_v31 }
 0x828   : > { %5962 = vpush %v7978_v40 }
 0x829   : > { %5964 = vpush %v7981_v3 }
 0x82a   : > { %5966 = vpush %v7984_v38 }
 0x82b   : > { %5968 = vpush %v7987_v32 }
 0x853   : > { %s5955_s24 = spop %5954 }
 0x854   : > { %v1611_v33 = vstv %s5955_s24  ;;  %s5957_s27 = spop %5956 }
 0x855   : > { %v1622_v7 = vmul.f32 %v1611_v33, %v7841_v2  ;;  %v1623_v61 = vmul.f32 %v1611_v33, %v7843_v42  ;;  %v1614_v34 = vstv %s5957_s27 }
 0x856   : > { %v1624_v35 = vmul.f32 %v1614_v34, %v7849_v41  ;;  %v1625_v30 = vmul.f32 %v1614_v34, %v7851_v12 }
 0x857   : > { %1640 = vrot.lane.b32.xlu1 %v1623_v61, %s11073_s29  ;;  %1638 = vrot.lane.b32.xlu0 %v1622_v7, %s11073_s29  ;;  %s5959_s22 = spop %5958 }
 0x858   : > { %v1617_v31 = vstv %s5959_s22  ;;  %s5961_s25 = spop %5960 }
 0x859   : > { %v1626_v2 = vmul.f32 %v1617_v31, %v7857_v39  ;;  %v1627_v42 = vmul.f32 %v1617_v31, %v7859_v0  ;;  %v1620_v29 = vstv %s5961_s25  ;;  %s8033_s24 = spop %5962 }
 0x85a   : > { %v1628_v33 = vmul.f32 %v1620_v29, %v7865_v56  ;;  %v1629_v41 = vmul.f32 %v1620_v29, %v7867_v5  ;;  %s8035_s27 = spop %5964  ;;  %v8043_v29 = vld [vmem:[#allocation2 + $0xc] sm:$0xff] }
 0x85b   : > { %1644 = vrot.lane.b32.xlu1 %v1625_v30, %s11073_s29  ;;  %1642 = vrot.lane.b32.xlu0 %v1624_v35, %s11073_s29  ;;  %s8037_s22 = spop %5966  ;;  %11164 = vst [vmem:[#allocation118_spill] sm:$0xff] %v8043_v29 }
 0x85c   : > { %s8039_s25 = spop %5968 }
 0x85f   : > { %1648 = vrot.lane.b32.xlu1 %v1627_v42, %s11073_s29  ;;  %1646 = vrot.lane.b32.xlu0 %v1626_v2, %s11073_s29  ;;  %v8041_v42 = vld [vmem:[#allocation2 + $0x4] sm:$0xff] }
 0x860   : > { %11163 = vst [vmem:[#allocation117_spill] sm:$0xff] %v8041_v42 }
 0x863   : > { %1652 = vrot.lane.b32.xlu1 %v1629_v41, %s11073_s29  ;;  %1650 = vrot.lane.b32.xlu0 %v1628_v33, %s11073_s29 }
 0x867   : > { %1712 = vrot.lane.b32.xlu1 %v7981_v3, %s11093_s0  ;;  %1710 = vrot.lane.b32.xlu0 %v7978_v40, %s11093_s0 }
 0x86b   : > { %1716 = vrot.lane.b32.xlu1 %v7987_v32, %s11093_s0  ;;  %1714 = vrot.lane.b32.xlu0 %v7984_v38, %s11093_s0 }
 0x8c9   : > { %v8017_v12 = vpop.permute.xlu1 %1640  ;;  %v8019_v39 = vpop.permute.xlu0 %1638 }
 0x8ca   : > { %11155 = vst [vmem:[#allocation109_spill] sm:$0xff] %v8017_v12  ;;  %11156 = vst [vmem:[#allocation110_spill] sm:$0xff] %v8019_v39 }
 0x8cd   : > { %v8021_v5 = vpop.permute.xlu1 %1644  ;;  %v8023_v0 = vpop.permute.xlu0 %1642 }
 0x8ce   : > { %11157 = vst [vmem:[#allocation111_spill] sm:$0xff] %v8021_v5  ;;  %11158 = vst [vmem:[#allocation112_spill] sm:$0xff] %v8023_v0 }
 0x8d1   : > { %v8025_v56 = vpop.permute.xlu1 %1648  ;;  %v8027_v7 = vpop.permute.xlu0 %1646 }
 0x8d2   : > { %11159 = vst [vmem:[#allocation113_spill] sm:$0xff] %v8025_v56  ;;  %11160 = vst [vmem:[#allocation114_spill] sm:$0xff] %v8027_v7 }
 0x8d5   : > { %v8029_v61 = vpop.permute.xlu1 %1652  ;;  %v8031_v34 = vpop.permute.xlu0 %1650 }
 0x8d6   : > { %11161 = vst [vmem:[#allocation115_spill] sm:$0xff] %v8029_v61  ;;  %11162 = vst [vmem:[#allocation116_spill] sm:$0xff] %v8031_v34 }
 0x8d9   : > { %v1713_v35 = vpop.permute.xlu1 %1712  ;;  %v1711_v30 = vpop.permute.xlu0 %1710 }
 0x8da   : > { %5970 = vpush %v1711_v30 }
 0x8db   : > { %5972 = vpush %v1713_v35 }
 0x8dd   : > { %v1717_v31 = vpop.permute.xlu1 %1716  ;;  %v1715_v2 = vpop.permute.xlu0 %1714 }
 0x8de   : > { %5974 = vpush %v1715_v2  ;;  %v8051_v2 = vld [vmem:[#allocation2 + $0x24] sm:$0xff] }
 0x8df   : > { %5976 = vpush %v1717_v31  ;;  %v8049_v31 = vld [vmem:[#allocation2 + $0x1c] sm:$0xff]  ;;  %11166 = vst [vmem:[#allocation120_spill] sm:$0xff] %v8051_v2 }
 0x8e0   : > { %11165 = vst [vmem:[#allocation119_spill] sm:$0xff] %v8049_v31 }
 0x90b   : > { %s5971_s15 = spop %5970 }
 0x90c   : > { %v1719_v33 = vstv %s5971_s15  ;;  %s5973_s7 = spop %5972 }
 0x90d   : > { %v1730_v41 = vmul.f32 %v1719_v33, %v8041_v42  ;;  %v1731_v35 = vmul.f32 %v1719_v33, %v8043_v29  ;;  %v1722_v30 = vstv %s5973_s7  ;;  %v8057_v33 = vld [vmem:[#allocation2 + $0x34] sm:$0xff] }
 0x90e   : > { %v1732_v34 = vmul.f32 %v1722_v30, %v8049_v31  ;;  %v1733_v61 = vmul.f32 %v1722_v30, %v8051_v2  ;;  %11167 = vst [vmem:[#allocation121_spill] sm:$0xff] %v8057_v33  ;;  %v8065_v30 = vld [vmem:[#allocation2 + $0x4c] sm:$0xff] }
 0x90f   : > { %1748 = vrot.lane.b32.xlu1 %v1731_v35, %s11093_s0  ;;  %1746 = vrot.lane.b32.xlu0 %v1730_v41, %s11093_s0  ;;  %s5975_s16 = spop %5974  ;;  %v8059_v35 = vld [vmem:[#allocation2 + $0x3c] sm:$0xff]  ;;  %11169 = vst [vmem:[#allocation123_spill] sm:$0xff] %v8065_v30 }
 0x910   : > { %v1725_v7 = vstv %s5975_s16  ;;  %s5977_s15 = spop %5976  ;;  %11168 = vst [vmem:[#allocation122_spill] sm:$0xff] %v8059_v35 }
 0x911   : > { %v1734_v41 = vmul.f32 %v1725_v7, %v8057_v33  ;;  %v1735_v56 = vmul.f32 %v1725_v7, %v8059_v35  ;;  %v1728_v36 = vstv %s5977_s15 }
 0x913   : > { %1752 = vrot.lane.b32.xlu1 %v1733_v61, %s11093_s0  ;;  %1750 = vrot.lane.b32.xlu0 %v1732_v34, %s11093_s0  ;;  %v1736_v61 = vmul.f32 %v1728_v36, %v8065_v30  ;;  %v1737_v34 = vmul.f32 %v1728_v36, %v8067_v6 }
 0x917   : > { %1756 = vrot.lane.b32.xlu1 %v1735_v56, %s11093_s0  ;;  %1754 = vrot.lane.b32.xlu0 %v1734_v41, %s11093_s0 }
 0x91b   : > { %1760 = vrot.lane.b32.xlu1 %v1737_v34, %s11093_s0  ;;  %1758 = vrot.lane.b32.xlu0 %v1736_v61, %s11093_s0 }
 0x91f   : > { %1780 = vrot.lane.b32.xlu1 %v7981_v3, %s11071_s17  ;;  %1778 = vrot.lane.b32.xlu0 %v7978_v40, %s11071_s17 }
 0x923   : > { %1784 = vrot.lane.b32.xlu1 %v7987_v32, %s11071_s17  ;;  %1782 = vrot.lane.b32.xlu0 %v7984_v38, %s11071_s17 }
 0x981   : > { %v8081_v56 = vpop.permute.xlu1 %1748  ;;  %v8083_v7 = vpop.permute.xlu0 %1746 }
 0x982   : > { %11171 = vst [vmem:[#allocation125_spill] sm:$0xff] %v8081_v56  ;;  %11172 = vst [vmem:[#allocation126_spill] sm:$0xff] %v8083_v7 }
 0x985   : > { %v8085_v36 = vpop.permute.xlu1 %1752  ;;  %v8087_v41 = vpop.permute.xlu0 %1750 }
 0x986   : > { %11173 = vst [vmem:[#allocation127_spill] sm:$0xff] %v8085_v36  ;;  %11174 = vst [vmem:[#allocation128_spill] sm:$0xff] %v8087_v41 }
 0x989   : > { %v8089_v61 = vpop.permute.xlu1 %1756  ;;  %v8091_v34 = vpop.permute.xlu0 %1754 }
 0x98a   : > { %11175 = vst [vmem:[#allocation129_spill] sm:$0xff] %v8089_v61  ;;  %11176 = vst [vmem:[#allocation130_spill] sm:$0xff] %v8091_v34 }
 0x98d   : > { %v8093_v0 = vpop.permute.xlu1 %1760  ;;  %v8095_v5 = vpop.permute.xlu0 %1758 }
 0x98e   : > { %11177 = vst [vmem:[#allocation131_spill] sm:$0xff] %v8093_v0  ;;  %11178 = vst [vmem:[#allocation132_spill] sm:$0xff] %v8095_v5 }
 0x991   : > { %v1781_v39 = vpop.permute.xlu1 %1780  ;;  %v1779_v12 = vpop.permute.xlu0 %1778 }
 0x992   : > { %5978 = vpush %v1779_v12 }
 0x993   : > { %5980 = vpush %v1781_v39 }
 0x995   : > { %v1785_v37 = vpop.permute.xlu1 %1784  ;;  %v1783_v56 = vpop.permute.xlu0 %1782 }
 0x996   : > { %5982 = vpush %v1783_v56 }
 0x997   : > { %5984 = vpush %v1785_v37 }
 0x9c3   : > { %s5979_s7 = spop %5978 }
 0x9c4   : > { %v1787_v36 = vstv %s5979_s7  ;;  %s5981_s16 = spop %5980 }
 0x9c5   : > { %v1798_v41 = vmul.f32 %v1787_v36, %v8041_v42  ;;  %v1799_v61 = vmul.f32 %v1787_v36, %v8043_v29  ;;  %v1790_v34 = vstv %s5981_s16 }
 0x9c6   : > { %v1800_v12 = vmul.f32 %v1790_v34, %v8049_v31  ;;  %v1801_v39 = vmul.f32 %v1790_v34, %v8051_v2 }
 0x9c7   : > { %1816 = vrot.lane.b32.xlu1 %v1799_v61, %s11071_s17  ;;  %1814 = vrot.lane.b32.xlu0 %v1798_v41, %s11071_s17  ;;  %s5983_s15 = spop %5982 }
 0x9c8   : > { %v1793_v5 = vstv %s5983_s15  ;;  %s5985_s23 = spop %5984 }
 0x9c9   : > { %v1802_v37 = vmul.f32 %v1793_v5, %v8057_v33  ;;  %v1803_v56 = vmul.f32 %v1793_v5, %v8059_v35  ;;  %v1796_v36 = vstv %s5985_s23 }
 0x9ca   : > { %v1804_v41 = vmul.f32 %v1796_v36, %v8065_v30  ;;  %v1805_v61 = vmul.f32 %v1796_v36, %v8067_v6 }
 0x9cb   : > { %1820 = vrot.lane.b32.xlu1 %v1801_v39, %s11071_s17  ;;  %1818 = vrot.lane.b32.xlu0 %v1800_v12, %s11071_s17 }
 0x9cf   : > { %1824 = vrot.lane.b32.xlu1 %v1803_v56, %s11071_s17  ;;  %1822 = vrot.lane.b32.xlu0 %v1802_v37, %s11071_s17 }
 0x9d3   : > { %1828 = vrot.lane.b32.xlu1 %v1805_v61, %s11071_s17  ;;  %1826 = vrot.lane.b32.xlu0 %v1804_v41, %s11071_s17 }
 0x9d7   : > { %1848 = vrot.lane.b32.xlu1 %v7981_v3, %s11072_s9  ;;  %1846 = vrot.lane.b32.xlu0 %v7978_v40, %s11072_s9 }
 0x9db   : > { %1852 = vrot.lane.b32.xlu1 %v7987_v32, %s11072_s9  ;;  %1850 = vrot.lane.b32.xlu0 %v7984_v38, %s11072_s9 }
 0xa39   : > { %v8121_v5 = vpop.permute.xlu1 %1816  ;;  %v8123_v34 = vpop.permute.xlu0 %1814 }
 0xa3a   : > { %11179 = vst [vmem:[#allocation133_spill] sm:$0xff] %v8121_v5  ;;  %11180 = vst [vmem:[#allocation134_spill] sm:$0xff] %v8123_v34  ;;  %v6575_v34 = vld [vmem:[#allocation2 + $0x30] sm:$0xff] }
 0xa3d   : > { %v8125_v12 = vpop.permute.xlu1 %1820  ;;  %v8127_v39 = vpop.permute.xlu0 %1818 }
 0xa3e   : > { %11181 = vst [vmem:[#allocation135_spill] sm:$0xff] %v8125_v12  ;;  %11182 = vst [vmem:[#allocation136_spill] sm:$0xff] %v8127_v39 }
 0xa41   : > { %v8129_v37 = vpop.permute.xlu1 %1824  ;;  %v8131_v56 = vpop.permute.xlu0 %1822 }
 0xa42   : > { %11183 = vst [vmem:[#allocation137_spill] sm:$0xff] %v8129_v37  ;;  %11184 = vst [vmem:[#allocation138_spill] sm:$0xff] %v8131_v56 }
 0xa45   : > { %v8133_v36 = vpop.permute.xlu1 %1828  ;;  %v8135_v41 = vpop.permute.xlu0 %1826 }
 0xa46   : > { %11185 = vst [vmem:[#allocation139_spill] sm:$0xff] %v8133_v36  ;;  %11186 = vst [vmem:[#allocation140_spill] sm:$0xff] %v8135_v41 }
 0xa49   : > { %v1849_v61 = vpop.permute.xlu1 %1848  ;;  %v1847_v0 = vpop.permute.xlu0 %1846 }
 0xa4a   : > { %5986 = vpush %v1847_v0 }
 0xa4b   : > { %5988 = vpush %v1849_v61 }
 0xa4d   : > { %v1853_v7 = vpop.permute.xlu1 %1852  ;;  %v1851_v5 = vpop.permute.xlu0 %1850 }
 0xa4e   : > { %5990 = vpush %v1851_v5 }
 0xa4f   : > { %5992 = vpush %v1853_v7 }
 0xa7b   : > { %s5987_s23 = spop %5986 }
 0xa7c   : > { %v1855_v12 = vstv %s5987_s23  ;;  %s5989_s7 = spop %5988 }
 0xa7d   : > { %v1866_v39 = vmul.f32 %v1855_v12, %v8041_v42  ;;  %v1867_v37 = vmul.f32 %v1855_v12, %v8043_v29  ;;  %v1858_v56 = vstv %s5989_s7 }
 0xa7e   : > { %v1868_v0 = vmul.f32 %v1858_v56, %v8049_v31  ;;  %v1869_v61 = vmul.f32 %v1858_v56, %v8051_v2  ;;  %v6886_v56 = vmov 0  }
 0xa7f   : > { %1884 = vrot.lane.b32.xlu1 %v1867_v37, %s11072_s9  ;;  %1882 = vrot.lane.b32.xlu0 %v1866_v39, %s11072_s9  ;;  %s5991_s16 = spop %5990 }
 0xa80   : > { %v1861_v41 = vstv %s5991_s16  ;;  %s5993_s15 = spop %5992  ;;  %6534 = vset.pattern.permute.xlu1 %v6886_v56  ;;  %6533 = vset.pattern.permute.xlu0 %v6886_v56 }
 0xa81   : > { %v1870_v7 = vmul.f32 %v1861_v41, %v8057_v33  ;;  %v1871_v5 = vmul.f32 %v1861_v41, %v8059_v35  ;;  %v1864_v12 = vstv %s5993_s15 }
 0xa82   : > { %v1872_v39 = vmul.f32 %v1864_v12, %v8065_v30  ;;  %v1873_v37 = vmul.f32 %v1864_v12, %v8067_v6 }
 0xa83   : > { %1888 = vrot.lane.b32.xlu1 %v1869_v61, %s11072_s9  ;;  %1886 = vrot.lane.b32.xlu0 %v1868_v0, %s11072_s9 }
 0xa87   : > { %1892 = vrot.lane.b32.xlu1 %v1871_v5, %s11072_s9  ;;  %1890 = vrot.lane.b32.xlu0 %v1870_v7, %s11072_s9 }
 0xa8b   : > { %1896 = vrot.lane.b32.xlu1 %v1873_v37, %s11072_s9  ;;  %1894 = vrot.lane.b32.xlu0 %v1872_v39, %s11072_s9 }
 0xa8f   : > { %1916 = vrot.lane.b32.xlu1 %v7981_v3, %s11073_s29  ;;  %1914 = vrot.lane.b32.xlu0 %v7978_v40, %s11073_s29 }
 0xa93   : > { %1920 = vrot.lane.b32.xlu1 %v7987_v32, %s11073_s29  ;;  %1918 = vrot.lane.b32.xlu0 %v7984_v38, %s11073_s29 }
 0xaf1   : > { %v8161_v41 = vpop.permute.xlu1 %1884  ;;  %v8163_v0 = vpop.permute.xlu0 %1882 }
 0xaf2   : > { %11187 = vst [vmem:[#allocation141_spill] sm:$0xff] %v8161_v41  ;;  %11188 = vst [vmem:[#allocation142_spill] sm:$0xff] %v8163_v0  ;;  %v6574_v0 = vld [vmem:[#allocation2 + $0x20] sm:$0xff] }
 0xaf5   : > { %v8165_v61 = vpop.permute.xlu1 %1888  ;;  %v8167_v7 = vpop.permute.xlu0 %1886 }
 0xaf6   : > { %11189 = vst [vmem:[#allocation143_spill] sm:$0xff] %v8165_v61  ;;  %11190 = vst [vmem:[#allocation144_spill] sm:$0xff] %v8167_v7  ;;  %v6573_v7 = vld [vmem:[#allocation2 + $0x18] sm:$0xff] }
 0xaf9   : > { %v8169_v3 = vpop.permute.xlu1 %1892  ;;  %v8171_v40 = vpop.permute.xlu0 %1890 }
 0xafa   : > { %11191 = vst [vmem:[#allocation145_spill] sm:$0xff] %v8169_v3  ;;  %11192 = vst [vmem:[#allocation146_spill] sm:$0xff] %v8171_v40 }
 0xafd   : > { %v8173_v5 = vpop.permute.xlu1 %1896  ;;  %v8175_v32 = vpop.permute.xlu0 %1894 }
 0xafe   : > { %11193 = vst [vmem:[#allocation147_spill] sm:$0xff] %v8173_v5  ;;  %11194 = vst [vmem:[#allocation148_spill] sm:$0xff] %v8175_v32  ;;  %v5786_v5 = vld [vmem:[#allocation10 + $0x3] ss:$0 sm:$0xff] }
 0xb01   : > { %v1917_v38 = vpop.permute.xlu1 %1916  ;;  %v1915_v12 = vpop.permute.xlu0 %1914 }
 0xb02   : > { %5994 = vpush %v1915_v12 }
 0xb03   : > { %5996 = vpush %v1917_v38 }
 0xb05   : > { %v1921_v39 = vpop.permute.xlu1 %1920  ;;  %v1919_v37 = vpop.permute.xlu0 %1918 }
 0xb06   : > { %5998 = vpush %v1919_v37 }
 0xb07   : > { %6000 = vpush %v1921_v39 }
 0xb33   : > { %s5995_s23 = spop %5994 }
 0xb34   : > { %v1923_v56 = vstv %s5995_s23  ;;  %s5997_s7 = spop %5996 }
 0xb35   : > { %v1934_v36 = vmul.f32 %v1923_v56, %v8041_v42  ;;  %v1935_v3 = vmul.f32 %v1923_v56, %v8043_v29  ;;  %v1926_v40 = vstv %s5997_s7  ;;  %v750_v29 = vstv %s7369_s18  ;;  %s11024_s7 = smov 116  }
 0xb36   : > { %v1936_v12 = vmul.f32 %v1926_v40, %v8049_v31  ;;  %v1937_v38 = vmul.f32 %v1926_v40, %v8051_v2  ;;  %v5784_v40 = vld [vmem:[#allocation10 + $0x1] ss:$0 sm:$0xff]  ;;  %v747_v31 = vstv %s7365_s14  ;;  %v756_v42 = vstv %s7377_s12 }
 0xb37   : > { %1952 = vrot.lane.b32.xlu1 %v1935_v3, %s11073_s29  ;;  %1950 = vrot.lane.b32.xlu0 %v1934_v36, %s11073_s29  ;;  %s5999_s16 = spop %5998 }
 0xb38   : > { %v1929_v32 = vstv %s5999_s16  ;;  %s6001_s15 = spop %6000 }
 0xb39   : > { %v1938_v39 = vmul.f32 %v1929_v32, %v8057_v33  ;;  %v1939_v37 = vmul.f32 %v1929_v32, %v8059_v35  ;;  %v1932_v56 = vstv %s6001_s15  ;;  %v8193_v32 = vld [vmem:[#allocation11] sm:$0x7f]  ;;  %v6578_v33 = vld [vmem:[#allocation2 + $0x50] sm:$0xff] }
 0xb3a   : > { %v1940_v36 = vmul.f32 %v1932_v56, %v8065_v30  ;;  %v1941_v3 = vmul.f32 %v1932_v56, %v8067_v6  ;;  %11195 = vst [vmem:[#allocation149_spill] sm:$0xff] %v8193_v32  ;;  %6002 = vpush %v8193_v32  ;;  %v8201_v56 = vld [vmem:[#allocation11 + $0x18] sm:$0x7f]  ;;  %v6577_v30 = vld [vmem:[#allocation2 + $0x48] sm:$0xff] }
 0xb3b   : > { %1956 = vrot.lane.b32.xlu1 %v1937_v38, %s11073_s29  ;;  %1954 = vrot.lane.b32.xlu0 %v1936_v12, %s11073_s29  ;;  %v5783_v38 = vld [vmem:[#allocation10] ss:$0 sm:$0xff]  ;;  %v5785_v12 = vld [vmem:[#allocation10 + $0x2] ss:$0 sm:$0xff]  ;;  %11198 = vst [vmem:[#allocation152_spill] sm:$0xff] %v8201_v56  ;;  %v6576_v6 = vld [vmem:[#allocation2 + $0x38] sm:$0xff] }
 0xb3f   : > { %1960 = vrot.lane.b32.xlu1 %v1939_v37, %s11073_s29  ;;  %1958 = vrot.lane.b32.xlu0 %v1938_v39, %s11073_s29  ;;  %v8195_v37 = vld [vmem:[#allocation11 + $0x8] sm:$0x7f]  ;;  %v8199_v39 = vld [vmem:[#allocation11 + $0x10] sm:$0x7f] }
 0xb40   : > { %11196 = vst [vmem:[#allocation150_spill] sm:$0xff] %v8195_v37  ;;  %6004 = vpush %v8195_v37  ;;  %v6572_v37 = vld [vmem:[#allocation2 + $0x8] sm:$0xff] }
 0xb41   : > { %11197 = vst [vmem:[#allocation151_spill] sm:$0xff] %v8199_v39  ;;  %6006 = vpush %v8199_v39 }
 0xb42   : > { %6008 = vpush %v8201_v56 }
 0xb43   : > { %1964 = vrot.lane.b32.xlu1 %v1941_v3, %s11073_s29  ;;  %1962 = vrot.lane.b32.xlu0 %v1940_v36, %s11073_s29  ;;  %v11199_v36 = vmov 0.0   ;;  %v436_v3 = vstv %s7291_s20 }
 0xb44   : > { %2104 = vst.msk [vmem:[#allocation3 + $0x8] sm:$0xff] %vm2102_vm3, %v11199_v36  ;;  %2105 = vst.msk [vmem:[#allocation3 + $0x10] sm:$0xff] %vm2102_vm3, %v11199_v36  ;;  %v448_v61 = vmul.f32 %v6573_v7, %v436_v3  ;;  %v449_v41 = vmul.f32 %v6574_v0, %v436_v3 }
 0xb45   : > { %2103 = vst.msk [vmem:[#allocation3] sm:$0xff] %vm2102_vm3, %v11199_v36  ;;  %2106 = vst.msk [vmem:[#allocation3 + $0x18] sm:$0xff] %vm2102_vm3, %v11199_v36 }
 0xb46   : > { %2109 = vst.msk [vmem:[#allocation3 + $0x28] sm:$0xff] %vm2102_vm3, %v11199_v36  ;;  %2110 = vst.msk [vmem:[#allocation3 + $0x30] sm:$0xff] %vm2102_vm3, %v11199_v36  ;;  %v525_v7 = vadd.f32 %v7461_v45, %v449_v41  ;;  %v524_v0 = vadd.f32 %v7463_v46, %v448_v61  ;;  %v6582_v41 = vld [vmem:[#allocation2 + $0x21] sm:$0xff]  ;;  %v6583_v61 = vld [vmem:[#allocation2 + $0x31] sm:$0xff] }
 0xb47   : > { %2011 = vperm.xlu1 %6534, %v5784_v40   ;;  %2007 = vperm.xlu0 %6533, %v5783_v38   ;;  %2111 = vst.msk [vmem:[#allocation3 + $0x38] sm:$0xff] %vm2102_vm3, %v11199_v36  ;;  %2112 = vst.msk [vmem:[#allocation3 + $0x40] sm:$0xff] %vm2102_vm3, %v11199_v36  ;;  %v440_v40 = vstv %s7293_s10  ;;  %v444_v38 = vstv %s7295_s13 }
 0xb48   : > { %2114 = vst.msk [vmem:[#allocation3 + $0x50] sm:$0xff] %vm2102_vm3, %v11199_v36  ;;  %2115 = vst.msk [vmem:[#allocation3 + $0x58] sm:$0xff] %vm2102_vm3, %v11199_v36  ;;  %v451_v56 = vmul.f32 %v6576_v6, %v440_v40  ;;  %v452_v35 = vmul.f32 %v6577_v30, %v444_v38  ;;  %v453_v2 = vmul.f32 %v6578_v33, %v444_v38 }
 0xb49   : > { %2116 = vst.msk [vmem:[#allocation3 + $0x60] sm:$0xff] %vm2102_vm3, %v11199_v36  ;;  %2117 = vst.msk [vmem:[#allocation3 + $0x68] sm:$0xff] %vm2102_vm3, %v11199_v36 }
 0xb4a   : > { %2119 = vst.msk [vmem:[#allocation3 + $0x78] sm:$0xff] %vm2102_vm3, %v11199_v36  ;;  %2120 = vst.msk [vmem:[#allocation3 + $0x80] sm:$0xff] %vm2102_vm3, %v11199_v36  ;;  %v529_v30 = vadd.f32 %v7469_v48, %v453_v2  ;;  %v528_v33 = vadd.f32 %v7471_v14, %v452_v35  ;;  %v6580_v2 = vld [vmem:[#allocation2 + $0x9] sm:$0xff]  ;;  %v6581_v35 = vld [vmem:[#allocation2 + $0x19] sm:$0xff] }
 0xb4b   : > { %2015 = vperm.xlu1 %6534, %v5785_v12   ;;  %2019 = vperm.xlu0 %6533, %v5786_v5   ;;  %2121 = vst.msk [vmem:[#allocation3 + $0x88] sm:$0xff] %vm2102_vm3, %v11199_v36  ;;  %2122 = vst.msk [vmem:[#allocation3 + $0x90] sm:$0xff] %vm2102_vm3, %v11199_v36  ;;  %v432_v5 = vstv %s7289_s21  ;;  %v6571_v12 = vld [vmem:[#allocation2] sm:$0xff]  ;;  %v450_v36 = vmul.f32 %v6575_v34, %v440_v40  ;;  %v527_v34 = vadd.f32 %v7465_v47, %v451_v56  ;;  %v6586_v56 = vld [vmem:[#allocation2 + $0x51] sm:$0xff] }
 0xb4c   : > { %v446_v39 = vmul.f32 %v6571_v12, %v432_v5  ;;  %v447_v32 = vmul.f32 %v6572_v37, %v432_v5  ;;  %v753_v12 = vstv %s7373_s11  ;;  %v597_v47 = vadd.f32 %v7485_v53, %v529_v30  ;;  %v11200_v30 = vld [vmem:[#allocation29_spill] sm:$0xff] }
 0xb4d   : > { %v526_v6 = vadd.f32 %v7467_v13, %v450_v36  ;;  %v595_v45 = vadd.f32 %v7481_v16, %v527_v34  ;;  %v596_v13 = vadd.f32 %v7487_v54, %v528_v33  ;;  %v11201_v33 = vld [vmem:[#allocation30_spill] sm:$0xff] }
 0xb4e   : > { %v523_v55 = vadd.f32 %v7453_v43, %v447_v32  ;;  %v522_v37 = vadd.f32 %v7455_v44, %v446_v39  ;;  %v593_v43 = vadd.f32 %v7477_v15, %v525_v7  ;;  %v592_v44 = vadd.f32 %v7479_v51, %v524_v0  ;;  %v6584_v32 = vld [vmem:[#allocation2 + $0x39] sm:$0xff]  ;;  %v6585_v39 = vld [vmem:[#allocation2 + $0x49] sm:$0xff] }
 0xb4f   : > { %v594_v46 = vadd.f32 %v7483_v52, %v526_v6  ;;  %v663_v15 = vadd.f32 %v7497_v63, %v595_v45  ;;  %v665_v16 = vadd.f32 %v7501_v4, %v597_v47  ;;  %v664_v52 = vadd.f32 %v7503_v8, %v596_v13  ;;  %v11206_v13 = vld [vmem:[#allocation35_spill] sm:$0xff] }
 0xb50   : > { %v591_v5 = vadd.f32 %v7473_v49, %v523_v55  ;;  %v590_v3 = vadd.f32 %v7475_v50, %v522_v37  ;;  %v661_v49 = vadd.f32 %v7493_v59, %v593_v43  ;;  %v660_v50 = vadd.f32 %v7495_v62, %v592_v44  ;;  %v6579_v55 = vld [vmem:[#allocation2 + $0x1] sm:$0xff] }
 0xb51   : > { %v662_v51 = vadd.f32 %v7499_v1, %v594_v46  ;;  %v731_v59 = vadd.f32 %v7513_v20, %v663_v15  ;;  %v733_v63 = vadd.f32 %v7517_v22, %v665_v16  ;;  %v732_v1 = vadd.f32 %v7519_v23, %v664_v52  ;;  %v11203_v44 = vld [vmem:[#allocation32_spill] sm:$0xff]  ;;  %v11204_v46 = vld [vmem:[#allocation33_spill] sm:$0xff]  ;;  %v11210_v15 = vld [vmem:[#allocation39_spill] sm:$0xff] }
 0xb52   : > { %v659_v48 = vadd.f32 %v7489_v57, %v591_v5  ;;  %v658_v14 = vadd.f32 %v7491_v58, %v590_v3  ;;  %v729_v57 = vadd.f32 %v7509_v18, %v661_v49  ;;  %v728_v58 = vadd.f32 %v7511_v19, %v660_v50  ;;  %v11202_v3 = vld [vmem:[#allocation31_spill] sm:$0xff]  ;;  %v11209_v49 = vld [vmem:[#allocation38_spill] sm:$0xff]  ;;  %v11211_v16 = vld [vmem:[#allocation40_spill] sm:$0xff] }
 0xb53   : > { %v730_v62 = vadd.f32 %v7515_v21, %v662_v51  ;;  %v758_v4 = vmul.f32 %v6579_v55, %v747_v31  ;;  %v759_v8 = vmul.f32 %v6580_v2, %v747_v31  ;;  %v762_v18 = vmul.f32 %v6583_v61, %v753_v12  ;;  %v11216_v55 = vld [vmem:[#allocation45_spill] sm:$0xff]  ;;  %v11217_v2 = vld [vmem:[#allocation46_spill] sm:$0xff] }
 0xb54   : > { %v727_v53 = vadd.f32 %v7505_v9, %v659_v48  ;;  %v726_v54 = vadd.f32 %v7507_v17, %v658_v14  ;;  %v760_v9 = vmul.f32 %v6581_v35, %v750_v29  ;;  %v761_v17 = vmul.f32 %v6582_v41, %v750_v29 }
 0xb55   : > { %v763_v19 = vmul.f32 %v6584_v32, %v753_v12  ;;  %v764_v20 = vmul.f32 %v6585_v39, %v756_v42  ;;  %v765_v21 = vmul.f32 %v6586_v56, %v756_v42  ;;  %v770_v37 = vadd.f32 %v762_v18, %v730_v62  ;;  %v11219_v18 = vld [vmem:[#allocation48_spill] sm:$0xff]  ;;  %v11220_v39 = vld [vmem:[#allocation49_spill] sm:$0xff]  ;;  %v11221_v56 = vld [vmem:[#allocation50_spill] sm:$0xff] }
 0xb56   : > { %v767_v36 = vadd.f32 %v759_v8, %v727_v53  ;;  %v766_v22 = vadd.f32 %v758_v4, %v726_v54  ;;  %v769_v40 = vadd.f32 %v761_v17, %v729_v57  ;;  %v768_v23 = vadd.f32 %v760_v9, %v728_v58  ;;  %v11212_v53 = vld [vmem:[#allocation41_spill] sm:$0xff]  ;;  %v11213_v57 = vld [vmem:[#allocation42_spill] sm:$0xff]  ;;  %v11218_v9 = vld [vmem:[#allocation47_spill] sm:$0xff] }
 0xb57   : > { %v771_v38 = vadd.f32 %v763_v19, %v731_v59  ;;  %v773_v7 = vadd.f32 %v765_v21, %v733_v63  ;;  %v772_v31 = vadd.f32 %v764_v20, %v732_v1  ;;  %v838_v42 = vadd.f32 %v11200_v30, %v770_v37  ;;  %v11214_v59 = vld [vmem:[#allocation43_spill] sm:$0xff]  ;;  %v11215_v63 = vld [vmem:[#allocation44_spill] sm:$0xff] }
 0xb58   : > { %v835_v0 = vadd.f32 %v7521_v24, %v767_v36  ;;  %v834_v29 = vadd.f32 %v7523_v25, %v766_v22  ;;  %v837_v34 = vadd.f32 %v7525_v26, %v769_v40  ;;  %v836_v12 = vadd.f32 %v7527_v27, %v768_v23  ;;  %v11205_v24 = vld [vmem:[#allocation34_spill] sm:$0xff]  ;;  %v11207_v27 = vld [vmem:[#allocation36_spill] sm:$0xff]  ;;  %v11222_v36 = vld [vmem:[#allocation51_spill] sm:$0xff] }
 0xb59   : > { %v839_v6 = vadd.f32 %v7529_v28, %v771_v38  ;;  %v841_v5 = vadd.f32 %v11201_v33, %v773_v7  ;;  %v840_v43 = vadd.f32 %v11202_v3, %v772_v31  ;;  %v11208_v28 = vld [vmem:[#allocation37_spill] sm:$0xff]  ;;  %v1059_v35 = vstv %s7625_s1  ;;  %v11223_v38 = vld [vmem:[#allocation52_spill] sm:$0xff] }
 0xb5a   : > { %v903_v45 = vadd.f32 %v11203_v44, %v835_v0  ;;  %v902_v47 = vadd.f32 %v11204_v46, %v834_v29  ;;  %v905_v25 = vadd.f32 %v11205_v24, %v837_v34  ;;  %v904_v26 = vadd.f32 %v11206_v13, %v836_v12  ;;  %v6587_v40 = vld [vmem:[#allocation2 + $0xa] sm:$0xff]  ;;  %v6588_v34 = vld [vmem:[#allocation2 + $0x2] sm:$0xff] }
 0xb5b   : > { %v907_v48 = vadd.f32 %v11207_v27, %v839_v6  ;;  %v906_v14 = vadd.f32 %v11208_v28, %v838_v42  ;;  %v909_v50 = vadd.f32 %v11209_v49, %v841_v5  ;;  %v908_v51 = vadd.f32 %v11210_v15, %v840_v43  ;;  %v11224_v7 = vld [vmem:[#allocation53_spill] sm:$0xff]  ;;  %v11225_v0 = vld [vmem:[#allocation54_spill] sm:$0xff]  ;;  %v6589_v6 = vld [vmem:[#allocation2 + $0x1a] sm:$0xff] }
 0xb5c   : > { %v971_v52 = vadd.f32 %v11211_v16, %v903_v45  ;;  %v970_v54 = vadd.f32 %v11212_v53, %v902_v47  ;;  %v973_v58 = vadd.f32 %v11213_v57, %v905_v25  ;;  %v972_v62 = vadd.f32 %v11214_v59, %v904_v26  ;;  %v6590_v42 = vld [vmem:[#allocation2 + $0x22] sm:$0xff]  ;;  %v11226_v5 = vld [vmem:[#allocation55_spill] sm:$0xff]  ;;  %v6594_v13 = vld [vmem:[#allocation2 + $0x4a] sm:$0xff] }
 0xb5d   : > { %v975_v1 = vadd.f32 %v11215_v63, %v907_v48  ;;  %v974_v4 = vadd.f32 %v11216_v55, %v906_v14  ;;  %v977_v8 = vadd.f32 %v11217_v2, %v909_v50  ;;  %v976_v41 = vadd.f32 %v11218_v9, %v908_v51  ;;  %v6591_v43 = vld [vmem:[#allocation2 + $0x32] sm:$0xff]  ;;  %v6592_v45 = vld [vmem:[#allocation2 + $0x3a] sm:$0xff]  ;;  %v11228_v16 = vld [vmem:[#allocation57_spill] sm:$0xff] }
 0xb5e   : > { %v1062_v17 = vstv %s7627_s8  ;;  %v1065_v61 = vstv %s7629_s30  ;;  %v1039_v32 = vadd.f32 %v11219_v18, %v971_v52  ;;  %v1068_v19 = vstv %s7631_s2  ;;  %v6593_v47 = vld [vmem:[#allocation2 + $0x52] sm:$0xff]  ;;  %v11227_v14 = vld [vmem:[#allocation56_spill] sm:$0xff]  ;;  %s6887_s2 = smov 9   ;;  %s6888_s30 = smov 122  }
 0xb5f   : > { %v1038_v20 = vadd.f32 %v11220_v39, %v970_v54  ;;  %v1041_v21 = vadd.f32 %v11221_v56, %v973_v58  ;;  %v1040_v22 = vadd.f32 %v11222_v36, %v972_v62  ;;  %v1071_v23 = vmul.f32 %v6587_v40, %v1059_v35  ;;  %v11229_v53 = vld [vmem:[#allocation58_spill] sm:$0xff]  ;;  %v11230_v57 = vld [vmem:[#allocation59_spill] sm:$0xff]  ;;  %v11231_v62 = vld [vmem:[#allocation60_spill] sm:$0xff] }
 0xb60   : > { %v1043_v37 = vadd.f32 %v11223_v38, %v975_v1  ;;  %v1042_v31 = vadd.f32 %v11224_v7, %v974_v4  ;;  %v1045_v29 = vadd.f32 %v11225_v0, %v977_v8  ;;  %v1070_v12 = vmul.f32 %v6588_v34, %v1059_v35  ;;  %v11232_v1 = vld [vmem:[#allocation61_spill] sm:$0xff]  ;;  %v11233_v4 = vld [vmem:[#allocation62_spill] sm:$0xff]  ;;  %v11234_v8 = vld [vmem:[#allocation64_spill] sm:$0xff] }
 0xb61   : > { %v1072_v30 = vmul.f32 %v6589_v6, %v1062_v17  ;;  %v1073_v33 = vmul.f32 %v6590_v42, %v1062_v17  ;;  %v1044_v3 = vadd.f32 %v11226_v5, %v976_v41  ;;  %v1074_v44 = vmul.f32 %v6591_v43, %v1065_v61  ;;  %v11235_v9 = vld [vmem:[#allocation63_spill] sm:$0xff]  ;;  %v11236_v17 = vld [vmem:[#allocation65_spill] sm:$0xff]  ;;  %v11237_v18 = vld [vmem:[#allocation66_spill] sm:$0xff] }
 0xb62   : > { %v1075_v46 = vmul.f32 %v6592_v45, %v1065_v61  ;;  %v1077_v24 = vmul.f32 %v6593_v47, %v1068_v19  ;;  %v1079_v25 = vadd.f32 %v1071_v23, %v1039_v32  ;;  %v1076_v26 = vmul.f32 %v6594_v13, %v1068_v19  ;;  %v11238_v19 = vld [vmem:[#allocation67_spill] sm:$0xff]  ;;  %v11242_v23 = vld [vmem:[#allocation72_spill] sm:$0xff]  ;;  %v11248_v5 = vld [vmem:[#allocation77_spill] sm:$0xff] }
 0xb63   : > { %v1078_v27 = vadd.f32 %v1070_v12, %v1038_v20  ;;  %v1081_v48 = vadd.f32 %v1073_v33, %v1041_v21  ;;  %v1080_v28 = vadd.f32 %v1072_v30, %v1040_v22  ;;  %v1082_v15 = vadd.f32 %v1074_v44, %v1042_v31  ;;  %v11239_v20 = vld [vmem:[#allocation68_spill] sm:$0xff]  ;;  %v11240_v21 = vld [vmem:[#allocation69_spill] sm:$0xff]  ;;  %v11241_v22 = vld [vmem:[#allocation70_spill] sm:$0xff] }
 0xb64   : > { %v1147_v49 = vadd.f32 %v11227_v14, %v1079_v25  ;;  %v1083_v50 = vadd.f32 %v1075_v46, %v1043_v37  ;;  %v1085_v51 = vadd.f32 %v1077_v24, %v1045_v29  ;;  %v1084_v59 = vadd.f32 %v1076_v26, %v1044_v3  ;;  %v11243_v37 = vld [vmem:[#allocation73_spill] sm:$0xff]  ;;  %v11244_v31 = vld [vmem:[#allocation74_spill] sm:$0xff]  ;;  %v11245_v29 = vld [vmem:[#allocation75_spill] sm:$0xff] }
 0xb65   : > { %v1146_v52 = vadd.f32 %v11228_v16, %v1078_v27  ;;  %v1149_v54 = vadd.f32 %v11229_v53, %v1081_v48  ;;  %v1148_v58 = vadd.f32 %v11230_v57, %v1080_v28  ;;  %v1150_v55 = vadd.f32 %v11232_v1, %v1082_v15  ;;  %v11246_v6 = vld [vmem:[#allocation71_spill] sm:$0xff]  ;;  %v11247_v42 = vld [vmem:[#allocation76_spill] sm:$0xff]  ;;  %v11250_v46 = vld [vmem:[#allocation81_spill] sm:$0xff] }
 0xb66   : > { %v1151_v63 = vadd.f32 %v11231_v62, %v1083_v50  ;;  %v1153_v2 = vadd.f32 %v11233_v4, %v1085_v51  ;;  %v1215_v35 = vadd.f32 %v11234_v8, %v1147_v49  ;;  %v1152_v41 = vadd.f32 %v11235_v9, %v1084_v59  ;;  %v11249_v44 = vld [vmem:[#allocation80_spill] sm:$0xff]  ;;  %v11251_v24 = vld [vmem:[#allocation82_spill] sm:$0xff]  ;;  %v11252_v13 = vld [vmem:[#allocation83_spill] sm:$0xff] }
 0xb67   : > { %v1214_v61 = vadd.f32 %v11236_v17, %v1146_v52  ;;  %v1217_v32 = vadd.f32 %v11237_v18, %v1149_v54  ;;  %v1216_v39 = vadd.f32 %v11238_v19, %v1148_v58  ;;  %v1218_v36 = vadd.f32 %v11240_v21, %v1150_v55  ;;  %v11253_v27 = vld [vmem:[#allocation78_spill] sm:$0xff]  ;;  %v11254_v28 = vld [vmem:[#allocation79_spill] sm:$0xff]  ;;  %v6595_v49 = vld [vmem:[#allocation2 + $0x3] sm:$0xff] }
 0xb68   : > { %v1219_v56 = vadd.f32 %v11239_v20, %v1151_v63  ;;  %v1221_v40 = vadd.f32 %v11241_v22, %v1153_v2  ;;  %v1283_v38 = vadd.f32 %v11242_v23, %v1215_v35  ;;  %v1371_v12 = vstv %s7833_s26  ;;  %v6596_v15 = vld [vmem:[#allocation2 + $0xb] sm:$0xff]  ;;  %v6597_v16 = vld [vmem:[#allocation2 + $0x1b] sm:$0xff]  ;;  %v6598_v53 = vld [vmem:[#allocation2 + $0x23] sm:$0xff] }
 0xb69   : > { %v1282_v7 = vadd.f32 %v11243_v37, %v1214_v61  ;;  %v1285_v0 = vadd.f32 %v11244_v31, %v1217_v32  ;;  %v1284_v34 = vadd.f32 %v11245_v29, %v1216_v39  ;;  %v1220_v30 = vadd.f32 %v11246_v6, %v1152_v41  ;;  %v11255_v59 = vld [vmem:[#allocation84_spill] sm:$0xff]  ;;  %v11256_v63 = vld [vmem:[#allocation85_spill] sm:$0xff]  ;;  %v11257_v55 = vld [vmem:[#allocation86_spill] sm:$0xff] }
 0xb6a   : > { %v1287_v33 = vadd.f32 %v11247_v42, %v1219_v56  ;;  %v1286_v3 = vadd.f32 %v11248_v5, %v1218_v36  ;;  %v1374_v43 = vstv %s7835_s4  ;;  %v1351_v45 = vadd.f32 %v11249_v44, %v1283_v38  ;;  %v11258_v2 = vld [vmem:[#allocation87_spill] sm:$0xff]  ;;  %v6601_v56 = vld [vmem:[#allocation2 + $0x4b] sm:$0xff]  ;;  %v11263_v42 = vld [vmem:[#allocation96_spill] sm:$0xff] }
 0xb6b   : > { %v1350_v47 = vadd.f32 %v11250_v46, %v1282_v7  ;;  %v1353_v25 = vadd.f32 %v11251_v24, %v1285_v0  ;;  %v1352_v26 = vadd.f32 %v11252_v13, %v1284_v34  ;;  %v1289_v48 = vadd.f32 %v11253_v27, %v1221_v40  ;;  %v6599_v32 = vld [vmem:[#allocation2 + $0x33] sm:$0xff]  ;;  %v6600_v39 = vld [vmem:[#allocation2 + $0x3b] sm:$0xff]  ;;  %v11260_v38 = vld [vmem:[#allocation89_spill] sm:$0xff]  ;;  %s8501_s14 = spop %6002 }
 0xb6c   : > { %v1288_v14 = vadd.f32 %v11254_v28, %v1220_v30  ;;  %v1382_v50 = vmul.f32 %v6595_v49, %v1371_v12  ;;  %v1383_v51 = vmul.f32 %v6596_v15, %v1371_v12  ;;  %v1384_v52 = vmul.f32 %v6597_v16, %v1374_v43  ;;  %v6602_v36 = vld [vmem:[#allocation2 + $0x53] sm:$0xff]  ;;  %v11259_v40 = vld [vmem:[#allocation88_spill] sm:$0xff]  ;;  %v11267_v24 = vld [vmem:[#allocation93_spill] sm:$0xff] }
 0xb6d   : > { %v1385_v54 = vmul.f32 %v6598_v53, %v1374_v43  ;;  %v1377_v57 = vstv %s7837_s19  ;;  %v1380_v58 = vstv %s7839_s3  ;;  %v1355_v62 = vadd.f32 %v11255_v59, %v1287_v33  ;;  %v11261_v7 = vld [vmem:[#allocation90_spill] sm:$0xff]  ;;  %v11262_v0 = vld [vmem:[#allocation91_spill] sm:$0xff]  ;;  %v11266_v46 = vld [vmem:[#allocation92_spill] sm:$0xff] }
 0xb6e   : > { %v1354_v1 = vadd.f32 %v11256_v63, %v1286_v3  ;;  %v1357_v4 = vadd.f32 %v11257_v55, %v1289_v48  ;;  %v1356_v8 = vadd.f32 %v11258_v2, %v1288_v14  ;;  %v1391_v41 = vadd.f32 %v1383_v51, %v1351_v45  ;;  %v11264_v3 = vld [vmem:[#allocation97_spill] sm:$0xff]  ;;  %v11265_v44 = vld [vmem:[#allocation98_spill] sm:$0xff]  ;;  %v11269_v27 = vld [vmem:[#allocation95_spill] sm:$0xff] }
 0xb6f   : > { %v1390_v17 = vadd.f32 %v1382_v50, %v1350_v47  ;;  %v1393_v61 = vadd.f32 %v1385_v54, %v1353_v25  ;;  %v1392_v18 = vadd.f32 %v1384_v52, %v1352_v26  ;;  %v1386_v19 = vmul.f32 %v6599_v32, %v1377_v57  ;;  %v11268_v13 = vld [vmem:[#allocation94_spill] sm:$0xff]  ;;  %v11270_v50 = vld [vmem:[#allocation103_spill] sm:$0xff]  ;;  %v11271_v51 = vld [vmem:[#allocation104_spill] sm:$0xff] }
 0xb70   : > { %v1387_v20 = vmul.f32 %v6600_v39, %v1377_v57  ;;  %v1388_v21 = vmul.f32 %v6601_v56, %v1380_v58  ;;  %v1389_v22 = vmul.f32 %v6602_v36, %v1380_v58  ;;  %v1459_v23 = vadd.f32 %v11259_v40, %v1391_v41  ;;  %v11272_v52 = vld [vmem:[#allocation99_spill] sm:$0xff]  ;;  %v11273_v54 = vld [vmem:[#allocation100_spill] sm:$0xff] }
 0xb71   : > { %v1458_v37 = vadd.f32 %v11260_v38, %v1390_v17  ;;  %v1461_v31 = vadd.f32 %v11261_v7, %v1393_v61  ;;  %v1460_v29 = vadd.f32 %v11262_v0, %v1392_v18  ;;  %v1394_v12 = vadd.f32 %v1386_v19, %v1354_v1  ;;  %v11275_v1 = vld [vmem:[#allocation110_spill] sm:$0xff]  ;;  %v11277_v2 = vld [vmem:[#allocation112_spill] sm:$0xff]  ;;  %v11280_v18 = vld [vmem:[#allocation105_spill] sm:$0xff]  ;;  %s8503_s11 = spop %6004 }
 0xb72   : > { %v1395_v34 = vadd.f32 %v1387_v20, %v1355_v62  ;;  %v1397_v6 = vadd.f32 %v1389_v22, %v1357_v4  ;;  %v1396_v30 = vadd.f32 %v1388_v21, %v1356_v8  ;;  %v1527_v33 = vadd.f32 %v11263_v42, %v1459_v23  ;;  %v11274_v62 = vld [vmem:[#allocation109_spill] sm:$0xff]  ;;  %v11276_v4 = vld [vmem:[#allocation111_spill] sm:$0xff]  ;;  %v11279_v17 = vld [vmem:[#allocation102_spill] sm:$0xff]  ;;  %s8505_s21 = spop %6006 }
 0xb73   : > { %v1526_v5 = vadd.f32 %v7923_v11, %v1458_v37  ;;  %v1529_v43 = vadd.f32 %v11264_v3, %v1461_v31  ;;  %v1528_v45 = vadd.f32 %v11265_v44, %v1460_v29  ;;  %v1462_v25 = vadd.f32 %v11267_v24, %v1394_v12  ;;  %v11278_v8 = vld [vmem:[#allocation101_spill] sm:$0xff]  ;;  %v11281_v19 = vld [vmem:[#allocation106_spill] sm:$0xff]  ;;  %v11284_v22 = vld [vmem:[#allocation119_spill] sm:$0xff]  ;;  %s8509_s20 = spop %6008 }
 0xb74   : > { %v1463_v47 = vadd.f32 %v11266_v46, %v1395_v34  ;;  %v1465_v26 = vadd.f32 %v11268_v13, %v1397_v6  ;;  %v1464_v48 = vadd.f32 %v11269_v27, %v1396_v30  ;;  %v1595_v49 = vadd.f32 %v7961_v10, %v1527_v33  ;;  %v11282_v20 = vld [vmem:[#allocation117_spill] sm:$0xff]  ;;  %v11283_v21 = vld [vmem:[#allocation118_spill] sm:$0xff]  ;;  %v11285_v23 = vld [vmem:[#allocation120_spill] sm:$0xff] }
 0xb75   : > { %v1594_v11 = vadd.f32 %v7963_v60, %v1526_v5  ;;  %v1597_v15 = vadd.f32 %v11270_v50, %v1529_v43  ;;  %v1596_v16 = vadd.f32 %v11271_v51, %v1528_v45  ;;  %v1530_v57 = vadd.f32 %v11273_v54, %v1462_v25  ;;  %v11286_v37 = vld [vmem:[#allocation107_spill] sm:$0xff]  ;;  %v11287_v31 = vld [vmem:[#allocation108_spill] sm:$0xff]  ;;  %v11288_v3 = vld [vmem:[#allocation113_spill] sm:$0xff] }
 0xb76   : > { %v1531_v53 = vadd.f32 %v11272_v52, %v1463_v47  ;;  %v1683_v58 = vstv %s8033_s24  ;;  %v1686_v59 = vstv %s8035_s27  ;;  %v1663_v63 = vadd.f32 %v11274_v62, %v1595_v49  ;;  %v11289_v44 = vld [vmem:[#allocation114_spill] sm:$0xff]  ;;  %v11290_v46 = vld [vmem:[#allocation115_spill] sm:$0xff]  ;;  %v11291_v24 = vld [vmem:[#allocation116_spill] sm:$0xff]  ;;  %s6889_s24 = smov 119  }
 0xb77   : > { %v1662_v55 = vadd.f32 %v11275_v1, %v1594_v11  ;;  %v1665_v10 = vadd.f32 %v11276_v4, %v1597_v15  ;;  %v1664_v60 = vadd.f32 %v11277_v2, %v1596_v16  ;;  %v1533_v41 = vadd.f32 %v11278_v8, %v1465_v26  ;;  %v11292_v13 = vld [vmem:[#allocation125_spill] sm:$0xff]  ;;  %v11293_v27 = vld [vmem:[#allocation126_spill] sm:$0xff]  ;;  %v11294_v49 = vld [vmem:[#allocation127_spill] sm:$0xff] }
 0xb78   : > { %v1532_v61 = vadd.f32 %v11279_v17, %v1464_v48  ;;  %v1599_v32 = vadd.f32 %v11280_v18, %v1531_v53  ;;  %v1598_v39 = vadd.f32 %v11281_v19, %v1530_v57  ;;  %v1694_v56 = vmul.f32 %v1683_v58, %v11282_v20  ;;  %v11295_v50 = vld [vmem:[#allocation128_spill] sm:$0xff]  ;;  %v11296_v51 = vld [vmem:[#allocation121_spill] sm:$0xff]  ;;  %v11297_v52 = vld [vmem:[#allocation122_spill] sm:$0xff] }
 0xb79   : > { %v1695_v36 = vmul.f32 %v1683_v58, %v11283_v21  ;;  %v1696_v40 = vmul.f32 %v1686_v59, %v11284_v22  ;;  %v1697_v38 = vmul.f32 %v1686_v59, %v11285_v23  ;;  %v1601_v7 = vadd.f32 %v11286_v37, %v1533_v41  ;;  %v11298_v54 = vld [vmem:[#allocation123_spill] sm:$0xff]  ;;  %v11299_v58 = vld [vmem:[#allocation124_spill] sm:$0xff]  ;;  %v11300_v62 = vld [vmem:[#allocation133_spill] sm:$0xff] }
 0xb7a   : > { %v1600_v0 = vadd.f32 %v11287_v31, %v1532_v61  ;;  %v1689_v29 = vstv %s8037_s22  ;;  %v1692_v34 = vstv %s8039_s25  ;;  %v1702_v42 = vadd.f32 %v1694_v56, %v1662_v55  ;;  %v11301_v1 = vld [vmem:[#allocation134_spill] sm:$0xff]  ;;  %v11302_v4 = vld [vmem:[#allocation135_spill] sm:$0xff]  ;;  %v11303_v2 = vld [vmem:[#allocation136_spill] sm:$0xff] }
 0xb7b   : > { %v1703_v30 = vadd.f32 %v1695_v36, %v1663_v63  ;;  %v1705_v33 = vadd.f32 %v1697_v38, %v1665_v10  ;;  %v1704_v5 = vadd.f32 %v1696_v40, %v1664_v60  ;;  %v1667_v43 = vadd.f32 %v11288_v3, %v1599_v32  ;;  %v11304_v19 = vld [vmem:[#allocation141_spill] sm:$0xff]  ;;  %v11305_v20 = vld [vmem:[#allocation142_spill] sm:$0xff]  ;;  %v11306_v21 = vld [vmem:[#allocation143_spill] sm:$0xff] }
 0xb7c   : > { %v1666_v45 = vadd.f32 %v11289_v44, %v1598_v39  ;;  %v1669_v47 = vadd.f32 %v11290_v46, %v1601_v7  ;;  %v1668_v25 = vadd.f32 %v11291_v24, %v1600_v0  ;;  %v1770_v48 = vadd.f32 %v11293_v27, %v1702_v42  ;;  %v11307_v22 = vld [vmem:[#allocation144_spill] sm:$0xff]  ;;  %v11308_v23 = vld [vmem:[#allocation129_spill] sm:$0xff]  ;;  %v11309_v37 = vld [vmem:[#allocation130_spill] sm:$0xff] }
 0xb7d   : > { %v1771_v26 = vadd.f32 %v11292_v13, %v1703_v30  ;;  %v1773_v11 = vadd.f32 %v11294_v49, %v1705_v33  ;;  %v1772_v15 = vadd.f32 %v11295_v50, %v1704_v5  ;;  %v1698_v16 = vmul.f32 %v1689_v29, %v11296_v51  ;;  %v11310_v31 = vld [vmem:[#allocation131_spill] sm:$0xff]  ;;  %v11312_v3 = vld [vmem:[#allocation137_spill] sm:$0xff]  ;;  %v11313_v44 = vld [vmem:[#allocation138_spill] sm:$0xff] }
 0xb7e   : > { %v1699_v53 = vmul.f32 %v1689_v29, %v11297_v52  ;;  %v1700_v57 = vmul.f32 %v1692_v34, %v11298_v54  ;;  %v1701_v59 = vmul.f32 %v1692_v34, %v11299_v58  ;;  %v1838_v55 = vadd.f32 %v11301_v1, %v1770_v48  ;;  %v11311_v29 = vld [vmem:[#allocation132_spill] sm:$0xff]  ;;  %v11314_v46 = vld [vmem:[#allocation139_spill] sm:$0xff]  ;;  %v11317_v49 = vld [vmem:[#allocation146_spill] sm:$0xff] }
 0xb7f   : > { %v1839_v63 = vadd.f32 %v11300_v62, %v1771_v26  ;;  %v1841_v10 = vadd.f32 %v11302_v4, %v1773_v11  ;;  %v1840_v60 = vadd.f32 %v11303_v2, %v1772_v15  ;;  %v1706_v41 = vadd.f32 %v1698_v16, %v1666_v45  ;;  %v11315_v24 = vld [vmem:[#allocation140_spill] sm:$0xff]  ;;  %v11318_v50 = vld [vmem:[#allocation147_spill] sm:$0xff] }
 0xb80   : > { %v1707_v8 = vadd.f32 %v1699_v53, %v1667_v43  ;;  %v1709_v17 = vadd.f32 %v1701_v59, %v1669_v47  ;;  %v1708_v61 = vadd.f32 %v1700_v57, %v1668_v25  ;;  %v1906_v56 = vadd.f32 %v11305_v20, %v1838_v55  ;;  %v11319_v51 = vld [vmem:[#allocation148_spill] sm:$0xff] }
 0xb81   : > { %v1907_v39 = vadd.f32 %v11304_v19, %v1839_v63  ;;  %v1909_v36 = vadd.f32 %v11306_v21, %v1841_v10  ;;  %v1908_v40 = vadd.f32 %v11307_v22, %v1840_v60  ;;  %v1774_v7 = vadd.f32 %v11309_v37, %v1706_v41 }
 0xb82   : > { %v1775_v38 = vadd.f32 %v11308_v23, %v1707_v8  ;;  %v1777_v0 = vadd.f32 %v11310_v31, %v1709_v17  ;;  %v1776_v34 = vadd.f32 %v11311_v29, %v1708_v61 }
 0xb83   : > { %v1842_v45 = vadd.f32 %v11313_v44, %v1774_v7 }
 0xb84   : > { %v1843_v43 = vadd.f32 %v11312_v3, %v1775_v38  ;;  %v1845_v47 = vadd.f32 %v11314_v46, %v1777_v0  ;;  %v1844_v25 = vadd.f32 %v11315_v24, %v1776_v34 }
 0xb85   : > { %v1910_v11 = vadd.f32 %v11317_v49, %v1842_v45 }
 0xb86   : > { %v1913_v15 = vadd.f32 %v11318_v50, %v1845_v47  ;;  %v1912_v16 = vadd.f32 %v11319_v51, %v1844_v25 }
 0xba9   : > { %v8349_v35 = vpop.permute.xlu1 %1952  ;;  %v8351_v9 = vpop.permute.xlu0 %1950 }
 0xbaa   : > { %v1975_v30 = vadd.f32 %v8349_v35, %v1907_v39  ;;  %v1974_v42 = vadd.f32 %v8351_v9, %v1906_v56 }
 0xbad   : > { %v8365_v28 = vpop.permute.xlu1 %1956  ;;  %v8367_v14 = vpop.permute.xlu0 %1954 }
 0xbae   : > { %v1977_v33 = vadd.f32 %v8365_v28, %v1909_v36  ;;  %v1976_v5 = vadd.f32 %v8367_v14, %v1908_v40  ;;  %v11316_v28 = vld [vmem:[#allocation145_spill] sm:$0xff] }
 0xbaf   : > { %v1911_v14 = vadd.f32 %v11316_v28, %v1843_v43 }
 0xbb1   : > { %v1961_v12 = vpop.permute.xlu1 %1960  ;;  %v1959_v6 = vpop.permute.xlu0 %1958 }
 0xbb2   : > { %v1979_v58 = vadd.f32 %v1961_v12, %v1911_v14  ;;  %v1978_v59 = vadd.f32 %v1959_v6, %v1910_v11 }
 0xbb5   : > { %v1965_v18 = vpop.permute.xlu1 %1964  ;;  %v1963_v32 = vpop.permute.xlu0 %1962 }
 0xbb6   : > { %v1981_v62 = vadd.f32 %v1965_v18, %v1913_v15  ;;  %v1980_v63 = vadd.f32 %v1963_v32, %v1912_v16 }
 0xbc6   : > { %v2012_v13 = vpop.permute.xlu1 %2011  ;;  %v2008_v26 = vpop.permute.xlu0 %2007 }
 0xbc7   : > { %v8425_v27 = vadd.f32 %v2012_v13, %v1976_v5  ;;  %v8427_v48 = vadd.f32 %v2012_v13, %v1977_v33  ;;  %v8429_v35 = vadd.f32 %v2008_v26, %v1974_v42  ;;  %v8431_v9 = vadd.f32 %v2008_v26, %v1975_v30 }
 0xbc9   : > { %v2040_v52 = vmul.f32 %v8425_v27, %v8425_v27  ;;  %v2041_v53 = vmul.f32 %v8427_v48, %v8427_v48  ;;  %v2038_v54 = vmul.f32 %v8429_v35, %v8429_v35  ;;  %v2039_v57 = vmul.f32 %v8431_v9, %v8431_v9 }
 0xbca   : > { %v2016_v1 = vpop.permute.xlu1 %2015  ;;  %v2020_v55 = vpop.permute.xlu0 %2019  ;;  %v2030_v28 = vmul.f32 0.5, %v8429_v35  ;;  %v2031_v11 = vmul.f32 0.5, %v8431_v9 }
 0xbcb   : > { %v2048_v4 = vmul.f32 %v2040_v52, %v8425_v27  ;;  %v2049_v10 = vmul.f32 %v2041_v53, %v8427_v48  ;;  %v2046_v2 = vmul.f32 %v2038_v54, %v8429_v35  ;;  %v2047_v60 = vmul.f32 %v2039_v57, %v8431_v9 }
 0xbcc   : > { %v8449_v8 = vadd.f32 %v2016_v1, %v1978_v59  ;;  %v8451_v41 = vadd.f32 %v2016_v1, %v1979_v58  ;;  %v8453_v17 = vadd.f32 %v2020_v55, %v1980_v63  ;;  %v8455_v12 = vadd.f32 %v2020_v55, %v1981_v62 }
 0xbcd   : > { %v2056_v6 = vmul.f32 0.044715, %v2048_v4  ;;  %v2057_v61 = vmul.f32 0.044715, %v2049_v10  ;;  %v2054_v18 = vmul.f32 0.044715, %v2046_v2 }
 0xbce   : > { %v2055_v32 = vmul.f32 0.044715, %v2047_v60  ;;  %v2042_v19 = vmul.f32 %v8449_v8, %v8449_v8  ;;  %v2043_v39 = vmul.f32 %v8451_v41, %v8451_v41  ;;  %v2044_v20 = vmul.f32 %v8453_v17, %v8453_v17 }
 0xbcf   : > { %v2064_v56 = vadd.f32 %v2056_v6, %v8425_v27  ;;  %v2065_v21 = vadd.f32 %v2057_v61, %v8427_v48  ;;  %v2062_v36 = vadd.f32 %v2054_v18, %v8429_v35  ;;  %v2045_v22 = vmul.f32 %v8455_v12, %v8455_v12 }
 0xbd0   : > { %v2063_v40 = vadd.f32 %v2055_v32, %v8431_v9  ;;  %v2050_v23 = vmul.f32 %v2042_v19, %v8449_v8  ;;  %v2051_v38 = vmul.f32 %v2043_v39, %v8451_v41  ;;  %v2052_v37 = vmul.f32 %v2044_v20, %v8453_v17  ;;  %v11320_v19 = vld [vmem:[#allocation149_spill] sm:$0xff]  ;;  %v11323_v39 = vld [vmem:[#allocation152_spill] sm:$0xff] }
 0xbd1   : > { %v2072_v7 = vmul.f32 0.7978846, %v2064_v56  ;;  %v2073_v31 = vmul.f32 0.7978846, %v2065_v21  ;;  %v2070_v0 = vmul.f32 0.7978846, %v2062_v36  ;;  %v2053_v29 = vmul.f32 %v2045_v22, %v8455_v12 }
 0xbd2   : > { %v2071_v34 = vmul.f32 0.7978846, %v2063_v40  ;;  %v2058_v30 = vmul.f32 0.044715, %v2050_v23  ;;  %v2059_v42 = vmul.f32 0.044715, %v2051_v38 }
 0xbd3   : > { %v2060_v33 = vmul.f32 0.044715, %v2052_v37  ;;  %v2061_v5 = vmul.f32 0.044715, %v2053_v29  ;;  %6535 = vtanh.f32 %v2070_v0  ;;  %v2032_v57 = vmul.f32 0.5, %v8425_v27 }
 0xbd4   : > { %v2066_v3 = vadd.f32 %v2058_v30, %v8449_v8  ;;  %v2067_v43 = vadd.f32 %v2059_v42, %v8451_v41  ;;  %6537 = vtanh.f32 %v2071_v34  ;;  %v2033_v59 = vmul.f32 0.5, %v8427_v48  ;;  %v8515_v42 = vld [vmem:[#allocation3 + $0x28] sm:$0xff] }
 0xbd5   : > { %v2068_v44 = vadd.f32 %v2060_v33, %v8453_v17  ;;  %v2069_v45 = vadd.f32 %v2061_v5, %v8455_v12  ;;  %6539 = vtanh.f32 %v2073_v31  ;;  %v2034_v4 = vmul.f32 0.5, %v8449_v8  ;;  %v11321_v8 = vld [vmem:[#allocation150_spill] sm:$0xff]  ;;  %v8507_v31 = vld [vmem:[#allocation3] sm:$0xff] }
 0xbd6   : > { %v2074_v46 = vmul.f32 0.7978846, %v2066_v3  ;;  %v2075_v47 = vmul.f32 0.7978846, %v2067_v43  ;;  %6541 = vtanh.f32 %v2072_v7  ;;  %v2035_v10 = vmul.f32 0.5, %v8451_v41  ;;  %v11322_v41 = vld [vmem:[#allocation151_spill] sm:$0xff] }
 0xbd7   : > { %v2076_v24 = vmul.f32 0.7978846, %v2068_v44  ;;  %v2077_v25 = vmul.f32 0.7978846, %v2069_v45  ;;  %v2036_v61 = vmul.f32 0.5, %v8453_v17  ;;  %v2037_v48 = vmul.f32 0.5, %v8455_v12 }
 0xbd8   : > { %6543 = vtanh.f32 %v2075_v47  ;;  %v8523_v44 = vld [vmem:[#allocation3 + $0x50] sm:$0xff] }
 0xbd9   : > { %6545 = vtanh.f32 %v2074_v46 }
 0xbda   : > { %6547 = vtanh.f32 %v2076_v24 }
 0xbdb   : > { %6549 = vtanh.f32 %v2077_v25  ;;  %v8531_v25 = vld [vmem:[#allocation3 + $0x78] sm:$0xff] }
 0xbdd   : > { %v6536_v13 = vpop.eup %6535 }
 0xbde   : > { %v6538_v26 = vpop.eup %6537  ;;  %v2086_v14 = vadd.f32 1.0, %v6536_v13 }
 0xbdf   : > { %v6540_v49 = vpop.eup %6539  ;;  %v2087_v50 = vadd.f32 1.0, %v6538_v26 }
 0xbe0   : > { %v6542_v15 = vpop.eup %6541  ;;  %v2094_v51 = vmul.f32 %v2086_v14, %v2030_v28  ;;  %v2089_v52 = vadd.f32 1.0, %v6540_v49 }
 0xbe1   : > { %v2095_v16 = vmul.f32 %v2087_v50, %v2031_v11  ;;  %v2088_v53 = vadd.f32 1.0, %v6542_v15 }
 0xbe2   : > { %v6544_v54 = vpop.eup %6543  ;;  %2132 = vrot.lane.b32.xlu1 %v2094_v51, %s6887_s2  ;;  %v2097_v1 = vmul.f32 %v2089_v52, %v2033_v59 }
 0xbe3   : > { %v6546_v58 = vpop.eup %6545  ;;  %2134 = vrot.lane.b32.xlu0 %v2095_v16, %s6887_s2  ;;  %v2096_v35 = vmul.f32 %v2088_v53, %v2032_v57  ;;  %v2091_v9 = vadd.f32 1.0, %v6544_v54 }
 0xbe4   : > { %v2090_v62 = vadd.f32 1.0, %v6546_v58  ;;  %v6548_v63 = vpop.eup %6547 }
 0xbe5   : > { %v6550_v55 = vpop.eup %6549  ;;  %v2092_v60 = vadd.f32 1.0, %v6548_v63  ;;  %v2099_v6 = vmul.f32 %v2091_v9, %v2035_v10 }
 0xbe6   : > { %2136 = vrot.lane.b32.xlu1 %v2096_v35, %s6887_s2  ;;  %v2098_v2 = vmul.f32 %v2090_v62, %v2034_v4  ;;  %v2093_v27 = vadd.f32 1.0, %v6550_v55 }
 0xbe7   : > { %2138 = vrot.lane.b32.xlu0 %v2097_v1, %s6887_s2  ;;  %v2100_v18 = vmul.f32 %v2092_v60, %v2036_v61 }
 0xbe8   : > { %v2101_v32 = vmul.f32 %v2093_v27, %v2037_v48 }
 0xbea   : > { %2140 = vrot.lane.b32.xlu1 %v2098_v2, %s6887_s2 }
 0xbeb   : > { %2142 = vrot.lane.b32.xlu0 %v2099_v6, %s6887_s2 }
 0xbee   : > { %2144 = vrot.lane.b32.xlu1 %v2100_v18, %s6887_s2 }
 0xbef   : > { %2146 = vrot.lane.b32.xlu0 %v2101_v32, %s6887_s2  ;;  %s11022_s2 = smov 123  }
 0xbf2   : > { %2209 = vrot.lane.b32.xlu1 %v11320_v19, %s11093_s0 }
 0xbf3   : > { %2211 = vrot.lane.b32.xlu0 %v11321_v8, %s11093_s0 }
 0xbf6   : > { %2213 = vrot.lane.b32.xlu1 %v11322_v41, %s11093_s0 }
 0xbf7   : > { %2215 = vrot.lane.b32.xlu0 %v11323_v39, %s11093_s0 }
 0xc54   : > { %v2133_v17 = vpop.permute.xlu1 %2132 }
 0xc55   : > { %2157 = vst.msk [vmem:[#allocation3 + $0x9] sm:$0xff] %vm2156_vm4, %v2133_v17  ;;  %v2135_v12 = vpop.permute.xlu0 %2134 }
 0xc56   : > { %2158 = vst.msk [vmem:[#allocation3 + $0x11] sm:$0xff] %vm2156_vm4, %v2135_v12 }
 0xc58   : > { %v2137_v20 = vpop.permute.xlu1 %2136 }
 0xc59   : > { %2159 = vst.msk [vmem:[#allocation3 + $0x31] sm:$0xff] %vm2156_vm4, %v2137_v20  ;;  %v2139_v56 = vpop.permute.xlu0 %2138 }
 0xc5a   : > { %2160 = vst.msk [vmem:[#allocation3 + $0x39] sm:$0xff] %vm2156_vm4, %v2139_v56 }
 0xc5c   : > { %v2141_v21 = vpop.permute.xlu1 %2140  ;;  %v8511_v0 = vld [vmem:[#allocation3 + $0x8] sm:$0xff] }
 0xc5d   : > { %2161 = vst.msk [vmem:[#allocation3 + $0x59] sm:$0xff] %vm2156_vm4, %v2141_v21  ;;  %v2143_v36 = vpop.permute.xlu0 %2142 }
 0xc5e   : > { %2162 = vst.msk [vmem:[#allocation3 + $0x61] sm:$0xff] %vm2156_vm4, %v2143_v36 }
 0xc60   : > { %v2145_v22 = vpop.permute.xlu1 %2144  ;;  %v8520_v3 = vld [vmem:[#allocation3 + $0x30] sm:$0xff] }
 0xc61   : > { %2163 = vst.msk [vmem:[#allocation3 + $0x81] sm:$0xff] %vm2156_vm4, %v2145_v22  ;;  %v2147_v40 = vpop.permute.xlu0 %2146 }
 0xc62   : > { %2164 = vst.msk [vmem:[#allocation3 + $0x89] sm:$0xff] %vm2156_vm4, %v2147_v40 }
 0xc64   : > { %v2210_v23 = vpop.permute.xlu1 %2209  ;;  %v8528_v47 = vld [vmem:[#allocation3 + $0x58] sm:$0xff] }
 0xc65   : > { %v2212_v38 = vpop.permute.xlu0 %2211  ;;  %6010 = vpush %v2210_v23 }
 0xc66   : > { %6012 = vpush %v2212_v38 }
 0xc68   : > { %v2214_v37 = vpop.permute.xlu1 %2213  ;;  %v8536_v28 = vld [vmem:[#allocation3 + $0x80] sm:$0xff] }
 0xc69   : > { %v2216_v7 = vpop.permute.xlu0 %2215  ;;  %6014 = vpush %v2214_v37 }
 0xc6a   : > { %6016 = vpush %v2216_v7 }
 0xc96   : > { %s6011_s10 = spop %6010 }
 0xc97   : > { %v2218_v29 = vstv %s6011_s10  ;;  %s6013_s13 = spop %6012 }
 0xc98   : > { %v2229_v34 = vmul.f32 %v2218_v29, %v8507_v31  ;;  %v2230_v30 = vmul.f32 %v2218_v29, %v8511_v0  ;;  %v2221_v33 = vstv %s6013_s13 }
 0xc99   : > { %v2231_v5 = vmul.f32 %v2221_v33, %v8515_v42  ;;  %v2232_v43 = vmul.f32 %v2221_v33, %v8520_v3 }
 0xc9a   : > { %2247 = vrot.lane.b32.xlu0 %v2230_v30, %s11072_s9  ;;  %2245 = vrot.lane.b32.xlu1 %v2229_v34, %s11072_s9  ;;  %s6015_s18 = spop %6014 }
 0xc9b   : > { %v2224_v45 = vstv %s6015_s18  ;;  %s6017_s12 = spop %6016  ;;  %s11020_s18 = smov 113  }
 0xc9c   : > { %v2233_v46 = vmul.f32 %v2224_v45, %v8523_v44  ;;  %v2234_v24 = vmul.f32 %v2224_v45, %v8528_v47  ;;  %v2227_v13 = vstv %s6017_s12  ;;  %v8629_v45 = vld [vmem:[#allocation11 + $0x18] sm:$0x7f] }
 0xc9d   : > { %v2235_v26 = vmul.f32 %v2227_v13, %v8531_v25  ;;  %v2236_v14 = vmul.f32 %v2227_v13, %v8536_v28 }
 0xc9e   : > { %2251 = vrot.lane.b32.xlu0 %v2232_v43, %s11072_s9  ;;  %2249 = vrot.lane.b32.xlu1 %v2231_v5, %s11072_s9  ;;  %v8621_v5 = vld [vmem:[#allocation11 + $0x8] sm:$0x7f]  ;;  %v8625_v43 = vld [vmem:[#allocation11] sm:$0x7f] }
 0xca2   : > { %2255 = vrot.lane.b32.xlu0 %v2234_v24, %s11072_s9  ;;  %2253 = vrot.lane.b32.xlu1 %v2233_v46, %s11072_s9  ;;  %v8633_v46 = vld [vmem:[#allocation11 + $0x10] sm:$0x7f] }
 0xca6   : > { %2259 = vrot.lane.b32.xlu0 %v2236_v14, %s11072_s9  ;;  %2257 = vrot.lane.b32.xlu1 %v2235_v26, %s11072_s9 }
 0xcaa   : > { %2279 = vrot.lane.b32.xlu0 %v11321_v8, %s11071_s17  ;;  %2277 = vrot.lane.b32.xlu1 %v11320_v19, %s11071_s17 }
 0xcae   : > { %2283 = vrot.lane.b32.xlu0 %v11323_v39, %s11071_s17  ;;  %2281 = vrot.lane.b32.xlu1 %v11322_v41, %s11071_s17 }
 0xd0c   : > { %v8549_v49 = vpop.permute.xlu1 %2245  ;;  %v8551_v11 = vpop.permute.xlu0 %2247 }
 0xd10   : > { %v8553_v50 = vpop.permute.xlu1 %2249  ;;  %v8555_v15 = vpop.permute.xlu0 %2251 }
 0xd14   : > { %v8557_v51 = vpop.permute.xlu1 %2253  ;;  %v8559_v16 = vpop.permute.xlu0 %2255 }
 0xd18   : > { %v8561_v52 = vpop.permute.xlu1 %2257  ;;  %v8563_v53 = vpop.permute.xlu0 %2259 }
 0xd19   : > { %11324 = vst [vmem:[#allocation29_spill] sm:$0xff] %v8561_v52  ;;  %11325 = vst [vmem:[#allocation30_spill] sm:$0xff] %v8563_v53 }
 0xd1c   : > { %v2278_v54 = vpop.permute.xlu1 %2277  ;;  %v2280_v57 = vpop.permute.xlu0 %2279 }
 0xd1d   : > { %6018 = vpush %v2278_v54 }
 0xd1e   : > { %6020 = vpush %v2280_v57 }
 0xd20   : > { %v2282_v58 = vpop.permute.xlu1 %2281  ;;  %v2284_v59 = vpop.permute.xlu0 %2283 }
 0xd21   : > { %6022 = vpush %v2282_v58 }
 0xd22   : > { %6024 = vpush %v2284_v59 }
 0xd4e   : > { %s6019_s1 = spop %6018 }
 0xd4f   : > { %v2286_v35 = vstv %s6019_s1  ;;  %s6021_s8 = spop %6020 }
 0xd50   : > { %v2297_v62 = vmul.f32 %v2286_v35, %v8507_v31  ;;  %v2298_v63 = vmul.f32 %v2286_v35, %v8511_v0  ;;  %v2289_v1 = vstv %s6021_s8 }
 0xd51   : > { %v2299_v9 = vmul.f32 %v2289_v1, %v8515_v42  ;;  %v2300_v55 = vmul.f32 %v2289_v1, %v8520_v3 }
 0xd52   : > { %2315 = vrot.lane.b32.xlu0 %v2298_v63, %s6888_s30  ;;  %2313 = vrot.lane.b32.xlu1 %v2297_v62, %s6888_s30  ;;  %s6023_s26 = spop %6022 }
 0xd53   : > { %v2292_v4 = vstv %s6023_s26  ;;  %s6025_s4 = spop %6024 }
 0xd54   : > { %v2301_v10 = vmul.f32 %v2292_v4, %v8523_v44  ;;  %v2302_v2 = vmul.f32 %v2292_v4, %v8528_v47  ;;  %v2295_v60 = vstv %s6025_s4  ;;  %s11018_s4 = smov 110  }
 0xd55   : > { %v2303_v6 = vmul.f32 %v2295_v60, %v8531_v25  ;;  %v2304_v27 = vmul.f32 %v2295_v60, %v8536_v28 }
 0xd56   : > { %2319 = vrot.lane.b32.xlu0 %v2300_v55, %s6888_s30  ;;  %2317 = vrot.lane.b32.xlu1 %v2299_v9, %s6888_s30 }
 0xd5a   : > { %2323 = vrot.lane.b32.xlu0 %v2302_v2, %s6888_s30  ;;  %2321 = vrot.lane.b32.xlu1 %v2301_v10, %s6888_s30 }
 0xd5e   : > { %2327 = vrot.lane.b32.xlu0 %v2304_v27, %s6888_s30  ;;  %2325 = vrot.lane.b32.xlu1 %v2303_v6, %s6888_s30 }
 0xd62   : > { %2347 = vrot.lane.b32.xlu0 %v11321_v8, %s11072_s9  ;;  %2345 = vrot.lane.b32.xlu1 %v11320_v19, %s11072_s9 }
 0xd66   : > { %2351 = vrot.lane.b32.xlu0 %v11323_v39, %s11072_s9  ;;  %2349 = vrot.lane.b32.xlu1 %v11322_v41, %s11072_s9 }
 0xdc4   : > { %v8589_v61 = vpop.permute.xlu1 %2313  ;;  %v8591_v48 = vpop.permute.xlu0 %2315 }
 0xdc8   : > { %v8593_v18 = vpop.permute.xlu1 %2317  ;;  %v8595_v32 = vpop.permute.xlu0 %2319 }
 0xdcc   : > { %v8597_v17 = vpop.permute.xlu1 %2321  ;;  %v8599_v8 = vpop.permute.xlu0 %2323 }
 0xdd0   : > { %v8601_v12 = vpop.permute.xlu1 %2325  ;;  %v8603_v19 = vpop.permute.xlu0 %2327 }
 0xdd1   : > { %11326 = vst [vmem:[#allocation31_spill] sm:$0xff] %v8601_v12  ;;  %11327 = vst [vmem:[#allocation32_spill] sm:$0xff] %v8603_v19 }
 0xdd4   : > { %v2346_v39 = vpop.permute.xlu1 %2345  ;;  %v2348_v20 = vpop.permute.xlu0 %2347 }
 0xdd5   : > { %6026 = vpush %v2346_v39 }
 0xdd6   : > { %6028 = vpush %v2348_v20 }
 0xdd8   : > { %v2350_v41 = vpop.permute.xlu1 %2349  ;;  %v2352_v56 = vpop.permute.xlu0 %2351 }
 0xdd9   : > { %6030 = vpush %v2350_v41 }
 0xdda   : > { %6032 = vpush %v2352_v56 }
 0xe06   : > { %s6027_s19 = spop %6026 }
 0xe07   : > { %v2354_v21 = vstv %s6027_s19  ;;  %s6029_s3 = spop %6028 }
 0xe08   : > { %v2365_v36 = vmul.f32 %v2354_v21, %v8507_v31  ;;  %v2366_v22 = vmul.f32 %v2354_v21, %v8511_v0  ;;  %v2357_v40 = vstv %s6029_s3 }
 0xe09   : > { %v2367_v23 = vmul.f32 %v2357_v40, %v8515_v42  ;;  %v2368_v38 = vmul.f32 %v2357_v40, %v8520_v3 }
 0xe0a   : > { %2383 = vrot.lane.b32.xlu0 %v2366_v22, %s6889_s24  ;;  %2381 = vrot.lane.b32.xlu1 %v2365_v36, %s6889_s24  ;;  %s6031_s27 = spop %6030 }
 0xe0b   : > { %v2360_v37 = vstv %s6031_s27  ;;  %s6033_s22 = spop %6032 }
 0xe0c   : > { %v2369_v7 = vmul.f32 %v2360_v37, %v8523_v44  ;;  %v2370_v29 = vmul.f32 %v2360_v37, %v8528_v47  ;;  %v2363_v34 = vstv %s6033_s22 }
 0xe0d   : > { %v2371_v30 = vmul.f32 %v2363_v34, %v8531_v25  ;;  %v2372_v33 = vmul.f32 %v2363_v34, %v8536_v28 }
 0xe0e   : > { %2387 = vrot.lane.b32.xlu0 %v2368_v38, %s6889_s24  ;;  %2385 = vrot.lane.b32.xlu1 %v2367_v23, %s6889_s24 }
 0xe12   : > { %2391 = vrot.lane.b32.xlu0 %v2370_v29, %s6889_s24  ;;  %2389 = vrot.lane.b32.xlu1 %v2369_v7, %s6889_s24 }
 0xe16   : > { %2395 = vrot.lane.b32.xlu0 %v2372_v33, %s6889_s24  ;;  %2393 = vrot.lane.b32.xlu1 %v2371_v30, %s6889_s24 }
 0xe1a   : > { %2415 = vrot.lane.b32.xlu0 %v8621_v5, %s11073_s29  ;;  %2413 = vrot.lane.b32.xlu1 %v8625_v43, %s11073_s29 }
 0xe1e   : > { %2419 = vrot.lane.b32.xlu0 %v8629_v45, %s11073_s29  ;;  %2417 = vrot.lane.b32.xlu1 %v8633_v46, %s11073_s29 }
 0xe7c   : > { %v8637_v24 = vpop.permute.xlu1 %2381  ;;  %v8639_v13 = vpop.permute.xlu0 %2383 }
 0xe80   : > { %v8641_v26 = vpop.permute.xlu1 %2385  ;;  %v8643_v14 = vpop.permute.xlu0 %2387 }
 0xe84   : > { %v8645_v54 = vpop.permute.xlu1 %2389  ;;  %v8647_v57 = vpop.permute.xlu0 %2391 }
 0xe88   : > { %v8649_v58 = vpop.permute.xlu1 %2393  ;;  %v8651_v59 = vpop.permute.xlu0 %2395 }
 0xe89   : > { %11328 = vst [vmem:[#allocation33_spill] sm:$0xff] %v8649_v58  ;;  %11329 = vst [vmem:[#allocation34_spill] sm:$0xff] %v8651_v59 }
 0xe8c   : > { %v2414_v35 = vpop.permute.xlu1 %2413  ;;  %v2416_v62 = vpop.permute.xlu0 %2415 }
 0xe8d   : > { %6034 = vpush %v2414_v35 }
 0xe8e   : > { %6036 = vpush %v2416_v62 }
 0xe90   : > { %v2418_v63 = vpop.permute.xlu1 %2417  ;;  %v2420_v1 = vpop.permute.xlu0 %2419 }
 0xe91   : > { %6038 = vpush %v2418_v63 }
 0xe92   : > { %6040 = vpush %v2420_v1 }
 0xebe   : > { %s6035_s25 = spop %6034 }
 0xebf   : > { %v2422_v9 = vstv %s6035_s25  ;;  %s6037_s23 = spop %6036 }
 0xec0   : > { %v2433_v55 = vmul.f32 %v2422_v9, %v8507_v31  ;;  %v2434_v4 = vmul.f32 %v2422_v9, %v8511_v0  ;;  %v2425_v10 = vstv %s6037_s23 }
 0xec1   : > { %v2435_v2 = vmul.f32 %v2425_v10, %v8515_v42  ;;  %v2436_v60 = vmul.f32 %v2425_v10, %v8520_v3 }
 0xec2   : > { %2451 = vrot.lane.b32.xlu0 %v2434_v4, %s11024_s7  ;;  %2449 = vrot.lane.b32.xlu1 %v2433_v55, %s11024_s7  ;;  %s6039_s16 = spop %6038 }
 0xec3   : > { %v2428_v6 = vstv %s6039_s16  ;;  %s6041_s15 = spop %6040 }
 0xec4   : > { %v2437_v27 = vmul.f32 %v2428_v6, %v8523_v44  ;;  %v2438_v39 = vmul.f32 %v2428_v6, %v8528_v47  ;;  %v2431_v20 = vstv %s6041_s15 }
 0xec5   : > { %v2439_v41 = vmul.f32 %v2431_v20, %v8531_v25  ;;  %v2440_v56 = vmul.f32 %v2431_v20, %v8536_v28 }
 0xec6   : > { %2455 = vrot.lane.b32.xlu0 %v2436_v60, %s11024_s7  ;;  %2453 = vrot.lane.b32.xlu1 %v2435_v2, %s11024_s7 }
 0xeca   : > { %2459 = vrot.lane.b32.xlu0 %v2438_v39, %s11024_s7  ;;  %2457 = vrot.lane.b32.xlu1 %v2437_v27, %s11024_s7 }
 0xece   : > { %2463 = vrot.lane.b32.xlu0 %v2440_v56, %s11024_s7  ;;  %2461 = vrot.lane.b32.xlu1 %v2439_v41, %s11024_s7 }
 0xed2   : > { %2483 = vrot.lane.b32.xlu0 %v8621_v5, %s11022_s2  ;;  %2481 = vrot.lane.b32.xlu1 %v8625_v43, %s11022_s2 }
 0xed6   : > { %2487 = vrot.lane.b32.xlu0 %v8629_v45, %s11022_s2  ;;  %2485 = vrot.lane.b32.xlu1 %v8633_v46, %s11022_s2 }
 0xf34   : > { %v8677_v21 = vpop.permute.xlu1 %2449  ;;  %v8679_v36 = vpop.permute.xlu0 %2451 }
 0xf38   : > { %v8681_v22 = vpop.permute.xlu1 %2453  ;;  %v8683_v40 = vpop.permute.xlu0 %2455 }
 0xf3c   : > { %v8685_v23 = vpop.permute.xlu1 %2457  ;;  %v8687_v38 = vpop.permute.xlu0 %2459 }
 0xf40   : > { %v8689_v37 = vpop.permute.xlu1 %2461  ;;  %v8691_v7 = vpop.permute.xlu0 %2463 }
 0xf41   : > { %11330 = vst [vmem:[#allocation35_spill] sm:$0xff] %v8689_v37  ;;  %11331 = vst [vmem:[#allocation36_spill] sm:$0xff] %v8691_v7  ;;  %v8823_v37 = vld [vmem:[#allocation3 + $0x83] sm:$0xff] }
 0xf44   : > { %v2482_v29 = vpop.permute.xlu1 %2481  ;;  %v2484_v34 = vpop.permute.xlu0 %2483 }
 0xf45   : > { %6042 = vpush %v2482_v29 }
 0xf46   : > { %6044 = vpush %v2484_v34 }
 0xf48   : > { %v2486_v30 = vpop.permute.xlu1 %2485  ;;  %v2488_v33 = vpop.permute.xlu0 %2487 }
 0xf49   : > { %6046 = vpush %v2486_v30 }
 0xf4a   : > { %6048 = vpush %v2488_v33 }
 0xf76   : > { %s6043_s10 = spop %6042 }
 0xf77   : > { %v2490_v35 = vstv %s6043_s10  ;;  %s6045_s13 = spop %6044 }
 0xf78   : > { %v2501_v62 = vmul.f32 %v2490_v35, %v8507_v31  ;;  %v2502_v63 = vmul.f32 %v2490_v35, %v8511_v0  ;;  %v2493_v1 = vstv %s6045_s13 }
 0xf79   : > { %v2503_v9 = vmul.f32 %v2493_v1, %v8515_v42  ;;  %v2504_v55 = vmul.f32 %v2493_v1, %v8520_v3 }
 0xf7a   : > { %2519 = vrot.lane.b32.xlu0 %v2502_v63, %s11020_s18  ;;  %2517 = vrot.lane.b32.xlu1 %v2501_v62, %s11020_s18  ;;  %s6047_s12 = spop %6046  ;;  %v8734_v63 = vrot.slane %v8625_v43, 1 }
 0xf7b   : > { %v2496_v4 = vstv %s6047_s12  ;;  %s6049_s1 = spop %6048 }
 0xf7c   : > { %v2505_v10 = vmul.f32 %v2496_v4, %v8523_v44  ;;  %v2506_v2 = vmul.f32 %v2496_v4, %v8528_v47  ;;  %v2499_v60 = vstv %s6049_s1  ;;  %v8740_v4 = vrot.slane %v8633_v46, 1 }
 0xf7d   : > { %v2507_v6 = vmul.f32 %v2499_v60, %v8531_v25  ;;  %v2508_v27 = vmul.f32 %v2499_v60, %v8536_v28 }
 0xf7e   : > { %2523 = vrot.lane.b32.xlu0 %v2504_v55, %s11020_s18  ;;  %2521 = vrot.lane.b32.xlu1 %v2503_v9, %s11020_s18  ;;  %v8737_v55 = vrot.slane %v8621_v5, 1 }
 0xf82   : > { %2527 = vrot.lane.b32.xlu0 %v2506_v2, %s11020_s18  ;;  %2525 = vrot.lane.b32.xlu1 %v2505_v10, %s11020_s18  ;;  %v8743_v10 = vrot.slane %v8629_v45, 1 }
 0xf86   : > { %2531 = vrot.lane.b32.xlu0 %v2508_v27, %s11020_s18  ;;  %2529 = vrot.lane.b32.xlu1 %v2507_v6, %s11020_s18 }
 0xf8a   : > { %2551 = vrot.lane.b32.xlu0 %v8621_v5, %s6888_s30  ;;  %2549 = vrot.lane.b32.xlu1 %v8625_v43, %s6888_s30 }
 0xf8e   : > { %2555 = vrot.lane.b32.xlu0 %v8629_v45, %s6888_s30  ;;  %2553 = vrot.lane.b32.xlu1 %v8633_v46, %s6888_s30 }
 0xfec   : > { %v8717_v39 = vpop.permute.xlu1 %2517  ;;  %v8719_v20 = vpop.permute.xlu0 %2519 }
 0xff0   : > { %v8721_v41 = vpop.permute.xlu1 %2521  ;;  %v8723_v56 = vpop.permute.xlu0 %2523 }
 0xff4   : > { %v8725_v29 = vpop.permute.xlu1 %2525  ;;  %v8727_v34 = vpop.permute.xlu0 %2527 }
 0xff8   : > { %v8729_v30 = vpop.permute.xlu1 %2529  ;;  %v8731_v33 = vpop.permute.xlu0 %2531 }
 0xff9   : > { %11332 = vst [vmem:[#allocation37_spill] sm:$0xff] %v8729_v30  ;;  %11333 = vst [vmem:[#allocation38_spill] sm:$0xff] %v8731_v33 }
 0xffc   : > { %v2550_v35 = vpop.permute.xlu1 %2549  ;;  %v2552_v62 = vpop.permute.xlu0 %2551 }
 0xffd   : > { %6050 = vpush %v2550_v35 }
 0xffe   : > { %6052 = vpush %v2552_v62 }
0x1000   : > { %v2554_v1 = vpop.permute.xlu1 %2553  ;;  %v2556_v9 = vpop.permute.xlu0 %2555 }
0x1001   : > { %6054 = vpush %v2554_v1 }
0x1002   : > { %6056 = vpush %v2556_v9 }
0x1003   : > { %6058 = vpush %v8734_v63 }
0x1004   : > { %6060 = vpush %v8737_v55 }
0x1005   : > { %6062 = vpush %v8740_v4 }
0x1006   : > { %6064 = vpush %v8743_v10 }
0x102e   : > { %s6051_s8 = spop %6050 }
0x102f   : > { %v2558_v2 = vstv %s6051_s8  ;;  %s6053_s26 = spop %6052 }
0x1030   : > { %v2569_v60 = vmul.f32 %v2558_v2, %v8507_v31  ;;  %v2570_v6 = vmul.f32 %v2558_v2, %v8511_v0  ;;  %v2561_v27 = vstv %s6053_s26 }
0x1031   : > { %v2571_v35 = vmul.f32 %v2561_v27, %v8515_v42  ;;  %v2572_v62 = vmul.f32 %v2561_v27, %v8520_v3 }
0x1032   : > { %2587 = vrot.lane.b32.xlu0 %v2570_v6, %s11018_s4  ;;  %2585 = vrot.lane.b32.xlu1 %v2569_v60, %s11018_s4  ;;  %s6055_s19 = spop %6054 }
0x1033   : > { %v2564_v1 = vstv %s6055_s19  ;;  %s6057_s3 = spop %6056 }
0x1034   : > { %v2573_v9 = vmul.f32 %v2564_v1, %v8523_v44  ;;  %v2574_v31 = vmul.f32 %v2564_v1, %v8528_v47  ;;  %v2567_v0 = vstv %s6057_s3  ;;  %s8789_s27 = spop %6058 }
0x1035   : > { %v2575_v42 = vmul.f32 %v2567_v0, %v8531_v25  ;;  %v2576_v2 = vmul.f32 %v2567_v0, %v8536_v28  ;;  %s8791_s22 = spop %6060  ;;  %v8799_v0 = vld [vmem:[#allocation3 + $0xb] sm:$0xff] }
0x1036   : > { %2591 = vrot.lane.b32.xlu0 %v2572_v62, %s11018_s4  ;;  %2589 = vrot.lane.b32.xlu1 %v2571_v35, %s11018_s4  ;;  %s8793_s25 = spop %6062 }
0x1037   : > { %s8795_s23 = spop %6064 }
0x103a   : > { %2595 = vrot.lane.b32.xlu0 %v2574_v31, %s11018_s4  ;;  %2593 = vrot.lane.b32.xlu1 %v2573_v9, %s11018_s4  ;;  %v8797_v31 = vld [vmem:[#allocation3 + $0x3] sm:$0xff] }
0x103e   : > { %2599 = vrot.lane.b32.xlu0 %v2576_v2, %s11018_s4  ;;  %2597 = vrot.lane.b32.xlu1 %v2575_v42, %s11018_s4 }
0x1042   : > { %2659 = vrot.lane.b32.xlu0 %v8737_v55, %s11093_s0  ;;  %2657 = vrot.lane.b32.xlu1 %v8734_v63, %s11093_s0 }
0x1046   : > { %2663 = vrot.lane.b32.xlu0 %v8743_v10, %s11093_s0  ;;  %2661 = vrot.lane.b32.xlu1 %v8740_v4, %s11093_s0 }
0x10a4   : > { %v8773_v3 = vpop.permute.xlu1 %2585  ;;  %v8775_v44 = vpop.permute.xlu0 %2587 }
0x10a8   : > { %v8777_v47 = vpop.permute.xlu1 %2589  ;;  %v8779_v25 = vpop.permute.xlu0 %2591 }
0x10ac   : > { %v8781_v28 = vpop.permute.xlu1 %2593  ;;  %v8783_v60 = vpop.permute.xlu0 %2595 }
0x10ad   : > { %11334 = vst [vmem:[#allocation39_spill] sm:$0xff] %v8783_v60 }
0x10b0   : > { %v8785_v6 = vpop.permute.xlu1 %2597  ;;  %v8787_v27 = vpop.permute.xlu0 %2599 }
0x10b1   : > { %11335 = vst [vmem:[#allocation40_spill] sm:$0xff] %v8785_v6  ;;  %11336 = vst [vmem:[#allocation41_spill] sm:$0xff] %v8787_v27 }
0x10b4   : > { %v2658_v35 = vpop.permute.xlu1 %2657  ;;  %v2660_v62 = vpop.permute.xlu0 %2659 }
0x10b5   : > { %6066 = vpush %v2658_v35 }
0x10b6   : > { %6068 = vpush %v2660_v62 }
0x10b8   : > { %v2662_v1 = vpop.permute.xlu1 %2661  ;;  %v2664_v9 = vpop.permute.xlu0 %2663 }
0x10b9   : > { %6070 = vpush %v2662_v1  ;;  %v8805_v1 = vld [vmem:[#allocation3 + $0x2b] sm:$0xff] }
0x10ba   : > { %6072 = vpush %v2664_v9  ;;  %v8807_v9 = vld [vmem:[#allocation3 + $0x33] sm:$0xff] }
0x10e6   : > { %s6067_s16 = spop %6066 }
0x10e7   : > { %v2666_v42 = vstv %s6067_s16  ;;  %s6069_s15 = spop %6068 }
0x10e8   : > { %v2677_v2 = vmul.f32 %v2666_v42, %v8797_v31  ;;  %v2678_v35 = vmul.f32 %v2666_v42, %v8799_v0  ;;  %v2669_v62 = vstv %s6069_s15  ;;  %v8813_v42 = vld [vmem:[#allocation3 + $0x53] sm:$0xff] }
0x10e9   : > { %v2679_v27 = vmul.f32 %v2669_v62, %v8805_v1  ;;  %v2680_v6 = vmul.f32 %v2669_v62, %v8807_v9  ;;  %v8821_v62 = vld [vmem:[#allocation3 + $0x7b] sm:$0xff] }
0x10ea   : > { %2695 = vrot.lane.b32.xlu0 %v2678_v35, %s11072_s9  ;;  %2693 = vrot.lane.b32.xlu1 %v2677_v2, %s11072_s9  ;;  %s6071_s10 = spop %6070  ;;  %v8815_v35 = vld [vmem:[#allocation3 + $0x5b] sm:$0xff] }
0x10eb   : > { %v2672_v33 = vstv %s6071_s10  ;;  %s6073_s13 = spop %6072 }
0x10ec   : > { %v2681_v2 = vmul.f32 %v2672_v33, %v8813_v42  ;;  %v2682_v30 = vmul.f32 %v2672_v33, %v8815_v35  ;;  %v2675_v7 = vstv %s6073_s13 }
0x10ee   : > { %2699 = vrot.lane.b32.xlu0 %v2680_v6, %s11072_s9  ;;  %2697 = vrot.lane.b32.xlu1 %v2679_v27, %s11072_s9  ;;  %v2683_v6 = vmul.f32 %v2675_v7, %v8821_v62  ;;  %v2684_v27 = vmul.f32 %v2675_v7, %v8823_v37 }
0x10f2   : > { %2703 = vrot.lane.b32.xlu0 %v2682_v30, %s11072_s9  ;;  %2701 = vrot.lane.b32.xlu1 %v2681_v2, %s11072_s9 }
0x10f6   : > { %2707 = vrot.lane.b32.xlu0 %v2684_v27, %s11072_s9  ;;  %2705 = vrot.lane.b32.xlu1 %v2683_v6, %s11072_s9 }
0x10fa   : > { %2727 = vrot.lane.b32.xlu0 %v8737_v55, %s11071_s17  ;;  %2725 = vrot.lane.b32.xlu1 %v8734_v63, %s11071_s17 }
0x10fe   : > { %2731 = vrot.lane.b32.xlu0 %v8743_v10, %s11071_s17  ;;  %2729 = vrot.lane.b32.xlu1 %v8740_v4, %s11071_s17 }
0x115c   : > { %v8837_v30 = vpop.permute.xlu1 %2693  ;;  %v8839_v33 = vpop.permute.xlu0 %2695 }
0x1160   : > { %v8841_v7 = vpop.permute.xlu1 %2697  ;;  %v8843_v2 = vpop.permute.xlu0 %2699 }
0x1161   : > { %11337 = vst [vmem:[#allocation42_spill] sm:$0xff] %v8841_v7  ;;  %11338 = vst [vmem:[#allocation43_spill] sm:$0xff] %v8843_v2 }
0x1164   : > { %v8845_v6 = vpop.permute.xlu1 %2701  ;;  %v8847_v27 = vpop.permute.xlu0 %2703 }
0x1165   : > { %11339 = vst [vmem:[#allocation44_spill] sm:$0xff] %v8845_v6  ;;  %11340 = vst [vmem:[#allocation45_spill] sm:$0xff] %v8847_v27 }
0x1168   : > { %v8849_v59 = vpop.permute.xlu1 %2705  ;;  %v8851_v58 = vpop.permute.xlu0 %2707 }
0x1169   : > { %11341 = vst [vmem:[#allocation46_spill] sm:$0xff] %v8849_v59  ;;  %11342 = vst [vmem:[#allocation47_spill] sm:$0xff] %v8851_v58 }
0x116c   : > { %v2726_v19 = vpop.permute.xlu1 %2725  ;;  %v2728_v12 = vpop.permute.xlu0 %2727 }
0x116d   : > { %6074 = vpush %v2726_v19 }
0x116e   : > { %6076 = vpush %v2728_v12 }
0x1170   : > { %v2730_v53 = vpop.permute.xlu1 %2729  ;;  %v2732_v52 = vpop.permute.xlu0 %2731 }
0x1171   : > { %6078 = vpush %v2730_v53 }
0x1172   : > { %6080 = vpush %v2732_v52 }
0x119e   : > { %s6075_s12 = spop %6074 }
0x119f   : > { %v2734_v7 = vstv %s6075_s12  ;;  %s6077_s1 = spop %6076 }
0x11a0   : > { %v2745_v2 = vmul.f32 %v2734_v7, %v8797_v31  ;;  %v2746_v6 = vmul.f32 %v2734_v7, %v8799_v0  ;;  %v2737_v27 = vstv %s6077_s1 }
0x11a1   : > { %v2747_v19 = vmul.f32 %v2737_v27, %v8805_v1  ;;  %v2748_v12 = vmul.f32 %v2737_v27, %v8807_v9 }
0x11a2   : > { %2763 = vrot.lane.b32.xlu0 %v2746_v6, %s6888_s30  ;;  %2761 = vrot.lane.b32.xlu1 %v2745_v2, %s6888_s30  ;;  %s6079_s8 = spop %6078 }
0x11a3   : > { %v2740_v58 = vstv %s6079_s8  ;;  %s6081_s26 = spop %6080 }
0x11a4   : > { %v2749_v52 = vmul.f32 %v2740_v58, %v8813_v42  ;;  %v2750_v53 = vmul.f32 %v2740_v58, %v8815_v35  ;;  %v2743_v7 = vstv %s6081_s26 }
0x11a5   : > { %v2751_v2 = vmul.f32 %v2743_v7, %v8821_v62  ;;  %v2752_v6 = vmul.f32 %v2743_v7, %v8823_v37 }
0x11a6   : > { %2767 = vrot.lane.b32.xlu0 %v2748_v12, %s6888_s30  ;;  %2765 = vrot.lane.b32.xlu1 %v2747_v19, %s6888_s30 }
0x11aa   : > { %2771 = vrot.lane.b32.xlu0 %v2750_v53, %s6888_s30  ;;  %2769 = vrot.lane.b32.xlu1 %v2749_v52, %s6888_s30 }
0x11ae   : > { %2775 = vrot.lane.b32.xlu0 %v2752_v6, %s6888_s30  ;;  %2773 = vrot.lane.b32.xlu1 %v2751_v2, %s6888_s30 }
0x11b2   : > { %2795 = vrot.lane.b32.xlu0 %v8737_v55, %s11072_s9  ;;  %2793 = vrot.lane.b32.xlu1 %v8734_v63, %s11072_s9 }
0x11b6   : > { %2799 = vrot.lane.b32.xlu0 %v8743_v10, %s11072_s9  ;;  %2797 = vrot.lane.b32.xlu1 %v8740_v4, %s11072_s9 }
0x1214   : > { %v8877_v58 = vpop.permute.xlu1 %2761  ;;  %v8879_v27 = vpop.permute.xlu0 %2763 }
0x1215   : > { %11343 = vst [vmem:[#allocation48_spill] sm:$0xff] %v8877_v58  ;;  %11344 = vst [vmem:[#allocation49_spill] sm:$0xff] %v8879_v27 }
0x1218   : > { %v8881_v19 = vpop.permute.xlu1 %2765  ;;  %v8883_v12 = vpop.permute.xlu0 %2767 }
0x1219   : > { %11345 = vst [vmem:[#allocation50_spill] sm:$0xff] %v8881_v19  ;;  %11346 = vst [vmem:[#allocation51_spill] sm:$0xff] %v8883_v12 }
0x121c   : > { %v8885_v52 = vpop.permute.xlu1 %2769  ;;  %v8887_v53 = vpop.permute.xlu0 %2771 }
0x121d   : > { %11347 = vst [vmem:[#allocation52_spill] sm:$0xff] %v8885_v52  ;;  %11348 = vst [vmem:[#allocation53_spill] sm:$0xff] %v8887_v53 }
0x1220   : > { %v8889_v7 = vpop.permute.xlu1 %2773  ;;  %v8891_v2 = vpop.permute.xlu0 %2775 }
0x1221   : > { %11349 = vst [vmem:[#allocation54_spill] sm:$0xff] %v8889_v7  ;;  %11350 = vst [vmem:[#allocation55_spill] sm:$0xff] %v8891_v2 }
0x1224   : > { %v2794_v6 = vpop.permute.xlu1 %2793  ;;  %v2796_v59 = vpop.permute.xlu0 %2795 }
0x1225   : > { %6082 = vpush %v2794_v6 }
0x1226   : > { %6084 = vpush %v2796_v59 }
0x1228   : > { %v2798_v60 = vpop.permute.xlu1 %2797  ;;  %v2800_v58 = vpop.permute.xlu0 %2799 }
0x1229   : > { %6086 = vpush %v2798_v60 }
0x122a   : > { %6088 = vpush %v2800_v58 }
0x1256   : > { %s6083_s19 = spop %6082 }
0x1257   : > { %v2802_v19 = vstv %s6083_s19  ;;  %s6085_s3 = spop %6084 }
0x1258   : > { %v2813_v12 = vmul.f32 %v2802_v19, %v8797_v31  ;;  %v2814_v52 = vmul.f32 %v2802_v19, %v8799_v0  ;;  %v2805_v53 = vstv %s6085_s3 }
0x1259   : > { %v2815_v6 = vmul.f32 %v2805_v53, %v8805_v1  ;;  %v2816_v59 = vmul.f32 %v2805_v53, %v8807_v9 }
0x125a   : > { %2831 = vrot.lane.b32.xlu0 %v2814_v52, %s6889_s24  ;;  %2829 = vrot.lane.b32.xlu1 %v2813_v12, %s6889_s24  ;;  %s6087_s16 = spop %6086 }
0x125b   : > { %v2808_v2 = vstv %s6087_s16  ;;  %s6089_s15 = spop %6088 }
0x125c   : > { %v2817_v60 = vmul.f32 %v2808_v2, %v8813_v42  ;;  %v2818_v58 = vmul.f32 %v2808_v2, %v8815_v35  ;;  %v2811_v19 = vstv %s6089_s15 }
0x125d   : > { %v2819_v12 = vmul.f32 %v2811_v19, %v8821_v62  ;;  %v2820_v52 = vmul.f32 %v2811_v19, %v8823_v37 }
0x125e   : > { %2835 = vrot.lane.b32.xlu0 %v2816_v59, %s6889_s24  ;;  %2833 = vrot.lane.b32.xlu1 %v2815_v6, %s6889_s24 }
0x1262   : > { %2839 = vrot.lane.b32.xlu0 %v2818_v58, %s6889_s24  ;;  %2837 = vrot.lane.b32.xlu1 %v2817_v60, %s6889_s24 }
0x1266   : > { %2843 = vrot.lane.b32.xlu0 %v2820_v52, %s6889_s24  ;;  %2841 = vrot.lane.b32.xlu1 %v2819_v12, %s6889_s24 }
0x126a   : > { %2863 = vrot.lane.b32.xlu0 %v8737_v55, %s11073_s29  ;;  %2861 = vrot.lane.b32.xlu1 %v8734_v63, %s11073_s29 }
0x126e   : > { %2867 = vrot.lane.b32.xlu0 %v8743_v10, %s11073_s29  ;;  %2865 = vrot.lane.b32.xlu1 %v8740_v4, %s11073_s29 }
0x12cc   : > { %v8917_v53 = vpop.permute.xlu1 %2829  ;;  %v8919_v2 = vpop.permute.xlu0 %2831 }
0x12cd   : > { %11351 = vst [vmem:[#allocation56_spill] sm:$0xff] %v8917_v53  ;;  %11352 = vst [vmem:[#allocation57_spill] sm:$0xff] %v8919_v2 }
0x12d0   : > { %v8921_v6 = vpop.permute.xlu1 %2833  ;;  %v8923_v59 = vpop.permute.xlu0 %2835 }
0x12d1   : > { %11353 = vst [vmem:[#allocation58_spill] sm:$0xff] %v8921_v6  ;;  %11354 = vst [vmem:[#allocation59_spill] sm:$0xff] %v8923_v59 }
0x12d4   : > { %v8925_v60 = vpop.permute.xlu1 %2837  ;;  %v8927_v58 = vpop.permute.xlu0 %2839 }
0x12d5   : > { %11355 = vst [vmem:[#allocation60_spill] sm:$0xff] %v8925_v60  ;;  %11356 = vst [vmem:[#allocation61_spill] sm:$0xff] %v8927_v58 }
0x12d8   : > { %v8929_v19 = vpop.permute.xlu1 %2841  ;;  %v8931_v12 = vpop.permute.xlu0 %2843 }
0x12d9   : > { %11357 = vst [vmem:[#allocation62_spill] sm:$0xff] %v8929_v19  ;;  %11358 = vst [vmem:[#allocation64_spill] sm:$0xff] %v8931_v12 }
0x12dc   : > { %v2862_v52 = vpop.permute.xlu1 %2861  ;;  %v2864_v7 = vpop.permute.xlu0 %2863 }
0x12dd   : > { %6090 = vpush %v2862_v52 }
0x12de   : > { %6092 = vpush %v2864_v7 }
0x12e0   : > { %v2866_v27 = vpop.permute.xlu1 %2865  ;;  %v2868_v53 = vpop.permute.xlu0 %2867 }
0x12e1   : > { %6094 = vpush %v2866_v27 }
0x12e2   : > { %6096 = vpush %v2868_v53 }
0x130e   : > { %s6091_s10 = spop %6090 }
0x130f   : > { %v2870_v6 = vstv %s6091_s10  ;;  %s6093_s13 = spop %6092 }
0x1310   : > { %v2881_v59 = vmul.f32 %v2870_v6, %v8797_v31  ;;  %v2882_v60 = vmul.f32 %v2870_v6, %v8799_v0  ;;  %v2873_v58 = vstv %s6093_s13 }
0x1311   : > { %v2883_v52 = vmul.f32 %v2873_v58, %v8805_v1  ;;  %v2884_v7 = vmul.f32 %v2873_v58, %v8807_v9 }
0x1312   : > { %2899 = vrot.lane.b32.xlu0 %v2882_v60, %s11024_s7  ;;  %2897 = vrot.lane.b32.xlu1 %v2881_v59, %s11024_s7  ;;  %s6095_s12 = spop %6094 }
0x1313   : > { %v2876_v12 = vstv %s6095_s12  ;;  %s6097_s1 = spop %6096 }
0x1314   : > { %v2885_v27 = vmul.f32 %v2876_v12, %v8813_v42  ;;  %v2886_v53 = vmul.f32 %v2876_v12, %v8815_v35  ;;  %v2879_v6 = vstv %s6097_s1 }
0x1315   : > { %v2887_v59 = vmul.f32 %v2879_v6, %v8821_v62  ;;  %v2888_v60 = vmul.f32 %v2879_v6, %v8823_v37 }
0x1316   : > { %2903 = vrot.lane.b32.xlu0 %v2884_v7, %s11024_s7  ;;  %2901 = vrot.lane.b32.xlu1 %v2883_v52, %s11024_s7 }
0x131a   : > { %2907 = vrot.lane.b32.xlu0 %v2886_v53, %s11024_s7  ;;  %2905 = vrot.lane.b32.xlu1 %v2885_v27, %s11024_s7 }
0x131e   : > { %2911 = vrot.lane.b32.xlu0 %v2888_v60, %s11024_s7  ;;  %2909 = vrot.lane.b32.xlu1 %v2887_v59, %s11024_s7 }
0x1322   : > { %2931 = vrot.lane.b32.xlu0 %v8737_v55, %s11022_s2  ;;  %2929 = vrot.lane.b32.xlu1 %v8734_v63, %s11022_s2 }
0x1326   : > { %2935 = vrot.lane.b32.xlu0 %v8743_v10, %s11022_s2  ;;  %2933 = vrot.lane.b32.xlu1 %v8740_v4, %s11022_s2 }
0x1384   : > { %v8957_v58 = vpop.permute.xlu1 %2897  ;;  %v8959_v12 = vpop.permute.xlu0 %2899 }
0x1385   : > { %11359 = vst [vmem:[#allocation63_spill] sm:$0xff] %v8957_v58  ;;  %11360 = vst [vmem:[#allocation65_spill] sm:$0xff] %v8959_v12 }
0x1388   : > { %v8961_v52 = vpop.permute.xlu1 %2901  ;;  %v8963_v7 = vpop.permute.xlu0 %2903 }
0x1389   : > { %11361 = vst [vmem:[#allocation66_spill] sm:$0xff] %v8961_v52  ;;  %11362 = vst [vmem:[#allocation67_spill] sm:$0xff] %v8963_v7 }
0x138c   : > { %v8965_v27 = vpop.permute.xlu1 %2905  ;;  %v8967_v53 = vpop.permute.xlu0 %2907 }
0x138d   : > { %11363 = vst [vmem:[#allocation68_spill] sm:$0xff] %v8965_v27  ;;  %11364 = vst [vmem:[#allocation69_spill] sm:$0xff] %v8967_v53 }
0x1390   : > { %v8969_v6 = vpop.permute.xlu1 %2909  ;;  %v8971_v59 = vpop.permute.xlu0 %2911 }
0x1391   : > { %11365 = vst [vmem:[#allocation70_spill] sm:$0xff] %v8969_v6  ;;  %11366 = vst [vmem:[#allocation72_spill] sm:$0xff] %v8971_v59  ;;  %v9017_v6 = vrot.slane %v8621_v5, 2 }
0x1394   : > { %v2930_v60 = vpop.permute.xlu1 %2929  ;;  %v2932_v19 = vpop.permute.xlu0 %2931 }
0x1395   : > { %6098 = vpush %v2930_v60 }
0x1396   : > { %6100 = vpush %v2932_v19 }
0x1398   : > { %v2934_v2 = vpop.permute.xlu1 %2933  ;;  %v2936_v58 = vpop.permute.xlu0 %2935 }
0x1399   : > { %6102 = vpush %v2934_v2 }
0x139a   : > { %6104 = vpush %v2936_v58 }
0x13c6   : > { %s6099_s8 = spop %6098 }
0x13c7   : > { %v2938_v52 = vstv %s6099_s8  ;;  %s6101_s26 = spop %6100 }
0x13c8   : > { %v2949_v7 = vmul.f32 %v2938_v52, %v8797_v31  ;;  %v2950_v27 = vmul.f32 %v2938_v52, %v8799_v0  ;;  %v2941_v53 = vstv %s6101_s26 }
0x13c9   : > { %v2951_v60 = vmul.f32 %v2941_v53, %v8805_v1  ;;  %v2952_v19 = vmul.f32 %v2941_v53, %v8807_v9 }
0x13ca   : > { %2967 = vrot.lane.b32.xlu0 %v2950_v27, %s11020_s18  ;;  %2965 = vrot.lane.b32.xlu1 %v2949_v7, %s11020_s18  ;;  %s6103_s19 = spop %6102 }
0x13cb   : > { %v2944_v59 = vstv %s6103_s19  ;;  %s6105_s3 = spop %6104 }
0x13cc   : > { %v2953_v2 = vmul.f32 %v2944_v59, %v8813_v42  ;;  %v2954_v58 = vmul.f32 %v2944_v59, %v8815_v35  ;;  %v2947_v52 = vstv %s6105_s3 }
0x13cd   : > { %v2955_v7 = vmul.f32 %v2947_v52, %v8821_v62  ;;  %v2956_v27 = vmul.f32 %v2947_v52, %v8823_v37 }
0x13ce   : > { %2971 = vrot.lane.b32.xlu0 %v2952_v19, %s11020_s18  ;;  %2969 = vrot.lane.b32.xlu1 %v2951_v60, %s11020_s18 }
0x13d2   : > { %2975 = vrot.lane.b32.xlu0 %v2954_v58, %s11020_s18  ;;  %2973 = vrot.lane.b32.xlu1 %v2953_v2, %s11020_s18 }
0x13d6   : > { %2979 = vrot.lane.b32.xlu0 %v2956_v27, %s11020_s18  ;;  %2977 = vrot.lane.b32.xlu1 %v2955_v7, %s11020_s18 }
0x13da   : > { %2999 = vrot.lane.b32.xlu0 %v8737_v55, %s6888_s30  ;;  %2997 = vrot.lane.b32.xlu1 %v8734_v63, %s6888_s30 }
0x13de   : > { %3003 = vrot.lane.b32.xlu0 %v8743_v10, %s6888_s30  ;;  %3001 = vrot.lane.b32.xlu1 %v8740_v4, %s6888_s30  ;;  %v9014_v4 = vrot.slane %v8625_v43, 2 }
0x143c   : > { %v8997_v53 = vpop.permute.xlu1 %2965  ;;  %v8999_v59 = vpop.permute.xlu0 %2967 }
0x143d   : > { %11367 = vst [vmem:[#allocation73_spill] sm:$0xff] %v8997_v53  ;;  %11368 = vst [vmem:[#allocation74_spill] sm:$0xff] %v8999_v59 }
0x1440   : > { %v9001_v60 = vpop.permute.xlu1 %2969  ;;  %v9003_v19 = vpop.permute.xlu0 %2971 }
0x1441   : > { %11369 = vst [vmem:[#allocation75_spill] sm:$0xff] %v9001_v60  ;;  %11370 = vst [vmem:[#allocation71_spill] sm:$0xff] %v9003_v19 }
0x1444   : > { %v9005_v2 = vpop.permute.xlu1 %2973  ;;  %v9007_v55 = vpop.permute.xlu0 %2975 }
0x1445   : > { %11371 = vst [vmem:[#allocation76_spill] sm:$0xff] %v9005_v2  ;;  %11372 = vst [vmem:[#allocation77_spill] sm:$0xff] %v9007_v55  ;;  %v9020_v2 = vrot.slane %v8633_v46, 2  ;;  %v9103_v55 = vld [vmem:[#allocation3 + $0x86] sm:$0xff] }
0x1448   : > { %v9009_v58 = vpop.permute.xlu1 %2977  ;;  %v9011_v63 = vpop.permute.xlu0 %2979 }
0x1449   : > { %11373 = vst [vmem:[#allocation80_spill] sm:$0xff] %v9009_v58  ;;  %11374 = vst [vmem:[#allocation81_spill] sm:$0xff] %v9011_v63  ;;  %v9023_v58 = vrot.slane %v8629_v45, 2 }
0x144c   : > { %v2998_v10 = vpop.permute.xlu1 %2997  ;;  %v3000_v52 = vpop.permute.xlu0 %2999 }
0x144d   : > { %6106 = vpush %v2998_v10 }
0x144e   : > { %6108 = vpush %v3000_v52 }
0x1450   : > { %v3002_v7 = vpop.permute.xlu1 %3001  ;;  %v3004_v27 = vpop.permute.xlu0 %3003 }
0x1451   : > { %6110 = vpush %v3002_v7 }
0x1452   : > { %6112 = vpush %v3004_v27 }
0x1453   : > { %6114 = vpush %v9014_v4 }
0x1454   : > { %6116 = vpush %v9017_v6 }
0x1455   : > { %6118 = vpush %v9020_v2 }
0x1456   : > { %6120 = vpush %v9023_v58 }
0x147e   : > { %s6107_s16 = spop %6106 }
0x147f   : > { %v3006_v43 = vstv %s6107_s16  ;;  %s6109_s15 = spop %6108 }
0x1480   : > { %v3017_v5 = vmul.f32 %v3006_v43, %v8797_v31  ;;  %v3018_v46 = vmul.f32 %v3006_v43, %v8799_v0  ;;  %v3009_v10 = vstv %s6109_s15 }
0x1481   : > { %v3019_v45 = vmul.f32 %v3009_v10, %v8805_v1  ;;  %v3020_v52 = vmul.f32 %v3009_v10, %v8807_v9 }
0x1482   : > { %3035 = vrot.lane.b32.xlu0 %v3018_v46, %s11018_s4  ;;  %3033 = vrot.lane.b32.xlu1 %v3017_v5, %s11018_s4  ;;  %s6111_s10 = spop %6110 }
0x1483   : > { %v3012_v7 = vstv %s6111_s10  ;;  %s6113_s13 = spop %6112 }
0x1484   : > { %v3021_v31 = vmul.f32 %v3012_v7, %v8813_v42  ;;  %v3022_v0 = vmul.f32 %v3012_v7, %v8815_v35  ;;  %v3015_v27 = vstv %s6113_s13  ;;  %s9069_s12 = spop %6114 }
0x1485   : > { %v3023_v43 = vmul.f32 %v3015_v27, %v8821_v62  ;;  %v3024_v1 = vmul.f32 %v3015_v27, %v8823_v37  ;;  %s9071_s1 = spop %6116  ;;  %v9079_v27 = vld [vmem:[#allocation3 + $0xe] sm:$0xff] }
0x1486   : > { %3039 = vrot.lane.b32.xlu0 %v3020_v52, %s11018_s4  ;;  %3037 = vrot.lane.b32.xlu1 %v3019_v45, %s11018_s4  ;;  %s9073_s8 = spop %6118 }
0x1487   : > { %s9075_s26 = spop %6120 }
0x148a   : > { %3043 = vrot.lane.b32.xlu0 %v3022_v0, %s11018_s4  ;;  %3041 = vrot.lane.b32.xlu1 %v3021_v31, %s11018_s4  ;;  %v9077_v0 = vld [vmem:[#allocation3 + $0x6] sm:$0xff] }
0x148e   : > { %3047 = vrot.lane.b32.xlu0 %v3024_v1, %s11018_s4  ;;  %3045 = vrot.lane.b32.xlu1 %v3023_v43, %s11018_s4 }
0x1492   : > { %3107 = vrot.lane.b32.xlu0 %v9017_v6, %s11093_s0  ;;  %3105 = vrot.lane.b32.xlu1 %v9014_v4, %s11093_s0 }
0x1496   : > { %3111 = vrot.lane.b32.xlu0 %v9023_v58, %s11093_s0  ;;  %3109 = vrot.lane.b32.xlu1 %v9020_v2, %s11093_s0 }
0x14f4   : > { %v9053_v9 = vpop.permute.xlu1 %3033  ;;  %v9055_v42 = vpop.permute.xlu0 %3035 }
0x14f5   : > { %11375 = vst [vmem:[#allocation82_spill] sm:$0xff] %v9053_v9  ;;  %11376 = vst [vmem:[#allocation83_spill] sm:$0xff] %v9055_v42 }
0x14f8   : > { %v9057_v37 = vpop.permute.xlu1 %3037  ;;  %v9059_v35 = vpop.permute.xlu0 %3039 }
0x14f9   : > { %11377 = vst [vmem:[#allocation78_spill] sm:$0xff] %v9057_v37  ;;  %11378 = vst [vmem:[#allocation79_spill] sm:$0xff] %v9059_v35 }
0x14fc   : > { %v9061_v62 = vpop.permute.xlu1 %3041  ;;  %v9063_v5 = vpop.permute.xlu0 %3043 }
0x14fd   : > { %11379 = vst [vmem:[#allocation84_spill] sm:$0xff] %v9061_v62  ;;  %11380 = vst [vmem:[#allocation85_spill] sm:$0xff] %v9063_v5 }
0x1500   : > { %v9065_v46 = vpop.permute.xlu1 %3045  ;;  %v9067_v10 = vpop.permute.xlu0 %3047 }
0x1501   : > { %11381 = vst [vmem:[#allocation86_spill] sm:$0xff] %v9065_v46  ;;  %11382 = vst [vmem:[#allocation87_spill] sm:$0xff] %v9067_v10 }
0x1504   : > { %v3106_v45 = vpop.permute.xlu1 %3105  ;;  %v3108_v52 = vpop.permute.xlu0 %3107 }
0x1505   : > { %6122 = vpush %v3106_v45 }
0x1506   : > { %6124 = vpush %v3108_v52 }
0x1508   : > { %v3110_v7 = vpop.permute.xlu1 %3109  ;;  %v3112_v31 = vpop.permute.xlu0 %3111 }
0x1509   : > { %6126 = vpush %v3110_v7  ;;  %v9085_v7 = vld [vmem:[#allocation3 + $0x2e] sm:$0xff] }
0x150a   : > { %6128 = vpush %v3112_v31  ;;  %v9087_v31 = vld [vmem:[#allocation3 + $0x36] sm:$0xff] }
0x1536   : > { %s6123_s19 = spop %6122 }
0x1537   : > { %v3114_v43 = vstv %s6123_s19  ;;  %s6125_s3 = spop %6124 }
0x1538   : > { %v3125_v1 = vmul.f32 %v3114_v43, %v9077_v0  ;;  %v3126_v45 = vmul.f32 %v3114_v43, %v9079_v27  ;;  %v3117_v52 = vstv %s6125_s3  ;;  %v9093_v43 = vld [vmem:[#allocation3 + $0x56] sm:$0xff] }
0x1539   : > { %v3127_v10 = vmul.f32 %v3117_v52, %v9085_v7  ;;  %v3128_v46 = vmul.f32 %v3117_v52, %v9087_v31  ;;  %v9101_v52 = vld [vmem:[#allocation3 + $0x7e] sm:$0xff] }
0x153a   : > { %3143 = vrot.lane.b32.xlu0 %v3126_v45, %s11072_s9  ;;  %3141 = vrot.lane.b32.xlu1 %v3125_v1, %s11072_s9  ;;  %s6127_s16 = spop %6126  ;;  %v9095_v45 = vld [vmem:[#allocation3 + $0x5e] sm:$0xff] }
0x153b   : > { %v3120_v63 = vstv %s6127_s16  ;;  %s6129_s15 = spop %6128 }
0x153c   : > { %v3129_v1 = vmul.f32 %v3120_v63, %v9093_v43  ;;  %v3130_v5 = vmul.f32 %v3120_v63, %v9095_v45  ;;  %v3123_v62 = vstv %s6129_s15 }
0x153e   : > { %3147 = vrot.lane.b32.xlu0 %v3128_v46, %s11072_s9  ;;  %3145 = vrot.lane.b32.xlu1 %v3127_v10, %s11072_s9  ;;  %v3131_v46 = vmul.f32 %v3123_v62, %v9101_v52  ;;  %v3132_v10 = vmul.f32 %v3123_v62, %v9103_v55 }
0x1542   : > { %3151 = vrot.lane.b32.xlu0 %v3130_v5, %s11072_s9  ;;  %3149 = vrot.lane.b32.xlu1 %v3129_v1, %s11072_s9 }
0x1546   : > { %3155 = vrot.lane.b32.xlu0 %v3132_v10, %s11072_s9  ;;  %3153 = vrot.lane.b32.xlu1 %v3131_v46, %s11072_s9 }
0x154a   : > { %3175 = vrot.lane.b32.xlu0 %v9017_v6, %s11071_s17  ;;  %3173 = vrot.lane.b32.xlu1 %v9014_v4, %s11071_s17 }
0x154e   : > { %3179 = vrot.lane.b32.xlu0 %v9023_v58, %s11071_s17  ;;  %3177 = vrot.lane.b32.xlu1 %v9020_v2, %s11071_s17 }
0x15ac   : > { %v9117_v63 = vpop.permute.xlu1 %3141  ;;  %v9119_v5 = vpop.permute.xlu0 %3143 }
0x15ad   : > { %11383 = vst [vmem:[#allocation88_spill] sm:$0xff] %v9117_v63  ;;  %11384 = vst [vmem:[#allocation89_spill] sm:$0xff] %v9119_v5 }
0x15b0   : > { %v9121_v62 = vpop.permute.xlu1 %3145  ;;  %v9123_v1 = vpop.permute.xlu0 %3147 }
0x15b1   : > { %11385 = vst [vmem:[#allocation90_spill] sm:$0xff] %v9121_v62  ;;  %11386 = vst [vmem:[#allocation91_spill] sm:$0xff] %v9123_v1 }
0x15b4   : > { %v9125_v46 = vpop.permute.xlu1 %3149  ;;  %v9127_v10 = vpop.permute.xlu0 %3151 }
0x15b5   : > { %11387 = vst [vmem:[#allocation96_spill] sm:$0xff] %v9125_v46  ;;  %11388 = vst [vmem:[#allocation97_spill] sm:$0xff] %v9127_v10 }
0x15b8   : > { %v9129_v35 = vpop.permute.xlu1 %3153  ;;  %v9131_v37 = vpop.permute.xlu0 %3155 }
0x15b9   : > { %11389 = vst [vmem:[#allocation98_spill] sm:$0xff] %v9129_v35  ;;  %11390 = vst [vmem:[#allocation92_spill] sm:$0xff] %v9131_v37 }
0x15bc   : > { %v3174_v19 = vpop.permute.xlu1 %3173  ;;  %v3176_v60 = vpop.permute.xlu0 %3175 }
0x15bd   : > { %6130 = vpush %v3174_v19 }
0x15be   : > { %6132 = vpush %v3176_v60 }
0x15c0   : > { %v3178_v42 = vpop.permute.xlu1 %3177  ;;  %v3180_v63 = vpop.permute.xlu0 %3179 }
0x15c1   : > { %6134 = vpush %v3178_v42 }
0x15c2   : > { %6136 = vpush %v3180_v63 }
0x15ee   : > { %s6131_s10 = spop %6130 }
0x15ef   : > { %v3182_v62 = vstv %s6131_s10  ;;  %s6133_s13 = spop %6132 }
0x15f0   : > { %v3193_v1 = vmul.f32 %v3182_v62, %v9077_v0  ;;  %v3194_v46 = vmul.f32 %v3182_v62, %v9079_v27  ;;  %v3185_v10 = vstv %s6133_s13 }
0x15f1   : > { %v3195_v19 = vmul.f32 %v3185_v10, %v9085_v7  ;;  %v3196_v60 = vmul.f32 %v3185_v10, %v9087_v31 }
0x15f2   : > { %3211 = vrot.lane.b32.xlu0 %v3194_v46, %s6888_s30  ;;  %3209 = vrot.lane.b32.xlu1 %v3193_v1, %s6888_s30  ;;  %s6135_s19 = spop %6134 }
0x15f3   : > { %v3188_v37 = vstv %s6135_s19  ;;  %s6137_s3 = spop %6136 }
0x15f4   : > { %v3197_v42 = vmul.f32 %v3188_v37, %v9093_v43  ;;  %v3198_v63 = vmul.f32 %v3188_v37, %v9095_v45  ;;  %v3191_v62 = vstv %s6137_s3 }
0x15f5   : > { %v3199_v1 = vmul.f32 %v3191_v62, %v9101_v52  ;;  %v3200_v46 = vmul.f32 %v3191_v62, %v9103_v55 }
0x15f6   : > { %3215 = vrot.lane.b32.xlu0 %v3196_v60, %s6888_s30  ;;  %3213 = vrot.lane.b32.xlu1 %v3195_v19, %s6888_s30 }
0x15fa   : > { %3219 = vrot.lane.b32.xlu0 %v3198_v63, %s6888_s30  ;;  %3217 = vrot.lane.b32.xlu1 %v3197_v42, %s6888_s30 }
0x15fe   : > { %3223 = vrot.lane.b32.xlu0 %v3200_v46, %s6888_s30  ;;  %3221 = vrot.lane.b32.xlu1 %v3199_v1, %s6888_s30 }
0x1602   : > { %3243 = vrot.lane.b32.xlu0 %v9017_v6, %s11072_s9  ;;  %3241 = vrot.lane.b32.xlu1 %v9014_v4, %s11072_s9 }
0x1606   : > { %3247 = vrot.lane.b32.xlu0 %v9023_v58, %s11072_s9  ;;  %3245 = vrot.lane.b32.xlu1 %v9020_v2, %s11072_s9 }
0x1664   : > { %v9157_v37 = vpop.permute.xlu1 %3209  ;;  %v9159_v10 = vpop.permute.xlu0 %3211 }
0x1665   : > { %11391 = vst [vmem:[#allocation93_spill] sm:$0xff] %v9157_v37  ;;  %11392 = vst [vmem:[#allocation94_spill] sm:$0xff] %v9159_v10 }
0x1668   : > { %v9161_v19 = vpop.permute.xlu1 %3213  ;;  %v9163_v60 = vpop.permute.xlu0 %3215 }
0x1669   : > { %11393 = vst [vmem:[#allocation95_spill] sm:$0xff] %v9161_v19  ;;  %11394 = vst [vmem:[#allocation103_spill] sm:$0xff] %v9163_v60 }
0x166c   : > { %v9165_v42 = vpop.permute.xlu1 %3217  ;;  %v9167_v63 = vpop.permute.xlu0 %3219 }
0x166d   : > { %11395 = vst [vmem:[#allocation104_spill] sm:$0xff] %v9165_v42  ;;  %11396 = vst [vmem:[#allocation99_spill] sm:$0xff] %v9167_v63 }
0x1670   : > { %v9169_v62 = vpop.permute.xlu1 %3221  ;;  %v9171_v1 = vpop.permute.xlu0 %3223 }
0x1671   : > { %11397 = vst [vmem:[#allocation100_spill] sm:$0xff] %v9169_v62  ;;  %11398 = vst [vmem:[#allocation109_spill] sm:$0xff] %v9171_v1 }
0x1674   : > { %v3242_v46 = vpop.permute.xlu1 %3241  ;;  %v3244_v35 = vpop.permute.xlu0 %3243 }
0x1675   : > { %6138 = vpush %v3242_v46 }
0x1676   : > { %6140 = vpush %v3244_v35 }
0x1678   : > { %v3246_v5 = vpop.permute.xlu1 %3245  ;;  %v3248_v37 = vpop.permute.xlu0 %3247 }
0x1679   : > { %6142 = vpush %v3246_v5 }
0x167a   : > { %6144 = vpush %v3248_v37 }
0x16a6   : > { %s6139_s16 = spop %6138 }
0x16a7   : > { %v3250_v19 = vstv %s6139_s16  ;;  %s6141_s15 = spop %6140 }
0x16a8   : > { %v3261_v60 = vmul.f32 %v3250_v19, %v9077_v0  ;;  %v3262_v42 = vmul.f32 %v3250_v19, %v9079_v27  ;;  %v3253_v63 = vstv %s6141_s15 }
0x16a9   : > { %v3263_v46 = vmul.f32 %v3253_v63, %v9085_v7  ;;  %v3264_v35 = vmul.f32 %v3253_v63, %v9087_v31 }
0x16aa   : > { %3279 = vrot.lane.b32.xlu0 %v3262_v42, %s6889_s24  ;;  %3277 = vrot.lane.b32.xlu1 %v3261_v60, %s6889_s24  ;;  %s6143_s10 = spop %6142 }
0x16ab   : > { %v3256_v1 = vstv %s6143_s10  ;;  %s6145_s13 = spop %6144 }
0x16ac   : > { %v3265_v5 = vmul.f32 %v3256_v1, %v9093_v43  ;;  %v3266_v37 = vmul.f32 %v3256_v1, %v9095_v45  ;;  %v3259_v19 = vstv %s6145_s13 }
0x16ad   : > { %v3267_v60 = vmul.f32 %v3259_v19, %v9101_v52  ;;  %v3268_v42 = vmul.f32 %v3259_v19, %v9103_v55 }
0x16ae   : > { %3283 = vrot.lane.b32.xlu0 %v3264_v35, %s6889_s24  ;;  %3281 = vrot.lane.b32.xlu1 %v3263_v46, %s6889_s24 }
0x16b2   : > { %3287 = vrot.lane.b32.xlu0 %v3266_v37, %s6889_s24  ;;  %3285 = vrot.lane.b32.xlu1 %v3265_v5, %s6889_s24 }
0x16b6   : > { %3291 = vrot.lane.b32.xlu0 %v3268_v42, %s6889_s24  ;;  %3289 = vrot.lane.b32.xlu1 %v3267_v60, %s6889_s24 }
0x16ba   : > { %3311 = vrot.lane.b32.xlu0 %v9017_v6, %s11073_s29  ;;  %3309 = vrot.lane.b32.xlu1 %v9014_v4, %s11073_s29 }
0x16be   : > { %3315 = vrot.lane.b32.xlu0 %v9023_v58, %s11073_s29  ;;  %3313 = vrot.lane.b32.xlu1 %v9020_v2, %s11073_s29 }
0x171c   : > { %v9197_v63 = vpop.permute.xlu1 %3277  ;;  %v9199_v1 = vpop.permute.xlu0 %3279 }
0x171d   : > { %11399 = vst [vmem:[#allocation110_spill] sm:$0xff] %v9197_v63  ;;  %11400 = vst [vmem:[#allocation111_spill] sm:$0xff] %v9199_v1 }
0x1720   : > { %v9201_v46 = vpop.permute.xlu1 %3281  ;;  %v9203_v35 = vpop.permute.xlu0 %3283 }
0x1721   : > { %11401 = vst [vmem:[#allocation112_spill] sm:$0xff] %v9201_v46  ;;  %11402 = vst [vmem:[#allocation101_spill] sm:$0xff] %v9203_v35 }
0x1724   : > { %v9205_v5 = vpop.permute.xlu1 %3285  ;;  %v9207_v37 = vpop.permute.xlu0 %3287 }
0x1725   : > { %11403 = vst [vmem:[#allocation102_spill] sm:$0xff] %v9205_v5  ;;  %11404 = vst [vmem:[#allocation105_spill] sm:$0xff] %v9207_v37 }
0x1728   : > { %v9209_v19 = vpop.permute.xlu1 %3289  ;;  %v9211_v60 = vpop.permute.xlu0 %3291 }
0x1729   : > { %11405 = vst [vmem:[#allocation106_spill] sm:$0xff] %v9209_v19  ;;  %11406 = vst [vmem:[#allocation117_spill] sm:$0xff] %v9211_v60 }
0x172c   : > { %v3310_v42 = vpop.permute.xlu1 %3309  ;;  %v3312_v62 = vpop.permute.xlu0 %3311 }
0x172d   : > { %6146 = vpush %v3310_v42 }
0x172e   : > { %6148 = vpush %v3312_v62 }
0x1730   : > { %v3314_v10 = vpop.permute.xlu1 %3313  ;;  %v3316_v63 = vpop.permute.xlu0 %3315 }
0x1731   : > { %6150 = vpush %v3314_v10 }
0x1732   : > { %6152 = vpush %v3316_v63 }
0x175e   : > { %s6147_s19 = spop %6146 }
0x175f   : > { %v3318_v46 = vstv %s6147_s19  ;;  %s6149_s3 = spop %6148 }
0x1760   : > { %v3329_v35 = vmul.f32 %v3318_v46, %v9077_v0  ;;  %v3330_v5 = vmul.f32 %v3318_v46, %v9079_v27  ;;  %v3321_v37 = vstv %s6149_s3 }
0x1761   : > { %v3331_v42 = vmul.f32 %v3321_v37, %v9085_v7  ;;  %v3332_v62 = vmul.f32 %v3321_v37, %v9087_v31 }
0x1762   : > { %3347 = vrot.lane.b32.xlu0 %v3330_v5, %s11024_s7  ;;  %3345 = vrot.lane.b32.xlu1 %v3329_v35, %s11024_s7  ;;  %s6151_s16 = spop %6150 }
0x1763   : > { %v3324_v60 = vstv %s6151_s16  ;;  %s6153_s15 = spop %6152 }
0x1764   : > { %v3333_v10 = vmul.f32 %v3324_v60, %v9093_v43  ;;  %v3334_v63 = vmul.f32 %v3324_v60, %v9095_v45  ;;  %v3327_v46 = vstv %s6153_s15 }
0x1765   : > { %v3335_v35 = vmul.f32 %v3327_v46, %v9101_v52  ;;  %v3336_v5 = vmul.f32 %v3327_v46, %v9103_v55 }
0x1766   : > { %3351 = vrot.lane.b32.xlu0 %v3332_v62, %s11024_s7  ;;  %3349 = vrot.lane.b32.xlu1 %v3331_v42, %s11024_s7 }
0x176a   : > { %3355 = vrot.lane.b32.xlu0 %v3334_v63, %s11024_s7  ;;  %3353 = vrot.lane.b32.xlu1 %v3333_v10, %s11024_s7 }
0x176e   : > { %3359 = vrot.lane.b32.xlu0 %v3336_v5, %s11024_s7  ;;  %3357 = vrot.lane.b32.xlu1 %v3335_v35, %s11024_s7 }
0x1772   : > { %3379 = vrot.lane.b32.xlu0 %v9017_v6, %s11022_s2  ;;  %3377 = vrot.lane.b32.xlu1 %v9014_v4, %s11022_s2 }
0x1776   : > { %3383 = vrot.lane.b32.xlu0 %v9023_v58, %s11022_s2  ;;  %3381 = vrot.lane.b32.xlu1 %v9020_v2, %s11022_s2 }
0x17d4   : > { %v9237_v37 = vpop.permute.xlu1 %3345  ;;  %v9239_v60 = vpop.permute.xlu0 %3347 }
0x17d5   : > { %11407 = vst [vmem:[#allocation118_spill] sm:$0xff] %v9237_v37  ;;  %11408 = vst [vmem:[#allocation119_spill] sm:$0xff] %v9239_v60 }
0x17d8   : > { %v9241_v42 = vpop.permute.xlu1 %3349  ;;  %v9243_v62 = vpop.permute.xlu0 %3351 }
0x17d9   : > { %11409 = vst [vmem:[#allocation120_spill] sm:$0xff] %v9241_v42  ;;  %11410 = vst [vmem:[#allocation107_spill] sm:$0xff] %v9243_v62 }
0x17dc   : > { %v9245_v10 = vpop.permute.xlu1 %3353  ;;  %v9247_v63 = vpop.permute.xlu0 %3355 }
0x17dd   : > { %11411 = vst [vmem:[#allocation108_spill] sm:$0xff] %v9245_v10  ;;  %11412 = vst [vmem:[#allocation113_spill] sm:$0xff] %v9247_v63 }
0x17e0   : > { %v9249_v46 = vpop.permute.xlu1 %3357  ;;  %v9251_v35 = vpop.permute.xlu0 %3359 }
0x17e1   : > { %11413 = vst [vmem:[#allocation114_spill] sm:$0xff] %v9249_v46  ;;  %11414 = vst [vmem:[#allocation115_spill] sm:$0xff] %v9251_v35 }
0x17e4   : > { %v3378_v5 = vpop.permute.xlu1 %3377  ;;  %v3380_v19 = vpop.permute.xlu0 %3379 }
0x17e5   : > { %6154 = vpush %v3378_v5 }
0x17e6   : > { %6156 = vpush %v3380_v19 }
0x17e8   : > { %v3382_v1 = vpop.permute.xlu1 %3381  ;;  %v3384_v37 = vpop.permute.xlu0 %3383 }
0x17e9   : > { %6158 = vpush %v3382_v1 }
0x17ea   : > { %6160 = vpush %v3384_v37 }
0x1816   : > { %s6155_s10 = spop %6154 }
0x1817   : > { %v3386_v42 = vstv %s6155_s10  ;;  %s6157_s13 = spop %6156 }
0x1818   : > { %v3397_v62 = vmul.f32 %v3386_v42, %v9077_v0  ;;  %v3398_v10 = vmul.f32 %v3386_v42, %v9079_v27  ;;  %v3389_v63 = vstv %s6157_s13 }
0x1819   : > { %v3399_v5 = vmul.f32 %v3389_v63, %v9085_v7  ;;  %v3400_v19 = vmul.f32 %v3389_v63, %v9087_v31 }
0x181a   : > { %3415 = vrot.lane.b32.xlu0 %v3398_v10, %s11020_s18  ;;  %3413 = vrot.lane.b32.xlu1 %v3397_v62, %s11020_s18  ;;  %s6159_s19 = spop %6158 }
0x181b   : > { %v3392_v35 = vstv %s6159_s19  ;;  %s6161_s3 = spop %6160 }
0x181c   : > { %v3401_v1 = vmul.f32 %v3392_v35, %v9093_v43  ;;  %v3402_v37 = vmul.f32 %v3392_v35, %v9095_v45  ;;  %v3395_v42 = vstv %s6161_s3 }
0x181d   : > { %v3403_v62 = vmul.f32 %v3395_v42, %v9101_v52  ;;  %v3404_v10 = vmul.f32 %v3395_v42, %v9103_v55 }
0x181e   : > { %3419 = vrot.lane.b32.xlu0 %v3400_v19, %s11020_s18  ;;  %3417 = vrot.lane.b32.xlu1 %v3399_v5, %s11020_s18 }
0x1822   : > { %3423 = vrot.lane.b32.xlu0 %v3402_v37, %s11020_s18  ;;  %3421 = vrot.lane.b32.xlu1 %v3401_v1, %s11020_s18 }
0x1826   : > { %3427 = vrot.lane.b32.xlu0 %v3404_v10, %s11020_s18  ;;  %3425 = vrot.lane.b32.xlu1 %v3403_v62, %s11020_s18 }
0x182a   : > { %3447 = vrot.lane.b32.xlu0 %v9017_v6, %s6888_s30  ;;  %3445 = vrot.lane.b32.xlu1 %v9014_v4, %s6888_s30 }
0x182e   : > { %3451 = vrot.lane.b32.xlu0 %v9023_v58, %s6888_s30  ;;  %3449 = vrot.lane.b32.xlu1 %v9020_v2, %s6888_s30  ;;  %v9293_v2 = vld [vmem:[#allocation11] sm:$0x7f] }
0x182f   : > { %v9296_v62 = vrot.slane %v9293_v2, 3 }
0x188c   : > { %v9277_v63 = vpop.permute.xlu1 %3413  ;;  %v9279_v35 = vpop.permute.xlu0 %3415 }
0x188d   : > { %11415 = vst [vmem:[#allocation116_spill] sm:$0xff] %v9277_v63  ;;  %11416 = vst [vmem:[#allocation125_spill] sm:$0xff] %v9279_v35 }
0x1890   : > { %v9281_v5 = vpop.permute.xlu1 %3417  ;;  %v9283_v19 = vpop.permute.xlu0 %3419 }
0x1891   : > { %11417 = vst [vmem:[#allocation126_spill] sm:$0xff] %v9281_v5  ;;  %11418 = vst [vmem:[#allocation127_spill] sm:$0xff] %v9283_v19  ;;  %v9298_v19 = vld [vmem:[#allocation11 + $0x8] sm:$0x7f] }
0x1894   : > { %v9285_v1 = vpop.permute.xlu1 %3421  ;;  %v9287_v6 = vpop.permute.xlu0 %3423 }
0x1895   : > { %11419 = vst [vmem:[#allocation128_spill] sm:$0xff] %v9285_v1  ;;  %11420 = vst [vmem:[#allocation121_spill] sm:$0xff] %v9287_v6  ;;  %v9301_v1 = vrot.slane %v9298_v19, 3 }
0x1898   : > { %v9289_v37 = vpop.permute.xlu1 %3425  ;;  %v9291_v4 = vpop.permute.xlu0 %3427 }
0x1899   : > { %11421 = vst [vmem:[#allocation122_spill] sm:$0xff] %v9289_v37  ;;  %11422 = vst [vmem:[#allocation123_spill] sm:$0xff] %v9291_v4  ;;  %v9303_v37 = vld [vmem:[#allocation11 + $0x10] sm:$0x7f] }
0x189a   : > { %v9306_v4 = vrot.slane %v9303_v37, 3 }
0x189c   : > { %v3446_v58 = vpop.permute.xlu1 %3445  ;;  %v3448_v42 = vpop.permute.xlu0 %3447 }
0x189d   : > { %6162 = vpush %v3446_v58  ;;  %v9308_v58 = vld [vmem:[#allocation11 + $0x18] sm:$0x7f] }
0x189e   : > { %6164 = vpush %v3448_v42  ;;  %v9311_v42 = vrot.slane %v9308_v58, 3 }
0x18a0   : > { %v3450_v10 = vpop.permute.xlu1 %3449  ;;  %v3452_v46 = vpop.permute.xlu0 %3451 }
0x18a1   : > { %6166 = vpush %v3450_v10 }
0x18a2   : > { %6168 = vpush %v3452_v46 }
0x18a3   : > { %6170 = vpush %v9296_v62 }
0x18a4   : > { %6172 = vpush %v9301_v1 }
0x18a5   : > { %6174 = vpush %v9306_v4 }
0x18a6   : > { %6176 = vpush %v9311_v42 }
0x18ce   : > { %s6163_s16 = spop %6162 }
0x18cf   : > { %v3454_v10 = vstv %s6163_s16  ;;  %s6165_s15 = spop %6164 }
0x18d0   : > { %v3465_v6 = vmul.f32 %v3454_v10, %v9077_v0  ;;  %v3466_v46 = vmul.f32 %v3454_v10, %v9079_v27  ;;  %v3457_v5 = vstv %s6165_s15 }
0x18d1   : > { %v3467_v35 = vmul.f32 %v3457_v5, %v9085_v7  ;;  %v3468_v63 = vmul.f32 %v3457_v5, %v9087_v31 }
0x18d2   : > { %3483 = vrot.lane.b32.xlu0 %v3466_v46, %s11018_s4  ;;  %3481 = vrot.lane.b32.xlu1 %v3465_v6, %s11018_s4  ;;  %s6167_s10 = spop %6166 }
0x18d3   : > { %v3460_v60 = vstv %s6167_s10  ;;  %s6169_s13 = spop %6168 }
0x18d4   : > { %v3469_v0 = vmul.f32 %v3460_v60, %v9093_v43  ;;  %v3470_v27 = vmul.f32 %v3460_v60, %v9095_v45  ;;  %v3463_v10 = vstv %s6169_s13  ;;  %s9357_s19 = spop %6170 }
0x18d5   : > { %v3471_v6 = vmul.f32 %v3463_v10, %v9101_v52  ;;  %v3472_v7 = vmul.f32 %v3463_v10, %v9103_v55  ;;  %s9359_s3 = spop %6172  ;;  %v9365_v10 = vld [vmem:[#allocation3 + $0x9] sm:$0xff] }
0x18d6   : > { %3487 = vrot.lane.b32.xlu0 %v3468_v63, %s11018_s4  ;;  %3485 = vrot.lane.b32.xlu1 %v3467_v35, %s11018_s4  ;;  %s9361_s16 = spop %6174 }
0x18d7   : > { %s9363_s15 = spop %6176 }
0x18da   : > { %3491 = vrot.lane.b32.xlu0 %v3470_v27, %s11018_s4  ;;  %3489 = vrot.lane.b32.xlu1 %v3469_v0, %s11018_s4 }
0x18de   : > { %3495 = vrot.lane.b32.xlu0 %v3472_v7, %s11018_s4  ;;  %3493 = vrot.lane.b32.xlu1 %v3471_v6, %s11018_s4  ;;  %v9367_v6 = vld [vmem:[#allocation3 + $0x11] sm:$0xff] }
0x18e2   : > { %3555 = vrot.lane.b32.xlu0 %v9301_v1, %s11093_s0  ;;  %3553 = vrot.lane.b32.xlu1 %v9296_v62, %s11093_s0 }
0x18e6   : > { %3559 = vrot.lane.b32.xlu0 %v9311_v42, %s11093_s0  ;;  %3557 = vrot.lane.b32.xlu1 %v9306_v4, %s11093_s0 }
0x1944   : > { %v9341_v31 = vpop.permute.xlu1 %3481  ;;  %v9343_v43 = vpop.permute.xlu0 %3483 }
0x1945   : > { %11423 = vst [vmem:[#allocation124_spill] sm:$0xff] %v9341_v31  ;;  %11424 = vst [vmem:[#allocation133_spill] sm:$0xff] %v9343_v43  ;;  %v9391_v43 = vld [vmem:[#allocation3 + $0x89] sm:$0xff] }
0x1948   : > { %v9345_v55 = vpop.permute.xlu1 %3485  ;;  %v9347_v45 = vpop.permute.xlu0 %3487 }
0x1949   : > { %11425 = vst [vmem:[#allocation134_spill] sm:$0xff] %v9345_v55  ;;  %11426 = vst [vmem:[#allocation135_spill] sm:$0xff] %v9347_v45 }
0x194c   : > { %v9349_v52 = vpop.permute.xlu1 %3489  ;;  %v9351_v60 = vpop.permute.xlu0 %3491 }
0x194d   : > { %11427 = vst [vmem:[#allocation136_spill] sm:$0xff] %v9349_v52  ;;  %11428 = vst [vmem:[#allocation141_spill] sm:$0xff] %v9351_v60 }
0x1950   : > { %v9353_v63 = vpop.permute.xlu1 %3493  ;;  %v9355_v35 = vpop.permute.xlu0 %3495 }
0x1951   : > { %11429 = vst [vmem:[#allocation142_spill] sm:$0xff] %v9353_v63  ;;  %11430 = vst [vmem:[#allocation143_spill] sm:$0xff] %v9355_v35  ;;  %v9375_v35 = vld [vmem:[#allocation3 + $0x39] sm:$0xff] }
0x1954   : > { %v3554_v5 = vpop.permute.xlu1 %3553  ;;  %v3556_v46 = vpop.permute.xlu0 %3555 }
0x1955   : > { %6178 = vpush %v3554_v5 }
0x1956   : > { %6180 = vpush %v3556_v46 }
0x1958   : > { %v3558_v0 = vpop.permute.xlu1 %3557  ;;  %v3560_v27 = vpop.permute.xlu0 %3559 }
0x1959   : > { %6182 = vpush %v3558_v0 }
0x195a   : > { %6184 = vpush %v3560_v27  ;;  %v9373_v27 = vld [vmem:[#allocation3 + $0x31] sm:$0xff] }
0x1986   : > { %s6179_s10 = spop %6178 }
0x1987   : > { %v3562_v7 = vstv %s6179_s10  ;;  %s6181_s13 = spop %6180 }
0x1988   : > { %v3573_v5 = vmul.f32 %v3562_v7, %v9365_v10  ;;  %v3574_v46 = vmul.f32 %v3562_v7, %v9367_v6  ;;  %v3565_v0 = vstv %s6181_s13  ;;  %v9381_v7 = vld [vmem:[#allocation3 + $0x59] sm:$0xff] }
0x1989   : > { %v3575_v63 = vmul.f32 %v3565_v0, %v9373_v27  ;;  %v3576_v60 = vmul.f32 %v3565_v0, %v9375_v35  ;;  %v9389_v0 = vld [vmem:[#allocation3 + $0x81] sm:$0xff] }
0x198a   : > { %3591 = vrot.lane.b32.xlu0 %v3574_v46, %s11072_s9  ;;  %3589 = vrot.lane.b32.xlu1 %v3573_v5, %s11072_s9  ;;  %s6183_s4 = spop %6182  ;;  %v9383_v46 = vld [vmem:[#allocation3 + $0x61] sm:$0xff] }
0x198b   : > { %v3568_v52 = vstv %s6183_s4  ;;  %s6185_s10 = spop %6184 }
0x198c   : > { %v3577_v5 = vmul.f32 %v3568_v52, %v9381_v7  ;;  %v3578_v45 = vmul.f32 %v3568_v52, %v9383_v46  ;;  %v3571_v55 = vstv %s6185_s10 }
0x198e   : > { %3595 = vrot.lane.b32.xlu0 %v3576_v60, %s11072_s9  ;;  %3593 = vrot.lane.b32.xlu1 %v3575_v63, %s11072_s9  ;;  %v3579_v60 = vmul.f32 %v3571_v55, %v9389_v0  ;;  %v3580_v63 = vmul.f32 %v3571_v55, %v9391_v43 }
0x1992   : > { %3599 = vrot.lane.b32.xlu0 %v3578_v45, %s11072_s9  ;;  %3597 = vrot.lane.b32.xlu1 %v3577_v5, %s11072_s9 }
0x1996   : > { %3603 = vrot.lane.b32.xlu0 %v3580_v63, %s11072_s9  ;;  %3601 = vrot.lane.b32.xlu1 %v3579_v60, %s11072_s9 }
0x199a   : > { %3623 = vrot.lane.b32.xlu0 %v9301_v1, %s11071_s17  ;;  %3621 = vrot.lane.b32.xlu1 %v9296_v62, %s11071_s17 }
0x199e   : > { %3627 = vrot.lane.b32.xlu0 %v9311_v42, %s11071_s17  ;;  %3625 = vrot.lane.b32.xlu1 %v9306_v4, %s11071_s17 }
0x19fc   : > { %v9405_v45 = vpop.permute.xlu1 %3589  ;;  %v9407_v52 = vpop.permute.xlu0 %3591 }
0x19fd   : > { %11431 = vst [vmem:[#allocation144_spill] sm:$0xff] %v9405_v45  ;;  %11432 = vst [vmem:[#allocation129_spill] sm:$0xff] %v9407_v52 }
0x1a00   : > { %v9409_v55 = vpop.permute.xlu1 %3593  ;;  %v9411_v5 = vpop.permute.xlu0 %3595 }
0x1a01   : > { %11433 = vst [vmem:[#allocation130_spill] sm:$0xff] %v9409_v55  ;;  %11434 = vst [vmem:[#allocation131_spill] sm:$0xff] %v9411_v5 }
0x1a04   : > { %v9413_v60 = vpop.permute.xlu1 %3597  ;;  %v9415_v63 = vpop.permute.xlu0 %3599 }
0x1a05   : > { %11435 = vst [vmem:[#allocation132_spill] sm:$0xff] %v9413_v60  ;;  %11436 = vst [vmem:[#allocation137_spill] sm:$0xff] %v9415_v63 }
0x1a08   : > { %v9417_v31 = vpop.permute.xlu1 %3601  ;;  %v9419_v9 = vpop.permute.xlu0 %3603 }
0x1a09   : > { %11437 = vst [vmem:[#allocation138_spill] sm:$0xff] %v9417_v31  ;;  %11438 = vst [vmem:[#allocation139_spill] sm:$0xff] %v9419_v9 }
0x1a0c   : > { %v3622_v59 = vpop.permute.xlu1 %3621  ;;  %v3624_v53 = vpop.permute.xlu0 %3623 }
0x1a0d   : > { %6186 = vpush %v3622_v59 }
0x1a0e   : > { %6188 = vpush %v3624_v53 }
0x1a10   : > { %v3626_v12 = vpop.permute.xlu1 %3625  ;;  %v3628_v45 = vpop.permute.xlu0 %3627 }
0x1a11   : > { %6190 = vpush %v3626_v12 }
0x1a12   : > { %6192 = vpush %v3628_v45 }
0x1a3e   : > { %s6187_s4 = spop %6186 }
0x1a3f   : > { %v3630_v55 = vstv %s6187_s4  ;;  %s6189_s13 = spop %6188 }
0x1a40   : > { %v3641_v5 = vmul.f32 %v3630_v55, %v9365_v10  ;;  %v3642_v60 = vmul.f32 %v3630_v55, %v9367_v6  ;;  %v3633_v63 = vstv %s6189_s13 }
0x1a41   : > { %v3643_v59 = vmul.f32 %v3633_v63, %v9373_v27  ;;  %v3644_v53 = vmul.f32 %v3633_v63, %v9375_v35 }
0x1a42   : > { %3659 = vrot.lane.b32.xlu0 %v3642_v60, %s6888_s30  ;;  %3657 = vrot.lane.b32.xlu1 %v3641_v5, %s6888_s30  ;;  %s6191_s10 = spop %6190 }
0x1a43   : > { %v3636_v9 = vstv %s6191_s10  ;;  %s6193_s18 = spop %6192 }
0x1a44   : > { %v3645_v12 = vmul.f32 %v3636_v9, %v9381_v7  ;;  %v3646_v45 = vmul.f32 %v3636_v9, %v9383_v46  ;;  %v3639_v55 = vstv %s6193_s18 }
0x1a45   : > { %v3647_v5 = vmul.f32 %v3639_v55, %v9389_v0  ;;  %v3648_v60 = vmul.f32 %v3639_v55, %v9391_v43 }
0x1a46   : > { %3663 = vrot.lane.b32.xlu0 %v3644_v53, %s6888_s30  ;;  %3661 = vrot.lane.b32.xlu1 %v3643_v59, %s6888_s30 }
0x1a4a   : > { %3667 = vrot.lane.b32.xlu0 %v3646_v45, %s6888_s30  ;;  %3665 = vrot.lane.b32.xlu1 %v3645_v12, %s6888_s30 }
0x1a4e   : > { %3671 = vrot.lane.b32.xlu0 %v3648_v60, %s6888_s30  ;;  %3669 = vrot.lane.b32.xlu1 %v3647_v5, %s6888_s30 }
0x1a52   : > { %3691 = vrot.lane.b32.xlu0 %v9301_v1, %s11072_s9  ;;  %3689 = vrot.lane.b32.xlu1 %v9296_v62, %s11072_s9 }
0x1a56   : > { %3695 = vrot.lane.b32.xlu0 %v9311_v42, %s11072_s9  ;;  %3693 = vrot.lane.b32.xlu1 %v9306_v4, %s11072_s9 }
0x1ab4   : > { %v9445_v9 = vpop.permute.xlu1 %3657  ;;  %v9447_v63 = vpop.permute.xlu0 %3659 }
0x1ab5   : > { %11439 = vst [vmem:[#allocation140_spill] sm:$0xff] %v9445_v9  ;;  %11440 = vst [vmem:[#allocation145_spill] sm:$0xff] %v9447_v63 }
0x1ab8   : > { %v9449_v59 = vpop.permute.xlu1 %3661  ;;  %v9451_v53 = vpop.permute.xlu0 %3663 }
0x1ab9   : > { %11441 = vst [vmem:[#allocation146_spill] sm:$0xff] %v9449_v59  ;;  %11442 = vst [vmem:[#allocation147_spill] sm:$0xff] %v9451_v53 }
0x1abc   : > { %v9453_v12 = vpop.permute.xlu1 %3665  ;;  %v9455_v45 = vpop.permute.xlu0 %3667 }
0x1abd   : > { %11443 = vst [vmem:[#allocation148_spill] sm:$0xff] %v9453_v12  ;;  %11444 = vst [vmem:[#allocation149_spill] sm:$0xff] %v9455_v45 }
0x1ac0   : > { %v9457_v55 = vpop.permute.xlu1 %3669  ;;  %v9459_v5 = vpop.permute.xlu0 %3671 }
0x1ac1   : > { %11445 = vst [vmem:[#allocation150_spill] sm:$0xff] %v9457_v55  ;;  %11446 = vst [vmem:[#allocation151_spill] sm:$0xff] %v9459_v5 }
0x1ac4   : > { %v3690_v60 = vpop.permute.xlu1 %3689  ;;  %v3692_v31 = vpop.permute.xlu0 %3691 }
0x1ac5   : > { %6194 = vpush %v3690_v60 }
0x1ac6   : > { %6196 = vpush %v3692_v31 }
0x1ac8   : > { %v3694_v52 = vpop.permute.xlu1 %3693  ;;  %v3696_v9 = vpop.permute.xlu0 %3695 }
0x1ac9   : > { %6198 = vpush %v3694_v52 }
0x1aca   : > { %6200 = vpush %v3696_v9 }
0x1af6   : > { %s6195_s18 = spop %6194 }
0x1af7   : > { %v3698_v59 = vstv %s6195_s18  ;;  %s6197_s4 = spop %6196 }
0x1af8   : > { %v3709_v53 = vmul.f32 %v3698_v59, %v9365_v10  ;;  %v3710_v12 = vmul.f32 %v3698_v59, %v9367_v6  ;;  %v3701_v45 = vstv %s6197_s4 }
0x1af9   : > { %v3711_v60 = vmul.f32 %v3701_v45, %v9373_v27  ;;  %v3712_v31 = vmul.f32 %v3701_v45, %v9375_v35 }
0x1afa   : > { %3727 = vrot.lane.b32.xlu0 %v3710_v12, %s6889_s24  ;;  %3725 = vrot.lane.b32.xlu1 %v3709_v53, %s6889_s24  ;;  %s6199_s13 = spop %6198 }
0x1afb   : > { %v3704_v5 = vstv %s6199_s13  ;;  %s6201_s10 = spop %6200 }
0x1afc   : > { %v3713_v52 = vmul.f32 %v3704_v5, %v9381_v7  ;;  %v3714_v9 = vmul.f32 %v3704_v5, %v9383_v46  ;;  %v3707_v59 = vstv %s6201_s10 }
0x1afd   : > { %v3715_v53 = vmul.f32 %v3707_v59, %v9389_v0  ;;  %v3716_v12 = vmul.f32 %v3707_v59, %v9391_v43 }
0x1afe   : > { %3731 = vrot.lane.b32.xlu0 %v3712_v31, %s6889_s24  ;;  %3729 = vrot.lane.b32.xlu1 %v3711_v60, %s6889_s24 }
0x1b02   : > { %3735 = vrot.lane.b32.xlu0 %v3714_v9, %s6889_s24  ;;  %3733 = vrot.lane.b32.xlu1 %v3713_v52, %s6889_s24 }
0x1b06   : > { %3739 = vrot.lane.b32.xlu0 %v3716_v12, %s6889_s24  ;;  %3737 = vrot.lane.b32.xlu1 %v3715_v53, %s6889_s24 }
0x1b0a   : > { %3759 = vrot.lane.b32.xlu0 %v9301_v1, %s11073_s29  ;;  %3757 = vrot.lane.b32.xlu1 %v9296_v62, %s11073_s29 }
0x1b0e   : > { %3763 = vrot.lane.b32.xlu0 %v9311_v42, %s11073_s29  ;;  %3761 = vrot.lane.b32.xlu1 %v9306_v4, %s11073_s29 }
0x1b6c   : > { %v9485_v45 = vpop.permute.xlu1 %3725  ;;  %v9487_v5 = vpop.permute.xlu0 %3727 }
0x1b6d   : > { %11447 = vst [vmem:[#allocation152_spill] sm:$0xff] %v9485_v45  ;;  %11448 = vst [vmem:[#allocation153_spill] sm:$0xff] %v9487_v5 }
0x1b70   : > { %v9489_v60 = vpop.permute.xlu1 %3729  ;;  %v9491_v31 = vpop.permute.xlu0 %3731 }
0x1b71   : > { %11449 = vst [vmem:[#allocation154_spill] sm:$0xff] %v9489_v60  ;;  %11450 = vst [vmem:[#allocation155_spill] sm:$0xff] %v9491_v31 }
0x1b74   : > { %v9493_v52 = vpop.permute.xlu1 %3733  ;;  %v9495_v9 = vpop.permute.xlu0 %3735 }
0x1b75   : > { %11451 = vst [vmem:[#allocation156_spill] sm:$0xff] %v9493_v52  ;;  %11452 = vst [vmem:[#allocation157_spill] sm:$0xff] %v9495_v9 }
0x1b78   : > { %v9497_v59 = vpop.permute.xlu1 %3737  ;;  %v9499_v53 = vpop.permute.xlu0 %3739 }
0x1b79   : > { %11453 = vst [vmem:[#allocation158_spill] sm:$0xff] %v9497_v59  ;;  %11454 = vst [vmem:[#allocation159_spill] sm:$0xff] %v9499_v53 }
0x1b7c   : > { %v3758_v12 = vpop.permute.xlu1 %3757  ;;  %v3760_v55 = vpop.permute.xlu0 %3759 }
0x1b7d   : > { %6202 = vpush %v3758_v12 }
0x1b7e   : > { %6204 = vpush %v3760_v55 }
0x1b80   : > { %v3762_v63 = vpop.permute.xlu1 %3761  ;;  %v3764_v45 = vpop.permute.xlu0 %3763 }
0x1b81   : > { %6206 = vpush %v3762_v63 }
0x1b82   : > { %6208 = vpush %v3764_v45 }
0x1bae   : > { %s6203_s18 = spop %6202 }
0x1baf   : > { %v3766_v60 = vstv %s6203_s18  ;;  %s6205_s4 = spop %6204 }
0x1bb0   : > { %v3777_v31 = vmul.f32 %v3766_v60, %v9365_v10  ;;  %v3778_v52 = vmul.f32 %v3766_v60, %v9367_v6  ;;  %v3769_v9 = vstv %s6205_s4 }
0x1bb1   : > { %v3779_v12 = vmul.f32 %v3769_v9, %v9373_v27  ;;  %v3780_v55 = vmul.f32 %v3769_v9, %v9375_v35 }
0x1bb2   : > { %3795 = vrot.lane.b32.xlu0 %v3778_v52, %s11024_s7  ;;  %3793 = vrot.lane.b32.xlu1 %v3777_v31, %s11024_s7  ;;  %s6207_s13 = spop %6206 }
0x1bb3   : > { %v3772_v53 = vstv %s6207_s13  ;;  %s6209_s10 = spop %6208  ;;  %s11462_s13 = smov 113  }
0x1bb4   : > { %v3781_v63 = vmul.f32 %v3772_v53, %v9381_v7  ;;  %v3782_v45 = vmul.f32 %v3772_v53, %v9383_v46  ;;  %v3775_v60 = vstv %s6209_s10 }
0x1bb5   : > { %v3783_v31 = vmul.f32 %v3775_v60, %v9389_v0  ;;  %v3784_v52 = vmul.f32 %v3775_v60, %v9391_v43 }
0x1bb6   : > { %3799 = vrot.lane.b32.xlu0 %v3780_v55, %s11024_s7  ;;  %3797 = vrot.lane.b32.xlu1 %v3779_v12, %s11024_s7 }
0x1bba   : > { %3803 = vrot.lane.b32.xlu0 %v3782_v45, %s11024_s7  ;;  %3801 = vrot.lane.b32.xlu1 %v3781_v63, %s11024_s7 }
0x1bbe   : > { %3807 = vrot.lane.b32.xlu0 %v3784_v52, %s11024_s7  ;;  %3805 = vrot.lane.b32.xlu1 %v3783_v31, %s11024_s7 }
0x1bc2   : > { %3827 = vrot.lane.b32.xlu0 %v9301_v1, %s11022_s2  ;;  %3825 = vrot.lane.b32.xlu1 %v9296_v62, %s11022_s2 }
0x1bc6   : > { %3831 = vrot.lane.b32.xlu0 %v9311_v42, %s11022_s2  ;;  %3829 = vrot.lane.b32.xlu1 %v9306_v4, %s11022_s2 }
0x1c24   : > { %v9525_v9 = vpop.permute.xlu1 %3793  ;;  %v9527_v53 = vpop.permute.xlu0 %3795 }
0x1c25   : > { %11455 = vst [vmem:[#allocation160_spill] sm:$0xff] %v9525_v9 }
0x1c28   : > { %v9529_v12 = vpop.permute.xlu1 %3797  ;;  %v9531_v55 = vpop.permute.xlu0 %3799 }
0x1c29   : > { %11456 = vst [vmem:[#allocation161_spill] sm:$0xff] %v9529_v12  ;;  %11457 = vst [vmem:[#allocation162_spill] sm:$0xff] %v9531_v55 }
0x1c2c   : > { %v9533_v63 = vpop.permute.xlu1 %3801  ;;  %v9535_v45 = vpop.permute.xlu0 %3803 }
0x1c2d   : > { %11458 = vst [vmem:[#allocation163_spill] sm:$0xff] %v9533_v63  ;;  %11459 = vst [vmem:[#allocation164_spill] sm:$0xff] %v9535_v45 }
0x1c30   : > { %v9537_v60 = vpop.permute.xlu1 %3805  ;;  %v9539_v31 = vpop.permute.xlu0 %3807 }
0x1c31   : > { %11460 = vst [vmem:[#allocation165_spill] sm:$0xff] %v9537_v60  ;;  %11461 = vst [vmem:[#allocation166_spill] sm:$0xff] %v9539_v31  ;;  %v9585_v60 = vrot.slane %v9298_v19, 4 }
0x1c33   : > { %11469 = vst [vmem:[#allocation173_spill] sm:$0xff] %v9585_v60 }
0x1c34   : > { %v3826_v52 = vpop.permute.xlu1 %3825  ;;  %v3828_v59 = vpop.permute.xlu0 %3827 }
0x1c35   : > { %6210 = vpush %v3826_v52 }
0x1c36   : > { %6212 = vpush %v3828_v59 }
0x1c38   : > { %v3830_v5 = vpop.permute.xlu1 %3829  ;;  %v3832_v9 = vpop.permute.xlu0 %3831 }
0x1c39   : > { %6214 = vpush %v3830_v5 }
0x1c3a   : > { %6216 = vpush %v3832_v9 }
0x1c66   : > { %s6211_s18 = spop %6210 }
0x1c67   : > { %v3834_v12 = vstv %s6211_s18  ;;  %s6213_s4 = spop %6212 }
0x1c68   : > { %v3845_v55 = vmul.f32 %v3834_v12, %v9365_v10  ;;  %v3846_v63 = vmul.f32 %v3834_v12, %v9367_v6  ;;  %v3837_v45 = vstv %s6213_s4  ;;  %s11472_s4 = smov 110  }
0x1c69   : > { %v3847_v52 = vmul.f32 %v3837_v45, %v9373_v27  ;;  %v3848_v59 = vmul.f32 %v3837_v45, %v9375_v35 }
0x1c6a   : > { %3863 = vrot.lane.b32.xlu0 %v3846_v63, %s11462_s13  ;;  %3861 = vrot.lane.b32.xlu1 %v3845_v55, %s11462_s13  ;;  %s6215_s10 = spop %6214 }
0x1c6b   : > { %v3840_v31 = vstv %s6215_s10  ;;  %s6217_s2 = spop %6216 }
0x1c6c   : > { %v3849_v5 = vmul.f32 %v3840_v31, %v9381_v7  ;;  %v3850_v9 = vmul.f32 %v3840_v31, %v9383_v46  ;;  %v3843_v12 = vstv %s6217_s2 }
0x1c6d   : > { %v3851_v55 = vmul.f32 %v3843_v12, %v9389_v0  ;;  %v3852_v63 = vmul.f32 %v3843_v12, %v9391_v43 }
0x1c6e   : > { %3867 = vrot.lane.b32.xlu0 %v3848_v59, %s11462_s13  ;;  %3865 = vrot.lane.b32.xlu1 %v3847_v52, %s11462_s13 }
0x1c72   : > { %3871 = vrot.lane.b32.xlu0 %v3850_v9, %s11462_s13  ;;  %3869 = vrot.lane.b32.xlu1 %v3849_v5, %s11462_s13 }
0x1c76   : > { %3875 = vrot.lane.b32.xlu0 %v3852_v63, %s11462_s13  ;;  %3873 = vrot.lane.b32.xlu1 %v3851_v55, %s11462_s13 }
0x1c7a   : > { %3895 = vrot.lane.b32.xlu0 %v9301_v1, %s6888_s30  ;;  %3893 = vrot.lane.b32.xlu1 %v9296_v62, %s6888_s30 }
0x1c7e   : > { %3899 = vrot.lane.b32.xlu0 %v9311_v42, %s6888_s30  ;;  %3897 = vrot.lane.b32.xlu1 %v9306_v4, %s6888_s30  ;;  %v9582_v4 = vrot.slane %v9293_v2, 4 }
0x1c80   : > { %11468 = vst [vmem:[#allocation172_spill] sm:$0xff] %v9582_v4 }
0x1cdc   : > { %v9565_v45 = vpop.permute.xlu1 %3861  ;;  %v9567_v31 = vpop.permute.xlu0 %3863 }
0x1ce0   : > { %v9569_v52 = vpop.permute.xlu1 %3865  ;;  %v9571_v59 = vpop.permute.xlu0 %3867 }
0x1ce1   : > { %11463 = vst [vmem:[#allocation167_spill] sm:$0xff] %v9571_v59  ;;  %v6615_v59 = vld [vmem:[#allocation3 + $0x50] sm:$0xff] }
0x1ce4   : > { %v9573_v5 = vpop.permute.xlu1 %3869  ;;  %v9575_v1 = vpop.permute.xlu0 %3871 }
0x1ce5   : > { %11464 = vst [vmem:[#allocation168_spill] sm:$0xff] %v9573_v5  ;;  %11465 = vst [vmem:[#allocation169_spill] sm:$0xff] %v9575_v1  ;;  %v9588_v5 = vrot.slane %v9303_v37, 4 }
0x1ce7   : > { %11470 = vst [vmem:[#allocation174_spill] sm:$0xff] %v9588_v5 }
0x1ce8   : > { %v9577_v9 = vpop.permute.xlu1 %3873  ;;  %v9579_v62 = vpop.permute.xlu0 %3875 }
0x1ce9   : > { %11466 = vst [vmem:[#allocation170_spill] sm:$0xff] %v9577_v9  ;;  %11467 = vst [vmem:[#allocation171_spill] sm:$0xff] %v9579_v62  ;;  %v9591_v9 = vrot.slane %v9308_v58, 4 }
0x1ceb   : > { %11471 = vst [vmem:[#allocation175_spill] sm:$0xff] %v9591_v9 }
0x1cec   : > { %v3894_v42 = vpop.permute.xlu1 %3893  ;;  %v3896_v12 = vpop.permute.xlu0 %3895 }
0x1ced   : > { %6218 = vpush %v3894_v42 }
0x1cee   : > { %6220 = vpush %v3896_v12 }
0x1cf0   : > { %v3898_v55 = vpop.permute.xlu1 %3897  ;;  %v3900_v63 = vpop.permute.xlu0 %3899 }
0x1cf1   : > { %6222 = vpush %v3898_v55 }
0x1cf2   : > { %6224 = vpush %v3900_v63 }
0x1cf3   : > { %6226 = vpush %v9582_v4 }
0x1cf4   : > { %6228 = vpush %v9585_v60 }
0x1cf5   : > { %6230 = vpush %v9588_v5 }
0x1cf6   : > { %6232 = vpush %v9591_v9 }
0x1d1e   : > { %s6219_s2 = spop %6218 }
0x1d1f   : > { %v3902_v2 = vstv %s6219_s2  ;;  %s6221_s18 = spop %6220 }
0x1d20   : > { %v3913_v19 = vmul.f32 %v3902_v2, %v9365_v10  ;;  %v3914_v37 = vmul.f32 %v3902_v2, %v9367_v6  ;;  %v3905_v42 = vstv %s6221_s18 }
0x1d21   : > { %v3915_v58 = vmul.f32 %v3905_v42, %v9373_v27  ;;  %v3916_v12 = vmul.f32 %v3905_v42, %v9375_v35  ;;  %v6611_v42 = vld [vmem:[#allocation3] sm:$0xff] }
0x1d22   : > { %3931 = vrot.lane.b32.xlu0 %v3914_v37, %s11472_s4  ;;  %3929 = vrot.lane.b32.xlu1 %v3913_v19, %s11472_s4  ;;  %s6223_s10 = spop %6222 }
0x1d23   : > { %v3908_v55 = vstv %s6223_s10  ;;  %s6225_s7 = spop %6224 }
0x1d24   : > { %v3917_v63 = vmul.f32 %v3908_v55, %v9381_v7  ;;  %v3918_v2 = vmul.f32 %v3908_v55, %v9383_v46  ;;  %v3911_v62 = vstv %s6225_s7 }
0x1d25   : > { %v3919_v19 = vmul.f32 %v3911_v62, %v9389_v0  ;;  %v3920_v37 = vmul.f32 %v3911_v62, %v9391_v43  ;;  %v2179_v0 = vstv %s8501_s14  ;;  %v6612_v62 = vld [vmem:[#allocation3 + $0x8] sm:$0xff]  ;;  %s6227_s14 = spop %6226 }
0x1d26   : > { %3935 = vrot.lane.b32.xlu0 %v3916_v12, %s11472_s4  ;;  %3933 = vrot.lane.b32.xlu1 %v3915_v58, %s11472_s4  ;;  %v2193_v43 = vmul.f32 %v6611_v42, %v2179_v0  ;;  %v2194_v58 = vmul.f32 %v6612_v62, %v2179_v0  ;;  %v2183_v12 = vstv %s8503_s11  ;;  %s6229_s11 = spop %6228 }
0x1d28   : > { %v2269_v55 = vadd.f32 %v8549_v49, %v2193_v43 }
0x1d2a   : > { %3939 = vrot.lane.b32.xlu0 %v3918_v2, %s11472_s4  ;;  %3937 = vrot.lane.b32.xlu1 %v3917_v63, %s11472_s4  ;;  %v2270_v63 = vadd.f32 %v8551_v11, %v2194_v58  ;;  %v6613_v2 = vld [vmem:[#allocation3 + $0x28] sm:$0xff]  ;;  %v6616_v11 = vld [vmem:[#allocation3 + $0x58] sm:$0xff] }
0x1d2c   : > { %v2338_v1 = vadd.f32 %v8591_v48, %v2270_v63  ;;  %v6620_v63 = vld [vmem:[#allocation3 + $0x33] sm:$0xff] }
0x1d2e   : > { %3943 = vrot.lane.b32.xlu0 %v3920_v37, %s11472_s4  ;;  %3941 = vrot.lane.b32.xlu1 %v3919_v19, %s11472_s4  ;;  %v2195_v19 = vmul.f32 %v6613_v2, %v2183_v12  ;;  %v6614_v37 = vld [vmem:[#allocation3 + $0x30] sm:$0xff]  ;;  %v2406_v49 = vadd.f32 %v8639_v13, %v2338_v1 }
0x1d2f   : > { %v6618_v1 = vld [vmem:[#allocation3 + $0xb] sm:$0xff] }
0x1d32   : > { %4003 = vrot.lane.b32.xlu0 %v9585_v60, %s11093_s0  ;;  %4001 = vrot.lane.b32.xlu1 %v9582_v4, %s11093_s0  ;;  %v2196_v4 = vmul.f32 %v6614_v37, %v2183_v12  ;;  %v2187_v60 = vstv %s8505_s21  ;;  %s6231_s21 = spop %6230 }
0x1d33   : > { %v2197_v0 = vmul.f32 %v6615_v59, %v2187_v60  ;;  %v2198_v43 = vmul.f32 %v6616_v11, %v2187_v60  ;;  %v11474_v11 = vld [vmem:[#allocation48_spill] sm:$0xff]  ;;  %s9811_s7 = spop %6232 }
0x1d34   : > { %v2272_v42 = vadd.f32 %v8555_v15, %v2196_v4 }
0x1d35   : > { %v2274_v15 = vadd.f32 %v8559_v16, %v2198_v43 }
0x1d36   : > { %4007 = vrot.lane.b32.xlu0 %v9591_v9, %s11093_s0  ;;  %4005 = vrot.lane.b32.xlu1 %v9588_v5, %s11093_s0  ;;  %v2337_v9 = vadd.f32 %v8589_v61, %v2269_v55  ;;  %v2271_v5 = vadd.f32 %v8553_v50, %v2195_v19  ;;  %v2340_v12 = vadd.f32 %v8595_v32, %v2272_v42  ;;  %v6619_v55 = vld [vmem:[#allocation3 + $0x2b] sm:$0xff]  ;;  %v2636_v19 = vstv %s8793_s25 }
0x1d37   : > { %v2273_v61 = vadd.f32 %v8557_v51, %v2197_v0  ;;  %v2474_v50 = vadd.f32 %v8679_v36, %v2406_v49  ;;  %v2342_v32 = vadd.f32 %v8599_v8, %v2274_v15  ;;  %v2630_v36 = vstv %s8789_s27  ;;  %v6617_v8 = vld [vmem:[#allocation3 + $0x3] sm:$0xff]  ;;  %v11477_v15 = vld [vmem:[#allocation43_spill] sm:$0xff] }
0x1d38   : > { %v2405_v62 = vadd.f32 %v8637_v24, %v2337_v9  ;;  %v2339_v58 = vadd.f32 %v8593_v18, %v2271_v5  ;;  %v2408_v24 = vadd.f32 %v8643_v14, %v2340_v12  ;;  %v2633_v9 = vstv %s8791_s22  ;;  %v6622_v12 = vld [vmem:[#allocation3 + $0x5b] sm:$0xff] }
0x1d39   : > { %v2341_v13 = vadd.f32 %v8597_v17, %v2273_v61  ;;  %v2542_v18 = vadd.f32 %v8719_v20, %v2474_v50  ;;  %v2410_v17 = vadd.f32 %v8647_v57, %v2342_v32  ;;  %v2644_v2 = vmul.f32 %v6620_v63, %v2633_v9  ;;  %v11493_v63 = vld [vmem:[#allocation67_spill] sm:$0xff] }
0x1d3a   : > { %v2473_v48 = vadd.f32 %v8677_v21, %v2405_v62  ;;  %v2407_v59 = vadd.f32 %v8641_v26, %v2339_v58  ;;  %v2476_v21 = vadd.f32 %v8683_v40, %v2408_v24  ;;  %v2642_v40 = vmul.f32 %v6618_v1, %v2630_v36  ;;  %v11487_v1 = vld [vmem:[#allocation59_spill] sm:$0xff] }
0x1d3b   : > { %v2409_v16 = vadd.f32 %v8645_v54, %v2341_v13  ;;  %v2610_v14 = vadd.f32 %v8775_v44, %v2542_v18  ;;  %v2478_v54 = vadd.f32 %v8687_v38, %v2410_v17  ;;  %v2646_v61 = vmul.f32 %v6622_v12, %v2636_v19  ;;  %v11480_v18 = vld [vmem:[#allocation50_spill] sm:$0xff]  ;;  %v11484_v17 = vld [vmem:[#allocation65_spill] sm:$0xff] }
0x1d3c   : > { %v2541_v60 = vadd.f32 %v8717_v39, %v2473_v48  ;;  %v2475_v51 = vadd.f32 %v8681_v22, %v2407_v59  ;;  %v2544_v20 = vadd.f32 %v8723_v56, %v2476_v21  ;;  %v2641_v22 = vmul.f32 %v6617_v8, %v2630_v36  ;;  %v11476_v48 = vld [vmem:[#allocation42_spill] sm:$0xff]  ;;  %v11482_v36 = vld [vmem:[#allocation44_spill] sm:$0xff] }
0x1d3d   : > { %v2477_v5 = vadd.f32 %v8685_v23, %v2409_v16  ;;  %v2546_v56 = vadd.f32 %v8727_v34, %v2478_v54  ;;  %v2643_v23 = vmul.f32 %v6619_v55, %v2633_v9  ;;  %v11475_v34 = vld [vmem:[#allocation49_spill] sm:$0xff]  ;;  %v11486_v8 = vld [vmem:[#allocation58_spill] sm:$0xff]  ;;  %v11488_v9 = vld [vmem:[#allocation52_spill] sm:$0xff] }
0x1d3e   : > { %v2609_v26 = vadd.f32 %v8773_v3, %v2541_v60  ;;  %v2543_v39 = vadd.f32 %v8721_v41, %v2475_v51  ;;  %v2612_v44 = vadd.f32 %v8779_v25, %v2544_v20  ;;  %v2650_v41 = vadd.f32 %v2642_v40, %v2610_v14  ;;  %v11473_v25 = vld [vmem:[#allocation39_spill] sm:$0xff]  ;;  %v11485_v20 = vld [vmem:[#allocation45_spill] sm:$0xff]  ;;  %v11492_v55 = vld [vmem:[#allocation66_spill] sm:$0xff] }
0x1d3f   : > { %v2545_v57 = vadd.f32 %v8725_v29, %v2477_v5  ;;  %v2614_v62 = vadd.f32 %v11473_v25, %v2546_v56  ;;  %v6621_v29 = vld [vmem:[#allocation3 + $0x53] sm:$0xff] }
0x1d40   : > { %v2611_v3 = vadd.f32 %v8777_v47, %v2543_v39  ;;  %v2649_v4 = vadd.f32 %v2641_v22, %v2609_v26  ;;  %v2718_v38 = vadd.f32 %v8839_v33, %v2650_v41  ;;  %v2652_v0 = vadd.f32 %v2644_v2, %v2612_v44  ;;  %v11479_v33 = vld [vmem:[#allocation57_spill] sm:$0xff]  ;;  %v11481_v51 = vld [vmem:[#allocation51_spill] sm:$0xff] }
0x1d41   : > { %v2613_v37 = vadd.f32 %v8781_v28, %v2545_v57  ;;  %v2645_v49 = vmul.f32 %v6621_v29, %v2636_v19  ;;  %v2654_v60 = vadd.f32 %v2646_v61, %v2614_v62  ;;  %v11483_v26 = vld [vmem:[#allocation63_spill] sm:$0xff]  ;;  %v11490_v57 = vld [vmem:[#allocation74_spill] sm:$0xff]  ;;  %v11491_v41 = vld [vmem:[#allocation53_spill] sm:$0xff]  ;;  %v3078_v19 = vstv %s9069_s12 }
0x1d42   : > { %v2717_v42 = vadd.f32 %v8837_v30, %v2649_v4  ;;  %v2651_v47 = vadd.f32 %v2643_v23, %v2611_v3  ;;  %v2786_v58 = vadd.f32 %v11475_v34, %v2718_v38  ;;  %v2720_v28 = vadd.f32 %v11477_v15, %v2652_v0  ;;  %v11478_v30 = vld [vmem:[#allocation56_spill] sm:$0xff]  ;;  %v11489_v3 = vld [vmem:[#allocation73_spill] sm:$0xff]  ;;  %v11495_v38 = vld [vmem:[#allocation82_spill] sm:$0xff] }
0x1d43   : > { %v2653_v59 = vadd.f32 %v2645_v49, %v2613_v37  ;;  %v2722_v5 = vadd.f32 %v11485_v20, %v2654_v60  ;;  %v11494_v37 = vld [vmem:[#allocation60_spill] sm:$0xff]  ;;  %v11496_v0 = vld [vmem:[#allocation83_spill] sm:$0xff]  ;;  %v11497_v62 = vld [vmem:[#allocation61_spill] sm:$0xff]  ;;  %v3084_v20 = vstv %s9073_s8 }
0x1d44   : > { %v2785_v43 = vadd.f32 %v11474_v11, %v2717_v42  ;;  %v2719_v50 = vadd.f32 %v11476_v48, %v2651_v47  ;;  %v2854_v13 = vadd.f32 %v11479_v33, %v2786_v58  ;;  %v2788_v21 = vadd.f32 %v11481_v51, %v2720_v28  ;;  %v11498_v49 = vld [vmem:[#allocation75_spill] sm:$0xff]  ;;  %v11500_v58 = vld [vmem:[#allocation68_spill] sm:$0xff] }
0x1d45   : > { %v2721_v16 = vadd.f32 %v11482_v36, %v2653_v59  ;;  %v2790_v56 = vadd.f32 %v11491_v41, %v2722_v5  ;;  %v6623_v61 = vld [vmem:[#allocation3 + $0x6] sm:$0xff]  ;;  %v3081_v28 = vstv %s9071_s1 }
0x1d46   : > { %v2853_v24 = vadd.f32 %v11478_v30, %v2785_v43  ;;  %v2787_v32 = vadd.f32 %v11480_v18, %v2719_v50  ;;  %v2922_v39 = vadd.f32 %v11484_v17, %v2854_v13  ;;  %v2856_v40 = vadd.f32 %v11487_v1, %v2788_v21  ;;  %v11499_v43 = vld [vmem:[#allocation71_spill] sm:$0xff]  ;;  %v6624_v50 = vld [vmem:[#allocation3 + $0xe] sm:$0xff]  ;;  %v11504_v18 = vld [vmem:[#allocation76_spill] sm:$0xff] }
0x1d47   : > { %v2789_v54 = vadd.f32 %v11488_v9, %v2721_v16  ;;  %v2858_v29 = vadd.f32 %v11497_v62, %v2790_v56  ;;  %v3089_v48 = vmul.f32 %v6623_v61, %v3078_v19  ;;  %v3090_v15 = vmul.f32 %v6624_v50, %v3078_v19  ;;  %v11501_v59 = vld [vmem:[#allocation69_spill] sm:$0xff]  ;;  %v11503_v13 = vld [vmem:[#allocation79_spill] sm:$0xff]  ;;  %v11506_v5 = vld [vmem:[#allocation84_spill] sm:$0xff] }
0x1d48   : > { %v2921_v14 = vadd.f32 %v11483_v26, %v2853_v24  ;;  %v2855_v22 = vadd.f32 %v11486_v8, %v2787_v32  ;;  %v2990_v4 = vadd.f32 %v11490_v57, %v2922_v39  ;;  %v2924_v2 = vadd.f32 %v11493_v63, %v2856_v40  ;;  %v11502_v24 = vld [vmem:[#allocation78_spill] sm:$0xff]  ;;  %v11505_v36 = vld [vmem:[#allocation77_spill] sm:$0xff]  ;;  %v11518_v61 = vld [vmem:[#allocation96_spill] sm:$0xff] }
0x1d49   : > { %v2857_v42 = vadd.f32 %v11494_v37, %v2789_v54  ;;  %v2926_v30 = vadd.f32 %v11501_v59, %v2858_v29  ;;  %v6625_v26 = vld [vmem:[#allocation3 + $0x2e] sm:$0xff]  ;;  %v6626_v17 = vld [vmem:[#allocation3 + $0x36] sm:$0xff] }
0x1d4a   : > { %v2989_v44 = vadd.f32 %v11489_v3, %v2921_v14  ;;  %v2923_v23 = vadd.f32 %v11492_v55, %v2855_v22  ;;  %v3058_v25 = vadd.f32 %v11496_v0, %v2990_v4  ;;  %v2992_v34 = vadd.f32 %v11499_v43, %v2924_v2  ;;  %v11507_v22 = vld [vmem:[#allocation88_spill] sm:$0xff]  ;;  %v11508_v40 = vld [vmem:[#allocation89_spill] sm:$0xff]  ;;  %v6627_v4 = vld [vmem:[#allocation3 + $0x56] sm:$0xff] }
0x1d4b   : > { %v2925_v12 = vadd.f32 %v11500_v58, %v2857_v42  ;;  %v2994_v16 = vadd.f32 %v11505_v36, %v2926_v30  ;;  %v3091_v14 = vmul.f32 %v6625_v26, %v3081_v28  ;;  %v3092_v39 = vmul.f32 %v6626_v17, %v3081_v28  ;;  %v11510_v56 = vld [vmem:[#allocation93_spill] sm:$0xff]  ;;  %v6628_v2 = vld [vmem:[#allocation3 + $0x5e] sm:$0xff]  ;;  %v11512_v37 = vld [vmem:[#allocation90_spill] sm:$0xff] }
0x1d4c   : > { %v3057_v47 = vadd.f32 %v11495_v38, %v2989_v44  ;;  %v2991_v11 = vadd.f32 %v11498_v49, %v2923_v23  ;;  %v3060_v60 = vadd.f32 %v11503_v13, %v2992_v34  ;;  %v3098_v21 = vadd.f32 %v3090_v15, %v3058_v25  ;;  %v11509_v44 = vld [vmem:[#allocation85_spill] sm:$0xff]  ;;  %v11511_v23 = vld [vmem:[#allocation94_spill] sm:$0xff]  ;;  %v11513_v38 = vld [vmem:[#allocation91_spill] sm:$0xff] }
0x1d4d   : > { %v2993_v32 = vadd.f32 %v11504_v18, %v2925_v12  ;;  %v3062_v57 = vadd.f32 %v11509_v44, %v2994_v16  ;;  %v3093_v41 = vmul.f32 %v6627_v4, %v3084_v20  ;;  %v3094_v19 = vmul.f32 %v6628_v2, %v3084_v20  ;;  %v11514_v25 = vld [vmem:[#allocation110_spill] sm:$0xff]  ;;  %v11515_v29 = vld [vmem:[#allocation111_spill] sm:$0xff]  ;;  %v11521_v30 = vld [vmem:[#allocation97_spill] sm:$0xff] }
0x1d4e   : > { %v3059_v33 = vadd.f32 %v11502_v24, %v2991_v11  ;;  %v3097_v51 = vadd.f32 %v3089_v48, %v3057_v47  ;;  %v3166_v9 = vadd.f32 %v11508_v40, %v3098_v21  ;;  %v3100_v3 = vadd.f32 %v3092_v39, %v3060_v60  ;;  %v11516_v43 = vld [vmem:[#allocation95_spill] sm:$0xff]  ;;  %v11519_v50 = vld [vmem:[#allocation118_spill] sm:$0xff]  ;;  %v11523_v60 = vld [vmem:[#allocation101_spill] sm:$0xff] }
0x1d4f   : > { %v3061_v8 = vadd.f32 %v11506_v5, %v2993_v32  ;;  %v3102_v11 = vadd.f32 %v3094_v19, %v3062_v57  ;;  %v11517_v58 = vld [vmem:[#allocation103_spill] sm:$0xff]  ;;  %v11524_v32 = vld [vmem:[#allocation104_spill] sm:$0xff]  ;;  %v11526_v16 = vld [vmem:[#allocation125_spill] sm:$0xff] }
0x1d50   : > { %v3165_v1 = vadd.f32 %v11507_v22, %v3097_v51  ;;  %v3099_v54 = vadd.f32 %v3091_v14, %v3059_v33  ;;  %v3234_v63 = vadd.f32 %v11511_v23, %v3166_v9  ;;  %v3168_v47 = vadd.f32 %v11513_v38, %v3100_v3  ;;  %v11520_v28 = vld [vmem:[#allocation119_spill] sm:$0xff]  ;;  %v11522_v33 = vld [vmem:[#allocation112_spill] sm:$0xff]  ;;  %v11532_v3 = vld [vmem:[#allocation133_spill] sm:$0xff] }
0x1d51   : > { %v3101_v0 = vadd.f32 %v3093_v41, %v3061_v8  ;;  %v3170_v24 = vadd.f32 %v11521_v30, %v3102_v11  ;;  %v11525_v21 = vld [vmem:[#allocation116_spill] sm:$0xff]  ;;  %v11527_v14 = vld [vmem:[#allocation99_spill] sm:$0xff]  ;;  %v3526_v22 = vstv %s9357_s19  ;;  %v11533_v57 = vld [vmem:[#allocation105_spill] sm:$0xff] }
0x1d52   : > { %v3233_v55 = vadd.f32 %v11510_v56, %v3165_v1  ;;  %v3167_v42 = vadd.f32 %v11512_v37, %v3099_v54  ;;  %v3302_v49 = vadd.f32 %v11515_v29, %v3234_v63  ;;  %v3236_v12 = vadd.f32 %v11517_v58, %v3168_v47  ;;  %v11528_v39 = vld [vmem:[#allocation120_spill] sm:$0xff]  ;;  %v11529_v5 = vld [vmem:[#allocation107_spill] sm:$0xff]  ;;  %v11530_v1 = vld [vmem:[#allocation102_spill] sm:$0xff] }
0x1d53   : > { %v3169_v48 = vadd.f32 %v11518_v61, %v3101_v0  ;;  %v3238_v17 = vadd.f32 %v11527_v14, %v3170_v24  ;;  %v11531_v9 = vld [vmem:[#allocation124_spill] sm:$0xff]  ;;  %v11534_v41 = vld [vmem:[#allocation126_spill] sm:$0xff]  ;;  %v3537_v19 = vmul.f32 %v3526_v22, %v9365_v10  ;;  %v3538_v37 = vmul.f32 %v3526_v22, %v9367_v6  ;;  %v11537_v38 = vld [vmem:[#allocation113_spill] sm:$0xff] }
0x1d54   : > { %v3301_v62 = vadd.f32 %v11514_v25, %v3233_v55  ;;  %v3235_v34 = vadd.f32 %v11516_v43, %v3167_v42  ;;  %v3370_v59 = vadd.f32 %v11520_v28, %v3302_v49  ;;  %v3304_v18 = vadd.f32 %v11523_v60, %v3236_v12  ;;  %v11535_v55 = vld [vmem:[#allocation127_spill] sm:$0xff]  ;;  %v11536_v63 = vld [vmem:[#allocation108_spill] sm:$0xff]  ;;  %v11538_v0 = vld [vmem:[#allocation134_spill] sm:$0xff] }
0x1d55   : > { %v3237_v51 = vadd.f32 %v11524_v32, %v3169_v48  ;;  %v3306_v4 = vadd.f32 %v11533_v57, %v3238_v17  ;;  %v3529_v42 = vstv %s9359_s3  ;;  %v11540_v49 = vld [vmem:[#allocation128_spill] sm:$0xff]  ;;  %v11541_v58 = vld [vmem:[#allocation121_spill] sm:$0xff]  ;;  %v3532_v10 = vstv %s9361_s16 }
0x1d56   : > { %v3369_v15 = vadd.f32 %v11519_v50, %v3301_v62  ;;  %v3303_v13 = vadd.f32 %v11522_v33, %v3235_v34  ;;  %v3438_v26 = vadd.f32 %v11526_v16, %v3370_v59  ;;  %v3372_v8 = vadd.f32 %v11529_v5, %v3304_v18  ;;  %v11539_v62 = vld [vmem:[#allocation135_spill] sm:$0xff]  ;;  %v11542_v50 = vld [vmem:[#allocation136_spill] sm:$0xff]  ;;  %v11544_v59 = vld [vmem:[#allocation129_spill] sm:$0xff] }
0x1d57   : > { %v3305_v40 = vadd.f32 %v11530_v1, %v3237_v51  ;;  %v3374_v47 = vadd.f32 %v11537_v38, %v3306_v4  ;;  %v3539_v61 = vmul.f32 %v3529_v42, %v9373_v27  ;;  %v3540_v48 = vmul.f32 %v3529_v42, %v9375_v35  ;;  %v11545_v24 = vld [vmem:[#allocation141_spill] sm:$0xff]  ;;  %v11546_v32 = vld [vmem:[#allocation140_spill] sm:$0xff]  ;;  %v11548_v35 = vld [vmem:[#allocation130_spill] sm:$0xff] }
0x1d58   : > { %v3437_v36 = vadd.f32 %v11525_v21, %v3369_v15  ;;  %v3371_v20 = vadd.f32 %v11528_v39, %v3303_v13  ;;  %v3506_v44 = vadd.f32 %v11532_v3, %v3438_v26  ;;  %v3440_v23 = vadd.f32 %v11535_v55, %v3372_v8  ;;  %v11543_v15 = vld [vmem:[#allocation144_spill] sm:$0xff]  ;;  %v11547_v21 = vld [vmem:[#allocation145_spill] sm:$0xff]  ;;  %v11549_v26 = vld [vmem:[#allocation131_spill] sm:$0xff] }
0x1d59   : > { %v3373_v2 = vadd.f32 %v11536_v63, %v3305_v40  ;;  %v3442_v12 = vadd.f32 %v11541_v58, %v3374_v47  ;;  %v3541_v18 = vmul.f32 %v3532_v10, %v9381_v7  ;;  %v3542_v27 = vmul.f32 %v3532_v10, %v9383_v46  ;;  %v11550_v39 = vld [vmem:[#allocation152_spill] sm:$0xff]  ;;  %v11551_v5 = vld [vmem:[#allocation153_spill] sm:$0xff]  ;;  %v11552_v1 = vld [vmem:[#allocation146_spill] sm:$0xff] }
0x1d5a   : > { %v3505_v54 = vadd.f32 %v11531_v9, %v3437_v36  ;;  %v3439_v56 = vadd.f32 %v11534_v41, %v3371_v20  ;;  %v3508_v29 = vadd.f32 %v11539_v62, %v3440_v23  ;;  %v3546_v34 = vadd.f32 %v3538_v37, %v3506_v44  ;;  %v11553_v7 = vld [vmem:[#allocation147_spill] sm:$0xff]  ;;  %v11555_v44 = vld [vmem:[#allocation160_spill] sm:$0xff]  ;;  %v11556_v4 = vld [vmem:[#allocation137_spill] sm:$0xff] }
0x1d5b   : > { %v3441_v11 = vadd.f32 %v11540_v49, %v3373_v2  ;;  %v3510_v33 = vadd.f32 %v11545_v24, %v3442_v12  ;;  %v11558_v23 = vld [vmem:[#allocation155_spill] sm:$0xff]  ;;  %v3974_v2 = vstv %s6227_s14  ;;  %v11559_v42 = vld [vmem:[#allocation148_spill] sm:$0xff]  ;;  %v11560_v47 = vld [vmem:[#allocation149_spill] sm:$0xff] }
0x1d5c   : > { %v3507_v25 = vadd.f32 %v11538_v0, %v3439_v56  ;;  %v3545_v43 = vadd.f32 %v3537_v19, %v3505_v54  ;;  %v3614_v30 = vadd.f32 %v11544_v59, %v3546_v34  ;;  %v3548_v60 = vadd.f32 %v3540_v48, %v3508_v29  ;;  %v11554_v54 = vld [vmem:[#allocation132_spill] sm:$0xff]  ;;  %v11557_v56 = vld [vmem:[#allocation154_spill] sm:$0xff]  ;;  %v11564_v10 = vld [vmem:[#allocation157_spill] sm:$0xff] }
0x1d5d   : > { %v3509_v6 = vadd.f32 %v11542_v50, %v3441_v11  ;;  %v3550_v22 = vadd.f32 %v3542_v27, %v3510_v33  ;;  %v11562_v29 = vld [vmem:[#allocation162_spill] sm:$0xff]  ;;  %v11566_v33 = vld [vmem:[#allocation163_spill] sm:$0xff] }
0x1d5e   : > { %v3613_v28 = vadd.f32 %v11543_v15, %v3545_v43  ;;  %v3547_v13 = vadd.f32 %v3539_v61, %v3507_v25  ;;  %v3682_v36 = vadd.f32 %v11547_v21, %v3614_v30  ;;  %v3616_v14 = vadd.f32 %v11549_v26, %v3548_v60  ;;  %v11561_v25 = vld [vmem:[#allocation161_spill] sm:$0xff]  ;;  %v9771_v11 = vld [vmem:[#allocation3 + $0x14] sm:$0xff]  ;;  %v11563_v61 = vld [vmem:[#allocation156_spill] sm:$0xff] }
0x1d5f   : > { %v3549_v17 = vadd.f32 %v3541_v18, %v3509_v6  ;;  %v3618_v41 = vadd.f32 %v11556_v4, %v3550_v22  ;;  %v9769_v49 = vld [vmem:[#allocation3 + $0xc] sm:$0xff]  ;;  %v3977_v6 = vstv %s6229_s11  ;;  %v11567_v60 = vld [vmem:[#allocation164_spill] sm:$0xff]  ;;  %v3980_v26 = vstv %s6231_s21  ;;  %s11577_s21 = smov 116  }
0x1d60   : > { %v3681_v51 = vadd.f32 %v11546_v32, %v3613_v28  ;;  %v3615_v16 = vadd.f32 %v11548_v35, %v3547_v13  ;;  %v3750_v8 = vadd.f32 %v11551_v5, %v3682_v36  ;;  %v3684_v9 = vadd.f32 %v11553_v7, %v3616_v14  ;;  %v11565_v28 = vld [vmem:[#allocation167_spill] sm:$0xff]  ;;  %v11568_v14 = vld [vmem:[#allocation168_spill] sm:$0xff] }
0x1d61   : > { %v3617_v3 = vadd.f32 %v11554_v54, %v3549_v17  ;;  %v3686_v0 = vadd.f32 %v11560_v47, %v3618_v41  ;;  %v3985_v58 = vmul.f32 %v3974_v2, %v9769_v49  ;;  %v9785_v32 = vld [vmem:[#allocation3 + $0x34] sm:$0xff]  ;;  %v9797_v22 = vld [vmem:[#allocation3 + $0x5c] sm:$0xff] }
0x1d62   : > { %v3749_v20 = vadd.f32 %v11550_v39, %v3681_v51  ;;  %v3683_v40 = vadd.f32 %v11552_v1, %v3615_v16  ;;  %v3818_v46 = vadd.f32 %v9527_v53, %v3750_v8  ;;  %v3752_v63 = vadd.f32 %v11558_v23, %v3684_v9  ;;  %v9787_v51 = vld [vmem:[#allocation3 + $0x3c] sm:$0xff]  ;;  %v11569_v39 = vld [vmem:[#allocation169_spill] sm:$0xff] }
0x1d63   : > { %v3685_v38 = vadd.f32 %v11559_v42, %v3617_v3  ;;  %v3754_v50 = vadd.f32 %v11564_v10, %v3686_v0  ;;  %v3987_v27 = vmul.f32 %v3977_v6, %v9785_v32  ;;  %v9799_v1 = vld [vmem:[#allocation3 + $0x64] sm:$0xff]  ;;  %v3989_v9 = vmul.f32 %v3980_v26, %v9797_v22 }
0x1d64   : > { %v3817_v57 = vadd.f32 %v11555_v44, %v3749_v20  ;;  %v3751_v55 = vadd.f32 %v11557_v56, %v3683_v40  ;;  %v3886_v37 = vadd.f32 %v9567_v31, %v3818_v46  ;;  %v3820_v53 = vadd.f32 %v11562_v29, %v3752_v63 }
0x1d65   : > { %v3753_v48 = vadd.f32 %v11563_v61, %v3685_v38  ;;  %v3822_v18 = vadd.f32 %v11567_v60, %v3754_v50  ;;  %v3990_v54 = vmul.f32 %v3980_v26, %v9799_v1  ;;  %v11573_v61 = vld [vmem:[#allocation174_spill] sm:$0xff] }
0x1d66   : > { %v3885_v19 = vadd.f32 %v9565_v45, %v3817_v57  ;;  %v3819_v62 = vadd.f32 %v11561_v25, %v3751_v55  ;;  %v3986_v45 = vmul.f32 %v3974_v2, %v9771_v11  ;;  %v3888_v59 = vadd.f32 %v11565_v28, %v3820_v53  ;;  %v9825_v53 = vld [vmem:[#allocation3 + $0x84] sm:$0xff] }
0x1d67   : > { %v3821_v13 = vadd.f32 %v11566_v33, %v3753_v48  ;;  %v3890_v20 = vadd.f32 %v11569_v39, %v3822_v18 }
0x1d68   : > { %v3887_v15 = vadd.f32 %v9569_v52, %v3819_v62  ;;  %v3988_v52 = vmul.f32 %v3977_v6, %v9787_v51 }
0x1d69   : > { %v3889_v17 = vadd.f32 %v11568_v14, %v3821_v13 }
0x1d94   : > { %v3930_v43 = vpop.permute.xlu1 %3929  ;;  %v3932_v34 = vpop.permute.xlu0 %3931 }
0x1d95   : > { %v3953_v31 = vadd.f32 %v3930_v43, %v3885_v19  ;;  %v3954_v12 = vadd.f32 %v3932_v34, %v3886_v37  ;;  %v9827_v43 = vld [vmem:[#allocation3 + $0x8c] sm:$0xff] }
0x1d97   : > { %v9779_v30 = vadd.f32 %v3985_v58, %v3953_v31  ;;  %v9781_v24 = vadd.f32 %v3986_v45, %v3954_v12  ;;  %v11570_v45 = vld [vmem:[#allocation173_spill] sm:$0xff]  ;;  %v11571_v31 = vld [vmem:[#allocation172_spill] sm:$0xff]  ;;  %v11572_v12 = vld [vmem:[#allocation175_spill] sm:$0xff] }
0x1d98   : > { %v3934_v21 = vpop.permute.xlu1 %3933  ;;  %v3936_v36 = vpop.permute.xlu0 %3935 }
0x1d99   : > { %v3955_v35 = vadd.f32 %v3934_v21, %v3887_v15  ;;  %v3956_v16 = vadd.f32 %v3936_v36, %v3888_v59 }
0x1d9b   : > { %v9793_v5 = vadd.f32 %v3987_v27, %v3955_v35  ;;  %v9795_v8 = vadd.f32 %v3988_v52, %v3956_v16 }
0x1d9c   : > { %v3938_v40 = vpop.permute.xlu1 %3937  ;;  %v3940_v7 = vpop.permute.xlu0 %3939 }
0x1d9d   : > { %v3957_v3 = vadd.f32 %v3938_v40, %v3889_v17  ;;  %v3958_v44 = vadd.f32 %v3940_v7, %v3890_v20 }
0x1d9f   : > { %v9803_v57 = vadd.f32 %v3989_v9, %v3957_v3  ;;  %v9805_v46 = vadd.f32 %v3990_v54, %v3958_v44 }
0x1da0   : > { %v9807_v4 = vpop.permute.xlu1 %3941  ;;  %v9809_v41 = vpop.permute.xlu0 %3943 }
0x1da4   : > { %v4002_v56 = vpop.permute.xlu1 %4001  ;;  %v4004_v55 = vpop.permute.xlu0 %4003 }
0x1da5   : > { %6234 = vpush %v4002_v56 }
0x1da6   : > { %6236 = vpush %v4004_v55 }
0x1da8   : > { %v4006_v23 = vpop.permute.xlu1 %4005  ;;  %v4008_v63 = vpop.permute.xlu0 %4007 }
0x1da9   : > { %6238 = vpush %v4006_v23 }
0x1daa   : > { %6240 = vpush %v4008_v63 }
0x1dd6   : > { %s6235_s27 = spop %6234 }
0x1dd7   : > { %v4010_v2 = vstv %s6235_s27  ;;  %s6237_s22 = spop %6236 }
0x1dd8   : > { %v4021_v19 = vmul.f32 %v4010_v2, %v9769_v49  ;;  %v4022_v37 = vmul.f32 %v4010_v2, %v9771_v11  ;;  %v4013_v42 = vstv %s6237_s22 }
0x1dd9   : > { %v4023_v38 = vmul.f32 %v4013_v42, %v9785_v32  ;;  %v4024_v47 = vmul.f32 %v4013_v42, %v9787_v51 }
0x1dda   : > { %4039 = vrot.lane.b32.xlu0 %v4022_v37, %s11072_s9  ;;  %4037 = vrot.lane.b32.xlu1 %v4021_v19, %s11072_s9  ;;  %s6239_s25 = spop %6238 }
0x1ddb   : > { %v4016_v0 = vstv %s6239_s25  ;;  %s6241_s12 = spop %6240  ;;  %s11578_s25 = smov 123  }
0x1ddc   : > { %v4025_v25 = vmul.f32 %v4016_v0, %v9797_v22  ;;  %v4026_v62 = vmul.f32 %v4016_v0, %v9799_v1  ;;  %v4019_v29 = vstv %s6241_s12 }
0x1ddd   : > { %v4027_v34 = vmul.f32 %v4019_v29, %v9825_v53  ;;  %v4028_v58 = vmul.f32 %v4019_v29, %v9827_v43 }
0x1dde   : > { %4043 = vrot.lane.b32.xlu0 %v4024_v47, %s11072_s9  ;;  %4041 = vrot.lane.b32.xlu1 %v4023_v38, %s11072_s9 }
0x1de2   : > { %4047 = vrot.lane.b32.xlu0 %v4026_v62, %s11072_s9  ;;  %4045 = vrot.lane.b32.xlu1 %v4025_v25, %s11072_s9 }
0x1de6   : > { %4051 = vrot.lane.b32.xlu0 %v4028_v58, %s11072_s9  ;;  %4049 = vrot.lane.b32.xlu1 %v4027_v34, %s11072_s9 }
0x1dea   : > { %4071 = vrot.lane.b32.xlu0 %v11570_v45, %s11071_s17  ;;  %4069 = vrot.lane.b32.xlu1 %v11571_v31, %s11071_s17 }
0x1dee   : > { %4075 = vrot.lane.b32.xlu0 %v11572_v12, %s11071_s17  ;;  %4073 = vrot.lane.b32.xlu1 %v11573_v61, %s11071_s17 }
0x1e4c   : > { %v9841_v48 = vpop.permute.xlu1 %4037  ;;  %v9843_v10 = vpop.permute.xlu0 %4039 }
0x1e50   : > { %v9845_v50 = vpop.permute.xlu1 %4041  ;;  %v9847_v6 = vpop.permute.xlu0 %4043 }
0x1e54   : > { %v9849_v15 = vpop.permute.xlu1 %4045  ;;  %v9851_v28 = vpop.permute.xlu0 %4047 }
0x1e58   : > { %v9853_v59 = vpop.permute.xlu1 %4049  ;;  %v9855_v33 = vpop.permute.xlu0 %4051 }
0x1e5c   : > { %v4070_v13 = vpop.permute.xlu1 %4069  ;;  %v4072_v60 = vpop.permute.xlu0 %4071 }
0x1e5d   : > { %6242 = vpush %v4070_v13 }
0x1e5e   : > { %6244 = vpush %v4072_v60 }
0x1e60   : > { %v4074_v18 = vpop.permute.xlu1 %4073  ;;  %v4076_v21 = vpop.permute.xlu0 %4075 }
0x1e61   : > { %6246 = vpush %v4074_v18 }
0x1e62   : > { %6248 = vpush %v4076_v21 }
0x1e8e   : > { %s6243_s1 = spop %6242 }
0x1e8f   : > { %v4078_v36 = vstv %s6243_s1  ;;  %s6245_s8 = spop %6244 }
0x1e90   : > { %v4089_v27 = vmul.f32 %v4078_v36, %v9769_v49  ;;  %v4090_v52 = vmul.f32 %v4078_v36, %v9771_v11  ;;  %v4081_v35 = vstv %s6245_s8 }
0x1e91   : > { %v4091_v16 = vmul.f32 %v4081_v35, %v9785_v32  ;;  %v4092_v26 = vmul.f32 %v4081_v35, %v9787_v51 }
0x1e92   : > { %4107 = vrot.lane.b32.xlu0 %v4090_v52, %s6888_s30  ;;  %4105 = vrot.lane.b32.xlu1 %v4089_v27, %s6888_s30  ;;  %s6247_s19 = spop %6246 }
0x1e93   : > { %v4084_v14 = vstv %s6247_s19  ;;  %s6249_s3 = spop %6248 }
0x1e94   : > { %v4093_v17 = vmul.f32 %v4084_v14, %v9797_v22  ;;  %v4094_v39 = vmul.f32 %v4084_v14, %v9799_v1  ;;  %v4087_v20 = vstv %s6249_s3 }
0x1e95   : > { %v4095_v40 = vmul.f32 %v4087_v20, %v9825_v53  ;;  %v4096_v7 = vmul.f32 %v4087_v20, %v9827_v43 }
0x1e96   : > { %4111 = vrot.lane.b32.xlu0 %v4092_v26, %s6888_s30  ;;  %4109 = vrot.lane.b32.xlu1 %v4091_v16, %s6888_s30 }
0x1e9a   : > { %4115 = vrot.lane.b32.xlu0 %v4094_v39, %s6888_s30  ;;  %4113 = vrot.lane.b32.xlu1 %v4093_v17, %s6888_s30 }
0x1e9e   : > { %4119 = vrot.lane.b32.xlu0 %v4096_v7, %s6888_s30  ;;  %4117 = vrot.lane.b32.xlu1 %v4095_v40, %s6888_s30 }
0x1ea2   : > { %4139 = vrot.lane.b32.xlu0 %v11570_v45, %s11072_s9  ;;  %4137 = vrot.lane.b32.xlu1 %v11571_v31, %s11072_s9 }
0x1ea6   : > { %4143 = vrot.lane.b32.xlu0 %v11572_v12, %s11072_s9  ;;  %4141 = vrot.lane.b32.xlu1 %v11573_v61, %s11072_s9 }
0x1f04   : > { %v9881_v9 = vpop.permute.xlu1 %4105  ;;  %v9883_v54 = vpop.permute.xlu0 %4107 }
0x1f08   : > { %v9885_v3 = vpop.permute.xlu1 %4109  ;;  %v9887_v44 = vpop.permute.xlu0 %4111 }
0x1f0c   : > { %v9889_v56 = vpop.permute.xlu1 %4113  ;;  %v9891_v55 = vpop.permute.xlu0 %4115 }
0x1f10   : > { %v9893_v23 = vpop.permute.xlu1 %4117  ;;  %v9895_v63 = vpop.permute.xlu0 %4119 }
0x1f11   : > { %11574 = vst [vmem:[#allocation39_spill] sm:$0xff] %v9895_v63 }
0x1f14   : > { %v4138_v2 = vpop.permute.xlu1 %4137  ;;  %v4140_v19 = vpop.permute.xlu0 %4139 }
0x1f15   : > { %6250 = vpush %v4138_v2 }
0x1f16   : > { %6252 = vpush %v4140_v19 }
0x1f18   : > { %v4142_v37 = vpop.permute.xlu1 %4141  ;;  %v4144_v42 = vpop.permute.xlu0 %4143 }
0x1f19   : > { %6254 = vpush %v4142_v37 }
0x1f1a   : > { %6256 = vpush %v4144_v42 }
0x1f46   : > { %s6251_s16 = spop %6250 }
0x1f47   : > { %v4146_v38 = vstv %s6251_s16  ;;  %s6253_s2 = spop %6252 }
0x1f48   : > { %v4157_v47 = vmul.f32 %v4146_v38, %v9769_v49  ;;  %v4158_v0 = vmul.f32 %v4146_v38, %v9771_v11  ;;  %v4149_v25 = vstv %s6253_s2 }
0x1f49   : > { %v4159_v62 = vmul.f32 %v4149_v25, %v9785_v32  ;;  %v4160_v29 = vmul.f32 %v4149_v25, %v9787_v51 }
0x1f4a   : > { %4175 = vrot.lane.b32.xlu0 %v4158_v0, %s6889_s24  ;;  %4173 = vrot.lane.b32.xlu1 %v4157_v47, %s6889_s24  ;;  %s6255_s18 = spop %6254 }
0x1f4b   : > { %v4152_v34 = vstv %s6255_s18  ;;  %s6257_s10 = spop %6256 }
0x1f4c   : > { %v4161_v58 = vmul.f32 %v4152_v34, %v9797_v22  ;;  %v4162_v13 = vmul.f32 %v4152_v34, %v9799_v1  ;;  %v4155_v60 = vstv %s6257_s10 }
0x1f4d   : > { %v4163_v18 = vmul.f32 %v4155_v60, %v9825_v53  ;;  %v4164_v21 = vmul.f32 %v4155_v60, %v9827_v43 }
0x1f4e   : > { %4179 = vrot.lane.b32.xlu0 %v4160_v29, %s6889_s24  ;;  %4177 = vrot.lane.b32.xlu1 %v4159_v62, %s6889_s24 }
0x1f52   : > { %4183 = vrot.lane.b32.xlu0 %v4162_v13, %s6889_s24  ;;  %4181 = vrot.lane.b32.xlu1 %v4161_v58, %s6889_s24 }
0x1f56   : > { %4187 = vrot.lane.b32.xlu0 %v4164_v21, %s6889_s24  ;;  %4185 = vrot.lane.b32.xlu1 %v4163_v18, %s6889_s24 }
0x1f5a   : > { %4207 = vrot.lane.b32.xlu0 %v11570_v45, %s11073_s29  ;;  %4205 = vrot.lane.b32.xlu1 %v11571_v31, %s11073_s29 }
0x1f5e   : > { %4211 = vrot.lane.b32.xlu0 %v11572_v12, %s11073_s29  ;;  %4209 = vrot.lane.b32.xlu1 %v11573_v61, %s11073_s29 }
0x1fbc   : > { %v9921_v36 = vpop.permute.xlu1 %4173  ;;  %v9923_v27 = vpop.permute.xlu0 %4175 }
0x1fc0   : > { %v9925_v52 = vpop.permute.xlu1 %4177  ;;  %v9927_v35 = vpop.permute.xlu0 %4179 }
0x1fc4   : > { %v9929_v16 = vpop.permute.xlu1 %4181  ;;  %v9931_v26 = vpop.permute.xlu0 %4183 }
0x1fc8   : > { %v9933_v14 = vpop.permute.xlu1 %4185  ;;  %v9935_v17 = vpop.permute.xlu0 %4187 }
0x1fc9   : > { %11575 = vst [vmem:[#allocation48_spill] sm:$0xff] %v9933_v14  ;;  %11576 = vst [vmem:[#allocation49_spill] sm:$0xff] %v9935_v17 }
0x1fcc   : > { %v4206_v39 = vpop.permute.xlu1 %4205  ;;  %v4208_v20 = vpop.permute.xlu0 %4207 }
0x1fcd   : > { %6258 = vpush %v4206_v39 }
0x1fce   : > { %6260 = vpush %v4208_v20 }
0x1fd0   : > { %v4210_v40 = vpop.permute.xlu1 %4209  ;;  %v4212_v7 = vpop.permute.xlu0 %4211 }
0x1fd1   : > { %6262 = vpush %v4210_v40 }
0x1fd2   : > { %6264 = vpush %v4212_v7 }
0x1ffe   : > { %s6259_s14 = spop %6258 }
0x1fff   : > { %v4214_v2 = vstv %s6259_s14  ;;  %s6261_s11 = spop %6260 }
0x2000   : > { %v4225_v19 = vmul.f32 %v4214_v2, %v9769_v49  ;;  %v4226_v37 = vmul.f32 %v4214_v2, %v9771_v11  ;;  %v4217_v42 = vstv %s6261_s11 }
0x2001   : > { %v4227_v38 = vmul.f32 %v4217_v42, %v9785_v32  ;;  %v4228_v47 = vmul.f32 %v4217_v42, %v9787_v51 }
0x2002   : > { %4243 = vrot.lane.b32.xlu0 %v4226_v37, %s11577_s21  ;;  %4241 = vrot.lane.b32.xlu1 %v4225_v19, %s11577_s21  ;;  %s6263_s27 = spop %6262 }
0x2003   : > { %v4220_v0 = vstv %s6263_s27  ;;  %s6265_s22 = spop %6264 }
0x2004   : > { %v4229_v25 = vmul.f32 %v4220_v0, %v9797_v22  ;;  %v4230_v62 = vmul.f32 %v4220_v0, %v9799_v1  ;;  %v4223_v29 = vstv %s6265_s22 }
0x2005   : > { %v4231_v34 = vmul.f32 %v4223_v29, %v9825_v53  ;;  %v4232_v58 = vmul.f32 %v4223_v29, %v9827_v43 }
0x2006   : > { %4247 = vrot.lane.b32.xlu0 %v4228_v47, %s11577_s21  ;;  %4245 = vrot.lane.b32.xlu1 %v4227_v38, %s11577_s21 }
0x200a   : > { %4251 = vrot.lane.b32.xlu0 %v4230_v62, %s11577_s21  ;;  %4249 = vrot.lane.b32.xlu1 %v4229_v25, %s11577_s21 }
0x200e   : > { %4255 = vrot.lane.b32.xlu0 %v4232_v58, %s11577_s21  ;;  %4253 = vrot.lane.b32.xlu1 %v4231_v34, %s11577_s21 }
0x2012   : > { %4275 = vrot.lane.b32.xlu0 %v11570_v45, %s11578_s25  ;;  %4273 = vrot.lane.b32.xlu1 %v11571_v31, %s11578_s25 }
0x2016   : > { %4279 = vrot.lane.b32.xlu0 %v11572_v12, %s11578_s25  ;;  %4277 = vrot.lane.b32.xlu1 %v11573_v61, %s11578_s25 }
0x2074   : > { %v9961_v13 = vpop.permute.xlu1 %4241  ;;  %v9963_v60 = vpop.permute.xlu0 %4243 }
0x2078   : > { %v9965_v18 = vpop.permute.xlu1 %4245  ;;  %v9967_v21 = vpop.permute.xlu0 %4247 }
0x207c   : > { %v9969_v39 = vpop.permute.xlu1 %4249  ;;  %v9971_v20 = vpop.permute.xlu0 %4251 }
0x2080   : > { %v9973_v40 = vpop.permute.xlu1 %4253  ;;  %v9975_v7 = vpop.permute.xlu0 %4255 }
0x2081   : > { %11579 = vst [vmem:[#allocation42_spill] sm:$0xff] %v9973_v40  ;;  %11580 = vst [vmem:[#allocation43_spill] sm:$0xff] %v9975_v7 }
0x2084   : > { %v4274_v2 = vpop.permute.xlu1 %4273  ;;  %v4276_v19 = vpop.permute.xlu0 %4275 }
0x2085   : > { %6266 = vpush %v4274_v2 }
0x2086   : > { %6268 = vpush %v4276_v19 }
0x2088   : > { %v4278_v37 = vpop.permute.xlu1 %4277  ;;  %v4280_v42 = vpop.permute.xlu0 %4279 }
0x2089   : > { %6270 = vpush %v4278_v37 }
0x208a   : > { %6272 = vpush %v4280_v42 }
0x20b6   : > { %s6267_s12 = spop %6266 }
0x20b7   : > { %v4282_v38 = vstv %s6267_s12  ;;  %s6269_s1 = spop %6268 }
0x20b8   : > { %v4293_v47 = vmul.f32 %v4282_v38, %v9769_v49  ;;  %v4294_v0 = vmul.f32 %v4282_v38, %v9771_v11  ;;  %v4285_v25 = vstv %s6269_s1 }
0x20b9   : > { %v4295_v62 = vmul.f32 %v4285_v25, %v9785_v32  ;;  %v4296_v29 = vmul.f32 %v4285_v25, %v9787_v51 }
0x20ba   : > { %4311 = vrot.lane.b32.xlu0 %v4294_v0, %s11462_s13  ;;  %4309 = vrot.lane.b32.xlu1 %v4293_v47, %s11462_s13  ;;  %s6271_s8 = spop %6270 }
0x20bb   : > { %v4288_v34 = vstv %s6271_s8  ;;  %s6273_s19 = spop %6272 }
0x20bc   : > { %v4297_v58 = vmul.f32 %v4288_v34, %v9797_v22  ;;  %v4298_v2 = vmul.f32 %v4288_v34, %v9799_v1  ;;  %v4291_v19 = vstv %s6273_s19 }
0x20bd   : > { %v4299_v37 = vmul.f32 %v4291_v19, %v9825_v53  ;;  %v4300_v42 = vmul.f32 %v4291_v19, %v9827_v43 }
0x20be   : > { %4315 = vrot.lane.b32.xlu0 %v4296_v29, %s11462_s13  ;;  %4313 = vrot.lane.b32.xlu1 %v4295_v62, %s11462_s13 }
0x20c2   : > { %4319 = vrot.lane.b32.xlu0 %v4298_v2, %s11462_s13  ;;  %4317 = vrot.lane.b32.xlu1 %v4297_v58, %s11462_s13 }
0x20c6   : > { %4323 = vrot.lane.b32.xlu0 %v4300_v42, %s11462_s13  ;;  %4321 = vrot.lane.b32.xlu1 %v4299_v37, %s11462_s13  ;;  %v10022_v37 = vld [vmem:[#allocation11 + $0x8] sm:$0x7f] }
0x20c7   : > { %v10025_v42 = vrot.slane %v10022_v37, 5 }
0x20ca   : > { %4343 = vrot.lane.b32.xlu0 %v11570_v45, %s6888_s30  ;;  %4341 = vrot.lane.b32.xlu1 %v11571_v31, %s6888_s30 }
0x20ce   : > { %4347 = vrot.lane.b32.xlu0 %v11572_v12, %s6888_s30  ;;  %4345 = vrot.lane.b32.xlu1 %v11573_v61, %s6888_s30  ;;  %v10017_v61 = vld [vmem:[#allocation11] sm:$0x7f] }
0x20cf   : > { %v10020_v58 = vrot.slane %v10017_v61, 5 }
0x212c   : > { %v10001_v38 = vpop.permute.xlu1 %4309  ;;  %v10003_v47 = vpop.permute.xlu0 %4311 }
0x2130   : > { %v10005_v0 = vpop.permute.xlu1 %4313  ;;  %v10007_v25 = vpop.permute.xlu0 %4315 }
0x2134   : > { %v10009_v62 = vpop.permute.xlu1 %4317  ;;  %v10011_v45 = vpop.permute.xlu0 %4319 }
0x2138   : > { %v10013_v29 = vpop.permute.xlu1 %4321  ;;  %v10015_v31 = vpop.permute.xlu0 %4323 }
0x2139   : > { %11581 = vst [vmem:[#allocation56_spill] sm:$0xff] %v10013_v29  ;;  %11582 = vst [vmem:[#allocation57_spill] sm:$0xff] %v10015_v31  ;;  %v10027_v29 = vld [vmem:[#allocation11 + $0x10] sm:$0x7f] }
0x213a   : > { %v10030_v31 = vrot.slane %v10027_v29, 5 }
0x213c   : > { %v4342_v12 = vpop.permute.xlu1 %4341  ;;  %v4344_v34 = vpop.permute.xlu0 %4343 }
0x213d   : > { %6274 = vpush %v4342_v12  ;;  %v10032_v12 = vld [vmem:[#allocation11 + $0x18] sm:$0x7f] }
0x213e   : > { %6276 = vpush %v4344_v34  ;;  %v10035_v34 = vrot.slane %v10032_v12, 5 }
0x2140   : > { %v4346_v2 = vpop.permute.xlu1 %4345  ;;  %v4348_v19 = vpop.permute.xlu0 %4347 }
0x2141   : > { %6278 = vpush %v4346_v2 }
0x2142   : > { %6280 = vpush %v4348_v19 }
0x2143   : > { %6282 = vpush %v10020_v58 }
0x2144   : > { %6284 = vpush %v10025_v42 }
0x2145   : > { %6286 = vpush %v10030_v31 }
0x2146   : > { %6288 = vpush %v10035_v34 }
0x216e   : > { %s6275_s3 = spop %6274 }
0x216f   : > { %v4350_v2 = vstv %s6275_s3  ;;  %s6277_s16 = spop %6276 }
0x2170   : > { %v4361_v7 = vmul.f32 %v4350_v2, %v9769_v49  ;;  %v4362_v19 = vmul.f32 %v4350_v2, %v9771_v11  ;;  %v4353_v40 = vstv %s6277_s16 }
0x2171   : > { %v4363_v17 = vmul.f32 %v4353_v40, %v9785_v32  ;;  %v4364_v14 = vmul.f32 %v4353_v40, %v9787_v51  ;;  %v4061_v51 = vadd.f32 %v9841_v48, %v9779_v30 }
0x2172   : > { %4379 = vrot.lane.b32.xlu0 %v4362_v19, %s11472_s4  ;;  %4377 = vrot.lane.b32.xlu1 %v4361_v7, %s11472_s4  ;;  %s6279_s2 = spop %6278 }
0x2173   : > { %v4356_v63 = vstv %s6279_s2  ;;  %s6281_s18 = spop %6280 }
0x2174   : > { %v4365_v49 = vmul.f32 %v4356_v63, %v9797_v22  ;;  %v4366_v11 = vmul.f32 %v4356_v63, %v9799_v1  ;;  %v4359_v2 = vstv %s6281_s18  ;;  %v4062_v22 = vadd.f32 %v9843_v10, %v9781_v24  ;;  %s6283_s10 = spop %6282 }
0x2175   : > { %v4367_v7 = vmul.f32 %v4359_v2, %v9825_v53  ;;  %v4368_v32 = vmul.f32 %v4359_v2, %v9827_v43  ;;  %v4129_v1 = vadd.f32 %v9881_v9, %v4061_v51  ;;  %v4063_v43 = vadd.f32 %v9845_v50, %v9793_v5  ;;  %s6285_s14 = spop %6284  ;;  %v10109_v2 = vld [vmem:[#allocation3 + $0x37] sm:$0xff] }
0x2176   : > { %4383 = vrot.lane.b32.xlu0 %v4364_v14, %s11472_s4  ;;  %4381 = vrot.lane.b32.xlu1 %v4363_v17, %s11472_s4  ;;  %v4130_v53 = vadd.f32 %v9883_v54, %v4062_v22  ;;  %v4064_v63 = vadd.f32 %v9847_v6, %v9795_v8  ;;  %v4065_v24 = vadd.f32 %v9849_v15, %v9803_v57  ;;  %v4422_v6 = vstv %s6283_s10  ;;  %s6287_s11 = spop %6286 }
0x2177   : > { %v4197_v14 = vadd.f32 %v9921_v36, %v4129_v1  ;;  %v4131_v30 = vadd.f32 %v9885_v3, %v4063_v43  ;;  %v4066_v5 = vadd.f32 %v9851_v28, %v9805_v46  ;;  %v10095_v46 = vld [vmem:[#allocation3 + $0x17] sm:$0xff]  ;;  %v4428_v22 = vstv %s6287_s11  ;;  %v10121_v43 = vld [vmem:[#allocation3 + $0x5f] sm:$0xff]  ;;  %s10135_s27 = spop %6288 }
0x2178   : > { %v4198_v17 = vadd.f32 %v9923_v27, %v4130_v53  ;;  %v4132_v48 = vadd.f32 %v9887_v44, %v4064_v63  ;;  %v4133_v44 = vadd.f32 %v9889_v56, %v4065_v24  ;;  %v10093_v27 = vld [vmem:[#allocation3 + $0xf] sm:$0xff]  ;;  %v10123_v63 = vld [vmem:[#allocation3 + $0x67] sm:$0xff] }
0x2179   : > { %v4265_v10 = vadd.f32 %v9961_v13, %v4197_v14  ;;  %v4199_v8 = vadd.f32 %v9925_v52, %v4131_v30  ;;  %v4134_v57 = vadd.f32 %v9891_v55, %v4066_v5  ;;  %v4434_v13 = vmul.f32 %v4422_v6, %v10095_v46 }
0x217a   : > { %4387 = vrot.lane.b32.xlu0 %v4366_v11, %s11472_s4  ;;  %4385 = vrot.lane.b32.xlu1 %v4365_v49, %s11472_s4  ;;  %v4266_v9 = vadd.f32 %v9963_v60, %v4198_v17  ;;  %v4200_v50 = vadd.f32 %v9927_v35, %v4132_v48  ;;  %v4433_v35 = vmul.f32 %v4422_v6, %v10093_v27 }
0x217b   : > { %v4333_v54 = vadd.f32 %v10001_v38, %v4265_v10  ;;  %v4267_v15 = vadd.f32 %v9965_v18, %v4199_v8  ;;  %v4201_v56 = vadd.f32 %v9929_v16, %v4133_v44  ;;  %v4202_v55 = vadd.f32 %v9931_v26, %v4134_v57 }
0x217c   : > { %v4334_v3 = vadd.f32 %v10003_v47, %v4266_v9  ;;  %v4268_v36 = vadd.f32 %v9967_v21, %v4200_v50  ;;  %v4425_v38 = vstv %s6285_s14  ;;  %v4437_v30 = vmul.f32 %v4428_v22, %v10121_v43 }
0x217d   : > { %v4335_v18 = vadd.f32 %v10005_v0, %v4267_v15  ;;  %v4269_v49 = vadd.f32 %v9969_v39, %v4201_v56  ;;  %v4270_v11 = vadd.f32 %v9971_v20, %v4202_v55  ;;  %v4438_v48 = vmul.f32 %v4428_v22, %v10123_v63  ;;  %v10151_v56 = vld [vmem:[#allocation3 + $0x8f] sm:$0xff] }
0x217e   : > { %4391 = vrot.lane.b32.xlu0 %v4368_v32, %s11472_s4  ;;  %4389 = vrot.lane.b32.xlu1 %v4367_v7, %s11472_s4  ;;  %v4336_v21 = vadd.f32 %v10007_v25, %v4268_v36  ;;  %v10111_v7 = vld [vmem:[#allocation3 + $0x3f] sm:$0xff]  ;;  %v4435_v32 = vmul.f32 %v4425_v38, %v10109_v2 }
0x217f   : > { %v4436_v0 = vmul.f32 %v4425_v38, %v10111_v7  ;;  %v4337_v1 = vadd.f32 %v10009_v62, %v4269_v49  ;;  %v4338_v53 = vadd.f32 %v10011_v45, %v4270_v11 }
0x2182   : > { %4451 = vrot.lane.b32.xlu0 %v10025_v42, %s11093_s0  ;;  %4449 = vrot.lane.b32.xlu1 %v10020_v58, %s11093_s0 }
0x2186   : > { %4455 = vrot.lane.b32.xlu0 %v10035_v34, %s11093_s0  ;;  %4453 = vrot.lane.b32.xlu1 %v10030_v31, %s11093_s0 }
0x21e4   : > { %v4378_v28 = vpop.permute.xlu1 %4377  ;;  %v4380_v52 = vpop.permute.xlu0 %4379 }
0x21e5   : > { %v4401_v60 = vadd.f32 %v4378_v28, %v4333_v54  ;;  %v4402_v40 = vadd.f32 %v4380_v52, %v4334_v3 }
0x21e7   : > { %v10103_v47 = vadd.f32 %v4433_v35, %v4401_v60  ;;  %v10105_v19 = vadd.f32 %v4434_v13, %v4402_v40  ;;  %v10149_v40 = vld [vmem:[#allocation3 + $0x87] sm:$0xff] }
0x21e8   : > { %v4382_v16 = vpop.permute.xlu1 %4381  ;;  %v4384_v26 = vpop.permute.xlu0 %4383 }
0x21e9   : > { %v4403_v25 = vadd.f32 %v4382_v16, %v4335_v18  ;;  %v4404_v51 = vadd.f32 %v4384_v26, %v4336_v21 }
0x21eb   : > { %v10117_v39 = vadd.f32 %v4435_v32, %v4403_v25  ;;  %v10119_v20 = vadd.f32 %v4436_v0, %v4404_v51 }
0x21ec   : > { %v4386_v14 = vpop.permute.xlu1 %4385  ;;  %v4388_v17 = vpop.permute.xlu0 %4387 }
0x21ed   : > { %v4405_v24 = vadd.f32 %v4386_v14, %v4337_v1  ;;  %v4406_v10 = vadd.f32 %v4388_v17, %v4338_v53 }
0x21ef   : > { %v10127_v9 = vadd.f32 %v4437_v30, %v4405_v24  ;;  %v10129_v62 = vadd.f32 %v4438_v48, %v4406_v10 }
0x21f0   : > { %v10131_v45 = vpop.permute.xlu1 %4389  ;;  %v10133_v5 = vpop.permute.xlu0 %4391 }
0x21f4   : > { %v4450_v8 = vpop.permute.xlu1 %4449  ;;  %v4452_v50 = vpop.permute.xlu0 %4451 }
0x21f5   : > { %6290 = vpush %v4450_v8 }
0x21f6   : > { %6292 = vpush %v4452_v50 }
0x21f8   : > { %v4454_v6 = vpop.permute.xlu1 %4453  ;;  %v4456_v54 = vpop.permute.xlu0 %4455 }
0x21f9   : > { %6294 = vpush %v4454_v6 }
0x21fa   : > { %6296 = vpush %v4456_v54 }
0x2226   : > { %s6291_s22 = spop %6290 }
0x2227   : > { %v4458_v3 = vstv %s6291_s22  ;;  %s6293_s12 = spop %6292 }
0x2228   : > { %v4469_v44 = vmul.f32 %v4458_v3, %v10093_v27  ;;  %v4470_v57 = vmul.f32 %v4458_v3, %v10095_v46  ;;  %v4461_v15 = vstv %s6293_s12 }
0x2229   : > { %v4471_v36 = vmul.f32 %v4461_v15, %v10109_v2  ;;  %v4472_v28 = vmul.f32 %v4461_v15, %v10111_v7 }
0x222a   : > { %4487 = vrot.lane.b32.xlu0 %v4470_v57, %s11072_s9  ;;  %4485 = vrot.lane.b32.xlu1 %v4469_v44, %s11072_s9  ;;  %s6295_s1 = spop %6294 }
0x222b   : > { %v4464_v52 = vstv %s6295_s1  ;;  %s6297_s8 = spop %6296 }
0x222c   : > { %v4473_v35 = vmul.f32 %v4464_v52, %v10121_v43  ;;  %v4474_v13 = vmul.f32 %v4464_v52, %v10123_v63  ;;  %v4467_v60 = vstv %s6297_s8 }
0x222d   : > { %v4475_v55 = vmul.f32 %v4467_v60, %v10149_v40  ;;  %v4476_v38 = vmul.f32 %v4467_v60, %v10151_v56 }
0x222e   : > { %4491 = vrot.lane.b32.xlu0 %v4472_v28, %s11072_s9  ;;  %4489 = vrot.lane.b32.xlu1 %v4471_v36, %s11072_s9 }
0x2232   : > { %4495 = vrot.lane.b32.xlu0 %v4474_v13, %s11072_s9  ;;  %4493 = vrot.lane.b32.xlu1 %v4473_v35, %s11072_s9 }
0x2236   : > { %4499 = vrot.lane.b32.xlu0 %v4476_v38, %s11072_s9  ;;  %4497 = vrot.lane.b32.xlu1 %v4475_v55, %s11072_s9 }
0x223a   : > { %4519 = vrot.lane.b32.xlu0 %v10025_v42, %s11071_s17  ;;  %4517 = vrot.lane.b32.xlu1 %v10020_v58, %s11071_s17 }
0x223e   : > { %4523 = vrot.lane.b32.xlu0 %v10035_v34, %s11071_s17  ;;  %4521 = vrot.lane.b32.xlu1 %v10030_v31, %s11071_s17 }
0x229c   : > { %v10165_v18 = vpop.permute.xlu1 %4485  ;;  %v10167_v21 = vpop.permute.xlu0 %4487 }
0x22a0   : > { %v10169_v49 = vpop.permute.xlu1 %4489  ;;  %v10171_v11 = vpop.permute.xlu0 %4491 }
0x22a4   : > { %v10173_v16 = vpop.permute.xlu1 %4493  ;;  %v10175_v26 = vpop.permute.xlu0 %4495 }
0x22a8   : > { %v10177_v32 = vpop.permute.xlu1 %4497  ;;  %v10179_v0 = vpop.permute.xlu0 %4499 }
0x22ac   : > { %v4518_v25 = vpop.permute.xlu1 %4517  ;;  %v4520_v51 = vpop.permute.xlu0 %4519 }
0x22ad   : > { %6298 = vpush %v4518_v25 }
0x22ae   : > { %6300 = vpush %v4520_v51 }
0x22b0   : > { %v4522_v22 = vpop.permute.xlu1 %4521  ;;  %v4524_v1 = vpop.permute.xlu0 %4523 }
0x22b1   : > { %6302 = vpush %v4522_v22 }
0x22b2   : > { %6304 = vpush %v4524_v1 }
0x22de   : > { %s6299_s19 = spop %6298 }
0x22df   : > { %v4526_v53 = vstv %s6299_s19  ;;  %s6301_s3 = spop %6300 }
0x22e0   : > { %v4537_v14 = vmul.f32 %v4526_v53, %v10093_v27  ;;  %v4538_v17 = vmul.f32 %v4526_v53, %v10095_v46  ;;  %v4529_v30 = vstv %s6301_s3 }
0x22e1   : > { %v4539_v48 = vmul.f32 %v4529_v30, %v10109_v2  ;;  %v4540_v24 = vmul.f32 %v4529_v30, %v10111_v7 }
0x22e2   : > { %4555 = vrot.lane.b32.xlu0 %v4538_v17, %s6888_s30  ;;  %4553 = vrot.lane.b32.xlu1 %v4537_v14, %s6888_s30  ;;  %s6303_s16 = spop %6302 }
0x22e3   : > { %v4532_v10 = vstv %s6303_s16  ;;  %s6305_s2 = spop %6304 }
0x22e4   : > { %v4541_v8 = vmul.f32 %v4532_v10, %v10121_v43  ;;  %v4542_v50 = vmul.f32 %v4532_v10, %v10123_v63  ;;  %v4535_v6 = vstv %s6305_s2 }
0x22e5   : > { %v4543_v54 = vmul.f32 %v4535_v6, %v10149_v40  ;;  %v4544_v3 = vmul.f32 %v4535_v6, %v10151_v56 }
0x22e6   : > { %4559 = vrot.lane.b32.xlu0 %v4540_v24, %s6888_s30  ;;  %4557 = vrot.lane.b32.xlu1 %v4539_v48, %s6888_s30 }
0x22ea   : > { %4563 = vrot.lane.b32.xlu0 %v4542_v50, %s6888_s30  ;;  %4561 = vrot.lane.b32.xlu1 %v4541_v8, %s6888_s30 }
0x22ee   : > { %4567 = vrot.lane.b32.xlu0 %v4544_v3, %s6888_s30  ;;  %4565 = vrot.lane.b32.xlu1 %v4543_v54, %s6888_s30 }
0x22f2   : > { %4587 = vrot.lane.b32.xlu0 %v10025_v42, %s11072_s9  ;;  %4585 = vrot.lane.b32.xlu1 %v10020_v58, %s11072_s9 }
0x22f6   : > { %4591 = vrot.lane.b32.xlu0 %v10035_v34, %s11072_s9  ;;  %4589 = vrot.lane.b32.xlu1 %v10030_v31, %s11072_s9 }
0x2354   : > { %v10205_v44 = vpop.permute.xlu1 %4553  ;;  %v10207_v57 = vpop.permute.xlu0 %4555 }
0x2358   : > { %v10209_v15 = vpop.permute.xlu1 %4557  ;;  %v10211_v36 = vpop.permute.xlu0 %4559 }
0x235c   : > { %v10213_v28 = vpop.permute.xlu1 %4561  ;;  %v10215_v52 = vpop.permute.xlu0 %4563 }
0x2360   : > { %v10217_v35 = vpop.permute.xlu1 %4565  ;;  %v10219_v13 = vpop.permute.xlu0 %4567 }
0x2364   : > { %v4586_v60 = vpop.permute.xlu1 %4585  ;;  %v4588_v55 = vpop.permute.xlu0 %4587 }
0x2365   : > { %6306 = vpush %v4586_v60 }
0x2366   : > { %6308 = vpush %v4588_v55 }
0x2368   : > { %v4590_v38 = vpop.permute.xlu1 %4589  ;;  %v4592_v25 = vpop.permute.xlu0 %4591 }
0x2369   : > { %6310 = vpush %v4590_v38 }
0x236a   : > { %6312 = vpush %v4592_v25 }
0x2396   : > { %s6307_s18 = spop %6306 }
0x2397   : > { %v4594_v51 = vstv %s6307_s18  ;;  %s6309_s10 = spop %6308 }
0x2398   : > { %v4605_v22 = vmul.f32 %v4594_v51, %v10093_v27  ;;  %v4606_v1 = vmul.f32 %v4594_v51, %v10095_v46  ;;  %v4597_v53 = vstv %s6309_s10 }
0x2399   : > { %v4607_v14 = vmul.f32 %v4597_v53, %v10109_v2  ;;  %v4608_v17 = vmul.f32 %v4597_v53, %v10111_v7 }
0x239a   : > { %4623 = vrot.lane.b32.xlu0 %v4606_v1, %s6889_s24  ;;  %4621 = vrot.lane.b32.xlu1 %v4605_v22, %s6889_s24  ;;  %s6311_s14 = spop %6310 }
0x239b   : > { %v4600_v30 = vstv %s6311_s14  ;;  %s6313_s11 = spop %6312 }
0x239c   : > { %v4609_v48 = vmul.f32 %v4600_v30, %v10121_v43  ;;  %v4610_v24 = vmul.f32 %v4600_v30, %v10123_v63  ;;  %v4603_v10 = vstv %s6313_s11 }
0x239d   : > { %v4611_v8 = vmul.f32 %v4603_v10, %v10149_v40  ;;  %v4612_v50 = vmul.f32 %v4603_v10, %v10151_v56 }
0x239e   : > { %4627 = vrot.lane.b32.xlu0 %v4608_v17, %s6889_s24  ;;  %4625 = vrot.lane.b32.xlu1 %v4607_v14, %s6889_s24 }
0x23a2   : > { %4631 = vrot.lane.b32.xlu0 %v4610_v24, %s6889_s24  ;;  %4629 = vrot.lane.b32.xlu1 %v4609_v48, %s6889_s24 }
0x23a6   : > { %4635 = vrot.lane.b32.xlu0 %v4612_v50, %s6889_s24  ;;  %4633 = vrot.lane.b32.xlu1 %v4611_v8, %s6889_s24  ;;  %v10285_v8 = vrot.slane %v10017_v61, 6  ;;  %v10295_v50 = vrot.slane %v10022_v37, 6 }
0x23aa   : > { %4655 = vrot.lane.b32.xlu0 %v10025_v42, %s11073_s29  ;;  %4653 = vrot.lane.b32.xlu1 %v10020_v58, %s11073_s29 }
0x23ae   : > { %4659 = vrot.lane.b32.xlu0 %v10035_v34, %s11073_s29  ;;  %4657 = vrot.lane.b32.xlu1 %v10030_v31, %s11073_s29 }
0x240c   : > { %v10245_v6 = vpop.permute.xlu1 %4621  ;;  %v10247_v54 = vpop.permute.xlu0 %4623 }
0x2410   : > { %v10249_v3 = vpop.permute.xlu1 %4625  ;;  %v10251_v60 = vpop.permute.xlu0 %4627 }
0x2414   : > { %v10253_v55 = vpop.permute.xlu1 %4629  ;;  %v10255_v38 = vpop.permute.xlu0 %4631 }
0x2418   : > { %v10257_v25 = vpop.permute.xlu1 %4633  ;;  %v10259_v51 = vpop.permute.xlu0 %4635 }
0x241c   : > { %v4654_v22 = vpop.permute.xlu1 %4653  ;;  %v4656_v1 = vpop.permute.xlu0 %4655 }
0x241d   : > { %6314 = vpush %v4654_v22 }
0x241e   : > { %6316 = vpush %v4656_v1 }
0x2420   : > { %v4658_v53 = vpop.permute.xlu1 %4657  ;;  %v4660_v14 = vpop.permute.xlu0 %4659 }
0x2421   : > { %6318 = vpush %v4658_v53 }
0x2422   : > { %6320 = vpush %v4660_v14 }
0x244e   : > { %s6315_s22 = spop %6314 }
0x244f   : > { %v4662_v17 = vstv %s6315_s22  ;;  %s10261_s12 = spop %6316 }
0x2450   : > { %v4673_v30 = vmul.f32 %v4662_v17, %v10093_v27  ;;  %v4674_v48 = vmul.f32 %v4662_v17, %v10095_v46  ;;  %v4665_v24 = vstv %s10261_s12 }
0x2451   : > { %v4675_v10 = vmul.f32 %v4665_v24, %v10109_v2  ;;  %v4676_v61 = vmul.f32 %v4665_v24, %v10111_v7 }
0x2452   : > { %4691 = vrot.lane.b32.xlu0 %v4674_v48, %s11577_s21  ;;  %4689 = vrot.lane.b32.xlu1 %v4673_v30, %s11577_s21 }
0x2456   : > { %4721 = vrot.lane.b32.xlu0 %v10020_v58, %s11578_s25  ;;  %4693 = vrot.lane.b32.xlu1 %v4675_v10, %s11577_s21 }
0x245a   : > { %4725 = vrot.lane.b32.xlu0 %v10030_v31, %s11578_s25  ;;  %4723 = vrot.lane.b32.xlu1 %v10025_v42, %s11578_s25 }
0x245e   : > { %4789 = vrot.lane.b32.xlu0 %v10020_v58, %s6888_s30  ;;  %4727 = vrot.lane.b32.xlu1 %v10035_v34, %s11578_s25  ;;  %v10292_v58 = vrot.slane %v10027_v29, 6  ;;  %v11583_v29 = vmov 0.0  }
0x245f   : > { %2108 = vst.msk [vmem:[#allocation3 + $0x20] sm:$0x3] %vm2107_vm5, %v11583_v29  ;;  %2113 = vst.msk [vmem:[#allocation3 + $0x48] sm:$0x3] %vm2107_vm5, %v11583_v29 }
0x2460   : > { %2118 = vst.msk [vmem:[#allocation3 + $0x70] sm:$0x3] %vm2107_vm5, %v11583_v29  ;;  %2123 = vst.msk [vmem:[#allocation3 + $0x98] sm:$0x3] %vm2107_vm5, %v11583_v29 }
0x2462   : > { %4793 = vrot.lane.b32.xlu0 %v10030_v31, %s6888_s30  ;;  %4791 = vrot.lane.b32.xlu1 %v10025_v42, %s6888_s30  ;;  %v10302_v31 = vrot.slane %v10032_v12, 6 }
0x2466   : > { %4897 = vrot.lane.b32.xlu0 %v10285_v8, %s11093_s0  ;;  %4795 = vrot.lane.b32.xlu1 %v10035_v34, %s6888_s30 }
0x246a   : > { %4901 = vrot.lane.b32.xlu0 %v10292_v58, %s11093_s0  ;;  %4899 = vrot.lane.b32.xlu1 %v10295_v50, %s11093_s0 }
0x246e   : > { %4965 = vrot.lane.b32.xlu0 %v10285_v8, %s11071_s17  ;;  %4903 = vrot.lane.b32.xlu1 %v10302_v31, %s11093_s0 }
0x2472   : > { %4969 = vrot.lane.b32.xlu0 %v10292_v58, %s11071_s17  ;;  %4967 = vrot.lane.b32.xlu1 %v10295_v50, %s11071_s17 }
0x2476   : > { %5033 = vrot.lane.b32.xlu0 %v10285_v8, %s11072_s9  ;;  %4971 = vrot.lane.b32.xlu1 %v10302_v31, %s11071_s17  ;;  %s6319_s17 = spop %6318 }
0x2477   : > { %v4668_v37 = vstv %s6319_s17 }
0x2478   : > { %v4677_v42 = vmul.f32 %v4668_v37, %v10121_v43  ;;  %v4678_v12 = vmul.f32 %v4668_v37, %v10123_v63 }
0x247a   : > { %5037 = vrot.lane.b32.xlu0 %v10292_v58, %s11072_s9  ;;  %5035 = vrot.lane.b32.xlu1 %v10295_v50, %s11072_s9 }
0x247e   : > { %5101 = vrot.lane.b32.xlu0 %v10285_v8, %s11073_s29  ;;  %5039 = vrot.lane.b32.xlu1 %v10302_v31, %s11072_s9 }
0x2482   : > { %5105 = vrot.lane.b32.xlu0 %v10292_v58, %s11073_s29  ;;  %5103 = vrot.lane.b32.xlu1 %v10295_v50, %s11073_s29 }
0x2486   : > { %5169 = vrot.lane.b32.xlu0 %v10285_v8, %s11578_s25  ;;  %5107 = vrot.lane.b32.xlu1 %v10302_v31, %s11073_s29  ;;  %s6321_s29 = spop %6320 }
0x2487   : > { %v4671_v34 = vstv %s6321_s29 }
0x2488   : > { %v4679_v22 = vmul.f32 %v4671_v34, %v10149_v40  ;;  %v4680_v1 = vmul.f32 %v4671_v34, %v10151_v56 }
0x248a   : > { %5173 = vrot.lane.b32.xlu0 %v10292_v58, %s11578_s25  ;;  %5171 = vrot.lane.b32.xlu1 %v10295_v50, %s11578_s25 }
0x248e   : > { %5237 = vrot.lane.b32.xlu0 %v10285_v8, %s6888_s30  ;;  %5175 = vrot.lane.b32.xlu1 %v10302_v31, %s11578_s25 }
0x2492   : > { %5241 = vrot.lane.b32.xlu0 %v10292_v58, %s6888_s30  ;;  %5239 = vrot.lane.b32.xlu1 %v10295_v50, %s6888_s30 }
0x2496   : > { %4695 = vrot.lane.b32.xlu0 %v4676_v61, %s11577_s21  ;;  %5243 = vrot.lane.b32.xlu1 %v10302_v31, %s6888_s30 }
0x249a   : > { %4699 = vrot.lane.b32.xlu0 %v4678_v12, %s11577_s21  ;;  %4697 = vrot.lane.b32.xlu1 %v4677_v42, %s11577_s21 }
0x249e   : > { %4703 = vrot.lane.b32.xlu0 %v4680_v1, %s11577_s21  ;;  %4701 = vrot.lane.b32.xlu1 %v4679_v22, %s11577_s21 }
0x24c4   : > { %v10360_v53 = vpop.permute.xlu1 %4689  ;;  %v10362_v14 = vpop.permute.xlu0 %4691 }
0x24c8   : > { %v10364_v17 = vpop.permute.xlu1 %4693  ;;  %v4722_v30 = vpop.permute.xlu0 %4721 }
0x24c9   : > { %6322 = vpush %v4722_v30 }
0x24cc   : > { %v4724_v48 = vpop.permute.xlu1 %4723  ;;  %v4726_v24 = vpop.permute.xlu0 %4725 }
0x24cd   : > { %6324 = vpush %v4724_v48 }
0x24ce   : > { %6326 = vpush %v4726_v24 }
0x24d0   : > { %v4728_v10 = vpop.permute.xlu1 %4727  ;;  %v4790_v29 = vpop.permute.xlu0 %4789 }
0x24d1   : > { %6328 = vpush %v4728_v10 }
0x24d2   : > { %6330 = vpush %v4790_v29 }
0x24d4   : > { %v4792_v61 = vpop.permute.xlu1 %4791  ;;  %v4794_v37 = vpop.permute.xlu0 %4793 }
0x24d5   : > { %6332 = vpush %v4792_v61 }
0x24d6   : > { %6334 = vpush %v4794_v37 }
0x24d8   : > { %v4796_v42 = vpop.permute.xlu1 %4795  ;;  %v4898_v12 = vpop.permute.xlu0 %4897 }
0x24d9   : > { %6336 = vpush %v4796_v42 }
0x24da   : > { %6338 = vpush %v10285_v8 }
0x24db   : > { %6340 = vpush %v10295_v50 }
0x24dc   : > { %6342 = vpush %v10292_v58  ;;  %v4900_v34 = vpop.permute.xlu1 %4899  ;;  %v4902_v22 = vpop.permute.xlu0 %4901 }
0x24dd   : > { %6344 = vpush %v10302_v31 }
0x24de   : > { %6346 = vpush %v4898_v12 }
0x24df   : > { %6348 = vpush %v4900_v34 }
0x24e0   : > { %6350 = vpush %v4902_v22  ;;  %v4904_v1 = vpop.permute.xlu1 %4903  ;;  %v4966_v30 = vpop.permute.xlu0 %4965 }
0x24e1   : > { %6352 = vpush %v4904_v1 }
0x24e2   : > { %6354 = vpush %v4966_v30 }
0x24e4   : > { %v4968_v48 = vpop.permute.xlu1 %4967  ;;  %v4970_v24 = vpop.permute.xlu0 %4969 }
0x24e5   : > { %6356 = vpush %v4968_v48 }
0x24e6   : > { %6358 = vpush %v4970_v24 }
0x24e8   : > { %v4972_v8 = vpop.permute.xlu1 %4971  ;;  %v5034_v10 = vpop.permute.xlu0 %5033 }
0x24e9   : > { %6360 = vpush %v4972_v8 }
0x24ea   : > { %6362 = vpush %v5034_v10 }
0x24ec   : > { %v5036_v58 = vpop.permute.xlu1 %5035  ;;  %v5038_v50 = vpop.permute.xlu0 %5037 }
0x24ed   : > { %6364 = vpush %v5036_v58 }
0x24ee   : > { %6366 = vpush %v5038_v50 }
0x24f0   : > { %v5040_v31 = vpop.permute.xlu1 %5039  ;;  %v5102_v29 = vpop.permute.xlu0 %5101 }
0x24f1   : > { %6368 = vpush %v5040_v31 }
0x24f2   : > { %6370 = vpush %v5102_v29  ;;  %v4512_v29 = vadd.f32 %v10171_v11, %v10119_v20  ;;  %v4514_v20 = vadd.f32 %v10175_v26, %v10129_v62  ;;  %v10404_v62 = vld [vmem:[#allocation3 + $0x1a] sm:$0xff] }
0x24f4   : > { %v5104_v61 = vpop.permute.xlu1 %5103  ;;  %v5106_v37 = vpop.permute.xlu0 %5105 }
0x24f5   : > { %6372 = vpush %v5104_v61 }
0x24f6   : > { %6374 = vpush %v5106_v37 }
0x24f8   : > { %v5108_v42 = vpop.permute.xlu1 %5107  ;;  %v5170_v12 = vpop.permute.xlu0 %5169 }
0x24f9   : > { %6376 = vpush %v5108_v42 }
0x24fa   : > { %6378 = vpush %v5170_v12  ;;  %s6323_s0 = spop %6322 }
0x24fb   : > { %v4730_v34 = vstv %s6323_s0 }
0x24fc   : > { %v4741_v22 = vmul.f32 %v4730_v34, %v10093_v27  ;;  %v4742_v1 = vmul.f32 %v4730_v34, %v10095_v46  ;;  %v5172_v30 = vpop.permute.xlu1 %5171  ;;  %v5174_v48 = vpop.permute.xlu0 %5173  ;;  %v4580_v34 = vadd.f32 %v10211_v36, %v4512_v29 }
0x24fd   : > { %6380 = vpush %v5172_v30 }
0x24fe   : > { %6382 = vpush %v5174_v48  ;;  %s6325_s25 = spop %6324  ;;  %4759 = vrot.lane.b32.xlu0 %v4742_v1, %s11462_s13  ;;  %4757 = vrot.lane.b32.xlu1 %v4741_v22, %s11462_s13  ;;  %v4513_v1 = vadd.f32 %v10173_v16, %v10127_v9  ;;  %v4648_v11 = vadd.f32 %v10251_v60, %v4580_v34 }
0x24ff   : > { %v4733_v24 = vstv %s6325_s25  ;;  %s6327_s1 = spop %6326 }
0x2500   : > { %v4743_v8 = vmul.f32 %v4733_v24, %v10109_v2  ;;  %v4744_v10 = vmul.f32 %v4733_v24, %v10111_v7  ;;  %v5176_v58 = vpop.permute.xlu1 %5175  ;;  %v5238_v50 = vpop.permute.xlu0 %5237  ;;  %v4736_v31 = vstv %s6327_s1 }
0x2501   : > { %6384 = vpush %v5176_v58  ;;  %v4745_v61 = vmul.f32 %v4736_v31, %v10121_v43  ;;  %v4746_v37 = vmul.f32 %v4736_v31, %v10123_v63  ;;  %v10413_v31 = vld [vmem:[#allocation3 + $0x12] sm:$0xff] }
0x2502   : > { %6386 = vpush %v5238_v50  ;;  %4763 = vrot.lane.b32.xlu0 %v4744_v10, %s11462_s13  ;;  %4761 = vrot.lane.b32.xlu1 %v4743_v8, %s11462_s13  ;;  %s6329_s8 = spop %6328  ;;  %v4581_v8 = vadd.f32 %v10213_v28, %v4513_v1  ;;  %v4582_v10 = vadd.f32 %v10215_v52, %v4514_v20  ;;  %v10408_v28 = vld [vmem:[#allocation3 + $0x42] sm:$0xff] }
0x2503   : > { %v4739_v22 = vstv %s6329_s8  ;;  %s6331_s19 = spop %6330  ;;  %v10435_v20 = vld [vmem:[#allocation3 + $0x62] sm:$0xff] }
0x2504   : > { %v5240_v42 = vpop.permute.xlu1 %5239  ;;  %v5242_v12 = vpop.permute.xlu0 %5241  ;;  %v4747_v36 = vmul.f32 %v4739_v22, %v10149_v40  ;;  %v4748_v30 = vmul.f32 %v4739_v22, %v10151_v56  ;;  %v4798_v58 = vstv %s6331_s19  ;;  %v4649_v16 = vadd.f32 %v10253_v55, %v4581_v8 }
0x2505   : > { %6388 = vpush %v5240_v42  ;;  %v4650_v26 = vadd.f32 %v10255_v38, %v4582_v10  ;;  %v4809_v52 = vmul.f32 %v4798_v58, %v10093_v27  ;;  %v4810_v60 = vmul.f32 %v4798_v58, %v10095_v46  ;;  %v10425_v46 = vld [vmem:[#allocation3 + $0x92] sm:$0xff] }
0x2506   : > { %6390 = vpush %v5242_v12  ;;  %4767 = vrot.lane.b32.xlu0 %v4746_v37, %s11462_s13  ;;  %4765 = vrot.lane.b32.xlu1 %v4745_v61, %s11462_s13  ;;  %s10390_s3 = spop %6332  ;;  %v10415_v61 = vld [vmem:[#allocation3 + $0x6a] sm:$0xff]  ;;  %v10423_v12 = vld [vmem:[#allocation3 + $0x3a] sm:$0xff] }
0x2507   : > { %s10396_s16 = spop %6334  ;;  %v4801_v50 = vstv %s10390_s3 }
0x2508   : > { %v5244_v48 = vpop.permute.xlu1 %5243  ;;  %v4696_v24 = vpop.permute.xlu0 %4695  ;;  %v4811_v10 = vmul.f32 %v4801_v50, %v10109_v2  ;;  %v4812_v58 = vmul.f32 %v4801_v50, %v10111_v7 }
0x2509   : > { %v10398_v9 = vadd.f32 %v4696_v24, %v4648_v11  ;;  %6392 = vpush %v5244_v48  ;;  %v10447_v24 = vld [vmem:[#allocation3 + $0x8a] sm:$0xff] }
0x250a   : > { %4771 = vrot.lane.b32.xlu0 %v4748_v30, %s11462_s13  ;;  %4769 = vrot.lane.b32.xlu1 %v4747_v36, %s11462_s13  ;;  %s10402_s2 = spop %6336 }
0x250b   : > { %s6339_s18 = spop %6338 }
0x250c   : > { %v4870_v29 = vstv %s6339_s18  ;;  %s6341_s10 = spop %6340  ;;  %v4698_v37 = vpop.permute.xlu1 %4697  ;;  %v4700_v42 = vpop.permute.xlu0 %4699 }
0x250d   : > { %v10418_v55 = vmul.f32 %v4870_v29, %v10413_v31  ;;  %v10421_v38 = vmul.f32 %v4870_v29, %v10404_v62  ;;  %v4873_v27 = vstv %s6341_s10  ;;  %s6343_s14 = spop %6342  ;;  %v10427_v34 = vadd.f32 %v4698_v37, %v4649_v16 }
0x250e   : > { %v10430_v22 = vmul.f32 %v4873_v27, %v10423_v12  ;;  %v10433_v1 = vmul.f32 %v4873_v27, %v10408_v28  ;;  %v4876_v11 = vstv %s6343_s14  ;;  %s6345_s11 = spop %6344  ;;  %v10437_v36 = vadd.f32 %v4700_v42, %v4650_v26  ;;  %4827 = vrot.lane.b32.xlu0 %v4810_v60, %s11472_s4  ;;  %4825 = vrot.lane.b32.xlu1 %v4809_v52, %s11472_s4 }
0x250f   : > { %v10442_v30 = vmul.f32 %v4876_v11, %v10435_v20  ;;  %v10445_v48 = vmul.f32 %v4876_v11, %v10415_v61  ;;  %v4879_v8 = vstv %s6345_s11  ;;  %v4804_v52 = vstv %s10396_s16  ;;  %s6347_s22 = spop %6346 }
0x2510   : > { %11584 = vst [vmem:[#allocation50_spill] sm:$0xff] %v10433_v1  ;;  %v10452_v16 = vmul.f32 %v4879_v8, %v10447_v24  ;;  %v10455_v26 = vmul.f32 %v4879_v8, %v10425_v46  ;;  %v4813_v60 = vmul.f32 %v4804_v52, %v10121_v43  ;;  %v4814_v29 = vmul.f32 %v4804_v52, %v10123_v63  ;;  %s6349_s12 = spop %6348  ;;  %v11634_v1 = vld [vmem:[#allocation171_spill] sm:$0xff] }
0x2511   : > { %11585 = vst [vmem:[#allocation51_spill] sm:$0xff] %v10442_v30  ;;  %11586 = vst [vmem:[#allocation44_spill] sm:$0xff] %v10445_v48  ;;  %v4807_v37 = vstv %s10402_s2  ;;  %v4906_v50 = vstv %s6347_s22  ;;  %v4909_v63 = vstv %s6349_s12  ;;  %s6351_s17 = spop %6350  ;;  %v11601_v48 = vld [vmem:[#allocation46_spill] sm:$0xff] }
0x2512   : > { %11587 = vst [vmem:[#allocation63_spill] sm:$0xff] %v10452_v16  ;;  %11588 = vst [vmem:[#allocation65_spill] sm:$0xff] %v10455_v26  ;;  %4831 = vrot.lane.b32.xlu0 %v4812_v58, %s11472_s4  ;;  %4829 = vrot.lane.b32.xlu1 %v4811_v10, %s11472_s4  ;;  %v4815_v2 = vmul.f32 %v4807_v37, %v10149_v40  ;;  %v4816_v7 = vmul.f32 %v4807_v37, %v10151_v56  ;;  %s6353_s29 = spop %6352  ;;  %v4912_v56 = vstv %s6351_s17 }
0x2513   : > { %v4918_v42 = vmul.f32 %v4906_v50, %v10404_v62  ;;  %v4917_v43 = vmul.f32 %v4906_v50, %v10413_v31  ;;  %v4920_v27 = vmul.f32 %v4909_v63, %v10408_v28  ;;  %v4919_v40 = vmul.f32 %v4909_v63, %v10423_v12  ;;  %s6355_s0 = spop %6354  ;;  %v6633_v50 = vld [vmem:[#allocation3 + $0x78] sm:$0xff] }
0x2514   : > { %v4922_v11 = vmul.f32 %v4912_v56, %v10415_v61  ;;  %v4921_v8 = vmul.f32 %v4912_v56, %v10435_v20  ;;  %v4974_v10 = vstv %s6355_s0  ;;  %v11589_v56 = vld [vmem:[#allocation29_spill] sm:$0xff]  ;;  %v2639_v16 = vstv %s8795_s23 }
0x2515   : > { %v4986_v58 = vmul.f32 %v4974_v10, %v10404_v62  ;;  %v4985_v52 = vmul.f32 %v4974_v10, %v10413_v31  ;;  %v11590_v10 = vld [vmem:[#allocation30_spill] sm:$0xff] }
0x2516   : > { %4835 = vrot.lane.b32.xlu0 %v4814_v29, %s11472_s4  ;;  %4833 = vrot.lane.b32.xlu1 %v4813_v60, %s11472_s4  ;;  %s6357_s25 = spop %6356 }
0x2517   : > { %v4977_v60 = vstv %s6357_s25  ;;  %s6359_s1 = spop %6358 }
0x2518   : > { %v4988_v29 = vmul.f32 %v4977_v60, %v10408_v28  ;;  %v4987_v37 = vmul.f32 %v4977_v60, %v10423_v12  ;;  %v11591_v60 = vld [vmem:[#allocation31_spill] sm:$0xff] }
0x251a   : > { %4839 = vrot.lane.b32.xlu0 %v4816_v7, %s11472_s4  ;;  %4837 = vrot.lane.b32.xlu1 %v4815_v2, %s11472_s4  ;;  %v2191_v2 = vstv %s8509_s20  ;;  %v4915_v7 = vstv %s6353_s29  ;;  %s10492_s8 = spop %6360 }
0x251b   : > { %s6363_s20 = spop %6362  ;;  %v4983_v30 = vstv %s10492_s8 }
0x251e   : > { %4935 = vrot.lane.b32.xlu0 %v4918_v42, %s11072_s9  ;;  %4933 = vrot.lane.b32.xlu1 %v4917_v43, %s11072_s9  ;;  %v2199_v42 = vmul.f32 %v6633_v50, %v2191_v2  ;;  %v6634_v43 = vld [vmem:[#allocation3 + $0x80] sm:$0xff]  ;;  %v11593_v50 = vld [vmem:[#allocation33_spill] sm:$0xff]  ;;  %s6365_s19 = spop %6364 }
0x251f   : > { %v2200_v63 = vmul.f32 %v6634_v43, %v2191_v2 }
0x2522   : > { %4939 = vrot.lane.b32.xlu0 %v4920_v27, %s11072_s9  ;;  %4937 = vrot.lane.b32.xlu1 %v4919_v40, %s11072_s9  ;;  %v4923_v27 = vmul.f32 %v4915_v7, %v10447_v24  ;;  %v4924_v40 = vmul.f32 %v4915_v7, %v10425_v46 }
0x2526   : > { %4943 = vrot.lane.b32.xlu0 %v4922_v11, %s11072_s9  ;;  %4941 = vrot.lane.b32.xlu1 %v4921_v8, %s11072_s9  ;;  %v2275_v11 = vadd.f32 %v11589_v56, %v2199_v42  ;;  %v4980_v8 = vstv %s6359_s1  ;;  %v5042_v42 = vstv %s6363_s20  ;;  %v11594_v56 = vld [vmem:[#allocation34_spill] sm:$0xff]  ;;  %s11650_s20 = sld [smem:[#allocation181_spill]] }
0x2527   : > { %v4989_v7 = vmul.f32 %v4980_v8, %v10435_v20 }
0x252a   : > { %5003 = vrot.lane.b32.xlu0 %v4986_v58, %s6888_s30  ;;  %5001 = vrot.lane.b32.xlu1 %v4985_v52, %s6888_s30  ;;  %v2276_v58 = vadd.f32 %v11590_v10, %v2200_v63  ;;  %v4990_v52 = vmul.f32 %v4980_v8, %v10415_v61  ;;  %v5054_v63 = vmul.f32 %v5042_v42, %v10404_v62 }
0x252e   : > { %5007 = vrot.lane.b32.xlu0 %v4988_v29, %s6888_s30  ;;  %5005 = vrot.lane.b32.xlu1 %v4987_v37, %s6888_s30  ;;  %v2343_v29 = vadd.f32 %v11591_v60, %v2275_v11  ;;  %v11592_v37 = vld [vmem:[#allocation32_spill] sm:$0xff]  ;;  %v11597_v60 = vld [vmem:[#allocation37_spill] sm:$0xff] }
0x252f   : > { %v2344_v2 = vadd.f32 %v11592_v37, %v2276_v58  ;;  %v11596_v11 = vld [vmem:[#allocation36_spill] sm:$0xff]  ;;  %v5053_v58 = vmul.f32 %v5042_v42, %v10413_v31  ;;  %v5045_v37 = vstv %s6365_s19 }
0x2530   : > { %v2411_v43 = vadd.f32 %v11593_v50, %v2343_v29  ;;  %v11598_v29 = vld [vmem:[#allocation38_spill] sm:$0xff]  ;;  %v6635_v42 = vld [vmem:[#allocation3 + $0x7b] sm:$0xff] }
0x2531   : > { %v2412_v26 = vadd.f32 %v11594_v56, %v2344_v2  ;;  %v5056_v2 = vmul.f32 %v5045_v37, %v10408_v28 }
0x2532   : > { %4947 = vrot.lane.b32.xlu0 %v4924_v40, %s11072_s9  ;;  %4945 = vrot.lane.b32.xlu1 %v4923_v27, %s11072_s9  ;;  %v11595_v27 = vld [vmem:[#allocation35_spill] sm:$0xff]  ;;  %s6367_s9 = spop %6366 }
0x2533   : > { %v2479_v40 = vadd.f32 %v11595_v27, %v2411_v43  ;;  %v2480_v10 = vadd.f32 %v11596_v11, %v2412_v26  ;;  %v11600_v43 = vld [vmem:[#allocation41_spill] sm:$0xff]  ;;  %v5055_v26 = vmul.f32 %v5045_v37, %v10423_v12  ;;  %v2647_v27 = vmul.f32 %v6635_v42, %v2639_v16  ;;  %v11603_v37 = vld [vmem:[#allocation54_spill] sm:$0xff]  ;;  %s10528_s23 = spop %6368  ;;  %v11606_v42 = vld [vmem:[#allocation64_spill] sm:$0xff] }
0x2534   : > { %s6371_s3 = spop %6370 }
0x2535   : > { %v2547_v8 = vadd.f32 %v11597_v60, %v2479_v40  ;;  %v2548_v50 = vadd.f32 %v11598_v29, %v2480_v10  ;;  %v6636_v40 = vld [vmem:[#allocation3 + $0x83] sm:$0xff]  ;;  %s6373_s16 = spop %6372 }
0x2536   : > { %5011 = vrot.lane.b32.xlu0 %v4990_v52, %s6888_s30  ;;  %5009 = vrot.lane.b32.xlu1 %v4989_v7, %s6888_s30  ;;  %v11599_v52 = vld [vmem:[#allocation40_spill] sm:$0xff]  ;;  %v2648_v11 = vmul.f32 %v6636_v40, %v2639_v16 }
0x2537   : > { %v2615_v7 = vadd.f32 %v11599_v52, %v2547_v8  ;;  %v2616_v56 = vadd.f32 %v11600_v43, %v2548_v50  ;;  %v5788_v60 = vld [vmem:[#allocation13 + $0x1] ss:$0 sm:$0xff]  ;;  %v11602_v8 = vld [vmem:[#allocation47_spill] sm:$0xff] }
0x2538   : > { %v11604_v43 = vld [vmem:[#allocation55_spill] sm:$0xff] }
0x2539   : > { %v2655_v10 = vadd.f32 %v2647_v27, %v2615_v7  ;;  %v2656_v29 = vadd.f32 %v2648_v11, %v2616_v56  ;;  %v4992_v7 = vmul.f32 %v4983_v30, %v10425_v46  ;;  %v11605_v56 = vld [vmem:[#allocation62_spill] sm:$0xff] }
0x253a   : > { %5071 = vrot.lane.b32.xlu0 %v5054_v63, %s6889_s24  ;;  %5069 = vrot.lane.b32.xlu1 %v5053_v58, %s6889_s24  ;;  %v5787_v63 = vld [vmem:[#allocation13] ss:$0 sm:$0xff]  ;;  %v11607_v11 = vld [vmem:[#allocation70_spill] sm:$0xff] }
0x253b   : > { %v2723_v58 = vadd.f32 %v11601_v48, %v2655_v10  ;;  %v2724_v52 = vadd.f32 %v11602_v8, %v2656_v29  ;;  %v5048_v48 = vstv %s6367_s9  ;;  %v11609_v29 = vld [vmem:[#allocation80_spill] sm:$0xff]  ;;  %v5110_v8 = vstv %s6371_s3 }
0x253c   : > { %v5058_v40 = vmul.f32 %v5048_v48, %v10415_v61 }
0x253d   : > { %v2791_v50 = vadd.f32 %v11603_v37, %v2723_v58  ;;  %v2792_v16 = vadd.f32 %v11604_v43, %v2724_v52  ;;  %v11610_v52 = vld [vmem:[#allocation81_spill] sm:$0xff]  ;;  %v5122_v43 = vmul.f32 %v5110_v8, %v10404_v62 }
0x253e   : > { %5075 = vrot.lane.b32.xlu0 %v5056_v2, %s6889_s24  ;;  %5073 = vrot.lane.b32.xlu1 %v5055_v26, %s6889_s24  ;;  %v4991_v2 = vmul.f32 %v4983_v30, %v10447_v24  ;;  %v5057_v30 = vmul.f32 %v5048_v48, %v10435_v20  ;;  %v6637_v48 = vld [vmem:[#allocation3 + $0x7e] sm:$0xff] }
0x253f   : > { %v2859_v26 = vadd.f32 %v11605_v56, %v2791_v50  ;;  %v2860_v27 = vadd.f32 %v11606_v42, %v2792_v16  ;;  %v3087_v50 = vstv %s9075_s26  ;;  %v11611_v16 = vld [vmem:[#allocation86_spill] sm:$0xff] }
0x2540   : > { %v3095_v42 = vmul.f32 %v6637_v48, %v3087_v50 }
0x2541   : > { %v2927_v10 = vadd.f32 %v11607_v11, %v2859_v26  ;;  %v5121_v26 = vmul.f32 %v5110_v8, %v10413_v31  ;;  %v6638_v11 = vld [vmem:[#allocation3 + $0x86] sm:$0xff] }
0x2542   : > { %5334 = vperm.xlu0 %6533, %v5788_v60   ;;  %5330 = vperm.xlu1 %6534, %v5787_v63   ;;  %v11608_v60 = vld [vmem:[#allocation72_spill] sm:$0xff] }
0x2543   : > { %v2928_v63 = vadd.f32 %v11608_v60, %v2860_v27  ;;  %v2995_v58 = vadd.f32 %v11609_v29, %v2927_v10  ;;  %v5113_v27 = vstv %s6373_s16  ;;  %v3096_v10 = vmul.f32 %v6638_v11, %v3087_v50  ;;  %v11613_v29 = vld [vmem:[#allocation98_spill] sm:$0xff]  ;;  %v11615_v50 = vld [vmem:[#allocation100_spill] sm:$0xff] }
0x2544   : > { %v5124_v60 = vmul.f32 %v5113_v27, %v10408_v28 }
0x2545   : > { %v2996_v37 = vadd.f32 %v11610_v52, %v2928_v63  ;;  %v5051_v52 = vstv %s10528_s23 }
0x2546   : > { %5015 = vrot.lane.b32.xlu0 %v4992_v7, %s6888_s30  ;;  %5013 = vrot.lane.b32.xlu1 %v4991_v2, %s6888_s30  ;;  %v3063_v2 = vadd.f32 %v11611_v16, %v2995_v58  ;;  %v11612_v7 = vld [vmem:[#allocation87_spill] sm:$0xff]  ;;  %s6375_s30 = spop %6374 }
0x2547   : > { %v3064_v56 = vadd.f32 %v11612_v7, %v2996_v37  ;;  %v11614_v37 = vld [vmem:[#allocation92_spill] sm:$0xff]  ;;  %s10559_s26 = spop %6376 }
0x2548   : > { %v5789_v7 = vld [vmem:[#allocation13 + $0x2] ss:$0 sm:$0xff]  ;;  %s6379_s2 = spop %6378 }
0x2549   : > { %v3104_v63 = vadd.f32 %v3096_v10, %v3064_v56  ;;  %v11617_v56 = vld [vmem:[#allocation106_spill] sm:$0xff]  ;;  %s6381_s18 = spop %6380 }
0x254a   : > { %5079 = vrot.lane.b32.xlu0 %v5058_v40, %s6889_s24  ;;  %5077 = vrot.lane.b32.xlu1 %v5057_v30, %s6889_s24  ;;  %v3103_v40 = vadd.f32 %v3095_v42, %v3063_v2  ;;  %v5123_v30 = vmul.f32 %v5113_v27, %v10423_v12  ;;  %v5059_v2 = vmul.f32 %v5051_v52, %v10447_v24  ;;  %v5116_v42 = vstv %s6375_s30  ;;  %v11618_v27 = vld [vmem:[#allocation117_spill] sm:$0xff]  ;;  %v11619_v10 = vld [vmem:[#allocation114_spill] sm:$0xff]  ;;  %s10614_s29 = spop %6382 }
0x254b   : > { %v3172_v8 = vadd.f32 %v11614_v37, %v3104_v63  ;;  %s10627_s0 = spop %6384 }
0x254c   : > { %v3171_v58 = vadd.f32 %v11613_v29, %v3103_v40  ;;  %v11620_v40 = vld [vmem:[#allocation115_spill] sm:$0xff]  ;;  %v5125_v29 = vmul.f32 %v5116_v42, %v10435_v20 }
0x254e   : > { %5139 = vrot.lane.b32.xlu0 %v5122_v43, %s11577_s21  ;;  %5137 = vrot.lane.b32.xlu1 %v5121_v26, %s11577_s21  ;;  %v3239_v16 = vadd.f32 %v11615_v50, %v3171_v58  ;;  %v11616_v43 = vld [vmem:[#allocation109_spill] sm:$0xff]  ;;  %v11621_v58 = vld [vmem:[#allocation122_spill] sm:$0xff]  ;;  %v11622_v50 = vld [vmem:[#allocation123_spill] sm:$0xff] }
0x254f   : > { %v3240_v48 = vadd.f32 %v11616_v43, %v3172_v8  ;;  %v5178_v8 = vstv %s6379_s2  ;;  %v3535_v43 = vstv %s9363_s15 }
0x2550   : > { %v3307_v26 = vadd.f32 %v11617_v56, %v3239_v16 }
0x2551   : > { %v3308_v11 = vadd.f32 %v11618_v27, %v3240_v48  ;;  %v6639_v27 = vld [vmem:[#allocation3 + $0x81] sm:$0xff] }
0x2552   : > { %5143 = vrot.lane.b32.xlu0 %v5124_v60, %s11577_s21  ;;  %5141 = vrot.lane.b32.xlu1 %v5123_v30, %s11577_s21  ;;  %v3375_v60 = vadd.f32 %v11619_v10, %v3307_v26  ;;  %v5060_v30 = vmul.f32 %v5051_v52, %v10425_v46  ;;  %v5126_v26 = vmul.f32 %v5116_v42, %v10415_v61  ;;  %v5181_v10 = vstv %s6381_s18 }
0x2553   : > { %v3376_v63 = vadd.f32 %v11620_v40, %v3308_v11  ;;  %v5189_v52 = vmul.f32 %v5178_v8, %v10413_v31  ;;  %v3543_v11 = vmul.f32 %v6639_v27, %v3535_v43 }
0x2554   : > { %v3443_v37 = vadd.f32 %v11621_v58, %v3375_v60  ;;  %v6640_v60 = vld [vmem:[#allocation3 + $0x89] sm:$0xff]  ;;  %v5191_v58 = vmul.f32 %v5181_v10, %v10423_v12 }
0x2555   : > { %v3444_v16 = vadd.f32 %v11622_v50, %v3376_v63  ;;  %v3544_v40 = vmul.f32 %v6640_v60, %v3535_v43  ;;  %v11626_v50 = vld [vmem:[#allocation139_spill] sm:$0xff]  ;;  %v10588_v43 = vld [vmem:[%s10968_s5] sm:$0xf]  ;;  %v11629_v60 = vld [vmem:[#allocation158_spill] sm:$0xff] }
0x2556   : > { %5081 = vrot.lane.b32.xlu0 %v5059_v2, %s6889_s24  ;;  %5338 = vperm.xlu1 %6534, %v5789_v7   ;;  %v11623_v7 = vld [vmem:[#allocation142_spill] sm:$0xff]  ;;  %v11624_v2 = vld [vmem:[#allocation143_spill] sm:$0xff]  ;;  %6394 = vpush %v10588_v43 }
0x2557   : > { %v3511_v48 = vadd.f32 %v11623_v7, %v3443_v37  ;;  %v3512_v56 = vadd.f32 %v11624_v2, %v3444_v16  ;;  %v11625_v37 = vld [vmem:[#allocation138_spill] sm:$0xff]  ;;  %v5790_v2 = vld [vmem:[#allocation13 + $0x3] ss:$0 sm:$0xff] }
0x2558   : > { %v11627_v7 = vld [vmem:[#allocation150_spill] sm:$0xff] }
0x2559   : > { %v3551_v63 = vadd.f32 %v3543_v11, %v3511_v48  ;;  %v5192_v11 = vmul.f32 %v5181_v10, %v10408_v28  ;;  %v5475_v10 = vrot.slane %v10588_v43, 1 }
0x255a   : > { %5083 = vrot.lane.b32.xlu1 %v5060_v30, %s6889_s24  ;;  %5145 = vrot.lane.b32.xlu0 %v5125_v29, %s11577_s21  ;;  %v3552_v30 = vadd.f32 %v3544_v40, %v3512_v56  ;;  %v5190_v29 = vmul.f32 %v5178_v8, %v10404_v62  ;;  %v10593_v8 = vld [vmem:[%s10968_s5 + $0x4] sm:$0xf]  ;;  %v10600_v56 = vld [vmem:[%s10968_s5 + $0x8] sm:$0xf] }
0x255b   : > { %v3619_v42 = vadd.f32 %v11625_v37, %v3551_v63  ;;  %6396 = vpush %v10593_v8  ;;  %v5119_v63 = vstv %s10559_s26  ;;  %v5477_v37 = vrot.slane %v10600_v56, 1 }
0x255c   : > { %v3620_v16 = vadd.f32 %v11626_v50, %v3552_v30  ;;  %6398 = vpush %v10600_v56  ;;  %v11630_v30 = vld [vmem:[#allocation159_spill] sm:$0xff] }
0x255d   : > { %v3687_v48 = vadd.f32 %v11627_v7, %v3619_v42  ;;  %v11631_v42 = vld [vmem:[#allocation165_spill] sm:$0xff]  ;;  %v11632_v7 = vld [vmem:[#allocation166_spill] sm:$0xff] }
0x255e   : > { %5147 = vrot.lane.b32.xlu1 %v5126_v26, %s11577_s21  ;;  %5205 = vrot.lane.b32.xlu0 %v5189_v52, %s11462_s13  ;;  %v10605_v26 = vld [vmem:[%s10968_s5 + $0xc] sm:$0xf]  ;;  %v11628_v52 = vld [vmem:[#allocation151_spill] sm:$0xff] }
0x255f   : > { %v3688_v27 = vadd.f32 %v11628_v52, %v3620_v16  ;;  %v3755_v40 = vadd.f32 %v11629_v60, %v3687_v48  ;;  %6400 = vpush %v10605_v26  ;;  %v5478_v16 = vrot.slane %v10605_v26, 1  ;;  %v3983_v52 = vstv %s9811_s7  ;;  %s10637_s7 = spop %6386 }
0x2560   : > { %6402 = vpush %v5475_v10  ;;  %v4510_v60 = vadd.f32 %v10167_v21, %v10105_v19 }
0x2561   : > { %v3823_v50 = vadd.f32 %v11631_v42, %v3755_v40  ;;  %v11633_v40 = vld [vmem:[#allocation170_spill] sm:$0xff] }
0x2562   : > { %5207 = vrot.lane.b32.xlu1 %v5190_v29, %s11462_s13  ;;  %5209 = vrot.lane.b32.xlu0 %v5191_v58, %s11462_s13  ;;  %v3756_v29 = vadd.f32 %v11630_v30, %v3688_v27  ;;  %v5476_v58 = vrot.slane %v10593_v8, 1  ;;  %v5127_v27 = vmul.f32 %v5119_v63, %v10447_v24  ;;  %v5184_v30 = vstv %s10614_s29 }
0x2563   : > { %v3891_v42 = vadd.f32 %v11633_v40, %v3823_v50  ;;  %v4578_v21 = vadd.f32 %v10207_v57, %v4510_v60  ;;  %v10645_v50 = vpop.permute.xlu1 %4701 }
0x2564   : > { %v3824_v48 = vadd.f32 %v11632_v7, %v3756_v29  ;;  %6404 = vpush %v5476_v58  ;;  %v5194_v7 = vmul.f32 %v5184_v30, %v10415_v61 }
0x2565   : > { %6406 = vpush %v5477_v37  ;;  %v5193_v37 = vmul.f32 %v5184_v30, %v10435_v20  ;;  %v4646_v57 = vadd.f32 %v10247_v54, %v4578_v21  ;;  %v5513_v54 = vrot.slane %v10605_v26, 2 }
0x2566   : > { %5211 = vrot.lane.b32.xlu1 %v5192_v11, %s11462_s13  ;;  %5342 = vperm.xlu0 %6533, %v5790_v2   ;;  %v5128_v11 = vmul.f32 %v5119_v63, %v10425_v46  ;;  %v4509_v2 = vadd.f32 %v10165_v18, %v10103_v47  ;;  %v3892_v29 = vadd.f32 %v11634_v1, %v3824_v48  ;;  %v6641_v47 = vld [vmem:[#allocation3 + $0x84] sm:$0xff]  ;;  %v6642_v63 = vld [vmem:[#allocation3 + $0x8c] sm:$0xff]  ;;  %v10647_v48 = vpop.permute.xlu0 %4703 }
0x2567   : > { %v3991_v18 = vmul.f32 %v6641_v47, %v3983_v52  ;;  %6408 = vpush %v5478_v16  ;;  %v3992_v10 = vmul.f32 %v6642_v63, %v3983_v52  ;;  %v3959_v1 = vadd.f32 %v9807_v4, %v3891_v42  ;;  %v5246_v16 = vstv %s10637_s7  ;;  %v11635_v63 = vld [vmem:[#allocation39_spill] sm:$0xff]  ;;  %s11647_s7 = sld [smem:[#allocation27_spill]] }
0x2568   : > { %v4577_v19 = vadd.f32 %v10205_v44, %v4509_v2  ;;  %v3960_v58 = vadd.f32 %v9809_v41, %v3892_v29  ;;  %v5258_v52 = vmul.f32 %v5246_v16, %v10404_v62  ;;  %v5510_v4 = vrot.slane %v10588_v43, 2 }
0x2569   : > { %v5511_v41 = vrot.slane %v10593_v8, 2  ;;  %v3999_v62 = vadd.f32 %v3991_v18, %v3959_v1  ;;  %v5257_v60 = vmul.f32 %v5246_v16, %v10413_v31 }
0x256a   : > { %5149 = vrot.lane.b32.xlu1 %v5127_v27, %s11577_s21  ;;  %5151 = vrot.lane.b32.xlu0 %v5128_v11, %s11577_s21  ;;  %v4511_v27 = vadd.f32 %v10169_v49, %v10117_v39  ;;  %v4645_v44 = vadd.f32 %v10245_v6, %v4577_v19  ;;  %s6389_s21 = spop %6388  ;;  %v5512_v11 = vrot.slane %v10600_v56, 2  ;;  %v4714_v6 = vadd.f32 %v10362_v14, %v4646_v57 }
0x256b   : > { %v4000_v2 = vadd.f32 %v3992_v10, %v3960_v58  ;;  %6410 = vpush %v5510_v4  ;;  %v5249_v29 = vstv %s6389_s21  ;;  %v5187_v10 = vstv %s10627_s0  ;;  %v11636_v58 = vld [vmem:[#allocation48_spill] sm:$0xff]  ;;  %s6391_s25 = spop %6390  ;;  %s11648_s21 = sld [smem:[#allocation28_spill]] }
0x256c   : > { %v4579_v39 = vadd.f32 %v10209_v15, %v4511_v27  ;;  %v4713_v49 = vadd.f32 %v10360_v53, %v4645_v44  ;;  %6412 = vpush %v5511_v41  ;;  %v4067_v53 = vadd.f32 %v9853_v59, %v3999_v62  ;;  %v5260_v14 = vmul.f32 %v5249_v29, %v10408_v28  ;;  %s6393_s1 = spop %6392 }
0x256d   : > { %6414 = vpush %v5512_v11  ;;  %v4068_v31 = vadd.f32 %v9855_v33, %v4000_v2  ;;  %v5259_v18 = vmul.f32 %v5249_v29, %v10423_v12  ;;  %v5196_v33 = vmul.f32 %v5187_v10, %v10425_v46  ;;  %v11638_v12 = vld [vmem:[#allocation42_spill] sm:$0xff]  ;;  %v5195_v44 = vmul.f32 %v5187_v10, %v10447_v24  ;;  %s5642_s9 = scalar_lea.sflag [#allocation7], %s11647_s7 }
0x256e   : > { %5215 = vrot.lane.b32.xlu0 %v5194_v7, %s11462_s13  ;;  %5213 = vrot.lane.b32.xlu1 %v5193_v37, %s11462_s13  ;;  %v4647_v42 = vadd.f32 %v10249_v3, %v4579_v39  ;;  %6416 = vpush %v5513_v54  ;;  %v4135_v47 = vadd.f32 %v9893_v23, %v4067_v53  ;;  %v11637_v23 = vld [vmem:[#allocation49_spill] sm:$0xff]  ;;  %v5252_v4 = vstv %s6391_s25  ;;  %v11640_v39 = vld [vmem:[#allocation56_spill] sm:$0xff]  ;;  %v5545_v2 = vrot.slane %v10588_v43, 3  ;;  %s5801_s25 = sshll.u32 %s6958_s28, 10 }
0x256f   : > { %v4136_v59 = vadd.f32 %v11635_v63, %v4068_v31  ;;  %v11641_v54 = vld [vmem:[#allocation57_spill] sm:$0xff]  ;;  %v5791_v63 = vld [vmem:[%s10969_s6] ss:$0 sm:$0xff] }
0x2570   : > { %v4758_v30 = vpop.permute.xlu1 %4757  ;;  %v4760_v40 = vpop.permute.xlu0 %4759  ;;  %v4715_v3 = vadd.f32 %v10364_v17, %v4647_v42  ;;  %v4203_v37 = vadd.f32 %v11636_v58, %v4135_v47  ;;  %6418 = vpush %v5545_v2  ;;  %v6643_v43 = vld [vmem:[#allocation3 + $0x87] sm:$0xff] }
0x2571   : > { %v10667_v7 = vadd.f32 %v4758_v30, %v4713_v49  ;;  %v10669_v15 = vadd.f32 %v4760_v40, %v4714_v6  ;;  %v4204_v17 = vadd.f32 %v11637_v23, %v4136_v59  ;;  %v5262_v6 = vmul.f32 %v5252_v4, %v10415_v61 }
0x2572   : > { %5275 = vrot.lane.b32.xlu0 %v5258_v52, %s11472_s4  ;;  %5273 = vrot.lane.b32.xlu1 %v5257_v60, %s11472_s4  ;;  %v4271_v27 = vadd.f32 %v11638_v12, %v4203_v37  ;;  %v5546_v60 = vrot.slane %v10593_v8, 3  ;;  %v4431_v30 = vstv %s10135_s27  ;;  %v5548_v61 = vrot.slane %v10605_v26, 3 }
0x2573   : > { %v4439_v8 = vmul.f32 %v6643_v43, %v4431_v30 }
0x2574   : > { %v4762_v19 = vpop.permute.xlu1 %4761  ;;  %v4764_v21 = vpop.permute.xlu0 %4763  ;;  %v4339_v49 = vadd.f32 %v11640_v39, %v4271_v27  ;;  %6420 = vpush %v5546_v60 }
0x2575   : > { %v10681_v28 = vadd.f32 %v4762_v19, %v4715_v3  ;;  %v10684_v1 = vadd.f32 %v4764_v21, %v10398_v9  ;;  %v11639_v9 = vld [vmem:[#allocation43_spill] sm:$0xff] }
0x2576   : > { %5279 = vrot.lane.b32.xlu0 %v5260_v14, %s11472_s4  ;;  %5277 = vrot.lane.b32.xlu1 %v5259_v18, %s11472_s4  ;;  %v4272_v52 = vadd.f32 %v11639_v9, %v4204_v17  ;;  %v4407_v29 = vadd.f32 %v10131_v45, %v4339_v49  ;;  %v5255_v14 = vstv %s6393_s1  ;;  %s11649_s1 = sshll.u32 %s11647_s7, 6 }
0x2577   : > { %v5264_v31 = vmul.f32 %v5255_v14, %v10425_v46  ;;  %v5263_v26 = vmul.f32 %v5255_v14, %v10447_v24  ;;  %v5792_v24 = vld [vmem:[%s10969_s6 + $0x1] ss:$0 sm:$0xff] }
0x2578   : > { %v4766_v57 = vpop.permute.xlu1 %4765  ;;  %v4768_v16 = vpop.permute.xlu0 %4767  ;;  %v4340_v62 = vadd.f32 %v11641_v54, %v4272_v52  ;;  %v11644_v52 = vld [vmem:[#allocation44_spill] sm:$0xff]  ;;  %v11645_v54 = vld [vmem:[#allocation63_spill] sm:$0xff] }
0x2579   : > { %v10695_v41 = vadd.f32 %v4766_v57, %v10427_v34  ;;  %v10698_v11 = vadd.f32 %v4768_v16, %v10437_v36  ;;  %v5547_v34 = vrot.slane %v10600_v56, 3  ;;  %v5261_v36 = vmul.f32 %v5252_v4, %v10435_v20  ;;  %v6644_v20 = vld [vmem:[#allocation3 + $0x8f] sm:$0xff]  ;;  %v11643_v16 = vld [vmem:[#allocation51_spill] sm:$0xff] }
0x257a   : > { %5219 = vrot.lane.b32.xlu0 %v5196_v33, %s11462_s13  ;;  %5217 = vrot.lane.b32.xlu1 %v5195_v44, %s11462_s13  ;;  %v4408_v53 = vadd.f32 %v10133_v5, %v4340_v62  ;;  %v4440_v56 = vmul.f32 %v6644_v20, %v4431_v30  ;;  %v4447_v5 = vadd.f32 %v4439_v8, %v4407_v29  ;;  %v11646_v62 = vld [vmem:[#allocation65_spill] sm:$0xff]  ;;  %s10887_s13 = scalar_lea.vmem [#allocation14], %s11649_s1 }
0x257b   : > { %6422 = vpush %v5547_v34  ;;  %s5655_s27 = sshll.u32 %s10887_s13, 4  ;;  %s10899_s27 = int_to_ptr.vmem [resolvable:$true] %s5655_s27 }
0x257c   : > { %v4770_v40 = vpop.permute.xlu1 %4769  ;;  %v4772_v42 = vpop.permute.xlu0 %4771  ;;  %6424 = vpush %v5548_v61  ;;  %v4448_v47 = vadd.f32 %v4440_v56, %v4408_v53  ;;  %v4515_v19 = vadd.f32 %v10177_v32, %v4447_v5  ;;  %s6795_s23 = scalar_lea.vmem %s10899_s27, 1024 }
0x257d   : > { %p6796_p3 = scmp.ne.s32.totalorder %s10899_s27, %s6795_s23 }
0x257e   : > { %5283 = vrot.lane.b32.xlu0 %v5262_v6, %s11472_s4  ;;  %5281 = vrot.lane.b32.xlu1 %v5261_v36, %s11472_s4  ;;  %v4516_v21 = vadd.f32 %v10179_v0, %v4448_v47  ;;  %v4583_v58 = vadd.f32 %v10217_v35, %v4515_v19  ;;  %v5793_v35 = vld [vmem:[%s10969_s6 + $0x2] ss:$0 sm:$0xff] }
0x257f   : > { %p6797_p5 = pnand %p6796_p3, %p7102_p10 }
0x2580   : > { %v4826_v3 = vpop.permute.xlu1 %4825  ;;  %v4828_v45 = vpop.permute.xlu0 %4827  ;;  %v4584_v32 = vadd.f32 %v10219_v13, %v4516_v21  ;;  %v4651_v33 = vadd.f32 %v10257_v25, %v4583_v58 }
0x2581   : > { %v4849_v18 = vadd.f32 %v4826_v3, %v10667_v7  ;;  %v4850_v46 = vadd.f32 %v4828_v45, %v10669_v15  ;;  %p6798_p7 = pneg %p6797_p5 }
0x2582   : > { %5287 = vrot.lane.b32.xlu0 %v5264_v31, %s11472_s4  ;;  %5285 = vrot.lane.b32.xlu1 %v5263_v26, %s11472_s4  ;;  %v4652_v23 = vadd.f32 %v10259_v51, %v4584_v32  ;;  %v4719_v12 = vadd.f32 %v10645_v50, %v4651_v33  ;;  %s10897_s4 = scalar_lea.hbm %s11650_s20, %s5801_s25 }
0x2583   : > { %v4889_v7 = vadd.f32 %v10418_v55, %v4849_v18  ;;  %v4890_v15 = vadd.f32 %v10421_v38, %v4850_v46  ;;  %v5794_v55 = vld [vmem:[%s10969_s6 + $0x3] ss:$0 sm:$0xff]  ;;  %v11642_v38 = vld [vmem:[#allocation50_spill] sm:$0xff] }
0x2584   : > { %v4830_v59 = vpop.permute.xlu1 %4829  ;;  %v4832_v10 = vpop.permute.xlu0 %4831  ;;  %v4720_v25 = vadd.f32 %v10647_v48, %v4652_v23  ;;  %v4787_v44 = vadd.f32 %v4770_v40, %v4719_v12 }
0x2585   : > { %v4851_v0 = vadd.f32 %v4830_v59, %v10681_v28  ;;  %v4852_v37 = vadd.f32 %v4832_v10, %v10684_v1 }
0x2586   : > { %5606 = vperm.xlu0 %6533, %v5792_v24   ;;  %5602 = vperm.xlu1 %6534, %v5791_v63   ;;  %v4788_v57 = vadd.f32 %v4772_v42, %v4720_v25 }
0x2587   : > { %v4891_v13 = vadd.f32 %v10430_v22, %v4851_v0  ;;  %v4892_v28 = vadd.f32 %v11642_v38, %v4852_v37  ;;  %s10782_s3 = spop %6394 }
0x2588   : > { %v4834_v17 = vpop.permute.xlu1 %4833  ;;  %v4836_v1 = vpop.permute.xlu0 %4835 }
0x2589   : > { %v4853_v51 = vadd.f32 %v4834_v17, %v10695_v41  ;;  %v4854_v27 = vadd.f32 %v4836_v1, %v10698_v11 }
0x258a   : > { %5614 = vperm.xlu0 %6533, %v5794_v55   ;;  %5610 = vperm.xlu1 %6534, %v5793_v35  }
0x258b   : > { %v4893_v9 = vadd.f32 %v11643_v16, %v4853_v51  ;;  %v4894_v22 = vadd.f32 %v11644_v52, %v4854_v27 }
0x258c   : > { %v4838_v4 = vpop.permute.xlu1 %4837  ;;  %v4840_v39 = vpop.permute.xlu0 %4839  ;;  %s10790_s16 = spop %6396 }
0x258d   : > { %v4855_v49 = vadd.f32 %v4838_v4, %v4787_v44  ;;  %v4856_v6 = vadd.f32 %v4840_v39, %v4788_v57  ;;  %s10798_s30 = spop %6398 }
0x258f   : > { %v4895_v50 = vadd.f32 %v11645_v54, %v4855_v49  ;;  %v4896_v48 = vadd.f32 %v11646_v62, %v4856_v6 }
0x2590   : > { %v4934_v2 = vpop.permute.xlu1 %4933  ;;  %v4936_v41 = vpop.permute.xlu0 %4935  ;;  %s10802_s26 = spop %6400 }
0x2591   : > { %v4957_v60 = vadd.f32 %v4934_v2, %v4889_v7  ;;  %v4958_v11 = vadd.f32 %v4936_v41, %v4890_v15  ;;  %s10810_s2 = spop %6402 }
0x2594   : > { %v4938_v34 = vpop.permute.xlu1 %4937  ;;  %v4940_v30 = vpop.permute.xlu0 %4939 }
0x2595   : > { %v4959_v36 = vadd.f32 %v4938_v34, %v4891_v13  ;;  %v4960_v40 = vadd.f32 %v4940_v30, %v4892_v28  ;;  %s10816_s18 = spop %6404 }
0x2596   : > { %s10822_s24 = spop %6406 }
0x2598   : > { %v4942_v42 = vpop.permute.xlu1 %4941  ;;  %v4944_v61 = vpop.permute.xlu0 %4943  ;;  %s10825_s15 = spop %6408 }
0x2599   : > { %v4961_v29 = vadd.f32 %v4942_v42, %v4893_v9  ;;  %v4962_v53 = vadd.f32 %v4944_v61, %v4894_v22 }
0x259c   : > { %v5002_v14 = vpop.permute.xlu1 %5001  ;;  %v5004_v31 = vpop.permute.xlu0 %5003  ;;  %s10828_s10 = spop %6410 }
0x259d   : > { %v5025_v43 = vadd.f32 %v5002_v14, %v4957_v60  ;;  %v5026_v8 = vadd.f32 %v5004_v31, %v4958_v11  ;;  %s10832_s14 = spop %6412 }
0x259e   : > { %s10837_s11 = spop %6414 }
0x259f   : > { %s10840_s22 = spop %6416 }
0x25a0   : > { %v5006_v20 = vpop.permute.xlu1 %5005  ;;  %v5008_v56 = vpop.permute.xlu0 %5007 }
0x25a1   : > { %v5027_v26 = vadd.f32 %v5006_v20, %v4959_v36  ;;  %v5028_v3 = vadd.f32 %v5008_v56, %v4960_v40  ;;  %s10842_s12 = spop %6418 }
0x25a4   : > { %v4946_v45 = vpop.permute.xlu1 %4945  ;;  %v4948_v5 = vpop.permute.xlu0 %4947 }
0x25a5   : > { %v4963_v47 = vadd.f32 %v4946_v45, %v4895_v50  ;;  %v10753_v18 = vadd.f32 %v4948_v5, %v4896_v48  ;;  %s10846_s17 = spop %6420 }
0x25a8   : > { %v5010_v46 = vpop.permute.xlu1 %5009  ;;  %v5012_v19 = vpop.permute.xlu0 %5011 }
0x25a9   : > { %v5029_v21 = vadd.f32 %v5010_v46, %v4961_v29  ;;  %v5030_v24 = vadd.f32 %v5012_v19, %v4962_v53 }
0x25ac   : > { %v5070_v63 = vpop.permute.xlu1 %5069  ;;  %v5072_v7 = vpop.permute.xlu0 %5071  ;;  %s10851_s29 = spop %6422 }
0x25ad   : > { %v5093_v52 = vadd.f32 %v5070_v63, %v5025_v43  ;;  %v5094_v22 = vadd.f32 %v5072_v7, %v5026_v8  ;;  %s10859_s0 = spop %6424 }
0x25b0   : > { %v5074_v15 = vpop.permute.xlu1 %5073  ;;  %v5076_v59 = vpop.permute.xlu0 %5075 }
0x25b1   : > { %v5095_v62 = vadd.f32 %v5074_v15, %v5027_v26  ;;  %v5096_v48 = vadd.f32 %v5076_v59, %v5028_v3 }
0x25c1   : > { %v5331_v10 = vpop.permute.xlu1 %5330  ;;  %v5335_v58 = vpop.permute.xlu0 %5334 }
0x25c5   : > { %v5014_v32 = vpop.permute.xlu1 %5013  ;;  %v5016_v0 = vpop.permute.xlu0 %5015 }
0x25c6   : > { %v5031_v45 = vadd.f32 %v5014_v32, %v4963_v47 }
0x25c9   : > { %v5078_v37 = vpop.permute.xlu1 %5077  ;;  %v5080_v33 = vpop.permute.xlu0 %5079 }
0x25ca   : > { %v5097_v20 = vadd.f32 %v5078_v37, %v5029_v21  ;;  %v5098_v56 = vadd.f32 %v5080_v33, %v5030_v24 }
0x25cd   : > { %v5138_v23 = vpop.permute.xlu1 %5137  ;;  %v5140_v55 = vpop.permute.xlu0 %5139 }
0x25ce   : > { %v5161_v49 = vadd.f32 %v5138_v23, %v5093_v52  ;;  %v5162_v6 = vadd.f32 %v5140_v55, %v5094_v22  ;;  %v5032_v23 = vadd.f32 %v5016_v0, %v10753_v18 }
0x25d1   : > { %v5142_v35 = vpop.permute.xlu1 %5141  ;;  %v5144_v13 = vpop.permute.xlu0 %5143 }
0x25d2   : > { %v5163_v34 = vadd.f32 %v5142_v35, %v5095_v62  ;;  %v5164_v30 = vadd.f32 %v5144_v13, %v5096_v48 }
0x25d5   : > { %v10755_v38 = vpop.permute.xlu1 %5338  ;;  %v5082_v28 = vpop.permute.xlu0 %5081 }
0x25d6   : > { %v5099_v55 = vadd.f32 %v5082_v28, %v5031_v45 }
0x25d9   : > { %v5084_v17 = vpop.permute.xlu1 %5083  ;;  %v5146_v1 = vpop.permute.xlu0 %5145 }
0x25da   : > { %v5165_v7 = vadd.f32 %v5146_v1, %v5097_v20  ;;  %v5100_v33 = vadd.f32 %v5084_v17, %v5032_v23 }
0x25dd   : > { %v5148_v12 = vpop.permute.xlu1 %5147  ;;  %v5206_v25 = vpop.permute.xlu0 %5205 }
0x25de   : > { %v5229_v54 = vadd.f32 %v5206_v25, %v5161_v49  ;;  %v5166_v15 = vadd.f32 %v5148_v12, %v5098_v56 }
0x25e1   : > { %v5208_v51 = vpop.permute.xlu1 %5207  ;;  %v5210_v27 = vpop.permute.xlu0 %5209 }
0x25e2   : > { %v5230_v50 = vadd.f32 %v5208_v51, %v5162_v6  ;;  %v5231_v42 = vadd.f32 %v5210_v27, %v5163_v34 }
0x25e5   : > { %v5212_v44 = vpop.permute.xlu1 %5211  ;;  %v10757_v57 = vpop.permute.xlu0 %5342 }
0x25e6   : > { %v5232_v61 = vadd.f32 %v5212_v44, %v5164_v30 }
0x25e9   : > { %v5150_v16 = vpop.permute.xlu1 %5149  ;;  %v5152_v9 = vpop.permute.xlu0 %5151 }
0x25ea   : > { %v5167_v35 = vadd.f32 %v5150_v16, %v5099_v55  ;;  %v5168_v27 = vadd.f32 %v5152_v9, %v5100_v33 }
0x25ed   : > { %v5214_v4 = vpop.permute.xlu1 %5213  ;;  %v5216_v39 = vpop.permute.xlu0 %5215 }
0x25ee   : > { %v5233_v47 = vadd.f32 %v5214_v4, %v5165_v7  ;;  %v5234_v32 = vadd.f32 %v5216_v39, %v5166_v15 }
0x25f1   : > { %v5274_v2 = vpop.permute.xlu1 %5273  ;;  %v5276_v41 = vpop.permute.xlu0 %5275 }
0x25f2   : > { %v5297_v60 = vadd.f32 %v5274_v2, %v5229_v54  ;;  %v5298_v11 = vadd.f32 %v5276_v41, %v5230_v50 }
0x25f4   : > { %v10759_v36 = vadd.f32 %v5331_v10, %v5297_v60  ;;  %v10761_v40 = vadd.f32 %v5331_v10, %v5298_v11 }
0x25f5   : > { %v5278_v29 = vpop.permute.xlu1 %5277  ;;  %v5280_v53 = vpop.permute.xlu0 %5279 }
0x25f6   : > { %v5361_v14 = vmul.f32 %v10759_v36, %v10759_v36  ;;  %v5362_v31 = vmul.f32 %v10761_v40, %v10761_v40  ;;  %v5299_v43 = vadd.f32 %v5278_v29, %v5231_v42  ;;  %v5300_v8 = vadd.f32 %v5280_v53, %v5232_v61 }
0x25f8   : > { %v5369_v26 = vmul.f32 %v5361_v14, %v10759_v36  ;;  %v5370_v3 = vmul.f32 %v5362_v31, %v10761_v40  ;;  %v10769_v5 = vadd.f32 %v5335_v58, %v5299_v43  ;;  %v10771_v46 = vadd.f32 %v5335_v58, %v5300_v8 }
0x25f9   : > { %v5218_v19 = vpop.permute.xlu1 %5217  ;;  %v5220_v63 = vpop.permute.xlu0 %5219 }
0x25fa   : > { %v5377_v59 = vmul.f32 0.044715, %v5369_v26  ;;  %v5378_v10 = vmul.f32 0.044715, %v5370_v3  ;;  %v5363_v21 = vmul.f32 %v10769_v5, %v10769_v5  ;;  %v5364_v24 = vmul.f32 %v10771_v46, %v10771_v46 }
0x25fb   : > { %v5235_v22 = vadd.f32 %v5218_v19, %v5167_v35  ;;  %v5236_v49 = vadd.f32 %v5220_v63, %v5168_v27  ;;  %v5353_v26 = vmul.f32 0.5, %v10759_v36  ;;  %v5354_v63 = vmul.f32 0.5, %v10761_v40 }
0x25fc   : > { %v5385_v58 = vadd.f32 %v5377_v59, %v10759_v36  ;;  %v5386_v37 = vadd.f32 %v5378_v10, %v10761_v40  ;;  %v5371_v13 = vmul.f32 %v5363_v21, %v10769_v5  ;;  %v5372_v1 = vmul.f32 %v5364_v24, %v10771_v46 }
0x25fd   : > { %v5282_v18 = vpop.permute.xlu1 %5281  ;;  %v5284_v0 = vpop.permute.xlu0 %5283  ;;  %v5355_v40 = vmul.f32 0.5, %v10769_v5  ;;  %v5480_v27 = vstv %s10810_s2 }
0x25fe   : > { %v5393_v28 = vmul.f32 0.7978846, %v5385_v58  ;;  %v5394_v12 = vmul.f32 0.7978846, %v5386_v37  ;;  %v5301_v25 = vadd.f32 %v5282_v18, %v5233_v47  ;;  %v5302_v51 = vadd.f32 %v5284_v0, %v5234_v32 }
0x25ff   : > { %v5379_v44 = vmul.f32 0.044715, %v5371_v13  ;;  %v5380_v52 = vmul.f32 0.044715, %v5372_v1  ;;  %v5356_v32 = vmul.f32 0.5, %v10771_v46  ;;  %v5442_v1 = vstv %s10782_s3  ;;  %s6894_s3 = smov [#allocation14]  }
0x2600   : > { %6551 = vtanh.f32 %v5393_v28  ;;  %v10785_v17 = vadd.f32 %v10755_v38, %v5301_v25  ;;  %v10788_v16 = vadd.f32 %v10755_v38, %v5302_v51  ;;  %v5446_v18 = vstv %s10790_s16  ;;  %s6799_s16 = sshll.u32 %s6894_s3, 4  ;;  %s6800_s16 = int_to_ptr.vmem [resolvable:$false] %s6799_s16 }
0x2601   : > { %6553 = vtanh.f32 %v5394_v12  ;;  %v5387_v4 = vadd.f32 %v5379_v44, %v10769_v5  ;;  %v5388_v39 = vadd.f32 %v5380_v52, %v10771_v46  ;;  %v5286_v6 = vpop.permute.xlu1 %5285  ;;  %v5288_v9 = vpop.permute.xlu0 %5287  ;;  %v5450_v12 = vstv %s10798_s30  ;;  %s6801_s30 = scalar_lea.vmem %s6800_s16, 2048  ;;  %p6802_p12 = scmp.lt.s32.totalorder %s10899_s27, %s6800_s16 }
0x2602   : > { %v5365_v54 = vmul.f32 %v10785_v17, %v10785_v17  ;;  %v5366_v50 = vmul.f32 %v10788_v16, %v10788_v16  ;;  %v5303_v48 = vadd.f32 %v5286_v6, %v5235_v22  ;;  %v5304_v2 = vadd.f32 %v5288_v9, %v5236_v49  ;;  %p6803_p1 = scmp.lt.s32.totalorder %s6801_s30, %s6795_s23 }
0x2603   : > { %v5395_v38 = vmul.f32 0.7978846, %v5387_v4  ;;  %v5396_v62 = vmul.f32 0.7978846, %v5388_v39  ;;  %v5357_v35 = vmul.f32 0.5, %v10785_v17  ;;  %v5358_v0 = vmul.f32 0.5, %v10788_v16 }
0x2604   : > { %v5373_v41 = vmul.f32 %v5365_v54, %v10785_v17  ;;  %v5374_v60 = vmul.f32 %v5366_v50, %v10788_v16  ;;  %v10805_v11 = vadd.f32 %v10757_v57, %v5303_v48  ;;  %v10808_v34 = vadd.f32 %v10757_v57, %v5304_v2  ;;  %p6804_p2 = por %p6803_p1, %p6802_p12 }
0x2605   : > { %6555 = vtanh.f32 %v5395_v38  ;;  %v5454_v25 = vstv %s10802_s26  ;;  %v5483_v44 = vstv %s10816_s18  ;;  %v5486_v52 = vstv %s10822_s24 }
0x2606   : > { %6557 = vtanh.f32 %v5396_v62  ;;  %v5381_v30 = vmul.f32 0.044715, %v5373_v41  ;;  %v5382_v42 = vmul.f32 0.044715, %v5374_v60  ;;  %v5367_v61 = vmul.f32 %v10805_v11, %v10805_v11  ;;  %p6805_p13 = pnand %p6804_p2, %p6798_p7 }
0x2607   : > { %v5368_v29 = vmul.f32 %v10808_v34, %v10808_v34  ;;  %v5489_v4 = vstv %s10825_s15  ;;  %v5515_v39 = vstv %s10828_s10  ;;  %v5521_v9 = vstv %s10837_s11 }
0x2608   : > { %v5389_v53 = vadd.f32 %v5381_v30, %v10785_v17  ;;  %v5390_v14 = vadd.f32 %v5382_v42, %v10788_v16  ;;  %v5375_v57 = vmul.f32 %v5367_v61, %v10805_v11  ;;  %v5518_v16 = vstv %s10832_s14 }
0x2609   : > { %v5376_v31 = vmul.f32 %v5368_v29, %v10808_v34  ;;  %v5524_v54 = vstv %s10840_s22  ;;  %v5550_v50 = vstv %s10842_s12  ;;  %v5553_v38 = vstv %s10846_s17 }
0x260a   : > { %v6552_v43 = vpop.eup %6551  ;;  %v5397_v8 = vmul.f32 0.7978846, %v5389_v53  ;;  %v5398_v20 = vmul.f32 0.7978846, %v5390_v14  ;;  %v5383_v45 = vmul.f32 0.044715, %v5375_v57  ;;  %v5556_v60 = vstv %s10851_s29 }
0x260b   : > { %v6554_v56 = vpop.eup %6553  ;;  %v5409_v3 = vadd.f32 1.0, %v6552_v43  ;;  %v5384_v19 = vmul.f32 0.044715, %v5376_v31  ;;  %v5359_v48 = vmul.f32 0.5, %v10805_v11  ;;  %v5559_v30 = vstv %s10859_s0 }
0x260c   : > { %v5410_v7 = vadd.f32 1.0, %v6554_v56  ;;  %6559 = vtanh.f32 %v5397_v8  ;;  %v5391_v59 = vadd.f32 %v5383_v45, %v10805_v11  ;;  %v5360_v42 = vmul.f32 0.5, %v10808_v34 }
0x260d   : > { %v5417_v15 = vmul.f32 %v5409_v3, %v5353_v26  ;;  %6561 = vtanh.f32 %v5398_v20  ;;  %v5392_v10 = vadd.f32 %v5384_v19, %v10808_v34 }
0x260e   : > { %v5418_v23 = vmul.f32 %v5410_v7, %v5354_v63  ;;  %v5399_v55 = vmul.f32 0.7978846, %v5391_v59 }
0x260f   : > { %v6556_v36 = vpop.eup %6555  ;;  %5426 = vst.msk [vmem:[#allocation4] sm:$0xff] %vm5425_vm6, %v5417_v15  ;;  %v5400_v21 = vmul.f32 0.7978846, %v5392_v10 }
0x2610   : > { %v6558_v24 = vpop.eup %6557  ;;  %5427 = vst.msk [vmem:[#allocation4 + $0x8] sm:$0xff] %vm5425_vm6, %v5418_v23  ;;  %v5411_v47 = vadd.f32 1.0, %v6556_v36  ;;  %6563 = vtanh.f32 %v5399_v55 }
0x2611   : > { %v5412_v58 = vadd.f32 1.0, %v6558_v24  ;;  %6565 = vtanh.f32 %v5400_v21 }
0x2612   : > { %v5419_v37 = vmul.f32 %v5411_v47, %v5355_v40 }
0x2613   : > { %v5420_v33 = vmul.f32 %v5412_v58, %v5356_v32 }
0x2614   : > { %5428 = vst.msk [vmem:[#allocation4 + $0x10] sm:$0xff] %vm5425_vm6, %v5419_v37 }
0x2615   : > { %5429 = vst.msk [vmem:[#allocation4 + $0x18] sm:$0xff] %vm5425_vm6, %v5420_v33 }
0x2616   : > { %v6560_v5 = vpop.eup %6559  ;;  %v5438_v17 = vld [vmem:[#allocation4] sm:$0xff] }
0x2617   : > { %v6562_v46 = vpop.eup %6561  ;;  %v5413_v13 = vadd.f32 1.0, %v6560_v5  ;;  %v5439_v41 = vld [vmem:[#allocation4 + $0x8] sm:$0xff]  ;;  %v5456_v29 = vmul.f32 %v5442_v1, %v5438_v17  ;;  %v5458_v53 = vmul.f32 %v5446_v18, %v5438_v17  ;;  %v5460_v3 = vmul.f32 %v5450_v12, %v5438_v17 }
0x2618   : > { %v5414_v28 = vadd.f32 1.0, %v6562_v46  ;;  %v5457_v56 = vmul.f32 %v5442_v1, %v5439_v41  ;;  %v5459_v26 = vmul.f32 %v5446_v18, %v5439_v41  ;;  %v5461_v11 = vmul.f32 %v5450_v12, %v5439_v41 }
0x2619   : > { %v5421_v51 = vmul.f32 %v5413_v13, %v5357_v35  ;;  %v5462_v45 = vmul.f32 %v5454_v25, %v5438_v17  ;;  %v5463_v19 = vmul.f32 %v5454_v25, %v5439_v41  ;;  %v5603_v35 = vpop.permute.xlu1 %5602  ;;  %v5607_v13 = vpop.permute.xlu0 %5606 }
0x261a   : > { %v5422_v22 = vmul.f32 %v5414_v28, %v5358_v0  ;;  %v6564_v49 = vpop.eup %6563 }
0x261b   : > { %5430 = vst.msk [vmem:[#allocation4 + $0x20] sm:$0xff] %vm5425_vm6, %v5421_v51  ;;  %v5473_v6 = vld [vmem:[#allocation4 + $0x10] sm:$0xff]  ;;  %v6566_v62 = vpop.eup %6565  ;;  %v5415_v2 = vadd.f32 1.0, %v6564_v49 }
0x261c   : > { %5431 = vst.msk [vmem:[#allocation4 + $0x28] sm:$0xff] %vm5425_vm6, %v5422_v22  ;;  %v5416_v61 = vadd.f32 1.0, %v6566_v62  ;;  %v5474_v57 = vld [vmem:[#allocation4 + $0x18] sm:$0xff]  ;;  %v5491_v31 = vmul.f32 %v5480_v27, %v5473_v6  ;;  %v5493_v43 = vmul.f32 %v5483_v44, %v5473_v6  ;;  %v5495_v8 = vmul.f32 %v5486_v52, %v5473_v6 }
0x261d   : > { %v5423_v14 = vmul.f32 %v5415_v2, %v5359_v48  ;;  %v5497_v63 = vmul.f32 %v5489_v4, %v5473_v6  ;;  %v5492_v34 = vmul.f32 %v5480_v27, %v5474_v57  ;;  %v5494_v7 = vmul.f32 %v5483_v44, %v5474_v57 }
0x261e   : > { %v5424_v20 = vmul.f32 %v5416_v61, %v5360_v42  ;;  %v5496_v15 = vmul.f32 %v5486_v52, %v5474_v57  ;;  %v5498_v59 = vmul.f32 %v5489_v4, %v5474_v57  ;;  %v5499_v10 = vadd.f32 %v5491_v31, %v5456_v29 }
0x261f   : > { %5432 = vst.msk [vmem:[#allocation4 + $0x30] sm:$0xff] %vm5425_vm6, %v5423_v14  ;;  %v5501_v23 = vadd.f32 %v5493_v43, %v5458_v53  ;;  %v5503_v36 = vadd.f32 %v5495_v8, %v5460_v3  ;;  %v5505_v55 = vadd.f32 %v5497_v63, %v5462_v45  ;;  %v5500_v1 = vadd.f32 %v5492_v34, %v5457_v56  ;;  %v5611_v53 = vpop.permute.xlu1 %5610  ;;  %v5615_v14 = vpop.permute.xlu0 %5614  ;;  %v6647_v34 = vld [vmem:[%s11648_s21 + $0x20] sm:$0xff] }
0x2620   : > { %5433 = vst.msk [vmem:[#allocation4 + $0x38] sm:$0xff] %vm5425_vm6, %v5424_v20  ;;  %v5502_v18 = vadd.f32 %v5494_v7, %v5459_v26  ;;  %v5504_v0 = vadd.f32 %v5496_v15, %v5461_v11  ;;  %v5506_v28 = vadd.f32 %v5498_v59, %v5463_v19  ;;  %v6645_v11 = vld [vmem:[%s11648_s21] sm:$0xff]  ;;  %v6646_v19 = vld [vmem:[%s11648_s21 + $0x10] sm:$0xff] }
0x2621   : > { %v6648_v15 = vld [vmem:[%s11648_s21 + $0x30] sm:$0xff] }
0x2622   : > { %v5508_v21 = vld [vmem:[#allocation4 + $0x20] sm:$0xff] }
0x2623   : > { %v5509_v24 = vld [vmem:[#allocation4 + $0x28] sm:$0xff]  ;;  %v5526_v40 = vmul.f32 %v5515_v39, %v5508_v21  ;;  %v5528_v47 = vmul.f32 %v5518_v16, %v5508_v21  ;;  %v5530_v32 = vmul.f32 %v5521_v9, %v5508_v21  ;;  %v5532_v58 = vmul.f32 %v5524_v54, %v5508_v21 }
0x2624   : > { %v5527_v37 = vmul.f32 %v5515_v39, %v5509_v24  ;;  %v5529_v33 = vmul.f32 %v5518_v16, %v5509_v24  ;;  %v5531_v5 = vmul.f32 %v5521_v9, %v5509_v24  ;;  %v5533_v46 = vmul.f32 %v5524_v54, %v5509_v24  ;;  %v6651_v21 = vld [vmem:[%s11648_s21 + $0x28] sm:$0xff] }
0x2625   : > { %v5534_v12 = vadd.f32 %v5526_v40, %v5499_v10  ;;  %v5536_v25 = vadd.f32 %v5528_v47, %v5501_v23  ;;  %v5538_v51 = vadd.f32 %v5530_v32, %v5503_v36  ;;  %v5540_v27 = vadd.f32 %v5532_v58, %v5505_v55  ;;  %v6649_v10 = vld [vmem:[%s11648_s21 + $0x8] sm:$0xff]  ;;  %v6650_v36 = vld [vmem:[%s11648_s21 + $0x18] sm:$0xff] }
0x2626   : > { %v5535_v44 = vadd.f32 %v5527_v37, %v5500_v1  ;;  %v5537_v52 = vadd.f32 %v5529_v33, %v5502_v18  ;;  %v5539_v22 = vadd.f32 %v5531_v5, %v5504_v0  ;;  %v5541_v17 = vadd.f32 %v5533_v46, %v5506_v28  ;;  %v5543_v4 = vld [vmem:[#allocation4 + $0x30] sm:$0xff]  ;;  %v6652_v40 = vld [vmem:[%s11648_s21 + $0x38] sm:$0xff] }
0x2627   : > { %v5544_v39 = vld [vmem:[#allocation4 + $0x38] sm:$0xff]  ;;  %v5561_v16 = vmul.f32 %v5550_v50, %v5543_v4  ;;  %v5563_v49 = vmul.f32 %v5553_v38, %v5543_v4  ;;  %v5565_v6 = vmul.f32 %v5556_v60, %v5543_v4  ;;  %v5567_v9 = vmul.f32 %v5559_v30, %v5543_v4 }
0x2628   : > { %v5562_v54 = vmul.f32 %v5550_v50, %v5544_v39  ;;  %v5564_v62 = vmul.f32 %v5553_v38, %v5544_v39  ;;  %v5566_v48 = vmul.f32 %v5556_v60, %v5544_v39  ;;  %v5568_v2 = vmul.f32 %v5559_v30, %v5544_v39 }
0x2629   : > { %v5569_v41 = vadd.f32 %v5561_v16, %v5534_v12  ;;  %v5571_v42 = vadd.f32 %v5563_v49, %v5536_v25  ;;  %v5573_v61 = vadd.f32 %v5565_v6, %v5538_v51  ;;  %v5575_v29 = vadd.f32 %v5567_v9, %v5540_v27 }
0x262a   : > { %v5570_v57 = vadd.f32 %v5562_v54, %v5535_v44  ;;  %v5572_v31 = vadd.f32 %v5564_v62, %v5537_v52  ;;  %v5574_v43 = vadd.f32 %v5566_v48, %v5539_v22  ;;  %v5576_v8 = vadd.f32 %v5568_v2, %v5541_v17 }
0x262b   : > { %v5617_v50 = vadd.f32 %v5603_v35, %v5569_v41  ;;  %v5619_v38 = vadd.f32 %v5607_v13, %v5571_v42  ;;  %v5621_v60 = vadd.f32 %v5611_v53, %v5573_v61  ;;  %v5623_v30 = vadd.f32 %v5615_v14, %v5575_v29 }
0x262c   : > { %v5618_v20 = vadd.f32 %v5603_v35, %v5570_v57  ;;  %v5620_v56 = vadd.f32 %v5607_v13, %v5572_v31  ;;  %v5622_v26 = vadd.f32 %v5611_v53, %v5574_v43  ;;  %v5624_v3 = vadd.f32 %v5615_v14, %v5576_v8 }
0x262d   : > { %v5625_v45 = vmul.f32 %v6645_v11, %v5617_v50  ;;  %v5627_v63 = vmul.f32 %v6646_v19, %v5619_v38  ;;  %v5629_v7 = vmul.f32 %v6647_v34, %v5621_v60  ;;  %v5631_v59 = vmul.f32 %v6648_v15, %v5623_v30 }
0x262e   : > { %v5626_v23 = vmul.f32 %v6649_v10, %v5618_v20  ;;  %v5628_v55 = vmul.f32 %v6650_v36, %v5620_v56  ;;  %v5630_v24 = vmul.f32 %v6651_v21, %v5622_v26  ;;  %v5632_v47 = vmul.f32 %v6652_v40, %v5624_v3 }
0x262f   : > { %5633 = vst.msk [vmem:[%s10887_s13] sm:$0xff] %vm5425_vm6, %v5625_v45  ;;  %5635 = vst.msk [vmem:[%s10887_s13 + $0x10] sm:$0xff] %vm5425_vm6, %v5627_v63 }
0x2630   : > { %5637 = vst.msk [vmem:[%s10887_s13 + $0x20] sm:$0xff] %vm5425_vm6, %v5629_v7  ;;  %5639 = vst.msk [vmem:[%s10887_s13 + $0x30] sm:$0xff] %vm5425_vm6, %v5631_v59 }
0x2631   : > { %5634 = vst.msk [vmem:[%s10887_s13 + $0x8] sm:$0xff] %vm5425_vm6, %v5626_v23  ;;  %5636 = vst.msk [vmem:[%s10887_s13 + $0x18] sm:$0xff] %vm5425_vm6, %v5628_v55 }
0x2632   : > { %5638 = vst.msk [vmem:[%s10887_s13 + $0x28] sm:$0xff] %vm5425_vm6, %v5630_v24  ;;  %5640 = vst.msk [vmem:[%s10887_s13 + $0x38] sm:$0xff] %vm5425_vm6, %v5632_v47 }
0x2633   : > { %6808 = shalt.err (!%p6805_p13)
}
0x2634   : > { %s6809_s26 = scalar_lea.hbm %s10897_s4, 1024  ;;  %s6813_s24 = scalar_lea.hbm %s11650_s20, 2048 }
0x2635   : > { %p6810_p9 = scmp.ne.s32.totalorder %s10897_s4, %s6809_s26  ;;  %p6814_p4 = scmp.lt.u32.totalorder %s10897_s4, %s11650_s20 }
0x2636   : > { %p6815_p8 = scmp.lt.u32.totalorder %s6813_s24, %s6809_s26  ;;  %p6817_p3 = scmp.lt.u32.totalorder %s6809_s26, %s10897_s4 }
0x2637   : > { %p6811_p0 = pnand %p6810_p9, %p7102_p10 }
0x2638   : > { %p6816_p6 = por %p6815_p8, %p6814_p4 }
0x2639   : > { %p6812_p11 = pneg %p6811_p0 }
0x263a   : > { %p6818_p5 = por %p6817_p3, %p6816_p6 }
0x263c   : > { %p6819_p7 = pnand %p6818_p5, %p6812_p11 }
0x263e   : > { %6822 = shalt.err (!%p6819_p7)
}
0x263f   : > { %s6895_s14 = smov 128   ;;  %s6896_s11 = smov 8  }
0x2640   : > { %6444 = dma.vmem_to_hbm [thread:$0]  (%p7102_p10), %s10899_s27, 1024, %s10897_s4, %s5642_s9, %s6895_s14, %s6895_s14, %s6896_s11  }
0x2641 PF: > { %s11652_s22 = sld [smem:[#allocation19_spill]]  ;;  %s11653_s12 = sld [smem:[#allocation23_spill]] }
0x2642   : > { %s11654_s17 = sld [smem:[#allocation22_spill]] }
0x2647   : > { %s5670_s29 = sand.u32 1, %s11652_s22   ;;  %p11655_p12 = scmp.ne.s32.totalorder %s11653_s12, 0 }
0x2648   : > { %p11656_p1 = scmp.ge.s32.totalorder %s11654_s17, 2  ;;  %s5671_s0 = scalar_lea.sflag [#allocation7], %s5670_s29 }
0x264a   : > { %p6464_p2 = pnand %p11656_p1, %p11655_p12 }
0x264c   : > { %6852 = dma.done.wait (!%p6464_p2), %s5671_s0, 1024  }
0x264d   : > { %6854 = vsyncadd (!%p6464_p2), %s5671_s0, 4294966272  ;;  %s11657_s27 = sld [smem:[#allocation24_spill]]  ;;  %s11658_s24 = sld [smem:[#allocation20_spill]] }
0x264e   : > { %s11659_s25 = sld [smem:[#allocation21_spill]]  ;;  %s11660_s26 = sld [smem:[#allocation26_spill]] }
0x2653   : > { %p22_p13 = scmp.ge.s32.totalorder %s11657_s27, 4  }
0x2655   :  { %24 = sbr.rel (!%p22_p13) target bundleno = 14 (0xe), region = 112 }
0x265c   :  { %5676 = vsyncpa [#allocation6], 1 }
0x265d   :  { %5678 = vsyncpa [#allocation6 + $0x1], 1 }
0x265e   :  { %5679 = vsyncpa [#allocation9], 1 }
0x265f   :  { %5680 = vsyncpa [#allocation12], 1 }
0x2660   :  { %5681 = vsyncpa [#allocation7], 1 }
0x2661   :  { %5683 = vsyncpa [#allocation7 + $0x1], 1 }

</bundles_post_ra>
